<compile_context>
chip_gen: v5e
topology: v5e:2x2
jax: 0.10.0
libtpu: 0.0.40
codegen_flags: <defaults>
</compile_context>

<pallas_src>
import functools

import jax
import jax.numpy as jnp
from jax.experimental import pallas as pl
from jax.experimental.pallas import tpu as pltpu

EPS = 1e-5        # nn.LayerNorm default eps
NEG_INF = -1e30   # additive mask for cross-sample / padded key tokens


def _round_up(x, m):
    return ((x + m - 1) // m) * m


def _next_pow2(x):
    return 1 << max(3, (x - 1).bit_length())   # power of two, >= 8


# --------------------------------------------------------------------------
# Fused encoder kernel (one chunk of `Bb` batch samples per grid step)
# --------------------------------------------------------------------------
def _encoder_kernel(
    patches_ref,          # (M, KPP_pad) bf16  im2col'd kept patches of the chunk
    pos_ref,              # (M, E_pad)   f32   gathered positional embeddings
    cls_ref,              # (1, E_pad)   f32
    pw_ref,               # (KPP_pad, E_pad) bf16   patch-embed conv as matmul
    pb_ref,               # (1, E_pad)   f32
    ln1w_ref, ln1b_ref,   # (L, 1, E_pad) f32
    wqkv_ref,             # (L, E_pad, 3*H*DH_pad) bf16   fused q|k|v, heads in 128-lane slabs
    wo_ref,               # (L, H*DH_pad, E_pad)   bf16   fused output projection
    bo_ref,               # (L, 1, E_pad) f32
    ln2w_ref, ln2b_ref,   # (L, 1, E_pad) f32
    w1_ref,               # (L, E_pad, F_pad) bf16
    b1_ref,               # (L, 1, F_pad) f32
    w2_ref,               # (L, F_pad, E_pad) bf16
    b2_ref,               # (L, 1, E_pad) f32
    nw_ref, nb_ref,       # (1, E_pad)   f32   final LayerNorm
    o_ref,                # (M, E_pad)   f32
    *, num_layers, num_heads, t_pad, t_real, e_real, scale,
):
    f32, bf16 = jnp.float32, jnp.bfloat16
    M, E_pad = o_ref.shape
    H = num_heads
    DH_pad = wo_ref.shape[1] // H
    shift = t_pad.bit_length() - 1           # t_pad is a power of two

    # ---- static masks (loop-invariant; computed once per grid step) ----
    row = jax.lax.broadcasted_iota(jnp.int32, (M, 1), 0)
    tok = jnp.bitwise_and(row, t_pad - 1)                    # token id within sample
    is_cls = (tok == 0).astype(f32)                          # (M, 1)
    is_patch = ((tok >= 1) & (tok < t_real)).astype(f32)     # (M, 1)
    lane = jax.lax.broadcasted_iota(jnp.int32, (1, E_pad), 1)
    lane_mask = (lane < e_real).astype(f32)                  # (1, E_pad)

    # block-diagonal attention bias over the flattened chunk: a query may only
    # attend to the real (non-padded) tokens of its own sample.
    r = jax.lax.broadcasted_iota(jnp.int32, (M, M), 0)
    c = jax.lax.broadcasted_iota(jnp.int32, (M, M), 1)
    same_sample = jnp.right_shift(r, shift) == jnp.right_shift(c, shift)
    key_real = jnp.bitwise_and(c, t_pad - 1) < t_real
    attn_bias = jnp.where(same_sample & key_real, 0.0, NEG_INF).astype(f32)

    inv_e = 1.0 / float(e_real)

    def ln(x, w, b):
        # LayerNorm over the e_real real features (pad lanes are kept exactly 0)
        mu = jnp.sum(x * lane_mask, axis=-1, keepdims=True) * inv_e
        cen = (x - mu) * lane_mask
        var = jnp.sum(cen * cen, axis=-1, keepdims=True) * inv_e
        return cen * jax.lax.rsqrt(var + EPS) * w + b

    # ---- patch embedding + positional embedding + cls-token assembly ----
    emb = jnp.dot(patches_ref[...], pw_ref[...], preferred_element_type=f32) + pb_ref[...]
    x = (emb + pos_ref[...]) * is_patch + is_cls * cls_ref[...]        # (M, E_pad) f32

    # ---- transformer blocks (weights VMEM-resident; L, H tiny -> static unroll) ----
    for l in range(num_layers):
        # fused QKV projection: one wide MXU push per layer
        h = ln(x, ln1w_ref[l], ln1b_ref[l])
        qkv = jnp.dot(h.astype(bf16), wqkv_ref[l],
                      preferred_element_type=f32).astype(bf16)         # (M, 3*H*DH_pad)

        # per-head scores (128-lane-aligned slices; one MXU push per head)
        s_list = []
        for hd in range(H):
            q_h = qkv[:, hd * DH_pad:(hd + 1) * DH_pad]
            k_h = qkv[:, (H + hd) * DH_pad:(H + hd + 1) * DH_pad]
            s = jax.lax.dot_general(q_h, k_h, (((1,), (1,)), ((), ())),
                                    preferred_element_type=f32)        # (M, M)
            s_list.append(s * scale + attn_bias)

        # softmax batched across heads (and across the Bb samples folded into M)
        s_all = jnp.concatenate(s_list, axis=0)                        # (H*M, M)
        s_all = s_all - jnp.max(s_all, axis=-1, keepdims=True)
        p_all = jnp.exp(s_all)
        p_all = (p_all * pl.reciprocal(jnp.sum(p_all, axis=-1, keepdims=True),
                                       approx=True)).astype(bf16)

        # per-head PV, then one fused output projection
        o_list = []
        for hd in range(H):
            v_h = qkv[:, (2 * H + hd) * DH_pad:(2 * H + hd + 1) * DH_pad]
            o_list.append(jnp.dot(p_all[hd * M:(hd + 1) * M], v_h,
                                  preferred_element_type=f32))         # (M, DH_pad)
        o_cat = jnp.concatenate(o_list, axis=-1).astype(bf16)          # (M, H*DH_pad)
        x = x + jnp.dot(o_cat, wo_ref[l], preferred_element_type=f32) + bo_ref[l]

        # MLP
        h = ln(x, ln2w_ref[l], ln2b_ref[l])
        f1 = jnp.dot(h.astype(bf16), w1_ref[l], preferred_element_type=f32) + b1_ref[l]
        # TODO(synk): PyTorch nn.GELU defaults to the exact erf form; tanh
        # approximation kept for robust Mosaic lowering (max |diff| ~1e-3).
        f1 = jax.nn.gelu(f1, approximate=True)
        x = x + jnp.dot(f1.astype(bf16), w2_ref[l], preferred_element_type=f32) + b2_ref[l]

    # ---- final LayerNorm, lane-dense (128-wide) store ----
    o_ref[...] = ln(x, nw_ref[...], nb_ref[...]).astype(o_ref.dtype)


# --------------------------------------------------------------------------
# JAX glue: im2col, shuffle (ImageRandom), parameter preparation
# --------------------------------------------------------------------------
def extract_patches(img, p):
    """(B, C, H, W) -> (B, T, C*p*p), feature order (c, kh, kw) matches Conv2d."""
    B, C, H, W = img.shape
    x = img.reshape(B, C, H // p, p, W // p, p)
    x = x.transpose(0, 2, 4, 1, 3, 5)
    return x.reshape(B, (H // p) * (W // p), C * p * p)


def shuffle_patches(img, params, *, patch_size, mask_ratio, shuffle_key):
    """ImageRandom: per-sample random permutation, keep first (1-ratio)*T patches."""
    xp = extract_patches(img, patch_size)                              # (B, T, 3*p*p)
    B, T, _ = xp.shape
    remain_T = int(T * (1 - mask_ratio))
    keys = jax.random.split(shuffle_key, B)
    fwd = jax.vmap(lambda k: jax.random.permutation(k, T))(keys)       # (B, T)
    bwd = jnp.argsort(fwd.T, axis=0)                                   # (T, B) backward map
    keep = fwd[:, :remain_T]                                           # (B, remain_T)
    kept_patches = jnp.take_along_axis(xp, keep[:, :, None], axis=1)   # (B, R, kpp)
    kept_pos = jnp.take(params["emd_pos"][:, 0, :], keep, axis=0)      # (B, R, E)
    return kept_patches, kept_pos, bwd


def init_params(key, *, embedding_dim, num_heads, num_layers, patch_size, image_size=32):
    E = embedding_dim
    T = (image_size // patch_size) ** 2
    kpp = 3 * patch_size * patch_size
    keys = iter(jax.random.split(key, 4 + 7 * num_layers))

    def tn(k, shape, std=0.02):
        return jax.random.truncated_normal(k, -2.0, 2.0, shape, jnp.float32) * std

    params = {
        "cls_token": tn(next(keys), (1, 1, E)),
        "emd_pos": tn(next(keys), (T, 1, E)),
        # Conv2d(3, E, p, p) folded into a (3*p*p, E) matmul weight
        "patch_w": tn(next(keys), (kpp, E)),
        "patch_b": tn(next(keys), (1, E)),
        "norm_w": jnp.ones((1, E), jnp.float32),
        "norm_b": jnp.zeros((1, E), jnp.float32),
    }
    blocks = []
    for _ in range(num_layers):
        blocks.append(dict(
            ln1_w=jnp.ones((1, E), jnp.float32),
            ln1_b=jnp.zeros((1, E), jnp.float32),
            qkv_w=tn(next(keys), (E, 3 * E)),     # layout [q|k|v]; qkv_bias=False
            proj_w=tn(next(keys), (E, E)),
            proj_b=tn(next(keys), (1, E)),
            ln2_w=jnp.ones((1, E), jnp.float32),
            ln2_b=jnp.zeros((1, E), jnp.float32),
            fc1_w=tn(next(keys), (E, 4 * E)),
            fc1_b=tn(next(keys), (1, 4 * E)),
            fc2_w=tn(next(keys), (4 * E, E)),
            fc2_b=tn(next(keys), (1, E)),
        ))
    params["blocks"] = blocks
    return params


def prepare_kernel_params(params, *, num_heads):
    """Pad to lane-dense shapes, fuse q|k|v and per-head output proj, stack layers."""
    E = params["cls_token"].shape[-1]
    H = num_heads
    dh = E // H
    Fd = params["blocks"][0]["fc1_w"].shape[1]
    kpp = params["patch_w"].shape[0]
    E_pad, DH_pad = _round_up(E, 128), _round_up(dh, 128)
    F_pad, KPP_pad = _round_up(Fd, 128), _round_up(kpp, 128)
    bf16 = jnp.bfloat16

    def pad2(w, r, c, dtype=jnp.float32):
        return jnp.zeros((r, c), dtype).at[:w.shape[0], :w.shape[1]].set(w.astype(dtype))

    def pack_qkv(qkv_w):
        # (E, 3E) -> (E_pad, 3*H*DH_pad) bf16; head hd of q/k/v lives in the
        # 128-lane slab starting at (which*H + hd) * DH_pad.
        out = jnp.zeros((E_pad, 3 * H * DH_pad), bf16)
        for which, w in enumerate(jnp.split(qkv_w, 3, axis=1)):
            whd = w.reshape(E, H, dh)
            for hd in range(H):
                base = (which * H + hd) * DH_pad
                out = out.at[:E, base:base + dh].set(whd[:, hd, :].astype(bf16))
        return out

    def pack_wo(proj_w):
        # (H*dh, E) -> (H*DH_pad, E_pad) bf16; head hd rows at offset hd*DH_pad.
        out = jnp.zeros((H * DH_pad, E_pad), bf16)
        whd = proj_w.reshape(H, dh, E)
        for hd in range(H):
            out = out.at[hd * DH_pad:hd * DH_pad + dh, :E].set(whd[hd].astype(bf16))
        return out

    per = {k: [] for k in ("ln1w", "ln1b", "wqkv", "wo", "bo",
                           "ln2w", "ln2b", "w1", "b1", "w2", "b2")}
    for blk in params["blocks"]:
        per["ln1w"].append(pad2(blk["ln1_w"], 1, E_pad))
        per["ln1b"].append(pad2(blk["ln1_b"], 1, E_pad))
        per["wqkv"].append(pack_qkv(blk["qkv_w"]))
        per["wo"].append(pack_wo(blk["proj_w"]))
        per["bo"].append(pad2(blk["proj_b"], 1, E_pad))
        per["ln2w"].append(pad2(blk["ln2_w"], 1, E_pad))
        per["ln2b"].append(pad2(blk["ln2_b"], 1, E_pad))
        per["w1"].append(pad2(blk["fc1_w"], E_pad, F_pad, bf16))
        per["b1"].append(pad2(blk["fc1_b"], 1, F_pad))
        per["w2"].append(pad2(blk["fc2_w"], F_pad, E_pad, bf16))
        per["b2"].append(pad2(blk["fc2_b"], 1, E_pad))

    kp = {k: jnp.stack(v, axis=0) for k, v in per.items()}
    kp.update(
        cls=pad2(params["cls_token"].reshape(1, E), 1, E_pad),
        patch_w=pad2(params["patch_w"], KPP_pad, E_pad, bf16),
        patch_b=pad2(params["patch_b"], 1, E_pad),
        norm_w=pad2(params["norm_w"], 1, E_pad),
        norm_b=pad2(params["norm_b"], 1, E_pad),
    )
    return kp


def encoder_mae_forward(img, params, *, patch_size, num_heads, mask_ratio,
                        shuffle_key, batch_block=4):
    B = img.shape[0]
    E = params["cls_token"].shape[-1]
    num_layers = len(params["blocks"])
    dh = E // num_heads

    # ---- ImageRandom shuffle/masking in thin JAX glue (per-sample gather) ----
    kept_patches, kept_pos, bwd = shuffle_patches(
        img, params, patch_size=patch_size, mask_ratio=mask_ratio, shuffle_key=shuffle_key)
    remain_T, kpp = kept_patches.shape[1], kept_patches.shape[2]
    T_real = 1 + remain_T                       # cls + kept patches
    T_pad = _next_pow2(T_real)                  # power of two -> shift/and math in-kernel
    E_pad = _round_up(E, 128)
    KPP_pad = _round_up(kpp, 128)

    Bb = min(batch_block, B)
    assert B % Bb == 0, "batch must be divisible by batch_block"
    M = Bb * T_pad                              # matmul row count per grid step

    # flattened (B*T_pad, lanes) token slabs: per sample, row 0 = cls slot,
    # rows [1, T_real) = kept patches, remaining rows zero padding.
    patches_in = jnp.zeros((B, T_pad, KPP_pad), jnp.bfloat16)
    patches_in = patches_in.at[:, 1:T_real, :kpp].set(kept_patches.astype(jnp.bfloat16))
    patches_in = patches_in.reshape(B * T_pad, KPP_pad)
    pos_in = jnp.zeros((B, T_pad, E_pad), jnp.float32)
    pos_in = pos_in.at[:, 1:T_real, :E].set(kept_pos).reshape(B * T_pad, E_pad)

    kp = prepare_kernel_params(params, num_heads=num_heads)
    weights = [kp["cls"], kp["patch_w"], kp["patch_b"],
               kp["ln1w"], kp["ln1b"], kp["wqkv"], kp["wo"], kp["bo"],
               kp["ln2w"], kp["ln2b"], kp["w1"], kp["b1"], kp["w2"], kp["b2"],
               kp["norm_w"], kp["norm_b"]]

    tok_spec = pl.BlockSpec((M, KPP_pad), lambda g: (g, 0))
    pos_spec = pl.BlockSpec((M, E_pad), lambda g: (g, 0))
    out_spec = pl.BlockSpec((M, E_pad), lambda g: (g, 0))
    # weights: constant index_map -> fetched once, never re-DMA'd across grid steps
    w_specs = [pl.BlockSpec(w.shape, (lambda g, n=w.ndim: (0,) * n)) for w in weights]

    out = pl.pallas_call(
        functools.partial(
            _encoder_kernel,
            num_layers=num_layers, num_heads=num_heads,
            t_pad=T_pad, t_real=T_real, e_real=E, scale=float(dh) ** -0.5),
        out_shape=jax.ShapeDtypeStruct((B * T_pad, E_pad), jnp.float32),
        grid=(B // Bb,),
        in_specs=[tok_spec, pos_spec] + w_specs,
        out_specs=out_spec,
        compiler_params=pltpu.CompilerParams(
            dimension_semantics=("parallel",),       # chunks independent -> 2 TCs on v7x
            vmem_limit_bytes=32 * 1024 * 1024,
        ),
    )(patches_in, pos_in, *weights)

    feats = out.reshape(B, T_pad, E_pad)[:, :T_real, :E].transpose(1, 0, 2)  # 'b t c -> t b c'
    return feats, bwd


# --------------------------------------------------------------------------
# Pure-JAX f32 reference (same semantics: pre-norm ViT block, tanh GELU)
# --------------------------------------------------------------------------
def reference_forward(kept_patches, kept_pos, params, *, num_heads):
    E = params["cls_token"].shape[-1]
    H = num_heads
    dh = E // H

    def ln(z, w, b):
        mu = jnp.mean(z, axis=-1, keepdims=True)
        var = jnp.mean((z - mu) ** 2, axis=-1, keepdims=True)
        return (z - mu) * jax.lax.rsqrt(var + EPS) * w + b

    def one(xp, pos):                        # xp: (R, kpp), pos: (R, E)
        emb = xp @ params["patch_w"] + params["patch_b"]
        x = jnp.concatenate([params["cls_token"].reshape(1, E), emb + pos], axis=0)
        T = x.shape[0]
        for blk in params["blocks"]:
            h = ln(x, blk["ln1_w"], blk["ln1_b"])
            q, k, v = jnp.split(h @ blk["qkv_w"], 3, axis=-1)
            q = q.reshape(T, H, dh)
            k = k.reshape(T, H, dh)
            v = v.reshape(T, H, dh)
            s = jnp.einsum("qhd,khd->hqk", q, k) * (dh ** -0.5)
            p = jax.nn.softmax(s, axis=-1)
            o = jnp.einsum("hqk,khd->qhd", p, v).reshape(T, E)
            x = x + o @ blk["proj_w"] + blk["proj_b"]
            h = ln(x, blk["ln2_w"], blk["ln2_b"])
            f = jax.nn.gelu(h @ blk["fc1_w"] + blk["fc1_b"], approximate=True)
            x = x + f @ blk["fc2_w"] + blk["fc2_b"]
        return ln(x, params["norm_w"], params["norm_b"])

    return jax.vmap(one)(kept_patches, kept_pos).transpose(1, 0, 2)   # (t, b, c)


# --------------------------------------------------------------------------
if __name__ == "__main__":
    key = jax.random.PRNGKey(0)
    k_img, k_param, k_shuffle = jax.random.split(key, 3)

    # small-but-consistent config (image_size fixed at 32 by the module)
    B = 8
    patch_size = 4          # -> 8x8 = 64 patches
    embedding_dim = 64
    num_heads = 2
    num_layers = 2
    mask_ratio = 0.75       # keep 16 patches, +1 cls token -> 17 real tokens

    img = jax.random.normal(k_img, (B, 3, 32, 32), jnp.float32)
    params = init_params(
        k_param, embedding_dim=embedding_dim, num_heads=num_heads,
        num_layers=num_layers, patch_size=patch_size, image_size=32)

    feats, b_idx = encoder_mae_forward(
        img, params, patch_size=patch_size, num_heads=num_heads,
        mask_ratio=mask_ratio, shuffle_key=k_shuffle, batch_block=4)
    jax.block_until_ready((feats, b_idx))

    remain = int(64 * (1 - mask_ratio))
    assert feats.shape == (1 + remain, B, embedding_dim)
    assert b_idx.shape == (64, B)
    assert bool(jnp.all(jnp.isfinite(feats)))

    # correctness check against a pure-JAX f32 reference on the same shuffle
    # (loose tolerance: kernel uses bf16 MXU operands + approx softmax recip).
    kept_patches, kept_pos, _ = shuffle_patches(
        img, params, patch_size=patch_size, mask_ratio=mask_ratio, shuffle_key=k_shuffle)
    ref = reference_forward(kept_patches, kept_pos, params, num_heads=num_heads)
    assert float(jnp.max(jnp.abs(feats - ref))) < 0.15

    print("KERNEL_OK")
</pallas_src>

<mosaic_0001>
module attributes {stable_mosaic.version = 11 : i64} {
  func.func @_encoder_kernel(%arg0: i32, %arg1: memref<128x128xbf16, #tpu.memory_space<vmem>>, %arg2: memref<128x128xf32, #tpu.memory_space<vmem>>, %arg3: memref<1x128xf32, #tpu.memory_space<vmem>>, %arg4: memref<128x128xbf16, #tpu.memory_space<vmem>>, %arg5: memref<1x128xf32, #tpu.memory_space<vmem>>, %arg6: memref<2x1x128xf32, #tpu.memory_space<vmem>>, %arg7: memref<2x1x128xf32, #tpu.memory_space<vmem>>, %arg8: memref<2x128x768xbf16, #tpu.memory_space<vmem>>, %arg9: memref<2x256x128xbf16, #tpu.memory_space<vmem>>, %arg10: memref<2x1x128xf32, #tpu.memory_space<vmem>>, %arg11: memref<2x1x128xf32, #tpu.memory_space<vmem>>, %arg12: memref<2x1x128xf32, #tpu.memory_space<vmem>>, %arg13: memref<2x128x256xbf16, #tpu.memory_space<vmem>>, %arg14: memref<2x1x256xf32, #tpu.memory_space<vmem>>, %arg15: memref<2x256x128xbf16, #tpu.memory_space<vmem>>, %arg16: memref<2x1x128xf32, #tpu.memory_space<vmem>>, %arg17: memref<1x128xf32, #tpu.memory_space<vmem>>, %arg18: memref<1x128xf32, #tpu.memory_space<vmem>>, %arg19: memref<128x128xf32, #tpu.memory_space<vmem>>) attributes {dimension_semantics = [#tpu.dimension_semantics<parallel>], iteration_bounds = array<i64: 2>, scalar_prefetch = 0 : i64, scratch_operands = 0 : i64, tpu.core_type = #tpu.core_type<tc>, window_params = [{transform_indices = @transform_0, window_bounds = array<i64: 128, 128>}, {transform_indices = @transform_1, window_bounds = array<i64: 128, 128>}, {pipeline_mode = #tpu.pipeline_mode<synchronous>, transform_indices = @transform_2, window_bounds = array<i64: 1, 128>}, {pipeline_mode = #tpu.pipeline_mode<synchronous>, transform_indices = @transform_3, window_bounds = array<i64: 128, 128>}, {pipeline_mode = #tpu.pipeline_mode<synchronous>, transform_indices = @transform_4, window_bounds = array<i64: 1, 128>}, {pipeline_mode = #tpu.pipeline_mode<synchronous>, transform_indices = @transform_5, window_bounds = array<i64: 2, 1, 128>}, {pipeline_mode = #tpu.pipeline_mode<synchronous>, transform_indices = @transform_6, window_bounds = array<i64: 2, 1, 128>}, {pipeline_mode = #tpu.pipeline_mode<synchronous>, transform_indices = @transform_7, window_bounds = array<i64: 2, 128, 768>}, {pipeline_mode = #tpu.pipeline_mode<synchronous>, transform_indices = @transform_8, window_bounds = array<i64: 2, 256, 128>}, {pipeline_mode = #tpu.pipeline_mode<synchronous>, transform_indices = @transform_9, window_bounds = array<i64: 2, 1, 128>}, {pipeline_mode = #tpu.pipeline_mode<synchronous>, transform_indices = @transform_10, window_bounds = array<i64: 2, 1, 128>}, {pipeline_mode = #tpu.pipeline_mode<synchronous>, transform_indices = @transform_11, window_bounds = array<i64: 2, 1, 128>}, {pipeline_mode = #tpu.pipeline_mode<synchronous>, transform_indices = @transform_12, window_bounds = array<i64: 2, 128, 256>}, {pipeline_mode = #tpu.pipeline_mode<synchronous>, transform_indices = @transform_13, window_bounds = array<i64: 2, 1, 256>}, {pipeline_mode = #tpu.pipeline_mode<synchronous>, transform_indices = @transform_14, window_bounds = array<i64: 2, 256, 128>}, {pipeline_mode = #tpu.pipeline_mode<synchronous>, transform_indices = @transform_15, window_bounds = array<i64: 2, 1, 128>}, {pipeline_mode = #tpu.pipeline_mode<synchronous>, transform_indices = @transform_16, window_bounds = array<i64: 1, 128>}, {pipeline_mode = #tpu.pipeline_mode<synchronous>, transform_indices = @transform_17, window_bounds = array<i64: 1, 128>}, {transform_indices = @transform_18, window_bounds = array<i64: 128, 128>}]} {
    %0 = tpu.iota {dimensions = array<i32: 0>} : vector<128x1xi32>
    %c31_i32 = arith.constant 31 : i32
    %1 = vector.broadcast %c31_i32 : i32 to vector<128x1xi32>
    %2 = arith.andi %0, %1 : vector<128x1xi32>
    %c0_i32 = arith.constant 0 : i32
    %3 = vector.broadcast %c0_i32 : i32 to vector<128x1xi32>
    %4 = arith.cmpi eq, %2, %3 : vector<128x1xi32>
    %5 = arith.extui %4 : vector<128x1xi1> to vector<128x1xi32>
    %6 = arith.sitofp %5 : vector<128x1xi32> to vector<128x1xf32>
    %c1_i32 = arith.constant 1 : i32
    %7 = vector.broadcast %c1_i32 : i32 to vector<128x1xi32>
    %8 = arith.cmpi sge, %2, %7 : vector<128x1xi32>
    %c17_i32 = arith.constant 17 : i32
    %9 = vector.broadcast %c17_i32 : i32 to vector<128x1xi32>
    %10 = arith.cmpi slt, %2, %9 : vector<128x1xi32>
    %11 = arith.andi %8, %10 : vector<128x1xi1>
    %12 = arith.extui %11 : vector<128x1xi1> to vector<128x1xi32>
    %13 = arith.sitofp %12 : vector<128x1xi32> to vector<128x1xf32>
    %14 = tpu.iota {dimensions = array<i32: 1>} : vector<1x128xi32>
    %c64_i32 = arith.constant 64 : i32
    %15 = vector.broadcast %c64_i32 : i32 to vector<1x128xi32>
    %16 = arith.cmpi slt, %14, %15 : vector<1x128xi32>
    %17 = arith.extui %16 : vector<1x128xi1> to vector<1x128xi32>
    %18 = arith.sitofp %17 : vector<1x128xi32> to vector<1x128xf32>
    %19 = tpu.iota {dimensions = array<i32: 0>} : vector<128x128xi32>
    %20 = tpu.iota {dimensions = array<i32: 1>} : vector<128x128xi32>
    %c5_i32 = arith.constant 5 : i32
    %21 = vector.broadcast %c5_i32 : i32 to vector<128x128xi32>
    %22 = arith.shrsi %19, %21 : vector<128x128xi32>
    %c5_i32_0 = arith.constant 5 : i32
    %23 = vector.broadcast %c5_i32_0 : i32 to vector<128x128xi32>
    %24 = arith.shrsi %20, %23 : vector<128x128xi32>
    %25 = arith.cmpi eq, %22, %24 : vector<128x128xi32>
    %c31_i32_1 = arith.constant 31 : i32
    %26 = vector.broadcast %c31_i32_1 : i32 to vector<128x128xi32>
    %27 = arith.andi %20, %26 : vector<128x128xi32>
    %c17_i32_2 = arith.constant 17 : i32
    %28 = vector.broadcast %c17_i32_2 : i32 to vector<128x128xi32>
    %29 = arith.cmpi slt, %27, %28 : vector<128x128xi32>
    %30 = arith.andi %25, %29 : vector<128x128xi1>
    %cst = arith.constant 0.000000e+00 : f32
    %cst_3 = arith.constant -1.000000e+30 : f32
    %31 = vector.broadcast %cst : f32 to vector<128x128xf32>
    %32 = vector.broadcast %cst_3 : f32 to vector<128x128xf32>
    %33 = arith.select %30, %31, %32 : vector<128x128xi1>, vector<128x128xf32>
    %c0 = arith.constant 0 : index
    %c0_4 = arith.constant 0 : index
    %34 = vector.load %arg1[%c0, %c0_4] : memref<128x128xbf16, #tpu.memory_space<vmem>>, vector<128x128xbf16>
    %c0_5 = arith.constant 0 : index
    %c0_6 = arith.constant 0 : index
    %35 = vector.load %arg4[%c0_5, %c0_6] : memref<128x128xbf16, #tpu.memory_space<vmem>>, vector<128x128xbf16>
    %cst_7 = arith.constant dense<0.000000e+00> : vector<128x128xf32>
    %36 = tpu.matmul %34, %35, %cst_7 {dimension_numbers = #tpu.dot_dimension_numbers<[1], [0], [0], [1], [0, 0, 1, 1], [], []>} : vector<128x128xbf16>, vector<128x128xbf16>, vector<128x128xf32> -> vector<128x128xf32>
    %c0_8 = arith.constant 0 : index
    %c0_9 = arith.constant 0 : index
    %37 = vector.load %arg5[%c0_8, %c0_9] : memref<1x128xf32, #tpu.memory_space<vmem>>, vector<1x128xf32>
    %38 = vector.broadcast %37 : vector<1x128xf32> to vector<128x128xf32>
    %39 = arith.addf %36, %38 : vector<128x128xf32>
    %c0_10 = arith.constant 0 : index
    %c0_11 = arith.constant 0 : index
    %40 = vector.load %arg2[%c0_10, %c0_11] : memref<128x128xf32, #tpu.memory_space<vmem>>, vector<128x128xf32>
    %41 = arith.addf %39, %40 : vector<128x128xf32>
    %42 = vector.broadcast %13 : vector<128x1xf32> to vector<128x128xf32>
    %43 = arith.mulf %41, %42 : vector<128x128xf32>
    %c0_12 = arith.constant 0 : index
    %c0_13 = arith.constant 0 : index
    %44 = vector.load %arg3[%c0_12, %c0_13] : memref<1x128xf32, #tpu.memory_space<vmem>>, vector<1x128xf32>
    %45 = vector.broadcast %6 : vector<128x1xf32> to vector<128x128xf32>
    %46 = vector.broadcast %44 : vector<1x128xf32> to vector<128x128xf32>
    %47 = arith.mulf %45, %46 : vector<128x128xf32>
    %48 = arith.addf %43, %47 : vector<128x128xf32>
    %c0_14 = arith.constant 0 : index
    %c0_15 = arith.constant 0 : index
    %c0_16 = arith.constant 0 : index
    %49 = vector.load %arg6[%c0_14, %c0_15, %c0_16] : memref<2x1x128xf32, #tpu.memory_space<vmem>>, vector<1x1x128xf32>
    %50 = vector.shape_cast %49 : vector<1x1x128xf32> to vector<1x128xf32>
    %c0_17 = arith.constant 0 : index
    %c0_18 = arith.constant 0 : index
    %c0_19 = arith.constant 0 : index
    %51 = vector.load %arg7[%c0_17, %c0_18, %c0_19] : memref<2x1x128xf32, #tpu.memory_space<vmem>>, vector<1x1x128xf32>
    %52 = vector.shape_cast %51 : vector<1x1x128xf32> to vector<1x128xf32>
    %53 = vector.broadcast %18 : vector<1x128xf32> to vector<128x128xf32>
    %54 = arith.mulf %48, %53 : vector<128x128xf32>
    %cst_20 = arith.constant dense<0.000000e+00> : vector<128xf32>
    %55 = vector.multi_reduction <add>, %54, %cst_20 [1] : vector<128x128xf32> to vector<128xf32>
    %56 = vector.shape_cast %55 : vector<128xf32> to vector<128x1xf32>
    %cst_21 = arith.constant 1.562500e-02 : f32
    %57 = vector.broadcast %cst_21 : f32 to vector<128x1xf32>
    %58 = arith.mulf %56, %57 : vector<128x1xf32>
    %59 = vector.broadcast %58 : vector<128x1xf32> to vector<128x128xf32>
    %60 = arith.subf %48, %59 : vector<128x128xf32>
    %61 = vector.broadcast %18 : vector<1x128xf32> to vector<128x128xf32>
    %62 = arith.mulf %60, %61 : vector<128x128xf32>
    %63 = arith.mulf %62, %62 : vector<128x128xf32>
    %cst_22 = arith.constant dense<0.000000e+00> : vector<128xf32>
    %64 = vector.multi_reduction <add>, %63, %cst_22 [1] : vector<128x128xf32> to vector<128xf32>
    %65 = vector.shape_cast %64 : vector<128xf32> to vector<128x1xf32>
    %cst_23 = arith.constant 1.562500e-02 : f32
    %66 = vector.broadcast %cst_23 : f32 to vector<128x1xf32>
    %67 = arith.mulf %65, %66 : vector<128x1xf32>
    %cst_24 = arith.constant 9.99999974E-6 : f32
    %68 = vector.broadcast %cst_24 : f32 to vector<128x1xf32>
    %69 = arith.addf %67, %68 : vector<128x1xf32>
    %70 = math.rsqrt %69 : vector<128x1xf32>
    %71 = vector.broadcast %70 : vector<128x1xf32> to vector<128x128xf32>
    %72 = arith.mulf %62, %71 : vector<128x128xf32>
    %73 = vector.broadcast %50 : vector<1x128xf32> to vector<128x128xf32>
    %74 = arith.mulf %72, %73 : vector<128x128xf32>
    %75 = vector.broadcast %52 : vector<1x128xf32> to vector<128x128xf32>
    %76 = arith.addf %74, %75 : vector<128x128xf32>
    %77 = arith.truncf %76 : vector<128x128xf32> to vector<128x128xbf16>
    %c0_25 = arith.constant 0 : index
    %c0_26 = arith.constant 0 : index
    %c0_27 = arith.constant 0 : index
    %78 = vector.load %arg8[%c0_25, %c0_26, %c0_27] : memref<2x128x768xbf16, #tpu.memory_space<vmem>>, vector<1x128x768xbf16>
    %79 = vector.shape_cast %78 : vector<1x128x768xbf16> to vector<128x768xbf16>
    %cst_28 = arith.constant dense<0.000000e+00> : vector<128x768xf32>
    %80 = tpu.matmul %77, %79, %cst_28 {dimension_numbers = #tpu.dot_dimension_numbers<[1], [0], [0], [1], [0, 0, 1, 1], [], []>} : vector<128x128xbf16>, vector<128x768xbf16>, vector<128x768xf32> -> vector<128x768xf32>
    %81 = arith.truncf %80 : vector<128x768xf32> to vector<128x768xbf16>
    %82 = vector.extract_strided_slice %81 {offsets = [0, 0], sizes = [128, 128], strides = [1, 1]} : vector<128x768xbf16> to vector<128x128xbf16>
    %83 = vector.extract_strided_slice %81 {offsets = [0, 256], sizes = [128, 128], strides = [1, 1]} : vector<128x768xbf16> to vector<128x128xbf16>
    %cst_29 = arith.constant dense<0.000000e+00> : vector<128x128xf32>
    %84 = tpu.matmul %82, %83, %cst_29 {dimension_numbers = #tpu.dot_dimension_numbers<[1], [1], [0], [0], [0, 0, 1, 0], [], []>} : vector<128x128xbf16>, vector<128x128xbf16>, vector<128x128xf32> -> vector<128x128xf32>
    %cst_30 = arith.constant 0.176776692 : f32
    %85 = vector.broadcast %cst_30 : f32 to vector<128x128xf32>
    %86 = arith.mulf %84, %85 : vector<128x128xf32>
    %87 = arith.addf %86, %33 : vector<128x128xf32>
    %88 = vector.extract_strided_slice %81 {offsets = [0, 128], sizes = [128, 128], strides = [1, 1]} : vector<128x768xbf16> to vector<128x128xbf16>
    %89 = vector.extract_strided_slice %81 {offsets = [0, 384], sizes = [128, 128], strides = [1, 1]} : vector<128x768xbf16> to vector<128x128xbf16>
    %cst_31 = arith.constant dense<0.000000e+00> : vector<128x128xf32>
    %90 = tpu.matmul %88, %89, %cst_31 {dimension_numbers = #tpu.dot_dimension_numbers<[1], [1], [0], [0], [0, 0, 1, 0], [], []>} : vector<128x128xbf16>, vector<128x128xbf16>, vector<128x128xf32> -> vector<128x128xf32>
    %cst_32 = arith.constant 0.176776692 : f32
    %91 = vector.broadcast %cst_32 : f32 to vector<128x128xf32>
    %92 = arith.mulf %90, %91 : vector<128x128xf32>
    %93 = arith.addf %92, %33 : vector<128x128xf32>
    %94 = tpu.concatenate %87, %93 in 0 : vector<128x128xf32>, vector<128x128xf32> -> vector<256x128xf32>
    %cst_33 = arith.constant dense<0xFF800000> : vector<256xf32>
    %95 = vector.multi_reduction <maximumf>, %94, %cst_33 [1] : vector<256x128xf32> to vector<256xf32>
    %96 = vector.shape_cast %95 : vector<256xf32> to vector<256x1xf32>
    %97 = vector.broadcast %96 : vector<256x1xf32> to vector<256x128xf32>
    %98 = arith.subf %94, %97 : vector<256x128xf32>
    %99 = math.exp %98 : vector<256x128xf32>
    %cst_34 = arith.constant dense<0.000000e+00> : vector<256xf32>
    %100 = vector.multi_reduction <add>, %99, %cst_34 [1] : vector<256x128xf32> to vector<256xf32>
    %101 = vector.shape_cast %100 : vector<256xf32> to vector<256x1xf32>
    %102 = tpu.reciprocal %101 {approx = true} : vector<256x1xf32> -> vector<256x1xf32>
    %103 = vector.broadcast %102 : vector<256x1xf32> to vector<256x128xf32>
    %104 = arith.mulf %99, %103 : vector<256x128xf32>
    %105 = arith.truncf %104 : vector<256x128xf32> to vector<256x128xbf16>
    %106 = vector.extract_strided_slice %81 {offsets = [0, 512], sizes = [128, 128], strides = [1, 1]} : vector<128x768xbf16> to vector<128x128xbf16>
    %107 = vector.extract_strided_slice %105 {offsets = [0, 0], sizes = [128, 128], strides = [1, 1]} : vector<256x128xbf16> to vector<128x128xbf16>
    %cst_35 = arith.constant dense<0.000000e+00> : vector<128x128xf32>
    %108 = tpu.matmul %107, %106, %cst_35 {dimension_numbers = #tpu.dot_dimension_numbers<[1], [0], [0], [1], [0, 0, 1, 1], [], []>} : vector<128x128xbf16>, vector<128x128xbf16>, vector<128x128xf32> -> vector<128x128xf32>
    %109 = vector.extract_strided_slice %81 {offsets = [0, 640], sizes = [128, 128], strides = [1, 1]} : vector<128x768xbf16> to vector<128x128xbf16>
    %110 = vector.extract_strided_slice %105 {offsets = [128, 0], sizes = [128, 128], strides = [1, 1]} : vector<256x128xbf16> to vector<128x128xbf16>
    %cst_36 = arith.constant dense<0.000000e+00> : vector<128x128xf32>
    %111 = tpu.matmul %110, %109, %cst_36 {dimension_numbers = #tpu.dot_dimension_numbers<[1], [0], [0], [1], [0, 0, 1, 1], [], []>} : vector<128x128xbf16>, vector<128x128xbf16>, vector<128x128xf32> -> vector<128x128xf32>
    %112 = tpu.concatenate %108, %111 in 1 : vector<128x128xf32>, vector<128x128xf32> -> vector<128x256xf32>
    %113 = arith.truncf %112 : vector<128x256xf32> to vector<128x256xbf16>
    %c0_37 = arith.constant 0 : index
    %c0_38 = arith.constant 0 : index
    %c0_39 = arith.constant 0 : index
    %114 = vector.load %arg9[%c0_37, %c0_38, %c0_39] : memref<2x256x128xbf16, #tpu.memory_space<vmem>>, vector<1x256x128xbf16>
    %115 = vector.shape_cast %114 : vector<1x256x128xbf16> to vector<256x128xbf16>
    %cst_40 = arith.constant dense<0.000000e+00> : vector<128x128xf32>
    %116 = tpu.matmul %113, %115, %cst_40 {dimension_numbers = #tpu.dot_dimension_numbers<[1], [0], [0], [1], [0, 0, 1, 1], [], []>} : vector<128x256xbf16>, vector<256x128xbf16>, vector<128x128xf32> -> vector<128x128xf32>
    %117 = arith.addf %48, %116 : vector<128x128xf32>
    %c0_41 = arith.constant 0 : index
    %c0_42 = arith.constant 0 : index
    %c0_43 = arith.constant 0 : index
    %118 = vector.load %arg10[%c0_41, %c0_42, %c0_43] : memref<2x1x128xf32, #tpu.memory_space<vmem>>, vector<1x1x128xf32>
    %119 = vector.shape_cast %118 : vector<1x1x128xf32> to vector<1x128xf32>
    %120 = vector.broadcast %119 : vector<1x128xf32> to vector<128x128xf32>
    %121 = arith.addf %117, %120 : vector<128x128xf32>
    %c0_44 = arith.constant 0 : index
    %c0_45 = arith.constant 0 : index
    %c0_46 = arith.constant 0 : index
    %122 = vector.load %arg11[%c0_44, %c0_45, %c0_46] : memref<2x1x128xf32, #tpu.memory_space<vmem>>, vector<1x1x128xf32>
    %123 = vector.shape_cast %122 : vector<1x1x128xf32> to vector<1x128xf32>
    %c0_47 = arith.constant 0 : index
    %c0_48 = arith.constant 0 : index
    %c0_49 = arith.constant 0 : index
    %124 = vector.load %arg12[%c0_47, %c0_48, %c0_49] : memref<2x1x128xf32, #tpu.memory_space<vmem>>, vector<1x1x128xf32>
    %125 = vector.shape_cast %124 : vector<1x1x128xf32> to vector<1x128xf32>
    %126 = vector.broadcast %18 : vector<1x128xf32> to vector<128x128xf32>
    %127 = arith.mulf %121, %126 : vector<128x128xf32>
    %cst_50 = arith.constant dense<0.000000e+00> : vector<128xf32>
    %128 = vector.multi_reduction <add>, %127, %cst_50 [1] : vector<128x128xf32> to vector<128xf32>
    %129 = vector.shape_cast %128 : vector<128xf32> to vector<128x1xf32>
    %cst_51 = arith.constant 1.562500e-02 : f32
    %130 = vector.broadcast %cst_51 : f32 to vector<128x1xf32>
    %131 = arith.mulf %129, %130 : vector<128x1xf32>
    %132 = vector.broadcast %131 : vector<128x1xf32> to vector<128x128xf32>
    %133 = arith.subf %121, %132 : vector<128x128xf32>
    %134 = vector.broadcast %18 : vector<1x128xf32> to vector<128x128xf32>
    %135 = arith.mulf %133, %134 : vector<128x128xf32>
    %136 = arith.mulf %135, %135 : vector<128x128xf32>
    %cst_52 = arith.constant dense<0.000000e+00> : vector<128xf32>
    %137 = vector.multi_reduction <add>, %136, %cst_52 [1] : vector<128x128xf32> to vector<128xf32>
    %138 = vector.shape_cast %137 : vector<128xf32> to vector<128x1xf32>
    %cst_53 = arith.constant 1.562500e-02 : f32
    %139 = vector.broadcast %cst_53 : f32 to vector<128x1xf32>
    %140 = arith.mulf %138, %139 : vector<128x1xf32>
    %cst_54 = arith.constant 9.99999974E-6 : f32
    %141 = vector.broadcast %cst_54 : f32 to vector<128x1xf32>
    %142 = arith.addf %140, %141 : vector<128x1xf32>
    %143 = math.rsqrt %142 : vector<128x1xf32>
    %144 = vector.broadcast %143 : vector<128x1xf32> to vector<128x128xf32>
    %145 = arith.mulf %135, %144 : vector<128x128xf32>
    %146 = vector.broadcast %123 : vector<1x128xf32> to vector<128x128xf32>
    %147 = arith.mulf %145, %146 : vector<128x128xf32>
    %148 = vector.broadcast %125 : vector<1x128xf32> to vector<128x128xf32>
    %149 = arith.addf %147, %148 : vector<128x128xf32>
    %150 = arith.truncf %149 : vector<128x128xf32> to vector<128x128xbf16>
    %c0_55 = arith.constant 0 : index
    %c0_56 = arith.constant 0 : index
    %c0_57 = arith.constant 0 : index
    %151 = vector.load %arg13[%c0_55, %c0_56, %c0_57] : memref<2x128x256xbf16, #tpu.memory_space<vmem>>, vector<1x128x256xbf16>
    %152 = vector.shape_cast %151 : vector<1x128x256xbf16> to vector<128x256xbf16>
    %cst_58 = arith.constant dense<0.000000e+00> : vector<128x256xf32>
    %153 = tpu.matmul %150, %152, %cst_58 {dimension_numbers = #tpu.dot_dimension_numbers<[1], [0], [0], [1], [0, 0, 1, 1], [], []>} : vector<128x128xbf16>, vector<128x256xbf16>, vector<128x256xf32> -> vector<128x256xf32>
    %c0_59 = arith.constant 0 : index
    %c0_60 = arith.constant 0 : index
    %c0_61 = arith.constant 0 : index
    %154 = vector.load %arg14[%c0_59, %c0_60, %c0_61] : memref<2x1x256xf32, #tpu.memory_space<vmem>>, vector<1x1x256xf32>
    %155 = vector.shape_cast %154 : vector<1x1x256xf32> to vector<1x256xf32>
    %156 = vector.broadcast %155 : vector<1x256xf32> to vector<128x256xf32>
    %157 = arith.addf %153, %156 : vector<128x256xf32>
    %158 = arith.mulf %157, %157 : vector<128x256xf32>
    %159 = arith.mulf %157, %158 : vector<128x256xf32>
    %cst_62 = arith.constant 4.471500e-02 : f32
    %160 = vector.broadcast %cst_62 : f32 to vector<128x256xf32>
    %161 = arith.mulf %160, %159 : vector<128x256xf32>
    %162 = arith.addf %157, %161 : vector<128x256xf32>
    %cst_63 = arith.constant 0.797884583 : f32
    %163 = vector.broadcast %cst_63 : f32 to vector<128x256xf32>
    %164 = arith.mulf %163, %162 : vector<128x256xf32>
    %165 = math.tanh %164 : vector<128x256xf32>
    %cst_64 = arith.constant 1.000000e+00 : f32
    %166 = vector.broadcast %cst_64 : f32 to vector<128x256xf32>
    %167 = arith.addf %166, %165 : vector<128x256xf32>
    %cst_65 = arith.constant 5.000000e-01 : f32
    %168 = vector.broadcast %cst_65 : f32 to vector<128x256xf32>
    %169 = arith.mulf %168, %167 : vector<128x256xf32>
    %170 = arith.mulf %157, %169 : vector<128x256xf32>
    %171 = arith.truncf %170 : vector<128x256xf32> to vector<128x256xbf16>
    %c0_66 = arith.constant 0 : index
    %c0_67 = arith.constant 0 : index
    %c0_68 = arith.constant 0 : index
    %172 = vector.load %arg15[%c0_66, %c0_67, %c0_68] : memref<2x256x128xbf16, #tpu.memory_space<vmem>>, vector<1x256x128xbf16>
    %173 = vector.shape_cast %172 : vector<1x256x128xbf16> to vector<256x128xbf16>
    %cst_69 = arith.constant dense<0.000000e+00> : vector<128x128xf32>
    %174 = tpu.matmul %171, %173, %cst_69 {dimension_numbers = #tpu.dot_dimension_numbers<[1], [0], [0], [1], [0, 0, 1, 1], [], []>} : vector<128x256xbf16>, vector<256x128xbf16>, vector<128x128xf32> -> vector<128x128xf32>
    %175 = arith.addf %121, %174 : vector<128x128xf32>
    %c0_70 = arith.constant 0 : index
    %c0_71 = arith.constant 0 : index
    %c0_72 = arith.constant 0 : index
    %176 = vector.load %arg16[%c0_70, %c0_71, %c0_72] : memref<2x1x128xf32, #tpu.memory_space<vmem>>, vector<1x1x128xf32>
    %177 = vector.shape_cast %176 : vector<1x1x128xf32> to vector<1x128xf32>
    %178 = vector.broadcast %177 : vector<1x128xf32> to vector<128x128xf32>
    %179 = arith.addf %175, %178 : vector<128x128xf32>
    %c1 = arith.constant 1 : index
    %c0_73 = arith.constant 0 : index
    %c0_74 = arith.constant 0 : index
    %180 = vector.load %arg6[%c1, %c0_73, %c0_74] : memref<2x1x128xf32, #tpu.memory_space<vmem>>, vector<1x1x128xf32>
    %181 = vector.shape_cast %180 : vector<1x1x128xf32> to vector<1x128xf32>
    %c1_75 = arith.constant 1 : index
    %c0_76 = arith.constant 0 : index
    %c0_77 = arith.constant 0 : index
    %182 = vector.load %arg7[%c1_75, %c0_76, %c0_77] : memref<2x1x128xf32, #tpu.memory_space<vmem>>, vector<1x1x128xf32>
    %183 = vector.shape_cast %182 : vector<1x1x128xf32> to vector<1x128xf32>
    %184 = vector.broadcast %18 : vector<1x128xf32> to vector<128x128xf32>
    %185 = arith.mulf %179, %184 : vector<128x128xf32>
    %cst_78 = arith.constant dense<0.000000e+00> : vector<128xf32>
    %186 = vector.multi_reduction <add>, %185, %cst_78 [1] : vector<128x128xf32> to vector<128xf32>
    %187 = vector.shape_cast %186 : vector<128xf32> to vector<128x1xf32>
    %cst_79 = arith.constant 1.562500e-02 : f32
    %188 = vector.broadcast %cst_79 : f32 to vector<128x1xf32>
    %189 = arith.mulf %187, %188 : vector<128x1xf32>
    %190 = vector.broadcast %189 : vector<128x1xf32> to vector<128x128xf32>
    %191 = arith.subf %179, %190 : vector<128x128xf32>
    %192 = vector.broadcast %18 : vector<1x128xf32> to vector<128x128xf32>
    %193 = arith.mulf %191, %192 : vector<128x128xf32>
    %194 = arith.mulf %193, %193 : vector<128x128xf32>
    %cst_80 = arith.constant dense<0.000000e+00> : vector<128xf32>
    %195 = vector.multi_reduction <add>, %194, %cst_80 [1] : vector<128x128xf32> to vector<128xf32>
    %196 = vector.shape_cast %195 : vector<128xf32> to vector<128x1xf32>
    %cst_81 = arith.constant 1.562500e-02 : f32
    %197 = vector.broadcast %cst_81 : f32 to vector<128x1xf32>
    %198 = arith.mulf %196, %197 : vector<128x1xf32>
    %cst_82 = arith.constant 9.99999974E-6 : f32
    %199 = vector.broadcast %cst_82 : f32 to vector<128x1xf32>
    %200 = arith.addf %198, %199 : vector<128x1xf32>
    %201 = math.rsqrt %200 : vector<128x1xf32>
    %202 = vector.broadcast %201 : vector<128x1xf32> to vector<128x128xf32>
    %203 = arith.mulf %193, %202 : vector<128x128xf32>
    %204 = vector.broadcast %181 : vector<1x128xf32> to vector<128x128xf32>
    %205 = arith.mulf %203, %204 : vector<128x128xf32>
    %206 = vector.broadcast %183 : vector<1x128xf32> to vector<128x128xf32>
    %207 = arith.addf %205, %206 : vector<128x128xf32>
    %208 = arith.truncf %207 : vector<128x128xf32> to vector<128x128xbf16>
    %c1_83 = arith.constant 1 : index
    %c0_84 = arith.constant 0 : index
    %c0_85 = arith.constant 0 : index
    %209 = vector.load %arg8[%c1_83, %c0_84, %c0_85] : memref<2x128x768xbf16, #tpu.memory_space<vmem>>, vector<1x128x768xbf16>
    %210 = vector.shape_cast %209 : vector<1x128x768xbf16> to vector<128x768xbf16>
    %cst_86 = arith.constant dense<0.000000e+00> : vector<128x768xf32>
    %211 = tpu.matmul %208, %210, %cst_86 {dimension_numbers = #tpu.dot_dimension_numbers<[1], [0], [0], [1], [0, 0, 1, 1], [], []>} : vector<128x128xbf16>, vector<128x768xbf16>, vector<128x768xf32> -> vector<128x768xf32>
    %212 = arith.truncf %211 : vector<128x768xf32> to vector<128x768xbf16>
    %213 = vector.extract_strided_slice %212 {offsets = [0, 0], sizes = [128, 128], strides = [1, 1]} : vector<128x768xbf16> to vector<128x128xbf16>
    %214 = vector.extract_strided_slice %212 {offsets = [0, 256], sizes = [128, 128], strides = [1, 1]} : vector<128x768xbf16> to vector<128x128xbf16>
    %cst_87 = arith.constant dense<0.000000e+00> : vector<128x128xf32>
    %215 = tpu.matmul %213, %214, %cst_87 {dimension_numbers = #tpu.dot_dimension_numbers<[1], [1], [0], [0], [0, 0, 1, 0], [], []>} : vector<128x128xbf16>, vector<128x128xbf16>, vector<128x128xf32> -> vector<128x128xf32>
    %cst_88 = arith.constant 0.176776692 : f32
    %216 = vector.broadcast %cst_88 : f32 to vector<128x128xf32>
    %217 = arith.mulf %215, %216 : vector<128x128xf32>
    %218 = arith.addf %217, %33 : vector<128x128xf32>
    %219 = vector.extract_strided_slice %212 {offsets = [0, 128], sizes = [128, 128], strides = [1, 1]} : vector<128x768xbf16> to vector<128x128xbf16>
    %220 = vector.extract_strided_slice %212 {offsets = [0, 384], sizes = [128, 128], strides = [1, 1]} : vector<128x768xbf16> to vector<128x128xbf16>
    %cst_89 = arith.constant dense<0.000000e+00> : vector<128x128xf32>
    %221 = tpu.matmul %219, %220, %cst_89 {dimension_numbers = #tpu.dot_dimension_numbers<[1], [1], [0], [0], [0, 0, 1, 0], [], []>} : vector<128x128xbf16>, vector<128x128xbf16>, vector<128x128xf32> -> vector<128x128xf32>
    %cst_90 = arith.constant 0.176776692 : f32
    %222 = vector.broadcast %cst_90 : f32 to vector<128x128xf32>
    %223 = arith.mulf %221, %222 : vector<128x128xf32>
    %224 = arith.addf %223, %33 : vector<128x128xf32>
    %225 = tpu.concatenate %218, %224 in 0 : vector<128x128xf32>, vector<128x128xf32> -> vector<256x128xf32>
    %cst_91 = arith.constant dense<0xFF800000> : vector<256xf32>
    %226 = vector.multi_reduction <maximumf>, %225, %cst_91 [1] : vector<256x128xf32> to vector<256xf32>
    %227 = vector.shape_cast %226 : vector<256xf32> to vector<256x1xf32>
    %228 = vector.broadcast %227 : vector<256x1xf32> to vector<256x128xf32>
    %229 = arith.subf %225, %228 : vector<256x128xf32>
    %230 = math.exp %229 : vector<256x128xf32>
    %cst_92 = arith.constant dense<0.000000e+00> : vector<256xf32>
    %231 = vector.multi_reduction <add>, %230, %cst_92 [1] : vector<256x128xf32> to vector<256xf32>
    %232 = vector.shape_cast %231 : vector<256xf32> to vector<256x1xf32>
    %233 = tpu.reciprocal %232 {approx = true} : vector<256x1xf32> -> vector<256x1xf32>
    %234 = vector.broadcast %233 : vector<256x1xf32> to vector<256x128xf32>
    %235 = arith.mulf %230, %234 : vector<256x128xf32>
    %236 = arith.truncf %235 : vector<256x128xf32> to vector<256x128xbf16>
    %237 = vector.extract_strided_slice %212 {offsets = [0, 512], sizes = [128, 128], strides = [1, 1]} : vector<128x768xbf16> to vector<128x128xbf16>
    %238 = vector.extract_strided_slice %236 {offsets = [0, 0], sizes = [128, 128], strides = [1, 1]} : vector<256x128xbf16> to vector<128x128xbf16>
    %cst_93 = arith.constant dense<0.000000e+00> : vector<128x128xf32>
    %239 = tpu.matmul %238, %237, %cst_93 {dimension_numbers = #tpu.dot_dimension_numbers<[1], [0], [0], [1], [0, 0, 1, 1], [], []>} : vector<128x128xbf16>, vector<128x128xbf16>, vector<128x128xf32> -> vector<128x128xf32>
    %240 = vector.extract_strided_slice %212 {offsets = [0, 640], sizes = [128, 128], strides = [1, 1]} : vector<128x768xbf16> to vector<128x128xbf16>
    %241 = vector.extract_strided_slice %236 {offsets = [128, 0], sizes = [128, 128], strides = [1, 1]} : vector<256x128xbf16> to vector<128x128xbf16>
    %cst_94 = arith.constant dense<0.000000e+00> : vector<128x128xf32>
    %242 = tpu.matmul %241, %240, %cst_94 {dimension_numbers = #tpu.dot_dimension_numbers<[1], [0], [0], [1], [0, 0, 1, 1], [], []>} : vector<128x128xbf16>, vector<128x128xbf16>, vector<128x128xf32> -> vector<128x128xf32>
    %243 = tpu.concatenate %239, %242 in 1 : vector<128x128xf32>, vector<128x128xf32> -> vector<128x256xf32>
    %244 = arith.truncf %243 : vector<128x256xf32> to vector<128x256xbf16>
    %c1_95 = arith.constant 1 : index
    %c0_96 = arith.constant 0 : index
    %c0_97 = arith.constant 0 : index
    %245 = vector.load %arg9[%c1_95, %c0_96, %c0_97] : memref<2x256x128xbf16, #tpu.memory_space<vmem>>, vector<1x256x128xbf16>
    %246 = vector.shape_cast %245 : vector<1x256x128xbf16> to vector<256x128xbf16>
    %cst_98 = arith.constant dense<0.000000e+00> : vector<128x128xf32>
    %247 = tpu.matmul %244, %246, %cst_98 {dimension_numbers = #tpu.dot_dimension_numbers<[1], [0], [0], [1], [0, 0, 1, 1], [], []>} : vector<128x256xbf16>, vector<256x128xbf16>, vector<128x128xf32> -> vector<128x128xf32>
    %248 = arith.addf %179, %247 : vector<128x128xf32>
    %c1_99 = arith.constant 1 : index
    %c0_100 = arith.constant 0 : index
    %c0_101 = arith.constant 0 : index
    %249 = vector.load %arg10[%c1_99, %c0_100, %c0_101] : memref<2x1x128xf32, #tpu.memory_space<vmem>>, vector<1x1x128xf32>
    %250 = vector.shape_cast %249 : vector<1x1x128xf32> to vector<1x128xf32>
    %251 = vector.broadcast %250 : vector<1x128xf32> to vector<128x128xf32>
    %252 = arith.addf %248, %251 : vector<128x128xf32>
    %c1_102 = arith.constant 1 : index
    %c0_103 = arith.constant 0 : index
    %c0_104 = arith.constant 0 : index
    %253 = vector.load %arg11[%c1_102, %c0_103, %c0_104] : memref<2x1x128xf32, #tpu.memory_space<vmem>>, vector<1x1x128xf32>
    %254 = vector.shape_cast %253 : vector<1x1x128xf32> to vector<1x128xf32>
    %c1_105 = arith.constant 1 : index
    %c0_106 = arith.constant 0 : index
    %c0_107 = arith.constant 0 : index
    %255 = vector.load %arg12[%c1_105, %c0_106, %c0_107] : memref<2x1x128xf32, #tpu.memory_space<vmem>>, vector<1x1x128xf32>
    %256 = vector.shape_cast %255 : vector<1x1x128xf32> to vector<1x128xf32>
    %257 = vector.broadcast %18 : vector<1x128xf32> to vector<128x128xf32>
    %258 = arith.mulf %252, %257 : vector<128x128xf32>
    %cst_108 = arith.constant dense<0.000000e+00> : vector<128xf32>
    %259 = vector.multi_reduction <add>, %258, %cst_108 [1] : vector<128x128xf32> to vector<128xf32>
    %260 = vector.shape_cast %259 : vector<128xf32> to vector<128x1xf32>
    %cst_109 = arith.constant 1.562500e-02 : f32
    %261 = vector.broadcast %cst_109 : f32 to vector<128x1xf32>
    %262 = arith.mulf %260, %261 : vector<128x1xf32>
    %263 = vector.broadcast %262 : vector<128x1xf32> to vector<128x128xf32>
    %264 = arith.subf %252, %263 : vector<128x128xf32>
    %265 = vector.broadcast %18 : vector<1x128xf32> to vector<128x128xf32>
    %266 = arith.mulf %264, %265 : vector<128x128xf32>
    %267 = arith.mulf %266, %266 : vector<128x128xf32>
    %cst_110 = arith.constant dense<0.000000e+00> : vector<128xf32>
    %268 = vector.multi_reduction <add>, %267, %cst_110 [1] : vector<128x128xf32> to vector<128xf32>
    %269 = vector.shape_cast %268 : vector<128xf32> to vector<128x1xf32>
    %cst_111 = arith.constant 1.562500e-02 : f32
    %270 = vector.broadcast %cst_111 : f32 to vector<128x1xf32>
    %271 = arith.mulf %269, %270 : vector<128x1xf32>
    %cst_112 = arith.constant 9.99999974E-6 : f32
    %272 = vector.broadcast %cst_112 : f32 to vector<128x1xf32>
    %273 = arith.addf %271, %272 : vector<128x1xf32>
    %274 = math.rsqrt %273 : vector<128x1xf32>
    %275 = vector.broadcast %274 : vector<128x1xf32> to vector<128x128xf32>
    %276 = arith.mulf %266, %275 : vector<128x128xf32>
    %277 = vector.broadcast %254 : vector<1x128xf32> to vector<128x128xf32>
    %278 = arith.mulf %276, %277 : vector<128x128xf32>
    %279 = vector.broadcast %256 : vector<1x128xf32> to vector<128x128xf32>
    %280 = arith.addf %278, %279 : vector<128x128xf32>
    %281 = arith.truncf %280 : vector<128x128xf32> to vector<128x128xbf16>
    %c1_113 = arith.constant 1 : index
    %c0_114 = arith.constant 0 : index
    %c0_115 = arith.constant 0 : index
    %282 = vector.load %arg13[%c1_113, %c0_114, %c0_115] : memref<2x128x256xbf16, #tpu.memory_space<vmem>>, vector<1x128x256xbf16>
    %283 = vector.shape_cast %282 : vector<1x128x256xbf16> to vector<128x256xbf16>
    %cst_116 = arith.constant dense<0.000000e+00> : vector<128x256xf32>
    %284 = tpu.matmul %281, %283, %cst_116 {dimension_numbers = #tpu.dot_dimension_numbers<[1], [0], [0], [1], [0, 0, 1, 1], [], []>} : vector<128x128xbf16>, vector<128x256xbf16>, vector<128x256xf32> -> vector<128x256xf32>
    %c1_117 = arith.constant 1 : index
    %c0_118 = arith.constant 0 : index
    %c0_119 = arith.constant 0 : index
    %285 = vector.load %arg14[%c1_117, %c0_118, %c0_119] : memref<2x1x256xf32, #tpu.memory_space<vmem>>, vector<1x1x256xf32>
    %286 = vector.shape_cast %285 : vector<1x1x256xf32> to vector<1x256xf32>
    %287 = vector.broadcast %286 : vector<1x256xf32> to vector<128x256xf32>
    %288 = arith.addf %284, %287 : vector<128x256xf32>
    %289 = arith.mulf %288, %288 : vector<128x256xf32>
    %290 = arith.mulf %288, %289 : vector<128x256xf32>
    %cst_120 = arith.constant 4.471500e-02 : f32
    %291 = vector.broadcast %cst_120 : f32 to vector<128x256xf32>
    %292 = arith.mulf %291, %290 : vector<128x256xf32>
    %293 = arith.addf %288, %292 : vector<128x256xf32>
    %cst_121 = arith.constant 0.797884583 : f32
    %294 = vector.broadcast %cst_121 : f32 to vector<128x256xf32>
    %295 = arith.mulf %294, %293 : vector<128x256xf32>
    %296 = math.tanh %295 : vector<128x256xf32>
    %cst_122 = arith.constant 1.000000e+00 : f32
    %297 = vector.broadcast %cst_122 : f32 to vector<128x256xf32>
    %298 = arith.addf %297, %296 : vector<128x256xf32>
    %cst_123 = arith.constant 5.000000e-01 : f32
    %299 = vector.broadcast %cst_123 : f32 to vector<128x256xf32>
    %300 = arith.mulf %299, %298 : vector<128x256xf32>
    %301 = arith.mulf %288, %300 : vector<128x256xf32>
    %302 = arith.truncf %301 : vector<128x256xf32> to vector<128x256xbf16>
    %c1_124 = arith.constant 1 : index
    %c0_125 = arith.constant 0 : index
    %c0_126 = arith.constant 0 : index
    %303 = vector.load %arg15[%c1_124, %c0_125, %c0_126] : memref<2x256x128xbf16, #tpu.memory_space<vmem>>, vector<1x256x128xbf16>
    %304 = vector.shape_cast %303 : vector<1x256x128xbf16> to vector<256x128xbf16>
    %cst_127 = arith.constant dense<0.000000e+00> : vector<128x128xf32>
    %305 = tpu.matmul %302, %304, %cst_127 {dimension_numbers = #tpu.dot_dimension_numbers<[1], [0], [0], [1], [0, 0, 1, 1], [], []>} : vector<128x256xbf16>, vector<256x128xbf16>, vector<128x128xf32> -> vector<128x128xf32>
    %306 = arith.addf %252, %305 : vector<128x128xf32>
    %c1_128 = arith.constant 1 : index
    %c0_129 = arith.constant 0 : index
    %c0_130 = arith.constant 0 : index
    %307 = vector.load %arg16[%c1_128, %c0_129, %c0_130] : memref<2x1x128xf32, #tpu.memory_space<vmem>>, vector<1x1x128xf32>
    %308 = vector.shape_cast %307 : vector<1x1x128xf32> to vector<1x128xf32>
    %309 = vector.broadcast %308 : vector<1x128xf32> to vector<128x128xf32>
    %310 = arith.addf %306, %309 : vector<128x128xf32>
    %c0_131 = arith.constant 0 : index
    %c0_132 = arith.constant 0 : index
    %311 = vector.load %arg17[%c0_131, %c0_132] : memref<1x128xf32, #tpu.memory_space<vmem>>, vector<1x128xf32>
    %c0_133 = arith.constant 0 : index
    %c0_134 = arith.constant 0 : index
    %312 = vector.load %arg18[%c0_133, %c0_134] : memref<1x128xf32, #tpu.memory_space<vmem>>, vector<1x128xf32>
    %313 = vector.broadcast %18 : vector<1x128xf32> to vector<128x128xf32>
    %314 = arith.mulf %310, %313 : vector<128x128xf32>
    %cst_135 = arith.constant dense<0.000000e+00> : vector<128xf32>
    %315 = vector.multi_reduction <add>, %314, %cst_135 [1] : vector<128x128xf32> to vector<128xf32>
    %316 = vector.shape_cast %315 : vector<128xf32> to vector<128x1xf32>
    %cst_136 = arith.constant 1.562500e-02 : f32
    %317 = vector.broadcast %cst_136 : f32 to vector<128x1xf32>
    %318 = arith.mulf %316, %317 : vector<128x1xf32>
    %319 = vector.broadcast %318 : vector<128x1xf32> to vector<128x128xf32>
    %320 = arith.subf %310, %319 : vector<128x128xf32>
    %321 = vector.broadcast %18 : vector<1x128xf32> to vector<128x128xf32>
    %322 = arith.mulf %320, %321 : vector<128x128xf32>
    %323 = arith.mulf %322, %322 : vector<128x128xf32>
    %cst_137 = arith.constant dense<0.000000e+00> : vector<128xf32>
    %324 = vector.multi_reduction <add>, %323, %cst_137 [1] : vector<128x128xf32> to vector<128xf32>
    %325 = vector.shape_cast %324 : vector<128xf32> to vector<128x1xf32>
    %cst_138 = arith.constant 1.562500e-02 : f32
    %326 = vector.broadcast %cst_138 : f32 to vector<128x1xf32>
    %327 = arith.mulf %325, %326 : vector<128x1xf32>
    %cst_139 = arith.constant 9.99999974E-6 : f32
    %328 = vector.broadcast %cst_139 : f32 to vector<128x1xf32>
    %329 = arith.addf %327, %328 : vector<128x1xf32>
    %330 = math.rsqrt %329 : vector<128x1xf32>
    %331 = vector.broadcast %330 : vector<128x1xf32> to vector<128x128xf32>
    %332 = arith.mulf %322, %331 : vector<128x128xf32>
    %333 = vector.broadcast %311 : vector<1x128xf32> to vector<128x128xf32>
    %334 = arith.mulf %332, %333 : vector<128x128xf32>
    %335 = vector.broadcast %312 : vector<1x128xf32> to vector<128x128xf32>
    %336 = arith.addf %334, %335 : vector<128x128xf32>
    %c0_140 = arith.constant 0 : index
    %c0_141 = arith.constant 0 : index
    %337 = vector.load %arg19[%c0_140, %c0_141] : memref<128x128xf32, #tpu.memory_space<vmem>>, vector<128x128xf32>
    tpu.vector_store %arg19[%c0_140, %c0_141], %336 {strides = array<i32>} : memref<128x128xf32, #tpu.memory_space<vmem>>, vector<128x128xf32>,
    return
  }
  func.func @transform_0(%arg0: i32) -> (i32, i32) {
    %c0_i32 = arith.constant 0 : i32
    %c0_i32_0 = arith.constant 0 : i32
    return %arg0, %c0_i32 : i32, i32
  }
  func.func @transform_1(%arg0: i32) -> (i32, i32) {
    %c0_i32 = arith.constant 0 : i32
    %c0_i32_0 = arith.constant 0 : i32
    return %arg0, %c0_i32 : i32, i32
  }
  func.func @transform_2(%arg0: i32) -> (i32, i32) {
    %c0_i32 = arith.constant 0 : i32
    %c0_i32_0 = arith.constant 0 : i32
    %c0_i32_1 = arith.constant 0 : i32
    return %c0_i32, %c0_i32_0 : i32, i32
  }
  func.func @transform_3(%arg0: i32) -> (i32, i32) {
    %c0_i32 = arith.constant 0 : i32
    %c0_i32_0 = arith.constant 0 : i32
    %c0_i32_1 = arith.constant 0 : i32
    return %c0_i32, %c0_i32_0 : i32, i32
  }
  func.func @transform_4(%arg0: i32) -> (i32, i32) {
    %c0_i32 = arith.constant 0 : i32
    %c0_i32_0 = arith.constant 0 : i32
    %c0_i32_1 = arith.constant 0 : i32
    return %c0_i32, %c0_i32_0 : i32, i32
  }
  func.func @transform_5(%arg0: i32) -> (i32, i32, i32) {
    %c0_i32 = arith.constant 0 : i32
    %c0_i32_0 = arith.constant 0 : i32
    %c0_i32_1 = arith.constant 0 : i32
    %c0_i32_2 = arith.constant 0 : i32
    return %c0_i32, %c0_i32_0, %c0_i32_1 : i32, i32, i32
  }
  func.func @transform_6(%arg0: i32) -> (i32, i32, i32) {
    %c0_i32 = arith.constant 0 : i32
    %c0_i32_0 = arith.constant 0 : i32
    %c0_i32_1 = arith.constant 0 : i32
    %c0_i32_2 = arith.constant 0 : i32
    return %c0_i32, %c0_i32_0, %c0_i32_1 : i32, i32, i32
  }
  func.func @transform_7(%arg0: i32) -> (i32, i32, i32) {
    %c0_i32 = arith.constant 0 : i32
    %c0_i32_0 = arith.constant 0 : i32
    %c0_i32_1 = arith.constant 0 : i32
    %c0_i32_2 = arith.constant 0 : i32
    return %c0_i32, %c0_i32_0, %c0_i32_1 : i32, i32, i32
  }
  func.func @transform_8(%arg0: i32) -> (i32, i32, i32) {
    %c0_i32 = arith.constant 0 : i32
    %c0_i32_0 = arith.constant 0 : i32
    %c0_i32_1 = arith.constant 0 : i32
    %c0_i32_2 = arith.constant 0 : i32
    return %c0_i32, %c0_i32_0, %c0_i32_1 : i32, i32, i32
  }
  func.func @transform_9(%arg0: i32) -> (i32, i32, i32) {
    %c0_i32 = arith.constant 0 : i32
    %c0_i32_0 = arith.constant 0 : i32
    %c0_i32_1 = arith.constant 0 : i32
    %c0_i32_2 = arith.constant 0 : i32
    return %c0_i32, %c0_i32_0, %c0_i32_1 : i32, i32, i32
  }
  func.func @transform_10(%arg0: i32) -> (i32, i32, i32) {
    %c0_i32 = arith.constant 0 : i32
    %c0_i32_0 = arith.constant 0 : i32
    %c0_i32_1 = arith.constant 0 : i32
    %c0_i32_2 = arith.constant 0 : i32
    return %c0_i32, %c0_i32_0, %c0_i32_1 : i32, i32, i32
  }
  func.func @transform_11(%arg0: i32) -> (i32, i32, i32) {
    %c0_i32 = arith.constant 0 : i32
    %c0_i32_0 = arith.constant 0 : i32
    %c0_i32_1 = arith.constant 0 : i32
    %c0_i32_2 = arith.constant 0 : i32
    return %c0_i32, %c0_i32_0, %c0_i32_1 : i32, i32, i32
  }
  func.func @transform_12(%arg0: i32) -> (i32, i32, i32) {
    %c0_i32 = arith.constant 0 : i32
    %c0_i32_0 = arith.constant 0 : i32
    %c0_i32_1 = arith.constant 0 : i32
    %c0_i32_2 = arith.constant 0 : i32
    return %c0_i32, %c0_i32_0, %c0_i32_1 : i32, i32, i32
  }
  func.func @transform_13(%arg0: i32) -> (i32, i32, i32) {
    %c0_i32 = arith.constant 0 : i32
    %c0_i32_0 = arith.constant 0 : i32
    %c0_i32_1 = arith.constant 0 : i32
    %c0_i32_2 = arith.constant 0 : i32
    return %c0_i32, %c0_i32_0, %c0_i32_1 : i32, i32, i32
  }
  func.func @transform_14(%arg0: i32) -> (i32, i32, i32) {
    %c0_i32 = arith.constant 0 : i32
    %c0_i32_0 = arith.constant 0 : i32
    %c0_i32_1 = arith.constant 0 : i32
    %c0_i32_2 = arith.constant 0 : i32
    return %c0_i32, %c0_i32_0, %c0_i32_1 : i32, i32, i32
  }
  func.func @transform_15(%arg0: i32) -> (i32, i32, i32) {
    %c0_i32 = arith.constant 0 : i32
    %c0_i32_0 = arith.constant 0 : i32
    %c0_i32_1 = arith.constant 0 : i32
    %c0_i32_2 = arith.constant 0 : i32
    return %c0_i32, %c0_i32_0, %c0_i32_1 : i32, i32, i32
  }
  func.func @transform_16(%arg0: i32) -> (i32, i32) {
    %c0_i32 = arith.constant 0 : i32
    %c0_i32_0 = arith.constant 0 : i32
    %c0_i32_1 = arith.constant 0 : i32
    return %c0_i32, %c0_i32_0 : i32, i32
  }
  func.func @transform_17(%arg0: i32) -> (i32, i32) {
    %c0_i32 = arith.constant 0 : i32
    %c0_i32_0 = arith.constant 0 : i32
    %c0_i32_1 = arith.constant 0 : i32
    return %c0_i32, %c0_i32_0 : i32, i32
  }
  func.func @transform_18(%arg0: i32) -> (i32, i32) {
    %c0_i32 = arith.constant 0 : i32
    %c0_i32_0 = arith.constant 0 : i32
    return %arg0, %c0_i32 : i32, i32
  }
}

</mosaic_0001>

<bundles_post_ra>
// kernel: tpu_custom_call.1
= control target key start
LH: loop header
LB: loop body
LE: loop exit
PB: predicated region body
PF: predicated region fallthrough
CT: control target
= control target key end

     0   :  { %s14609_s0 = inlined_call_operand.hbm [shape: bf16[256,128], index: 0, kind: input, shape index: {}]   ;;  %s14610_s1 = inlined_call_operand.hbm [shape: f32[256,128], index: 1, kind: input, shape index: {}]   ;;  %s14611_s2 = inlined_call_operand.hbm [shape: f32[1,128], index: 2, kind: input, shape index: {}]   ;;  %s14612_s3 = inlined_call_operand.hbm [shape: bf16[128,128], index: 3, kind: input, shape index: {}]   ;;  %s14613_s4 = inlined_call_operand.hbm [shape: f32[1,128], index: 4, kind: input, shape index: {}]   ;;  %s14614_s5 = inlined_call_operand.vmem [shape: f32[2,1,128], index: 5, kind: input, shape index: {}]   ;;  %s14615_s6 = inlined_call_operand.hbm [shape: f32[2,1,128], index: 6, kind: input, shape index: {}]   ;;  %s14616_s7 = inlined_call_operand.hbm [shape: bf16[2,128,768], index: 7, kind: input, shape index: {}]   ;;  %s14617_s8 = inlined_call_operand.hbm [shape: bf16[2,256,128], index: 8, kind: input, shape index: {}]   ;;  %s14618_s9 = inlined_call_operand.vmem [shape: f32[2,1,128], index: 9, kind: input, shape index: {}]   ;;  %s14619_s10 = inlined_call_operand.hbm [shape: f32[2,1,128], index: 10, kind: input, shape index: {}]   ;;  %s14620_s11 = inlined_call_operand.vmem [shape: f32[2,1,128], index: 11, kind: input, shape index: {}]   ;;  %s14621_s12 = inlined_call_operand.hbm [shape: bf16[2,128,256], index: 12, kind: input, shape index: {}]   ;;  %s14622_s13 = inlined_call_operand.vmem [shape: f32[2,1,256], index: 13, kind: input, shape index: {}]   ;;  %s14623_s14 = inlined_call_operand.hbm [shape: bf16[2,256,128], index: 14, kind: input, shape index: {}]   ;;  %s14624_s15 = inlined_call_operand.vmem [shape: f32[2,1,128], index: 15, kind: input, shape index: {}]   ;;  %s14625_s16 = inlined_call_operand.vmem [shape: f32[1,128], index: 16, kind: input, shape index: {}]   ;;  %s14626_s17 = inlined_call_operand.vmem [shape: f32[1,128], index: 17, kind: input, shape index: {}]   ;;  %s14627_s18 = inlined_call_operand.hbm [shape: f32[256,128], index: 18, kind: output, shape index: {}]  }
   0x1   :  { %14723 = sst [smem:[#allocation69_spill]] %s14609_s0 }
   0x2   :  { %14724 = sst [smem:[#allocation70_spill]] %s14610_s1 }
   0x3   :  { %14725 = sst [smem:[#allocation71_spill]] %s14611_s2 }
   0x4   :  { %14726 = sst [smem:[#allocation72_spill]] %s14612_s3 }
   0x5   :  { %14727 = sst [smem:[#allocation73_spill]] %s14613_s4 }
   0x6   :  { %14728 = sst [smem:[#allocation74_spill]] %s14615_s6 }
   0x7   :  { %14729 = sst [smem:[#allocation75_spill]] %s14616_s7 }
   0x8   :  { %14730 = sst [smem:[#allocation76_spill]] %s14617_s8 }
   0x9   :  { %14731 = sst [smem:[#allocation77_spill]] %s14619_s10 }
   0xa   :  { %14732 = sst [smem:[#allocation78_spill]] %s14621_s12 }
   0xb   :  { %14733 = sst [smem:[#allocation79_spill]] %s14622_s13 }
   0xc   :  { %14734 = sst [smem:[#allocation80_spill]] %s14623_s14 }
   0xd   :  { %14735 = sst [smem:[#allocation81_spill]] %s14624_s15 }
   0xe   :  { %14736 = sst [smem:[#allocation82_spill]] %s14625_s16 }
   0xf   :  { %14737 = sst [smem:[#allocation83_spill]] %s14626_s17 }
  0x10   :  { %14738 = sst [smem:[#allocation84_spill]] %s14627_s18 }
  0x11   :  { %23 = vsyncpa [#allocation3], 0 }
  0x12   :  { %25 = vsyncpa [#allocation3 + $0x1], 0 }
  0x13   :  { %26 = vsyncpa [#allocation6], 0 }
  0x14   :  { %28 = vsyncpa [#allocation6 + $0x1], 0 }
  0x15   :  { %29 = vsyncpa [#allocation9], 0 }
  0x16   :  { %30 = vsyncpa [#allocation12], 0 }
  0x17   :  { %31 = vsyncpa [#allocation15], 0 }
  0x18   :  { %32 = vsyncpa [#allocation18], 0 }
  0x19   :  { %33 = vsyncpa [#allocation4], 0 }
  0x1a   :  { %35 = vsyncpa [#allocation4 + $0x1], 0  ;;  %s11052_s27 = smov 0   ;;  %s11054_s28 = smov 0  }
  0x1b   :  { %s11056_s29 = smov 0   ;;  %s11058_s30 = smov 0  }
  0x1c LB: > { %14739 = sst [smem:[#allocation29_spill]] %s10930_s29  ;;  %s11076_s21 = sadd.s32 4294967295, %s10934_s30   ;;  %s10934_s30 = sphi %s11058_s30, %s14938_s30   ;;  %s10930_s29 = sphi %s11056_s29, %s14940_s29   ;;  %s10926_s28 = sphi %s11054_s28, %s14942_s28   ;;  %s10922_s27 = sphi %s11052_s27, %s14941_s27  }
  0x1d   : > { %s14740_s1 = sld [smem:[#allocation71_spill]]  ;;  %p8680_p0 = scmp.ge.s32.totalorder %s10934_s30, 1 }
  0x1e   : > { %p62_p1 = scmp.eq.s32.totalorder %s11076_s21, 0  ;;  %p460_p2 = scmp.lt.s32.totalorder %s10934_s30, 3 }
  0x1f   : > { %s10936_s2 = smov [#allocation7]   ;;  %s14742_s3 = sld [smem:[#allocation72_spill]] }
  0x20   : > { %p11081_p3 = pnand %p8680_p0, %p460_p2  ;;  %s474_s23 = sshll.u32 %s10936_s2, 4  ;;  %s475_s23 = int_to_ptr.vmem [resolvable:$true] %s474_s23 }
  0x21   : > { %s10937_s19 = smov [#allocation8]   ;;  %s14635_s2 = smov 64  }
  0x22   : > { %p9842_p5 = pneg %p11081_p3  ;;  %s14639_s18 = smov 4  }
  0x23   : > { %s472_s20 = sshll.u32 %s14740_s1, 4  ;;  %s485_s1 = sshll.u32 %s10937_s19, 4  ;;  %s473_s20 = int_to_ptr.hbm [resolvable:$true] %s472_s20  ;;  %s486_s1 = int_to_ptr.vmem [resolvable:$true] %s485_s1 }
  0x24   : > { %p11093_p6 = pnand %p9842_p5, %p62_p1  ;;  %s14744_s6 = sld [smem:[#allocation74_spill]] }
  0x25   : > { %s483_s26 = sshll.u32 %s14742_s3, 4  ;;  %s10940_s17 = smov [#allocation11]   ;;  %s484_s26 = int_to_ptr.hbm [resolvable:$true] %s483_s26 }
  0x26   : > { %9845 = dma.hbm_to_vmem [thread:$0]  (!%p11093_p6), %s473_s20, 16, %s475_s23, [#allocation6]  }
  0x27   : > { %9848 = dma.hbm_to_vmem [thread:$0]  (!%p11093_p6), %s484_s26, 1024, %s486_s1, [#allocation9], %s14635_s2, %s14635_s2, %s14639_s18  }
  0x28   : > { %s514_s16 = sshll.u32 %s10940_s17, 4  ;;  %s14745_s8 = sld [smem:[#allocation76_spill]]  ;;  %s515_s16 = int_to_ptr.vmem [resolvable:$true] %s514_s16 }
  0x29   : > { %s14633_s23 = smov 16   ;;  %s14634_s13 = smov 1  }
  0x2a   : > { %s512_s3 = sshll.u32 %s14744_s6, 4  ;;  %s10943_s26 = smov [#allocation14]   ;;  %s513_s3 = int_to_ptr.hbm [resolvable:$true] %s512_s3 }
  0x2b   : > { %9854 = dma.hbm_to_vmem [thread:$0]  (!%p11093_p6), %s513_s3, 32, %s515_s16, [#allocation12], %s14633_s23, %s14633_s23, %s14634_s13  }
  0x2c   : > { %s542_s1 = sshll.u32 %s10943_s26, 4  ;;  %s14746_s12 = sld [smem:[#allocation78_spill]]  ;;  %s543_s1 = int_to_ptr.vmem [resolvable:$true] %s542_s1 }
  0x2d   : > { %s10944_s15 = smov [#allocation17]   ;;  %s14747_s4 = sld [smem:[#allocation73_spill]] }
  0x2e   : > { %s540_s20 = sshll.u32 %s14745_s8, 4  ;;  %s576_s19 = sshll.u32 %s10944_s15, 4  ;;  %s541_s20 = int_to_ptr.hbm [resolvable:$true] %s540_s20  ;;  %s577_s19 = int_to_ptr.vmem [resolvable:$true] %s576_s19 }
  0x2f   : > { %9860 = dma.hbm_to_vmem [thread:$0]  (!%p11093_p6), %s541_s20, 4096, %s543_s1, [#allocation15], %s14635_s2, %s14635_s2, %s14639_s18  }
  0x30   : > { %s14637_s26 = smov 128   ;;  %s14638_s23 = smov 8  }
  0x31   : > { %s10947_s24 = smov [#allocation10]   ;;  %s14748_s7 = sld [smem:[#allocation75_spill]] }
  0x32   : > { %s574_s17 = sshll.u32 %s14746_s12, 4  ;;  %s500_s25 = sshll.u32 %s10947_s24, 4  ;;  %s575_s17 = int_to_ptr.hbm [resolvable:$true] %s574_s17  ;;  %s501_s25 = int_to_ptr.vmem [resolvable:$true] %s500_s25 }
  0x33   : > { %s498_s16 = sshll.u32 %s14747_s4, 4  ;;  %s10948_s6 = smov [#allocation13]   ;;  %s499_s16 = int_to_ptr.hbm [resolvable:$true] %s498_s16 }
  0x34   : > { %9866 = dma.hbm_to_vmem [thread:$0]  (!%p11093_p6), %s575_s17, 4096, %s577_s19, [#allocation18], %s14637_s26, %s14637_s26, %s14638_s23  }
  0x35   : > { %9851 = dma.hbm_to_vmem [thread:$0]  (!%p11093_p6), %s499_s16, 16, %s501_s25, [#allocation9]  }
  0x36   : > { %s528_s15 = sshll.u32 %s10948_s6, 4  ;;  %s14749_s10 = sld [smem:[#allocation77_spill]]  ;;  %s529_s15 = int_to_ptr.vmem [resolvable:$true] %s528_s15 }
  0x37   : > { %s526_s1 = sshll.u32 %s14748_s7, 4  ;;  %s10949_s19 = smov 384   ;;  %s527_s1 = int_to_ptr.hbm [resolvable:$true] %s526_s1 }
  0x38   : > { %s10950_s24 = smov 24   ;;  %s10951_s13 = smov [#allocation16]  }
  0x39   : > { %9857 = dma.hbm_to_vmem [thread:$0]  (!%p11093_p6), %s527_s1, 12288, %s529_s15, [#allocation12], %s10949_s19, %s10949_s19, %s10950_s24  }
  0x3a   : > { %s559_s16 = sshll.u32 %s10951_s13, 4  ;;  %s14750_s14 = sld [smem:[#allocation80_spill]]  ;;  %s560_s16 = int_to_ptr.vmem [resolvable:$true] %s559_s16 }
  0x3b   : > { %s14751_s6 = smov 1   ;;  %s14752_s3 = smov 16  }
  0x3c   : > { %s557_s17 = sshll.u32 %s14749_s10, 4  ;;  %s10952_s1 = smov [#allocation19]   ;;  %s558_s17 = int_to_ptr.hbm [resolvable:$true] %s557_s17 }
  0x3d   : > { %9863 = dma.hbm_to_vmem [thread:$0]  (!%p11093_p6), %s558_s17, 32, %s560_s16, [#allocation15], %s14752_s3, %s14752_s3, %s14751_s6  }
  0x3e   : > { %s593_s15 = sshll.u32 %s10952_s1, 4  ;;  %s14753_s19 = smov 64   ;;  %s594_s15 = int_to_ptr.vmem [resolvable:$true] %s593_s15 }
  0x3f   : > { %s8679_s24 = sadd.s32 4294967294, %s10934_s30   ;;  %s11156_s13 = sadd.s32 1, %s10934_s30  }
  0x40   : > { %s591_s2 = sshll.u32 %s14750_s14, 4  ;;  %14754 = sst [smem:[#allocation30_spill]] %s11156_s13  ;;  %s592_s2 = int_to_ptr.hbm [resolvable:$true] %s591_s2 }
  0x41   : > { %9869 = dma.hbm_to_vmem [thread:$0]  (!%p11093_p6), %s592_s2, 4096, %s594_s15, [#allocation18], %s14753_s19, %s14753_s19, %s14639_s18  }
  0x42   : > { %s48_s25 = sadd.s32 1, %s10930_s29  ;;  %s45_s20 = ssub.s32 %s10934_s30, %s11156_s13 }
  0x43   : > { %p55_p7 = scmp.ne.s32.totalorder %s10930_s29, %s10926_s28  ;;  %p46_p8 = scmp.eq.s32.totalorder %s45_s20, 0 }
  0x44   : > { %p56_p9 = scmp.eq.s32.totalorder %s10934_s30, 0  ;;  %p61_p10 = scmp.ne.s32.totalorder %s10926_s28, %s10922_s27 }
  0x45   : > { %p447_p11 = scmp.eq.s32.totalorder %s11076_s21, 1  ;;  %p453_p2 = scmp.eq.s32.totalorder %s8679_s24, 1 }
  0x46   : > { %s11168_s17 = scalar_select %p46_p8, %s10930_s29, %s48_s25  }
  0x47   : > { %p11170_p12 = por %p56_p9, %p55_p7  ;;  %p11176_p13 = por %p62_p1, %p61_p10 }
  0x48   : > { %14755 = sst [smem:[#allocation31_spill]] %s11168_s17  ;;  %p11180_p0 = por %p447_p11, %p55_p7 }
  0x49   : > { %p9890_p5 = scmp.lt.s32.totalorder %s10934_s30, 2  ;;  %s11186_s6 = sand.u32 1, %s10930_s29  }
  0x4a   : > { %p11188_p6 = por %p453_p2, %p61_p10  ;;  %s8691_s1 = sshll.u32 %s11186_s6, 6 }
  0x4b   : > { %s9565_s15 = sshll.u32 %s10934_s30, 6  ;;  %s14760_s26 = sld [smem:[#allocation69_spill]] }
  0x4c   : > { %s620_s4 = scalar_lea.vmem [#allocation2], %s8691_s1  ;;  %p11199_p7 = pnand %p9890_p5, %p11170_p12 }
  0x4d   : > { %s628_s7 = sshll.u32 %s620_s4, 4  ;;  %s638_s8 = sand.u32 1, %s10934_s30   ;;  %s629_s7 = int_to_ptr.vmem [resolvable:$true] %s628_s7 }
  0x4e   : > { %s8694_s10 = sshll.u32 %s11186_s6, 7  ;;  %s617_s12 = scalar_lea.sflag [#allocation3], %s11186_s6 }
  0x4f   : > { %p10788_p9 = pneg %p11199_p7 }
  0x51   : > { %s625_s23 = scalar_lea.hbm %s14760_s26, %s9565_s15  ;;  %s10791_s0 = scalar_lea.hbm %s14760_s26, 128 }
  0x52   : > { %s626_s18 = sshll.u32 %s625_s23, 4  ;;  %s627_s18 = int_to_ptr.hbm [resolvable:$true] %s626_s18 }
  0x53   : > { %s10784_s14 = sshra.s32 %s627_s18, 4  ;;  %s10785_s14 = int_to_ptr.hbm [resolvable:$true] %s10784_s14 }
  0x54   : > { %s10786_s17 = scalar_lea.hbm %s10785_s14, 64  ;;  %p10792_p12 = scmp.lt.s32.totalorder %s10785_s14, %s14760_s26 }
  0x55   : > { %p10787_p8 = scmp.ne.s32.totalorder %s10785_s14, %s10786_s17  ;;  %p10793_p2 = scmp.lt.s32.totalorder %s10791_s0, %s10786_s17 }
  0x57   : > { %p10789_p10 = pnand %p10788_p9, %p10787_p8  ;;  %p10794_p5 = por %p10793_p2, %p10792_p12 }
  0x59   : > { %p10790_p11 = pneg %p10789_p10 }
  0x5b   : > { %p10795_p4 = pnand %p10794_p5, %p10790_p11 }
  0x5d   : > { %10798 = shalt.err (!%p10795_p4)
}
  0x5e   : > { %s14762_s6 = smov 4   ;;  %s9566_s25 = sshll.u32 %s10934_s30, 7 }
  0x5f   : > { %9873 = dma.hbm_to_vmem [thread:$0]  (!%p11199_p7), %s627_s18, 1024, %s629_s7, %s617_s12, %s14753_s19, %s14753_s19, %s14762_s6  }
  0x60   : > { %s642_s20 = scalar_lea.vmem [#allocation5], %s8694_s10  ;;  %s14763_s13 = sld [smem:[#allocation70_spill]] }
  0x61   : > { %s650_s4 = sshll.u32 %s642_s20, 4  ;;  %s639_s17 = scalar_lea.sflag [#allocation6], %s638_s8  ;;  %s651_s4 = int_to_ptr.vmem [resolvable:$true] %s650_s4 }
  0x66   : > { %s647_s1 = scalar_lea.hbm %s14763_s13, %s9566_s25  ;;  %s10821_s10 = scalar_lea.hbm %s14763_s13, 256 }
  0x67   : > { %s648_s14 = sshll.u32 %s647_s1, 4  ;;  %s649_s14 = int_to_ptr.hbm [resolvable:$true] %s648_s14 }
  0x68   : > { %s10814_s0 = sshra.s32 %s649_s14, 4  ;;  %s10815_s0 = int_to_ptr.hbm [resolvable:$true] %s10814_s0 }
  0x69   : > { %s10816_s15 = scalar_lea.hbm %s10815_s0, 128  ;;  %p10822_p11 = scmp.lt.s32.totalorder %s10815_s0, %s14763_s13 }
  0x6a   : > { %p10817_p4 = scmp.ne.s32.totalorder %s10815_s0, %s10816_s15  ;;  %p10823_p12 = scmp.lt.s32.totalorder %s10821_s10, %s10816_s15 }
  0x6c   : > { %p10819_p8 = pnand %p10817_p4, %p10788_p9  ;;  %p10824_p2 = por %p10823_p12, %p10822_p11 }
  0x6e   : > { %p10820_p10 = pneg %p10819_p8 }
  0x70   : > { %p10825_p5 = pnand %p10824_p2, %p10820_p10 }
  0x72   : > { %10828 = shalt.err (!%p10825_p5)
}
  0x73   : > { %s14764_s8 = smov 8   ;;  %s14765_s29 = smov 128  }
  0x74   : > { %9876 = dma.hbm_to_vmem [thread:$0]  (!%p11199_p7), %s649_s14, 2048, %s651_s4, %s639_s17, %s14765_s29, %s14765_s29, %s14764_s8  }
  0x75   : > { %662 = sbr.rel (%p11081_p3) target bundleno = 4668 (0x123c), region = 92 }
  0x7a   : > { %s11243_s6 = sand.u32 1, %s10926_s28  }
  0x7b   : > { %s8698_s25 = sshll.u32 %s11243_s6, 6  ;;  %s665_s20 = scalar_lea.sflag [#allocation3], %s11243_s6 }
  0x7c   : > { %s11247_s23 = scalar_lea.vmem [#allocation2], %s8698_s25 }
  0x7d   : > { %10889 = dma.done.wait (%p11176_p13), %s665_s20, 1024  }
  0x7e   : > { %10891 = vsyncadd (%p11176_p13), %s665_s20, 4294966272  ;;  %s674_s22 = sand.u32 1, %s11076_s21   ;;  %s8699_s24 = sshll.u32 %s11243_s6, 7 }
  0x7f   : > { %s675_s4 = scalar_lea.sflag [#allocation6], %s674_s22  ;;  %s11257_s1 = scalar_lea.vmem [#allocation5], %s8699_s24 }
  0x80   : > { %10893 = dma.done.wait (%p11176_p13), %s675_s4, 2048  }
  0x81   : > { %10895 = vsyncadd (%p11176_p13), %s675_s4, 4294965248 }
  0x82   : > { %10897 = dma.done.wait (%p62_p1), [#allocation6], 16  }
  0x83   : > { %10899 = vsyncadd (%p62_p1), [#allocation6], 4294967280 }
  0x84   : > { %10901 = dma.done.wait (%p62_p1), [#allocation9], 1040  }
  0x85   : > { %10903 = vsyncadd (%p62_p1), [#allocation9], 4294966256 }
  0x86   : > { %10905 = dma.done.wait (%p62_p1), [#allocation12], 12320  }
  0x87   : > { %10907 = vsyncadd (%p62_p1), [#allocation12], 4294954976 }
  0x88   : > { %10909 = dma.done.wait (%p62_p1), [#allocation15], 4128  }
  0x89   : > { %10911 = vsyncadd (%p62_p1), [#allocation15], 4294963168 }
  0x8a   : > { %10913 = dma.done.wait (%p62_p1), [#allocation18], 8192  }
  0x8b   : > { %10915 = vsyncadd (%p62_p1), [#allocation18], 4294959104  ;;  %v9582_v0 = vld [vmem:[#allocation8 + $0x38] sm:$0xff]  ;;  %v9581_v1 = vld [vmem:[#allocation8 + $0x30] sm:$0xff]  ;;  %v785_v15 = vlaneseq  ;;  %v10953_v26 = vmov 0.0   ;;  %s14858_s18 = sld [smem:[#allocation79_spill]] }
  0x8c   : > { %1150 = vmatpush.bf16.msra.mxu0 %v9582_v0  ;;  %9776 = vmatpush.bf16.msra.mxu2 %v9582_v0  ;;  %v9580_v2 = vld [vmem:[#allocation8 + $0x28] sm:$0xff]  ;;  %v9579_v3 = vld [vmem:[#allocation8 + $0x20] sm:$0xff]  ;;  %v9578_v4 = vld [vmem:[#allocation8 + $0x18] sm:$0xff]  ;;  %s14867_s29 = sld [smem:[#allocation81_spill]]  ;;  %s14505_s20 = scalar_lea.vmem [#allocation20], %s8699_s24 }
  0x8d   : > { %v9577_v5 = vld [vmem:[#allocation8 + $0x10] sm:$0xff]  ;;  %v9576_v6 = vld [vmem:[#allocation8 + $0x8] sm:$0xff]  ;;  %v9575_v7 = vld [vmem:[#allocation8] sm:$0xff]  ;;  %v11290_v16 = vshrl.u32 %v785_v15, 7  ;;  %v11299_v21 = vand.u32 127, %v785_v15  ;;  %s14934_s10 = sld [smem:[#allocation82_spill]] }
  0x8e   : > { %v9567_v8 = vld [vmem:[%s11247_s23] sm:$0xff]  ;;  %v9573_v9 = vld [vmem:[%s11247_s23 + $0x30] sm:$0xff]  ;;  %v9568_v10 = vld [vmem:[%s11247_s23 + $0x8] sm:$0xff]  ;;  %s9775_s24 = sshll.u32 %s11076_s21, 7  ;;  %s14936_s4 = sld [smem:[#allocation84_spill]] }
  0x8f   : > { %v9574_v11 = vld [vmem:[%s11247_s23 + $0x38] sm:$0xff]  ;;  %v9569_v12 = vld [vmem:[%s11247_s23 + $0x10] sm:$0xff]  ;;  %v9571_v14 = vld [vmem:[%s11247_s23 + $0x20] sm:$0xff]  ;;  %14766 = vst [vmem:[#allocation32_spill] sm:$0xff] %v11290_v16  ;;  %v802_v17 = vand.u32 31, %v11290_v16  ;;  %v11294_v18 = vadd.s32 96, %v11290_v16 }
  0x90   : > { %1151 = vmatpush.bf16.msra.mxu0 %v9581_v1  ;;  %9777 = vmatpush.bf16.msra.mxu2 %v9581_v1  ;;  %v9570_v13 = vld [vmem:[%s11247_s23 + $0x18] sm:$0xff]  ;;  %v9572_v19 = vld [vmem:[%s11247_s23 + $0x28] sm:$0xff]  ;;  %v11297_v20 = vld [vmem:[#allocation10] ss:$0 sm:$0xff]  ;;  %14768 = vst [vmem:[#allocation34_spill] sm:$0xff] %v11299_v21  ;;  %vm948_vm2 = vcmp.lt.s32.totalorder %v11299_v21, 64 }
  0x91   : > { %14767 = vst [vmem:[#allocation33_spill] sm:$0xff] %v11294_v18  ;;  %vm818_vm0 = vcmp.eq.s32.totalorder %v802_v17, 0  ;;  %vm866_vm1 = vcmp.ge.s32.totalorder %v802_v17, 1  ;;  %v814_v22 = vand.u32 31, %v11294_v18  ;;  %v11302_v23 = vld [vmem:[#allocation7] ss:$0 sm:$0xff] }
  0x92   : > { %v1199_v25 = vld [vmem:[%s11257_s1] sm:$0xff]  ;;  %v8710_v27 = vsel %vm818_vm0, 1.0, %v10953_v26  ;;  %v8714_v29 = vsel %vm866_vm1, 1.0, %v10953_v26  ;;  %v11311_v33 = vsel %vm948_vm2, 1.0, %v10953_v26  ;;  %v11319_v39 = vadd.s32 16, %v11290_v16  ;;  %v1200_v42 = vld [vmem:[%s11257_s1 + $0x8] sm:$0xff]  ;;  %s14868_s25 = smov %s14867_s29 }
  0x93   : > { %v1251_v31 = vmul.f32 %v11302_v23, %v8710_v27  ;;  %vm830_vm3 = vcmp.eq.s32.totalorder %v814_v22, 0  ;;  %vm878_vm4 = vcmp.ge.s32.totalorder %v814_v22, 1  ;;  %14769 = vst [vmem:[#allocation35_spill] sm:$0xff] %v11311_v33  ;;  %v1211_v35 = vld [vmem:[%s11257_s1 + $0x60] sm:$0xff]  ;;  %v11324_v43 = vmul.f32 0.0, %v11302_v23  ;;  %v1212_v55 = vld [vmem:[%s11257_s1 + $0x68] sm:$0xff] }
  0x94   : > { %1152 = vmatpush.bf16.msra.mxu0 %v9580_v2  ;;  %9778 = vmatpush.bf16.msra.mxu2 %v9580_v2  ;;  %v8713_v36 = vsel %vm830_vm3, 1.0, %v10953_v26  ;;  %14771 = vst [vmem:[#allocation37_spill] sm:$0xff] %v11319_v39  ;;  %v8720_v40 = vsel %vm878_vm4, 1.0, %v10953_v26  ;;  %v804_v50 = vand.u32 31, %v11319_v39  ;;  %v11337_v53 = vadd.s32 112, %v11290_v16  ;;  %v1201_v60 = vld [vmem:[%s11257_s1 + $0x10] sm:$0xff] }
  0x95   : > { %v1263_v47 = vmul.f32 %v11302_v23, %v8713_v36  ;;  %s8495_s16 = sshll.u32 %s14505_s20, 4  ;;  %s8483_s14 = scalar_lea.sflag [#allocation4], %s11243_s6  ;;  %s8496_s16 = int_to_ptr.vmem [resolvable:$true] %s8495_s16 }
  0x96   : > { %14774 = vst [vmem:[#allocation40_spill] sm:$0xff] %v11337_v53  ;;  %vm884_vm5 = vcmp.lt.s32.totalorder %v804_v50, 17  ;;  %v816_v63 = vand.u32 31, %v11337_v53  ;;  %s10864_s12 = scalar_lea.hbm %s14936_s4, 256 }
  0x97   : > { %v8715_v0 = vsel %vm884_vm5, 1.0, %v10953_v26 }
  0x98   : > { %1153 = vmatpush.bf16.msra.mxu0 %v9579_v3  ;;  %9779 = vmatpush.bf16.msra.mxu2 %v9579_v3  ;;  %vm896_vm6 = vcmp.lt.s32.totalorder %v816_v63, 17  ;;  %v1205_v63 = vld [vmem:[%s11257_s1 + $0x30] sm:$0xff] }
  0x9c   : > { %1154 = vmatpush.bf16.msra.mxu0 %v9578_v4  ;;  %9780 = vmatpush.bf16.msra.mxu2 %v9578_v4 }
  0xa0   : > { %1155 = vmatpush.bf16.msra.mxu0 %v9577_v5  ;;  %9781 = vmatpush.bf16.msra.mxu2 %v9577_v5  ;;  %v1213_v5 = vld [vmem:[%s11257_s1 + $0x70] sm:$0xff] }
  0xa4   : > { %1156 = vmatpush.bf16.msra.mxu0 %v9576_v6  ;;  %9782 = vmatpush.bf16.msra.mxu2 %v9576_v6  ;;  %v11354_v6 = vadd.s32 32, %v11290_v16 }
  0xa6   : > { %14776 = vst [vmem:[#allocation42_spill] sm:$0xff] %v11354_v6  ;;  %v806_v15 = vand.u32 31, %v11354_v6 }
  0xa8   : > { %1157 = vmatpush.bf16.msra.mxu0 %v9575_v7  ;;  %9783 = vmatpush.bf16.msra.mxu2 %v9575_v7  ;;  %vm870_vm7 = vcmp.ge.s32.totalorder %v806_v15, 1  ;;  %vm822_vm8 = vcmp.eq.s32.totalorder %v806_v15, 0  ;;  %v1206_v15 = vld [vmem:[%s11257_s1 + $0x38] sm:$0xff] }
  0xab   : > { %1158 = vmatmul.bf16.vlgmr.msra.gmra.mxu0 %v9567_v8  ;;  %1188 = vmatmul.bf16.vlgmr.msra.gmra.mxu2 %v9573_v9  ;;  %v8721_v9 = vsel %vm896_vm6, 1.0, %v10953_v26 }
  0xbb   : > { %1163 = vmatmul.bf16.gmra.mxu0 %v9568_v10  ;;  %1193 = vmatmul.bf16.gmra.mxu2 %v9574_v11  ;;  %v1202_v11 = vld [vmem:[%s11257_s1 + $0x18] sm:$0xff] }
  0xcb   : > { %1168 = vmatmul.bf16.gmra.mxu0 %v9569_v12 }
  0xdb   : > { %1173 = vmatmul.bf16.gmra.mxu0 %v9570_v13 }
  0xeb   : > { %1178 = vmatmul.bf16.gmra.mxu0 %v9571_v14 }
  0xfb   : > { %1183 = vmatmul.bf16.gmra.mxu0 %v9572_v19 }
 0x128   : > { %v1159_v24 = vpop.f32.mrf.mxu0 }
 0x129   : > { %v1160_v28 = vadd.f32 %v11297_v20, %v1159_v24 }
 0x12b   : > { %v1215_v30 = vadd.f32 %v1199_v25, %v1160_v28  ;;  %v1214_v28 = vld [vmem:[%s11257_s1 + $0x78] sm:$0xff] }
 0x12d   : > { %v1231_v32 = vmul.f32 %v8714_v29, %v1215_v30 }
 0x12e   : > { %v1189_v34 = vpop.f32.mrf.mxu2 }
 0x12f   : > { %v1190_v37 = vadd.f32 %v11297_v20, %v1189_v34  ;;  %v11316_v38 = vadd.f32 %v1251_v31, %v1231_v32  ;;  %v1203_v34 = vld [vmem:[%s11257_s1 + $0x20] sm:$0xff] }
 0x130   : > { %v1161_v41 = vpop.f32.mrf.mxu0 }
 0x131   : > { %14770 = vst [vmem:[#allocation36_spill] sm:$0xff] %v11316_v38  ;;  %v1227_v44 = vadd.f32 %v1211_v35, %v1190_v37  ;;  %v1162_v45 = vadd.f32 %v11297_v20, %v1161_v41  ;;  %v1285_v46 = vmul.f32 %v11311_v33, %v11316_v38  ;;  %v8711_v41 = vsel %vm822_vm8, 1.0, %v10953_v26 }
 0x133   : > { %v1243_v48 = vmul.f32 %v8720_v40, %v1227_v44  ;;  %v1216_v49 = vadd.f32 %v1200_v42, %v1162_v45  ;;  %1301 = vadd.xlane.f32.xlu1 %v1285_v46  ;;  %v8716_v40 = vsel %vm870_vm7, 1.0, %v10953_v26 }
 0x135   : > { %v11332_v51 = vadd.f32 %v11324_v43, %v1216_v49  ;;  %v11334_v52 = vadd.f32 %v1263_v47, %v1243_v48  ;;  %v1255_v47 = vmul.f32 %v11302_v23, %v8711_v41  ;;  %v11391_v49 = vadd.s32 48, %v11290_v16 }
 0x136   : > { %v1191_v54 = vpop.f32.mrf.mxu2 }
 0x137   : > { %14772 = vst [vmem:[#allocation38_spill] sm:$0xff] %v11332_v51  ;;  %v1192_v56 = vadd.f32 %v11297_v20, %v1191_v54  ;;  %v1297_v57 = vmul.f32 %v11311_v33, %v11334_v52  ;;  %v1286_v58 = vmul.f32 %v11311_v33, %v11332_v51  ;;  %v1204_v54 = vld [vmem:[%s11257_s1 + $0x28] sm:$0xff] }
 0x138   : > { %14773 = vst [vmem:[#allocation39_spill] sm:$0xff] %v11334_v52  ;;  %v1164_v59 = vpop.f32.mrf.mxu0 }
 0x139   : > { %v1228_v61 = vadd.f32 %v1212_v55, %v1192_v56  ;;  %v1165_v62 = vadd.f32 %v11297_v20, %v1164_v59  ;;  %1325 = vadd.xlane.f32.xlu0 %v1297_v57  ;;  %14781 = vst [vmem:[#allocation47_spill] sm:$0xff] %v11391_v49 }
 0x13b   : > { %v11350_v1 = vadd.f32 %v11324_v43, %v1228_v61  ;;  %v1217_v2 = vadd.f32 %v1201_v60, %v1165_v62  ;;  %1303 = vadd.xlane.f32.xlu1 %v1286_v58  ;;  %v808_v58 = vand.u32 31, %v11391_v49 }
 0x13d   : > { %14775 = vst [vmem:[#allocation41_spill] sm:$0xff] %v11350_v1  ;;  %v1233_v3 = vmul.f32 %v8715_v0, %v1217_v2  ;;  %v1298_v8 = vmul.f32 %v11311_v33, %v11350_v1  ;;  %vm888_vm9 = vcmp.lt.s32.totalorder %v808_v58, 17 }
 0x13e   : > { %v1194_v4 = vpop.f32.mrf.mxu2  ;;  %v8717_v2 = vsel %vm888_vm9, 1.0, %v10953_v26 }
 0x13f   : > { %v1195_v7 = vadd.f32 %v11297_v20, %v1194_v4  ;;  %v11363_v14 = vadd.f32 %v11324_v43, %v1233_v3 }
 0x140   : > { %v1166_v10 = vpop.f32.mrf.mxu0 }
 0x141   : > { %v1229_v12 = vadd.f32 %v1213_v5, %v1195_v7  ;;  %v1167_v13 = vadd.f32 %v11297_v20, %v1166_v10  ;;  %1327 = vadd.xlane.f32.xlu0 %v1298_v8  ;;  %14777 = vst [vmem:[#allocation43_spill] sm:$0xff] %v11363_v14  ;;  %v1287_v25 = vmul.f32 %v11311_v33, %v11363_v14 }
 0x143   : > { %v1245_v17 = vmul.f32 %v8721_v9, %v1229_v12  ;;  %v1218_v19 = vadd.f32 %v1202_v11, %v1167_v13  ;;  %v11414_v9 = vadd.s32 64, %v11290_v16 }
 0x145   : > { %v1234_v22 = vmul.f32 0.0, %v1218_v19  ;;  %v11367_v24 = vadd.f32 %v11324_v43, %v1245_v17  ;;  %14785 = vst [vmem:[#allocation51_spill] sm:$0xff] %v11414_v9  ;;  %v810_v11 = vand.u32 31, %v11414_v9 }
 0x146   : > { %v1196_v27 = vpop.f32.mrf.mxu2 }
 0x147   : > { %14778 = vst [vmem:[#allocation44_spill] sm:$0xff] %v11367_v24  ;;  %v1197_v29 = vadd.f32 %v11297_v20, %v1196_v27  ;;  %v1299_v30 = vmul.f32 %v11311_v33, %v11367_v24  ;;  %v11376_v31 = vadd.f32 %v11324_v43, %v1234_v22  ;;  %v1207_v22 = vld [vmem:[%s11257_s1 + $0x40] sm:$0xff]  ;;  %vm874_vm10 = vcmp.ge.s32.totalorder %v810_v11, 1 }
 0x148   : > { %v1169_v32 = vpop.f32.mrf.mxu0  ;;  %vm826_vm11 = vcmp.eq.s32.totalorder %v810_v11, 0  ;;  %v1208_v11 = vld [vmem:[%s11257_s1 + $0x48] sm:$0xff] }
 0x149   : > { %14779 = vst [vmem:[#allocation45_spill] sm:$0xff] %v11376_v31  ;;  %v1230_v35 = vadd.f32 %v1214_v28, %v1197_v29  ;;  %v1170_v36 = vadd.f32 %v11297_v20, %v1169_v32  ;;  %1329 = vadd.xlane.f32.xlu2 %v1299_v30  ;;  %1305 = vadd.xlane.f32.xlu0 %v1287_v25 }
 0x14a   : > { %v1288_v37 = vmul.f32 %v11311_v33, %v11376_v31 }
 0x14b   : > { %v1246_v42 = vmul.f32 0.0, %v1230_v35  ;;  %v1219_v44 = vadd.f32 %v1203_v34, %v1170_v36  ;;  %v8718_v34 = vsel %vm874_vm10, 1.0, %v10953_v26  ;;  %v8712_v35 = vsel %vm826_vm11, 1.0, %v10953_v26 }
 0x14c   : > { %1307 = vadd.xlane.f32.xlu1 %v1288_v37 }
 0x14d   : > { %v1235_v45 = vmul.f32 %v8716_v40, %v1219_v44  ;;  %v11385_v46 = vadd.f32 %v11324_v43, %v1246_v42 }
 0x14f   : > { %14780 = vst [vmem:[#allocation46_spill] sm:$0xff] %v11385_v46  ;;  %v1300_v48 = vmul.f32 %v11311_v33, %v11385_v46  ;;  %v11395_v56 = vadd.f32 %v1255_v47, %v1235_v45  ;;  %v1259_v45 = vmul.f32 %v11302_v23, %v8712_v35 }
 0x150   : > { %v1171_v50 = vpop.f32.mrf.mxu0 }
 0x151   : > { %v1172_v55 = vadd.f32 %v11297_v20, %v1171_v50  ;;  %1331 = vadd.xlane.f32.xlu2 %v1300_v48  ;;  %14782 = vst [vmem:[#allocation48_spill] sm:$0xff] %v11395_v56  ;;  %v1289_v60 = vmul.f32 %v11311_v33, %v11395_v56 }
 0x153   : > { %v1220_v57 = vadd.f32 %v1204_v54, %v1172_v55 }
 0x155   : > { %v11399_v59 = vadd.f32 %v11324_v43, %v1220_v57 }
 0x157   : > { %14783 = vst [vmem:[#allocation49_spill] sm:$0xff] %v11399_v59  ;;  %v1290_v61 = vmul.f32 %v11311_v33, %v11399_v59 }
 0x158   : > { %v1174_v62 = vpop.f32.mrf.mxu0 }
 0x159   : > { %v1175_v0 = vadd.f32 %v11297_v20, %v1174_v62  ;;  %1309 = vadd.xlane.f32.xlu2 %v1289_v60  ;;  %1311 = vadd.xlane.f32.xlu0 %v1290_v61 }
 0x15b   : > { %v1221_v3 = vadd.f32 %v1205_v63, %v1175_v0 }
 0x15d   : > { %v1237_v4 = vmul.f32 %v8717_v2, %v1221_v3  ;;  %v11453_v2 = vadd.s32 80, %v11290_v16 }
 0x15f   : > { %v11409_v5 = vadd.f32 %v11324_v43, %v1237_v4  ;;  %14788 = vst [vmem:[#allocation54_spill] sm:$0xff] %v11453_v2 }
 0x160   : > { %v1176_v8 = vpop.f32.mrf.mxu0 }
 0x161   : > { %14784 = vst [vmem:[#allocation50_spill] sm:$0xff] %v11409_v5  ;;  %v1291_v7 = vmul.f32 %v11311_v33, %v11409_v5  ;;  %v1177_v12 = vadd.f32 %v11297_v20, %v1176_v8 }
 0x163   : > { %1313 = vadd.xlane.f32.xlu0 %v1291_v7  ;;  %v1222_v27 = vadd.f32 %v1206_v15, %v1177_v12  ;;  %v812_v15 = vand.u32 31, %v11453_v2 }
 0x165   : > { %v1238_v40 = vmul.f32 0.0, %v1222_v27  ;;  %vm892_vm12 = vcmp.lt.s32.totalorder %v812_v15, 17 }
 0x167   : > { %v11437_v55 = vadd.f32 %v11324_v43, %v1238_v40 }
 0x168   : > { %v1179_v13 = vpop.f32.mrf.mxu0 }
 0x169   : > { %v1180_v17 = vadd.f32 %v11297_v20, %v1179_v13  ;;  %14786 = vst [vmem:[#allocation52_spill] sm:$0xff] %v11437_v55  ;;  %v1292_v23 = vmul.f32 %v11311_v33, %v11437_v55 }
 0x16b   : > { %v1223_v32 = vadd.f32 %v1207_v22, %v1180_v17 }
 0x16d   : > { %v1239_v41 = vmul.f32 %v8718_v34, %v1223_v32 }
 0x16f   : > { %v11440_v60 = vadd.f32 %v1259_v45, %v1239_v41 }
 0x170   : > { %v1181_v48 = vpop.f32.mrf.mxu0 }
 0x171   : > { %14787 = vst [vmem:[#allocation53_spill] sm:$0xff] %v11440_v60  ;;  %v1293_v0 = vmul.f32 %v11311_v33, %v11440_v60  ;;  %v1182_v7 = vadd.f32 %v11297_v20, %v1181_v48 }
 0x173   : > { %v1224_v27 = vadd.f32 %v1208_v11, %v1182_v7 }
 0x175   : > { %v11479_v45 = vadd.f32 %v11324_v43, %v1224_v27 }
 0x177   : > { %14789 = vst [vmem:[#allocation55_spill] sm:$0xff] %v11479_v45 }
 0x1a6   : > { %v1302_v10 = vpop.xlane.xlu1 %1301 }
 0x1a7   : > { %v1333_v57 = vmul.f32 0.015625, %v1302_v10  ;;  %v1184_v10 = vpop.f32.mrf.mxu0 }
 0x1a8   : > { %v1185_v22 = vadd.f32 %v11297_v20, %v1184_v10 }
 0x1a9   : > { %v1349_v62 = vsub.f32 %v11316_v38, %v1333_v57 }
 0x1ab   : > { %v11460_v17 = vmul.f32 %v11311_v33, %v1349_v62  ;;  %v1294_v62 = vmul.f32 %v11311_v33, %v11479_v45 }
 0x1ac   : > { %v1326_v19 = vpop.xlane.xlu0 %1325 }
 0x1ad   : > { %v1345_v25 = vmul.f32 0.015625, %v1326_v19 }
 0x1ae   : > { %v1304_v28 = vpop.xlane.xlu1 %1303 }
 0x1af   : > { %v1361_v29 = vsub.f32 %v11334_v52, %v1345_v25  ;;  %v1334_v30 = vmul.f32 0.015625, %v1304_v28  ;;  %v1209_v28 = vld [vmem:[%s11257_s1 + $0x50] sm:$0xff]  ;;  %v8917_v52 = vld [vmem:[#allocation13 + $0xf8] sm:$0xf] }
 0x1b1   : > { %v1350_v36 = vsub.f32 %v11332_v51, %v1334_v30  ;;  %v11426_v37 = vmul.f32 %v11311_v33, %v1361_v29  ;;  %v1381_v30 = vmul.f32 %v11460_v17, %v11460_v17 }
 0x1b3   : > { %v1393_v42 = vmul.f32 %v11426_v37, %v11426_v37  ;;  %v11431_v44 = vmul.f32 %v11311_v33, %v1350_v36  ;;  %v1225_v36 = vadd.f32 %v1209_v28, %v1185_v22 }
 0x1b4   : > { %v1328_v47 = vpop.xlane.xlu0 %1327 }
 0x1b5   : > { %v1346_v50 = vmul.f32 0.015625, %v1328_v47  ;;  %1421 = vadd.xlane.f32.xlu1 %v1393_v42  ;;  %v1382_v54 = vmul.f32 %v11431_v44, %v11431_v44  ;;  %v8719_v42 = vsel %vm892_vm12, 1.0, %v10953_v26 }
 0x1b7   : > { %v1362_v58 = vsub.f32 %v11350_v1, %v1346_v50  ;;  %1399 = vadd.xlane.f32.xlu0 %v1382_v54  ;;  %v1186_v50 = vpop.f32.mrf.mxu0  ;;  %v1241_v54 = vmul.f32 %v8719_v42, %v1225_v36 }
 0x1b9   : > { %v11443_v61 = vmul.f32 %v11311_v33, %v1362_v58  ;;  %v11493_v7 = vadd.f32 %v11324_v43, %v1241_v54  ;;  %v9622_v54 = vld [vmem:[#allocation13 + $0x134] sm:$0xf0] }
 0x1bb   : > { %v1394_v63 = vmul.f32 %v11443_v61, %v11443_v61  ;;  %14790 = vst [vmem:[#allocation56_spill] sm:$0xff] %v11493_v7 }
 0x1bc   : > { %v1330_v3 = vpop.xlane.xlu2 %1329  ;;  %v1306_v34 = vpop.xlane.xlu0 %1305 }
 0x1bd   : > { %v1347_v4 = vmul.f32 0.015625, %v1330_v3  ;;  %1423 = vadd.xlane.f32.xlu2 %v1394_v63  ;;  %1315 = vadd.xlane.f32.xlu1 %v1292_v23  ;;  %v1335_v47 = vmul.f32 0.015625, %v1306_v34  ;;  %v1187_v23 = vadd.f32 %v11297_v20, %v1186_v50  ;;  %v1210_v63 = vld [vmem:[%s11257_s1 + $0x58] sm:$0xff]  ;;  %v8933_v50 = vld [vmem:[#allocation13 + $0x120] sm:$0xf]  ;;  %s8494_s1 = scalar_lea.hbm %s14936_s4, %s9775_s24 }
 0x1be   : > { %s8497_s21 = sshll.u32 %s8494_s1, 4  ;;  %s8498_s21 = int_to_ptr.hbm [resolvable:$true] %s8497_s21 }
 0x1bf   : > { %v1308_v8 = vpop.xlane.xlu1 %1307  ;;  %v1363_v12 = vsub.f32 %v11367_v24, %v1347_v4  ;;  %1317 = vadd.xlane.f32.xlu0 %v1293_v0  ;;  %v1351_v58 = vsub.f32 %v11363_v14, %v1335_v47  ;;  %v8957_v47 = vld [vmem:[#allocation13 + $0x150] sm:$0xf]  ;;  %s10858_s17 = sshra.s32 %s8498_s21, 4  ;;  %s10859_s17 = int_to_ptr.hbm [resolvable:$true] %s10858_s17 }
 0x1c0   : > { %v1336_v13 = vmul.f32 0.015625, %v1308_v8  ;;  %v1226_v8 = vadd.f32 %v1210_v63, %v1187_v23  ;;  %v8909_v23 = vld [vmem:[#allocation13 + $0xf0] sm:$0xf]  ;;  %s10860_s0 = scalar_lea.hbm %s10859_s17, 128  ;;  %p10865_p7 = scmp.lt.s32.totalorder %s10859_s17, %s14936_s4 }
 0x1c1   : > { %v11465_v25 = vmul.f32 %v11311_v33, %v1363_v12  ;;  %v11497_v20 = vmul.f32 %v11311_v33, %v1351_v58  ;;  %v1295_v12 = vmul.f32 %v11311_v33, %v11493_v7  ;;  %v8934_v58 = vor.u32 %v9622_v54, %v8933_v50  ;;  %v8919_v50 = vld [vmem:[#allocation13 + $0x110] sm:$0xf0]  ;;  %p10861_p1 = scmp.ne.s32.totalorder %s10859_s17, %s10860_s0  ;;  %p10866_p9 = scmp.lt.s32.totalorder %s10864_s12, %s10860_s0 }
 0x1c2   : > { %v1352_v19 = vsub.f32 %v11376_v31, %v1336_v13  ;;  %v1242_v15 = vmul.f32 0.0, %v1226_v8 }
 0x1c3   : > { %v1395_v29 = vmul.f32 %v11465_v25, %v11465_v25  ;;  %v1383_v22 = vmul.f32 %v11497_v20, %v11497_v20  ;;  %p10862_p3 = pnand %p10861_p1, %p11180_p0  ;;  %p10867_p4 = por %p10866_p9, %p10865_p7 }
 0x1c4   : > { %v11473_v32 = vmul.f32 %v11311_v33, %v1352_v19  ;;  %v1332_v35 = vpop.xlane.xlu2 %1331  ;;  %v11513_v34 = vadd.f32 %v11324_v43, %v1242_v15  ;;  %v9628_v43 = vld [vmem:[#allocation13 + $0x164] sm:$0xf0]  ;;  %v9619_v15 = vld [vmem:[#allocation13 + $0x124] sm:$0xf] }
 0x1c5   : > { %v1348_v40 = vmul.f32 0.015625, %v1332_v35  ;;  %1425 = vadd.xlane.f32.xlu1 %v1395_v29  ;;  %1397 = vadd.xlane.f32.xlu2 %v1381_v30  ;;  %p10863_p13 = pneg %p10862_p3 }
 0x1c6   : > { %v1384_v41 = vmul.f32 %v11473_v32, %v11473_v32  ;;  %14791 = vst [vmem:[#allocation57_spill] sm:$0xff] %v11513_v34 }
 0x1c7   : > { %v1364_v48 = vsub.f32 %v11385_v46, %v1348_v40  ;;  %v1296_v40 = vmul.f32 %v11311_v33, %v11513_v34  ;;  %p10868_p8 = pnand %p10867_p4, %p10863_p13 }
 0x1c8   : > { %1403 = vadd.xlane.f32.xlu0 %v1384_v41 }
 0x1c9   : > { %v11483_v57 = vmul.f32 %v11311_v33, %v1364_v48  ;;  %v8958_v48 = vor.u32 %v9628_v43, %v8957_v47  ;;  %v8911_v43 = vld [vmem:[#allocation13 + $0x108] sm:$0xf0] }
 0x1cb   : > { %v1396_v26 = vmul.f32 %v11483_v57, %v11483_v57  ;;  %9784 = vmatpush.bf16.msra.mxu3 %v8958_v48  ;;  %1971 = vmatpush.bf16.msra.mxu1 %v8958_v48  ;;  %v9614_v48 = vld [vmem:[#allocation13 + $0xfc] sm:$0xf] }
 0x1cc   : > { %v1310_v0 = vpop.xlane.xlu2 %1309  ;;  %v1312_v3 = vpop.xlane.xlu0 %1311 }
 0x1cd   : > { %v1337_v4 = vmul.f32 0.015625, %v1310_v0  ;;  %1319 = vadd.xlane.f32.xlu1 %v1294_v62  ;;  %1427 = vadd.xlane.f32.xlu2 %v1396_v26  ;;  %v1338_v11 = vmul.f32 0.015625, %v1312_v3  ;;  %v9616_v62 = vld [vmem:[#allocation13 + $0x104] sm:$0xf0]  ;;  %v9625_v26 = vld [vmem:[#allocation13 + $0x154] sm:$0xf] }
 0x1ce   : > { %v8910_v63 = vor.u32 %v9616_v62, %v8909_v23  ;;  %v8959_v0 = vld [vmem:[#allocation13 + $0x168] sm:$0xf0]  ;;  %v9626_v3 = vld [vmem:[#allocation13 + $0x15c] sm:$0xf]  ;;  %v8837_v23 = vld [vmem:[#allocation13 + $0x60] sm:$0xf] }
 0x1cf   : > { %v1353_v10 = vsub.f32 %v11395_v56, %v1337_v4  ;;  %v1354_v19 = vsub.f32 %v11399_v59, %v1338_v11  ;;  %9785 = vmatpush.bf16.msra.mxu3 %v8934_v58  ;;  %1972 = vmatpush.bf16.msra.mxu1 %v8934_v58  ;;  %v8967_v4 = vld [vmem:[#allocation13 + $0x170] sm:$0xf0]  ;;  %v8962_v8 = vor.u32 %v9625_v26, %v8959_v0  ;;  %v8885_v11 = vld [vmem:[#allocation13 + $0xc0] sm:$0xf]  ;;  %v9598_v62 = vld [vmem:[#allocation13 + $0x74] sm:$0xf0] }
 0x1d0   : > { %v11531_v58 = vor.u32 %v9614_v48, %v8919_v50  ;;  %v9607_v26 = vld [vmem:[#allocation13 + $0xc4] sm:$0xf]  ;;  %v8887_v0 = vld [vmem:[#allocation13 + $0xd8] sm:$0xf0] }
 0x1d1   : > { %v11502_v13 = vmul.f32 %v11311_v33, %v1353_v10  ;;  %v11510_v30 = vmul.f32 %v11311_v33, %v1354_v19  ;;  %v11525_v10 = vor.u32 %v9626_v3, %v8967_v4  ;;  %2020 = vmatpush.bf16.msrb.mxu2 %v8962_v8  ;;  %v9608_v3 = vld [vmem:[#allocation13 + $0xcc] sm:$0xf]  ;;  %v8895_v4 = vld [vmem:[#allocation13 + $0xe0] sm:$0xf0]  ;;  %v8890_v8 = vor.u32 %v9607_v26, %v8887_v0  ;;  %v8839_v0 = vld [vmem:[#allocation13 + $0x78] sm:$0xf0] }
 0x1d3   : > { %v1385_v27 = vmul.f32 %v11502_v13, %v11502_v13  ;;  %v1386_v36 = vmul.f32 %v11510_v30, %v11510_v30  ;;  %9786 = vmatpush.bf16.msra.mxu3 %v8910_v63  ;;  %1973 = vmatpush.bf16.msra.mxu1 %v8910_v63  ;;  %v8838_v63 = vor.u32 %v9598_v62, %v8837_v23  ;;  %v8789_v23 = vld [vmem:[#allocation13] sm:$0xf]  ;;  %v9586_v62 = vld [vmem:[#allocation13 + $0x14] sm:$0xf0] }
 0x1d4   : > { %2118 = vmatpush.bf16.msrb.mxu0 %v11525_v10  ;;  %v8790_v26 = vor.u32 %v9586_v62, %v8789_v23 }
 0x1d5   : > { %1321 = vadd.xlane.f32.xlu1 %v1295_v12  ;;  %1401 = vadd.xlane.f32.xlu2 %v1383_v22  ;;  %v9610_v12 = vld [vmem:[#allocation13 + $0xd4] sm:$0xf0]  ;;  %v8935_v22 = vld [vmem:[#allocation13 + $0x138] sm:$0xf0] }
 0x1d6   : > { %1405 = vadd.xlane.f32.xlu0 %v1385_v27  ;;  %v1314_v28 = vpop.xlane.xlu0 %1313  ;;  %v8886_v19 = vor.u32 %v9610_v12, %v8885_v11  ;;  %v9620_v27 = vld [vmem:[#allocation13 + $0x12c] sm:$0xf]  ;;  %v11534_v11 = vor.u32 %v9608_v3, %v8895_v4  ;;  %v8813_v12 = vld [vmem:[#allocation13 + $0x30] sm:$0xf] }
 0x1d7   : > { %v1339_v29 = vmul.f32 0.015625, %v1314_v28  ;;  %v8943_v28 = vld [vmem:[#allocation13 + $0x140] sm:$0xf0]  ;;  %v9596_v3 = vld [vmem:[#allocation13 + $0x6c] sm:$0xf] }
 0x1d8   : > { %9787 = vmatpush.bf16.msra.mxu3 %v8886_v19  ;;  %1974 = vmatpush.bf16.msra.mxu1 %v8886_v19  ;;  %v9601_v19 = vld [vmem:[#allocation13 + $0x94] sm:$0xf] }
 0x1d9   : > { %v1355_v35 = vsub.f32 %v11409_v5, %v1339_v29  ;;  %v8938_v29 = vor.u32 %v9619_v15, %v8935_v22  ;;  %v9592_v15 = vld [vmem:[#allocation13 + $0x44] sm:$0xf0] }
 0x1db   : > { %v11521_v41 = vmul.f32 %v11311_v33, %v1355_v35  ;;  %v11528_v35 = vor.u32 %v9620_v27, %v8943_v28  ;;  %2021 = vmatpush.bf16.msrb.mxu2 %v8938_v29  ;;  %v8814_v27 = vor.u32 %v9592_v15, %v8813_v12  ;;  %v8863_v28 = vld [vmem:[#allocation13 + $0xa8] sm:$0xf0]  ;;  %v9602_v29 = vld [vmem:[#allocation13 + $0x9c] sm:$0xf] }
 0x1dd   : > { %1407 = vadd.xlane.f32.xlu1 %v1386_v36  ;;  %1323 = vadd.xlane.f32.xlu2 %v1296_v40  ;;  %v1387_v42 = vmul.f32 %v11521_v41, %v11521_v41  ;;  %v8861_v36 = vld [vmem:[#allocation13 + $0x90] sm:$0xf]  ;;  %v9604_v40 = vld [vmem:[#allocation13 + $0xa4] sm:$0xf0] }
 0x1de   : > { %2119 = vmatpush.bf16.msrb.mxu0 %v11528_v35  ;;  %v8862_v47 = vor.u32 %v9604_v40, %v8861_v36  ;;  %v8871_v36 = vld [vmem:[#allocation13 + $0xb0] sm:$0xf0] }
 0x1e0   : > { %9788 = vmatpush.bf16.msra.mxu3 %v8862_v47  ;;  %1975 = vmatpush.bf16.msra.mxu1 %v8862_v47  ;;  %v11537_v47 = vor.u32 %v9602_v29, %v8871_v36  ;;  %v8815_v29 = vld [vmem:[#allocation13 + $0x48] sm:$0xf0] }
 0x1e2   : > { %2120 = vmatpush.bf16.msrb.mxu0 %v11531_v58 }
 0x1e4   : > { %9789 = vmatpush.bf16.msra.mxu3 %v8838_v63  ;;  %1976 = vmatpush.bf16.msra.mxu1 %v8838_v63  ;;  %v9595_v63 = vld [vmem:[#allocation13 + $0x64] sm:$0xf] }
 0x1e5   : > { %1409 = vadd.xlane.f32.xlu2 %v1387_v42  ;;  %v9613_v42 = vld [vmem:[#allocation13 + $0xf4] sm:$0xf]  ;;  %v8842_v4 = vor.u32 %v9595_v63, %v8839_v0 }
 0x1e6   : > { %v8914_v54 = vor.u32 %v9613_v42, %v8911_v43  ;;  %2121 = vmatpush.bf16.msrb.mxu0 %v11534_v11  ;;  %v8866_v42 = vor.u32 %v9601_v19, %v8863_v28  ;;  %v9589_v28 = vld [vmem:[#allocation13 + $0x34] sm:$0xf] }
 0x1e8   : > { %2022 = vmatpush.bf16.msrb.mxu2 %v8914_v54  ;;  %9790 = vmatpush.bf16.msra.mxu3 %v8814_v27 }
 0x1e9   : > { %1977 = vmatpush.bf16.msra.mxu1 %v8814_v27 }
 0x1ea   : > { %2122 = vmatpush.bf16.msrb.mxu0 %v11537_v47 }
 0x1ec   : > { %2023 = vmatpush.bf16.msrb.mxu2 %v8890_v8  ;;  %v8847_v8 = vld [vmem:[#allocation13 + $0x80] sm:$0xf0]  ;;  %9791 = vmatpush.bf16.msra.mxu3 %v8790_v26 }
 0x1ed   : > { %v11546_v19 = vor.u32 %v9596_v3, %v8847_v8  ;;  %1978 = vmatpush.bf16.msra.mxu1 %v8790_v26  ;;  %v8823_v3 = vld [vmem:[#allocation13 + $0x50] sm:$0xf0] }
 0x1ef   : > { %2123 = vmatpush.bf16.msrb.mxu0 %v11546_v19 }
 0x1f0   : > { %2024 = vmatpush.bf16.msrb.mxu2 %v8866_v42  ;;  %v8965_v42 = vld [vmem:[#allocation13 + $0x158] sm:$0xf] }
 0x1f1   : > { %9792 = vmatpush.bf16.msrb.mxu1 %v11525_v10 }
 0x1f4   : > { %2025 = vmatpush.bf16.msrb.mxu2 %v8842_v4 }
 0x1f5   : > { %9793 = vmatpush.bf16.msrb.mxu1 %v11528_v35 }
 0x1f9   : > { %9794 = vmatpush.bf16.msrb.mxu1 %v11531_v58 }
 0x1fd   : > { %9795 = vmatpush.bf16.msrb.mxu1 %v11534_v11 }
 0x201   : > { %9796 = vmatpush.bf16.msrb.mxu1 %v11537_v47 }
 0x205   : > { %9797 = vmatpush.bf16.msrb.mxu1 %v11546_v19 }
 0x228   : > { %v1422_v22 = vpop.xlane.xlu1 %1421 }
 0x229   : > { %v1441_v40 = vmul.f32 0.015625, %v1422_v22 }
 0x22a   : > { %v1400_v43 = vpop.xlane.xlu0 %1399 }
 0x22b   : > { %v11539_v48 = vadd.f32 1e-05, %v1441_v40  ;;  %v1430_v50 = vmul.f32 0.015625, %v1400_v43  ;;  %v8818_v40 = vor.u32 %v9589_v28, %v8815_v29  ;;  %v9629_v43 = vld [vmem:[#allocation13 + $0x16c] sm:$0xf0] }
 0x22c   : > { %v8966_v0 = vor.u32 %v9629_v43, %v8965_v42  ;;  %v8941_v42 = vld [vmem:[#allocation13 + $0x128] sm:$0xf]  ;;  %v9623_v43 = vld [vmem:[#allocation13 + $0x13c] sm:$0xf0] }
 0x22d   : > { %9970 = vrsqrt.f32 %v11539_v48  ;;  %v11543_v54 = vadd.f32 1e-05, %v1430_v50  ;;  %v9590_v50 = vld [vmem:[#allocation13 + $0x3c] sm:$0xf]  ;;  %2026 = vmatpush.bf16.msrb.mxu2 %v8818_v40  ;;  %vm1587_vm14 = vweird.f32 %v11539_v48 }
 0x22e   : > { %v11557_v10 = vor.u32 %v9590_v50, %v8823_v3  ;;  %2069 = vmatpush.bf16.msrb.mxu3 %v8966_v0  ;;  %v9584_v50 = vld [vmem:[#allocation13 + $0xc] sm:$0xf]  ;;  %v8799_v0 = vld [vmem:[#allocation13 + $0x20] sm:$0xf0] }
 0x22f   : > { %9972 = vrsqrt.f32 %v11543_v54  ;;  %v11577_v1 = vor.u32 %v9584_v50, %v8799_v0  ;;  %v9611_v0 = vld [vmem:[#allocation13 + $0xdc] sm:$0xf0]  ;;  %vm1477_vm1 = vweird.f32 %v11543_v54 }
 0x230   : > { %v1424_v12 = vpop.xlane.xlu2 %1423  ;;  %v1316_v15 = vpop.xlane.xlu1 %1315  ;;  %2124 = vmatpush.bf16.msrb.mxu0 %v11557_v10  ;;  %9798 = vmatpush.bf16.msrb.mxu1 %v11557_v10 }
 0x231   : > { %v1442_v22 = vmul.f32 0.015625, %v1424_v12  ;;  %v1340_v27 = vmul.f32 0.015625, %v1316_v15 }
 0x232   : > { %v1318_v36 = vpop.xlane.xlu0 %1317 }
 0x233   : > { %v11550_v23 = vpop.eup %9970  ;;  %v11552_v62 = vadd.f32 1e-05, %v1442_v22  ;;  %v1356_v26 = vsub.f32 %v11437_v55, %v1340_v27  ;;  %v1341_v63 = vmul.f32 0.015625, %v1318_v36  ;;  %v9583_v22 = vld [vmem:[#allocation13 + $0x4] sm:$0xf] }
 0x234   : > { %v1582_v4 = vmul.f32 %v11550_v23, %v11539_v48  ;;  %v8791_v27 = vld [vmem:[#allocation13 + $0x18] sm:$0xf0]  ;;  %vm1588_vm13 = vweird.f32 %v11550_v23  ;;  %2125 = vmatpush.bf16.msrb.mxu0 %v11577_v1  ;;  %9799 = vmatpush.bf16.msrb.mxu1 %v11577_v1 }
 0x235   : > { %v11559_v8 = vpop.eup %9972  ;;  %9974 = vrsqrt.f32 %v11552_v62  ;;  %v1357_v12 = vsub.f32 %v11440_v60, %v1341_v63  ;;  %v11564_v15 = vmul.f32 %v11311_v33, %v1356_v26  ;;  %v8794_v36 = vor.u32 %v9583_v22, %v8791_v27  ;;  %v9617_v60 = vld [vmem:[#allocation13 + $0x10c] sm:$0xf0]  ;;  %vm1589_vm15 = vmor %vm1587_vm14, %vm1588_vm13 }
 0x236   : > { %v1583_v28 = vmul.f32 %v11550_v23, %v1582_v4  ;;  %v1472_v29 = vmul.f32 %v11559_v8, %v11543_v54  ;;  %v8942_v63 = vor.u32 %v9623_v43, %v8941_v42  ;;  %vm1478_vm0 = vweird.f32 %v11559_v8 }
 0x237   : > { %v1388_v26 = vmul.f32 %v11564_v15, %v11564_v15  ;;  %v11574_v40 = vmul.f32 %v11311_v33, %v1357_v12  ;;  %2027 = vmatpush.bf16.msrb.mxu2 %v8794_v36  ;;  %vm11616_vm3 = vmor %vm1477_vm1, %vm1478_vm0  ;;  %vm1597_vm4 = vweird.f32 %v11552_v62 }
 0x238   : > { %v1584_v3 = vmul.f32 0.5, %v1583_v28  ;;  %v1473_v4 = vmul.f32 %v11559_v8, %v1472_v29  ;;  %v1398_v46 = vpop.xlane.xlu2 %1397  ;;  %v1426_v24 = vpop.xlane.xlu1 %1425  ;;  %2070 = vmatpush.bf16.msrb.mxu3 %v8942_v63  ;;  %v8918_v29 = vor.u32 %v9617_v60, %v8917_v52  ;;  %v8893_v60 = vld [vmem:[#allocation13 + $0xc8] sm:$0xf] }
 0x239   : > { %v1429_v22 = vmul.f32 0.015625, %v1398_v46  ;;  %v1443_v27 = vmul.f32 0.015625, %v1426_v24  ;;  %1411 = vadd.xlane.f32.xlu0 %v1388_v26  ;;  %v1389_v35 = vmul.f32 %v11574_v40, %v11574_v40  ;;  %v8894_v48 = vor.u32 %v9611_v0, %v8893_v60  ;;  %v11627_v0 = vld [vmem:[#allocation11] ss:$0 sm:$0xff] }
 0x23a   : > { %v1585_v12 = vsub.f32 1.5, %v1584_v3  ;;  %v1474_v42 = vmul.f32 0.5, %v1473_v4  ;;  %v11607_v4 = vld [vmem:[%s14614_s5] ss:$0 sm:$0xff] }
 0x23b   : > { %v1404_v28 = vpop.xlane.xlu0 %1403  ;;  %v11583_v43 = vpop.eup %9974  ;;  %v11585_v46 = vadd.f32 1e-05, %v1429_v22  ;;  %v11587_v24 = vadd.f32 1e-05, %v1443_v27  ;;  %1413 = vadd.xlane.f32.xlu1 %v1389_v35 }
 0x23c   : > { %v1432_v50 = vmul.f32 0.015625, %v1404_v28  ;;  %v1586_v36 = vmul.f32 %v11550_v23, %v1585_v12  ;;  %v1475_v26 = vsub.f32 1.5, %v1474_v42  ;;  %v1592_v63 = vmul.f32 %v11583_v43, %v11552_v62  ;;  %2071 = vmatpush.bf16.msrb.mxu3 %v8918_v29  ;;  %v8869_v29 = vld [vmem:[#allocation13 + $0x98] sm:$0xf] }
 0x23d   : > { %9976 = vrsqrt.f32 %v11585_v46  ;;  %vm1598_vm2 = vweird.f32 %v11583_v43  ;;  %vm1467_vm6 = vweird.f32 %v11585_v46  ;;  %vm1607_vm10 = vweird.f32 %v11587_v24 }
 0x23e   : > { %v11597_v52 = vadd.f32 1e-05, %v1432_v50  ;;  %v1590_v3 = vsel %vm1589_vm15, %v11550_v23, %v1586_v36  ;;  %v1593_v58 = vmul.f32 %v11583_v43, %v1592_v63  ;;  %9978 = vrsqrt.f32 %v11587_v24  ;;  %v9605_v50 = vld [vmem:[#allocation13 + $0xac] sm:$0xf0]  ;;  %vm1599_vm5 = vmor %vm1597_vm4, %vm1598_vm2 }
 0x23f   : > { %v1633_v22 = vmul.f32 %v1590_v3, %v11426_v37  ;;  %v1476_v27 = vmul.f32 %v11559_v8, %v1475_v26  ;;  %v8870_v36 = vor.u32 %v9605_v50, %v8869_v29 }
 0x240   : > { %9980 = vrsqrt.f32 %v11597_v52  ;;  %v1594_v23 = vmul.f32 0.5, %v1593_v58  ;;  %v1428_v35 = vpop.xlane.xlu2 %1427  ;;  %v1320_v12 = vpop.xlane.xlu1 %1319  ;;  %2072 = vmatpush.bf16.msrb.mxu3 %v8894_v48  ;;  %vm1497_vm0 = vweird.f32 %v11597_v52 }
 0x241   : > { %v1444_v42 = vmul.f32 0.015625, %v1428_v35  ;;  %v1342_v28 = vmul.f32 0.015625, %v1320_v12  ;;  %v1652_v3 = vmul.f32 %v11607_v4, %v1633_v22  ;;  %v1480_v58 = vsel %vm11616_vm3, %v11559_v8, %v1476_v27  ;;  %v8845_v22 = vld [vmem:[#allocation13 + $0x68] sm:$0xf]  ;;  %v9599_v35 = vld [vmem:[#allocation13 + $0x7c] sm:$0xf0] }
 0x242   : > { %v1595_v11 = vsub.f32 1.5, %v1594_v23 }
 0x243   : > { %v11614_v63 = vpop.eup %9976  ;;  %v11621_v26 = vadd.f32 1e-05, %v1444_v42  ;;  %v1358_v60 = vsub.f32 %v11479_v45, %v1342_v28  ;;  %v1622_v42 = vmul.f32 %v1480_v58, %v11431_v44  ;;  %v8846_v45 = vor.u32 %v9599_v35, %v8845_v22 }
 0x244   : > { %v11625_v54 = vpop.eup %9978  ;;  %v1596_v48 = vmul.f32 %v11583_v43, %v1595_v11  ;;  %v1462_v62 = vmul.f32 %v11614_v63, %v11585_v46  ;;  %2073 = vmatpush.bf16.msrb.mxu3 %v8870_v36  ;;  %vm1468_vm7 = vweird.f32 %v11614_v63 }
 0x245   : > { %v1602_v47 = vmul.f32 %v11625_v54, %v11587_v24  ;;  %9982 = vrsqrt.f32 %v11621_v26  ;;  %v11652_v50 = vmul.f32 %v11311_v33, %v1358_v60  ;;  %vm1608_vm8 = vweird.f32 %v11625_v54  ;;  %vm1469_vm9 = vmor %vm1467_vm6, %vm1468_vm7 }
 0x246   : > { %v11636_v23 = vpop.eup %9980  ;;  %v1600_v12 = vsel %vm1599_vm5, %v11583_v43, %v1596_v48  ;;  %v1463_v8 = vmul.f32 %v11614_v63, %v1462_v62  ;;  %v1671_v43 = vadd.f32 %v11627_v0, %v1652_v3  ;;  %vm11689_vm11 = vmor %vm1607_vm10, %vm1608_vm8  ;;  %vm1617_vm14 = vweird.f32 %v11621_v26 }
 0x247   : > { %v1492_v27 = vmul.f32 %v11636_v23, %v11597_v52  ;;  %v1634_v28 = vmul.f32 %v1600_v12, %v11443_v61  ;;  %v1603_v29 = vmul.f32 %v11625_v54, %v1602_v47  ;;  %v1390_v19 = vmul.f32 %v11652_v50, %v11652_v50 }
 0x248   : > { %v1464_v11 = vmul.f32 0.5, %v1463_v8  ;;  %v1402_v48 = vpop.xlane.xlu2 %1401  ;;  %v1322_v62 = vpop.xlane.xlu1 %1321  ;;  %2074 = vmatpush.bf16.msrb.mxu3 %v8846_v45  ;;  %v8821_v45 = vld [vmem:[#allocation13 + $0x38] sm:$0xf]  ;;  %vm1498_vm12 = vweird.f32 %v11636_v23 }
 0x249   : > { %v1493_v37 = vmul.f32 %v11636_v23, %v1492_v27  ;;  %v1653_v36 = vmul.f32 %v11607_v4, %v1634_v28  ;;  %v1604_v44 = vmul.f32 0.5, %v1603_v29  ;;  %v1431_v58 = vmul.f32 0.015625, %v1402_v48  ;;  %v1406_v61 = vpop.xlane.xlu0 %1405  ;;  %1415 = vadd.xlane.f32.xlu2 %v1390_v19  ;;  %v9593_v48 = vld [vmem:[#allocation13 + $0x4c] sm:$0xf0]  ;;  %v9587_v19 = vld [vmem:[#allocation13 + $0x1c] sm:$0xf0]  ;;  %vm11725_vm1 = vmor %vm1497_vm0, %vm1498_vm12 }
 0x24a   : > { %v1343_v12 = vmul.f32 0.015625, %v1322_v62  ;;  %v1465_v47 = vsub.f32 1.5, %v1464_v11  ;;  %v1433_v60 = vmul.f32 0.015625, %v1406_v61  ;;  %v1641_v62 = vmul.f32 %v11607_v4, %v1622_v42 }
 0x24b   : > { %v11661_v3 = vpop.eup %9982  ;;  %v1672_v8 = vadd.f32 %v11627_v0, %v1653_v36  ;;  %v1605_v27 = vsub.f32 1.5, %v1604_v44  ;;  %v11664_v22 = vadd.f32 1e-05, %v1431_v58  ;;  %v1494_v29 = vmul.f32 0.5, %v1493_v37 }
 0x24c   : > { %v1359_v35 = vsub.f32 %v11493_v7, %v1343_v12  ;;  %v1466_v28 = vmul.f32 %v11614_v63, %v1465_v47  ;;  %v1612_v11 = vmul.f32 %v11661_v3, %v11621_v26  ;;  %v11684_v58 = vadd.f32 1e-05, %v1433_v60  ;;  %v8797_v60 = vld [vmem:[#allocation13 + $0x8] sm:$0xf] }
 0x24d   : > { %v11673_v36 = vpack.c.bf16 %v1672_v8, %v1671_v43  ;;  %v1606_v10 = vmul.f32 %v11625_v54, %v1605_v27  ;;  %9984 = vrsqrt.f32 %v11664_v22  ;;  %v1495_v61 = vsub.f32 1.5, %v1494_v29 }
 0x24e   : > { %v1470_v37 = vsel %vm1469_vm9, %v11614_v63, %v1466_v28  ;;  %v1613_v44 = vmul.f32 %v11661_v3, %v1612_v11  ;;  %v11695_v46 = vmul.f32 %v11311_v33, %v1359_v35  ;;  %v8822_v63 = vor.u32 %v9593_v48, %v8821_v45 }
 0x24f   : > { %v1621_v42 = vmul.f32 %v1470_v37, %v11460_v17  ;;  %2009 = vmatmul.bf16.vlgmr.msra.gmra.mxu3 %v11673_v36  ;;  %v1610_v24 = vsel %vm11689_vm11, %v11625_v54, %v1606_v10  ;;  %9986 = vrsqrt.f32 %v11684_v58  ;;  %v1660_v8 = vadd.f32 %v11627_v0, %v1641_v62 }
 0x250   : > { %v1614_v12 = vmul.f32 0.5, %v1613_v44  ;;  %v1324_v17 = vpop.xlane.xlu2 %1323  ;;  %v1408_v47 = vpop.xlane.xlu1 %1407  ;;  %2075 = vmatpush.bf16.msrb.mxu3 %v8822_v63  ;;  %vm1618_vm13 = vweird.f32 %v11661_v3  ;;  %v1391_v29 = vmul.f32 %v11695_v46, %v11695_v46  ;;  %v1635_v1 = vmul.f32 %v1610_v24, %v11465_v25 }
 0x251   : > { %v1640_v27 = vmul.f32 %v11607_v4, %v1621_v42  ;;  %v1344_v35 = vmul.f32 0.015625, %v1324_v17  ;;  %v1434_v54 = vmul.f32 0.015625, %v1408_v47  ;;  %v8798_v62 = vor.u32 %v9587_v19, %v8797_v60  ;;  %vm1619_vm15 = vmor %vm1617_vm14, %vm1618_vm13 }
 0x252   : > { %v1615_v28 = vsub.f32 1.5, %v1614_v12  ;;  %v1496_v10 = vmul.f32 %v11636_v23, %v1495_v61  ;;  %1417 = vadd.xlane.f32.xlu0 %v1391_v29  ;;  %v1654_v12 = vmul.f32 %v11607_v4, %v1635_v1  ;;  %vm1487_vm3 = vweird.f32 %v11664_v22 }
 0x253   : > { %v9985_v11 = vpop.eup %9984  ;;  %v1659_v45 = vadd.f32 %v11627_v0, %v1640_v27  ;;  %v1360_v48 = vsub.f32 %v11513_v34, %v1344_v35  ;;  %v1450_v43 = vadd.f32 1e-05, %v1434_v54  ;;  %vm1507_vm7 = vweird.f32 %v11684_v58 }
 0x254   : > { %v1616_v37 = vmul.f32 %v11661_v3, %v1615_v28  ;;  %v1482_v44 = vmul.f32 %v9985_v11, %v11664_v22  ;;  %2076 = vmatpush.bf16.msrb.mxu3 %v8798_v62  ;;  %v1500_v52 = vsel %vm11725_vm1, %v11636_v23, %v1496_v10  ;;  %vm1488_vm2 = vweird.f32 %v9985_v11 }
 0x255   : > { %v11715_v42 = vpack.c.bf16 %v1660_v8, %v1659_v45  ;;  %v11718_v63 = vmul.f32 %v11311_v33, %v1360_v48  ;;  %v9987_v25 = vpop.eup %9986  ;;  %9988 = vrsqrt.f32 %v1450_v43  ;;  %v1673_v27 = vadd.f32 %v11627_v0, %v1654_v12  ;;  %vm1489_vm4 = vmor %vm1487_vm3, %vm1488_vm2 }
 0x256   : > { %v1620_v24 = vsel %vm1619_vm15, %v11661_v3, %v1616_v37  ;;  %v1483_v61 = vmul.f32 %v9985_v11, %v1482_v44  ;;  %v1502_v47 = vmul.f32 %v9987_v25, %v11684_v58  ;;  %v1624_v35 = vmul.f32 %v1500_v52, %v11473_v32 }
 0x257   : > { %v1636_v17 = vmul.f32 %v1620_v24, %v11483_v57  ;;  %1979 = vmatmul.bf16.vlgmr.msra.gmra.mxu1 %v11715_v42  ;;  %2028 = vmatmul.bf16.vlgmr.msrb.gmra.mxu2 %v11715_v42  ;;  %v1392_v60 = vmul.f32 %v11718_v63, %v11718_v63  ;;  %vm1508_vm5 = vweird.f32 %v9987_v25  ;;  %vm1517_vm9 = vweird.f32 %v1450_v43 }
 0x258   : > { %v1484_v3 = vmul.f32 0.5, %v1483_v61  ;;  %2126 = vmatmul.bf16.vlgmr.msrb.gmra.mxu0 %v11715_v42  ;;  %v1503_v57 = vmul.f32 %v9987_v25, %v1502_v47  ;;  %v1643_v62 = vmul.f32 %v11607_v4, %v1624_v35  ;;  %vm1509_vm8 = vmor %vm1507_vm7, %vm1508_vm5 }
 0x259   : > { %v1655_v19 = vmul.f32 %v11607_v4, %v1636_v17  ;;  %1419 = vadd.xlane.f32.xlu1 %v1392_v60 }
 0x25a   : > { %v1485_v8 = vsub.f32 1.5, %v1484_v3  ;;  %v1504_v23 = vmul.f32 0.5, %v1503_v57  ;;  %v1662_v22 = vadd.f32 %v11627_v0, %v1643_v62 }
 0x25b   : > { %v1674_v28 = vadd.f32 %v11627_v0, %v1655_v19  ;;  %v9989_v29 = vpop.eup %9988 }
 0x25c   : > { %v1486_v54 = vmul.f32 %v9985_v11, %v1485_v8  ;;  %v1512_v48 = vmul.f32 %v9989_v29, %v1450_v43  ;;  %v1505_v37 = vsub.f32 1.5, %v1504_v23  ;;  %vm1518_vm6 = vweird.f32 %v9989_v29 }
 0x25d   : > { %v11744_v45 = vpack.c.bf16 %v1674_v28, %v1673_v27  ;;  %vm1519_vm10 = vmor %vm1517_vm9, %vm1518_vm6 }
 0x25e   : > { %v1490_v1 = vsel %vm1489_vm4, %v9985_v11, %v1486_v54  ;;  %v1513_v32 = vmul.f32 %v9989_v29, %v1512_v48  ;;  %v1506_v12 = vmul.f32 %v9987_v25, %v1505_v37 }
 0x25f   : > { %v1623_v10 = vmul.f32 %v1490_v1, %v11497_v20  ;;  %2014 = vmatmul.bf16.gmra.mxu3 %v11744_v45 }
 0x260   : > { %v1514_v24 = vmul.f32 0.5, %v1513_v32  ;;  %v1510_v17 = vsel %vm1509_vm8, %v9987_v25, %v1506_v12 }
 0x261   : > { %v1642_v44 = vmul.f32 %v11607_v4, %v1623_v10  ;;  %v1625_v3 = vmul.f32 %v1510_v17, %v11502_v13  ;;  %v1410_v13 = vpop.xlane.xlu2 %1409 }
 0x262   : > { %v1515_v26 = vsub.f32 1.5, %v1514_v24 }
 0x263   : > { %v1661_v61 = vadd.f32 %v11627_v0, %v1642_v44  ;;  %v1644_v58 = vmul.f32 %v11607_v4, %v1625_v3 }
 0x264   : > { %v1516_v20 = vmul.f32 %v9989_v29, %v1515_v26 }
 0x265   : > { %v11752_v11 = vpack.c.bf16 %v1662_v22, %v1661_v61  ;;  %v1663_v19 = vadd.f32 %v11627_v0, %v1644_v58 }
 0x266   : > { %v1520_v47 = vsel %vm1519_vm10, %v9989_v29, %v1516_v20 }
 0x267   : > { %1984 = vmatmul.bf16.gmra.mxu1 %v11752_v11  ;;  %2033 = vmatmul.bf16.gmra.mxu2 %v11752_v11  ;;  %v1626_v52 = vmul.f32 %v1520_v47, %v11510_v30  ;;  %v1435_v30 = vmul.f32 0.015625, %v1410_v13 }
 0x268   : > { %2131 = vmatmul.bf16.gmra.mxu0 %v11752_v11 }
 0x269   : > { %v1645_v60 = vmul.f32 %v11607_v4, %v1626_v52  ;;  %v1451_v25 = vadd.f32 1e-05, %v1435_v30 }
 0x26b   : > { %v1664_v43 = vadd.f32 %v11627_v0, %v1645_v60  ;;  %9990 = vrsqrt.f32 %v1451_v25  ;;  %vm1527_vm12 = vweird.f32 %v1451_v25 }
 0x26d   : > { %v11765_v57 = vpack.c.bf16 %v1664_v43, %v1663_v19 }
 0x26f   : > { %2077 = vmatmul.bf16.vlgmr.msrb.gmra.mxu3 %v11715_v42 }
 0x271   : > { %v9991_v8 = vpop.eup %9990 }
 0x272   : > { %v1522_v27 = vmul.f32 %v9991_v8, %v1451_v25  ;;  %vm1528_vm11 = vweird.f32 %v9991_v8 }
 0x273   : > { %vm1529_vm13 = vmor %vm1527_vm12, %vm1528_vm11 }
 0x274   : > { %v1523_v35 = vmul.f32 %v9991_v8, %v1522_v27 }
 0x276   : > { %v1524_v48 = vmul.f32 0.5, %v1523_v35 }
 0x277   : > { %1989 = vmatmul.bf16.gmra.mxu1 %v11765_v57  ;;  %2038 = vmatmul.bf16.gmra.mxu2 %v11765_v57 }
 0x278   : > { %2136 = vmatmul.bf16.gmra.mxu0 %v11765_v57  ;;  %v1525_v10 = vsub.f32 1.5, %v1524_v48 }
 0x27a   : > { %v1526_v32 = vmul.f32 %v9991_v8, %v1525_v10 }
 0x27c   : > { %v1530_v12 = vsel %vm1529_vm13, %v9991_v8, %v1526_v32 }
 0x27d   : > { %v1627_v17 = vmul.f32 %v1530_v12, %v11521_v41 }
 0x27f   : > { %2082 = vmatmul.bf16.gmra.mxu3 %v11752_v11  ;;  %v1646_v19 = vmul.f32 %v11607_v4, %v1627_v17 }
 0x281   : > { %v1665_v8 = vadd.f32 %v11627_v0, %v1646_v19 }
 0x28f   : > { %2087 = vmatmul.bf16.gmra.mxu3 %v11765_v57 }
 0x2ac   : > { %v1412_v28 = vpop.xlane.xlu0 %1411 }
 0x2ad   : > { %v1436_v54 = vmul.f32 0.015625, %v1412_v28 }
 0x2ae   : > { %v1414_v23 = vpop.xlane.xlu1 %1413 }
 0x2af   : > { %v1452_v29 = vadd.f32 1e-05, %v1436_v54  ;;  %v1437_v1 = vmul.f32 0.015625, %v1414_v23 }
 0x2b1   : > { %9992 = vrsqrt.f32 %v1452_v29  ;;  %v1453_v62 = vadd.f32 1e-05, %v1437_v1  ;;  %vm1537_vm15 = vweird.f32 %v1452_v29 }
 0x2b3   : > { %9994 = vrsqrt.f32 %v1453_v62  ;;  %vm1547_vm2 = vweird.f32 %v1453_v62 }
 0x2b7   : > { %v9993_v37 = vpop.eup %9992 }
 0x2b8   : > { %v1532_v44 = vmul.f32 %v9993_v37, %v1452_v29  ;;  %vm1538_vm14 = vweird.f32 %v9993_v37 }
 0x2b9   : > { %v9995_v24 = vpop.eup %9994  ;;  %vm1539_vm0 = vmor %vm1537_vm15, %vm1538_vm14 }
 0x2ba   : > { %v1533_v22 = vmul.f32 %v9993_v37, %v1532_v44  ;;  %v1542_v61 = vmul.f32 %v9995_v24, %v1453_v62  ;;  %vm1548_vm1 = vweird.f32 %v9995_v24 }
 0x2bb   : > { %vm1549_vm3 = vmor %vm1547_vm2, %vm1548_vm1 }
 0x2bc   : > { %v1534_v26 = vmul.f32 0.5, %v1533_v22  ;;  %v1543_v47 = vmul.f32 %v9995_v24, %v1542_v61  ;;  %v1416_v52 = vpop.xlane.xlu2 %1415 }
 0x2bd   : > { %v1438_v60 = vmul.f32 0.015625, %v1416_v52 }
 0x2be   : > { %v1535_v20 = vsub.f32 1.5, %v1534_v26  ;;  %v1544_v30 = vmul.f32 0.5, %v1543_v47 }
 0x2bf   : > { %v1454_v43 = vadd.f32 1e-05, %v1438_v60 }
 0x2c0   : > { %v1536_v3 = vmul.f32 %v9993_v37, %v1535_v20  ;;  %v1545_v27 = vsub.f32 1.5, %v1544_v30 }
 0x2c1   : > { %9996 = vrsqrt.f32 %v1454_v43  ;;  %vm1557_vm5 = vweird.f32 %v1454_v43 }
 0x2c2   : > { %v1540_v58 = vsel %vm1539_vm0, %v9993_v37, %v1536_v3  ;;  %v1546_v1 = vmul.f32 %v9995_v24, %v1545_v27 }
 0x2c3   : > { %v1628_v13 = vmul.f32 %v1540_v58, %v11564_v15 }
 0x2c4   : > { %v1550_v32 = vsel %vm1549_vm3, %v9995_v24, %v1546_v1 }
 0x2c5   : > { %v1647_v25 = vmul.f32 %v11607_v4, %v1628_v13  ;;  %v1418_v35 = vpop.xlane.xlu0 %1417  ;;  %v1629_v26 = vmul.f32 %v1550_v32, %v11574_v40 }
 0x2c6   : > { %v1439_v28 = vmul.f32 0.015625, %v1418_v35 }
 0x2c7   : > { %v1666_v41 = vadd.f32 %v11627_v0, %v1647_v25  ;;  %v9997_v23 = vpop.eup %9996  ;;  %v1648_v60 = vmul.f32 %v11607_v4, %v1629_v26 }
 0x2c8   : > { %v1455_v29 = vadd.f32 1e-05, %v1439_v28  ;;  %v1552_v48 = vmul.f32 %v9997_v23, %v1454_v43  ;;  %vm1558_vm4 = vweird.f32 %v9997_v23 }
 0x2c9   : > { %v11778_v54 = vpack.c.bf16 %v1666_v41, %v1665_v8  ;;  %vm1559_vm6 = vmor %vm1557_vm5, %vm1558_vm4  ;;  %v1667_v25 = vadd.f32 %v11627_v0, %v1648_v60  ;;  %v9615_v60 = vld [vmem:[#allocation13 + $0x104] sm:$0xf] }
 0x2ca   : > { %9998 = vrsqrt.f32 %v1455_v29  ;;  %v1553_v15 = vmul.f32 %v9997_v23, %v1552_v48  ;;  %vm1567_vm8 = vweird.f32 %v1455_v29 }
 0x2cb   : > { %1994 = vmatmul.bf16.gmra.mxu1 %v11778_v54  ;;  %2043 = vmatmul.bf16.gmra.mxu2 %v11778_v54 }
 0x2cc   : > { %2092 = vmatmul.bf16.gmra.mxu3 %v11778_v54  ;;  %2141 = vmatmul.bf16.gmra.mxu0 %v11778_v54  ;;  %v1420_v10 = vpop.xlane.xlu1 %1419  ;;  %v1554_v44 = vmul.f32 0.5, %v1553_v15  ;;  %v9627_v15 = vld [vmem:[#allocation13 + $0x164] sm:$0xf] }
 0x2cd   : > { %v1440_v37 = vmul.f32 0.015625, %v1420_v10  ;;  %v8975_v10 = vld [vmem:[#allocation13 + $0x178] sm:$0xf0] }
 0x2ce   : > { %v1555_v61 = vsub.f32 1.5, %v1554_v44  ;;  %v8951_v44 = vld [vmem:[#allocation13 + $0x148] sm:$0xf0] }
 0x2cf   : > { %v1456_v22 = vadd.f32 1e-05, %v1440_v37  ;;  %v8978_v37 = vor.u32 %v9627_v15, %v8975_v10 }
 0x2d0   : > { %v9999_v12 = vpop.eup %9998  ;;  %v1556_v17 = vmul.f32 %v9997_v23, %v1555_v61 }
 0x2d1   : > { %10000 = vrsqrt.f32 %v1456_v22  ;;  %v1562_v47 = vmul.f32 %v9999_v12, %v1455_v29  ;;  %vm1568_vm7 = vweird.f32 %v9999_v12  ;;  %v9621_v29 = vld [vmem:[#allocation13 + $0x134] sm:$0xf]  ;;  %2216 = vmatpush.bf16.msra.mxu2 %v8978_v37  ;;  %vm1577_vm11 = vweird.f32 %v1456_v22 }
 0x2d2   : > { %v11785_v20 = vpop.f32.mrf.mxu3  ;;  %v1560_v52 = vsel %vm1559_vm6, %v9997_v23, %v1556_v17  ;;  %vm1569_vm9 = vmor %vm1567_vm8, %vm1568_vm7  ;;  %v8954_v26 = vor.u32 %v9621_v29, %v8951_v44 }
 0x2d3   : > { %v1563_v3 = vmul.f32 %v9999_v12, %v1562_v47  ;;  %v1630_v24 = vmul.f32 %v1560_v52, %v11652_v50 }
 0x2d4   : > { %v1980_v62 = vpop.f32.mrf.mxu1 }
 0x2d5   : > { %v1564_v58 = vmul.f32 0.5, %v1563_v3  ;;  %v1649_v13 = vmul.f32 %v11607_v4, %v1630_v24  ;;  %2217 = vmatpush.bf16.msra.mxu2 %v8954_v26  ;;  %v8927_v24 = vld [vmem:[#allocation13 + $0x118] sm:$0xf0]  ;;  %v2127_v37 = vpop.f32.mrf.mxu0 }
 0x2d6   : > { %v8831_v26 = vld [vmem:[#allocation13 + $0x58] sm:$0xf0] }
 0x2d7   : > { %v10001_v19 = vpop.eup %10000  ;;  %v1565_v30 = vsub.f32 1.5, %v1564_v58  ;;  %v1668_v43 = vadd.f32 %v11627_v0, %v1649_v13  ;;  %v9609_v58 = vld [vmem:[#allocation13 + $0xd4] sm:$0xf] }
 0x2d8   : > { %v1572_v40 = vmul.f32 %v10001_v19, %v1456_v22  ;;  %vm1578_vm10 = vweird.f32 %v10001_v19 }
 0x2d9   : > { %v1566_v27 = vmul.f32 %v9999_v12, %v1565_v30  ;;  %v11796_v50 = vpack.c.bf16 %v1668_v43, %v1667_v25  ;;  %vm1579_vm12 = vmor %vm1577_vm11, %vm1578_vm10  ;;  %v8930_v30 = vor.u32 %v9615_v60, %v8927_v24 }
 0x2da   : > { %v11792_v8 = vpop.f32.mrf.mxu3  ;;  %v2029_v41 = vpop.f32.mrf.mxu2  ;;  %v1573_v35 = vmul.f32 %v10001_v19, %v1572_v40  ;;  %v8903_v40 = vld [vmem:[#allocation13 + $0xe8] sm:$0xf0] }
 0x2db   : > { %v11794_v28 = vpack.c.bf16 %v2029_v41, %v1980_v62  ;;  %v1570_v1 = vsel %vm1569_vm9, %v9999_v12, %v1566_v27  ;;  %1999 = vmatmul.bf16.gmra.mxu1 %v11796_v50  ;;  %2048 = vmatmul.bf16.gmra.mxu2 %v11796_v50  ;;  %v8906_v43 = vor.u32 %v9609_v58, %v8903_v40  ;;  %v8949_v40 = vld [vmem:[#allocation13 + $0x130] sm:$0xf] }
 0x2dc   : > { %v11798_v23 = vpop.f32.mrf.mxu1  ;;  %v1574_v48 = vmul.f32 0.5, %v1573_v35  ;;  %2097 = vmatmul.bf16.gmra.mxu3 %v11796_v50  ;;  %v1631_v61 = vmul.f32 %v1570_v1, %v11695_v46  ;;  %2218 = vmatpush.bf16.msra.mxu2 %v8930_v30  ;;  %v9603_v35 = vld [vmem:[#allocation13 + $0xa4] sm:$0xf]  ;;  %v8879_v1 = vld [vmem:[#allocation13 + $0xb8] sm:$0xf0] }
 0x2de   : > { %v1575_v32 = vsub.f32 1.5, %v1574_v48  ;;  %v1650_v52 = vmul.f32 %v11607_v4, %v1631_v61  ;;  %v8855_v48 = vld [vmem:[#allocation13 + $0x88] sm:$0xf0]  ;;  %v9591_v61 = vld [vmem:[#allocation13 + $0x44] sm:$0xf] }
 0x2e0   : > { %v1576_v17 = vmul.f32 %v10001_v19, %v1575_v32  ;;  %v1669_v22 = vadd.f32 %v11627_v0, %v1650_v52  ;;  %2219 = vmatpush.bf16.msra.mxu2 %v8906_v43  ;;  %v8807_v52 = vld [vmem:[#allocation13 + $0x28] sm:$0xf0]  ;;  %v8925_v43 = vld [vmem:[#allocation13 + $0x100] sm:$0xf] }
 0x2e2   : > { %v11804_v12 = vpop.f32.mrf.mxu3  ;;  %v11806_v47 = vpop.f32.mrf.mxu2  ;;  %v1580_v62 = vsel %vm1579_vm12, %v10001_v19, %v1576_v17  ;;  %v9585_v17 = vld [vmem:[#allocation13 + $0x14] sm:$0xf] }
 0x2e3   : > { %14798 = vst [vmem:[#allocation58_spill] sm:$0xff] %v11804_v12  ;;  %v1632_v3 = vmul.f32 %v1580_v62, %v11718_v63  ;;  %v8834_v62 = vor.u32 %v9591_v61, %v8831_v26  ;;  %v9600_v61 = vld [vmem:[#allocation13 + $0x84] sm:$0xf0] }
 0x2e4   : > { %v1985_v13 = vpop.f32.mrf.mxu1 }
 0x2e5   : > { %v1651_v46 = vmul.f32 %v11607_v4, %v1632_v3  ;;  %v8882_v4 = vor.u32 %v9603_v35, %v8879_v1  ;;  %v8810_v3 = vor.u32 %v9585_v17, %v8807_v52  ;;  %v8901_v1 = vld [vmem:[#allocation13 + $0xd0] sm:$0xf]  ;;  %v8829_v17 = vld [vmem:[#allocation13 + $0x40] sm:$0xf] }
 0x2e7   : > { %v1670_v25 = vadd.f32 %v11627_v0, %v1651_v46  ;;  %v9597_v0 = vld [vmem:[#allocation13 + $0x74] sm:$0xf]  ;;  %2220 = vmatpush.bf16.msra.mxu2 %v8882_v4  ;;  %v8973_v46 = vld [vmem:[#allocation13 + $0x160] sm:$0xf]  ;;  %v9612_v4 = vld [vmem:[#allocation13 + $0xe4] sm:$0xf0] }
 0x2e8   : > { %v8858_v10 = vor.u32 %v9597_v0, %v8855_v48  ;;  %v8902_v0 = vor.u32 %v9612_v4, %v8901_v1  ;;  %v8877_v48 = vld [vmem:[#allocation13 + $0xa0] sm:$0xf] }
 0x2e9   : > { %v11813_v19 = vpack.c.bf16 %v1670_v25, %v1669_v22  ;;  %v9624_v22 = vld [vmem:[#allocation13 + $0x144] sm:$0xf0] }
 0x2ea   : > { %v11815_v41 = vpop.f32.mrf.mxu3  ;;  %v2034_v63 = vpop.f32.mrf.mxu2  ;;  %v8950_v25 = vor.u32 %v9624_v22, %v8949_v40 }
 0x2eb   : > { %14799 = vst [vmem:[#allocation59_spill] sm:$0xff] %v11815_v41  ;;  %v11817_v27 = vpack.c.bf16 %v2034_v63, %v1985_v13  ;;  %2004 = vmatmul.bf16.gmra.mxu1 %v11813_v19  ;;  %2053 = vmatmul.bf16.gmra.mxu2 %v11813_v19  ;;  %v9630_v13 = vld [vmem:[#allocation13 + $0x174] sm:$0xf0] }
 0x2ec   : > { %2102 = vmatmul.bf16.gmra.mxu3 %v11813_v19  ;;  %v11822_v15 = vpop.f32.mrf.mxu1  ;;  %2221 = vmatpush.bf16.msra.mxu2 %v8858_v10  ;;  %v8974_v30 = vor.u32 %v9630_v13, %v8973_v46  ;;  %v9618_v63 = vld [vmem:[#allocation13 + $0x114] sm:$0xf0] }
 0x2ed   : > { %v8926_v35 = vor.u32 %v9618_v63, %v8925_v43  ;;  %v9606_v10 = vld [vmem:[#allocation13 + $0xb4] sm:$0xf0] }
 0x2ee   : > { %2167 = vmatpush.bf16.msra.mxu1 %v8974_v30 }
 0x2f0   : > { %2222 = vmatpush.bf16.msra.mxu2 %v8834_v62  ;;  %v9594_v62 = vld [vmem:[#allocation13 + $0x54] sm:$0xf0] }
 0x2f1   : > { %v8830_v52 = vor.u32 %v9594_v62, %v8829_v17 }
 0x2f2   : > { %v11824_v32 = vpop.f32.mrf.mxu2  ;;  %v2078_v29 = vpop.f32.mrf.mxu3  ;;  %2168 = vmatpush.bf16.msra.mxu1 %v8950_v25 }
 0x2f3   : > { %v11826_v44 = vpack.c.bf16 %v2127_v37, %v2078_v29  ;;  %v8878_v37 = vor.u32 %v9606_v10, %v8877_v48  ;;  %v8853_v29 = vld [vmem:[#allocation13 + $0x70] sm:$0xf] }
 0x2f4   : > { %v1990_v60 = vpop.f32.mrf.mxu1  ;;  %2223 = vmatpush.bf16.msra.mxu2 %v8810_v3  ;;  %v8854_v26 = vor.u32 %v9600_v61, %v8853_v29  ;;  %v8805_v3 = vld [vmem:[#allocation13 + $0x10] sm:$0xf] }
 0x2f6   : > { %2169 = vmatpush.bf16.msra.mxu1 %v8926_v35 }
 0x2fa   : > { %v2039_v24 = vpop.f32.mrf.mxu2  ;;  %2170 = vmatpush.bf16.msra.mxu1 %v8902_v0  ;;  %v11838_v46 = vpop.f32.mrf.mxu3 }
 0x2fb   : > { %v11828_v58 = vpack.c.bf16 %v2039_v24, %v1990_v60  ;;  %2058 = vmatmul.bf16.gmra.mxu2 %v11673_v36  ;;  %2146 = vmatmul.bf16.vlgmr.msrb.gmra.mxu1 %v11796_v50  ;;  %v9588_v60 = vld [vmem:[#allocation13 + $0x24] sm:$0xf0] }
 0x2fc   : > { %2107 = vmatmul.bf16.gmra.mxu3 %v11673_v36  ;;  %v8806_v24 = vor.u32 %v9588_v60, %v8805_v3  ;;  %v11848_v40 = vpop.f32.mrf.mxu1 }
 0x2fe   : > { %2171 = vmatpush.bf16.msra.mxu1 %v8878_v37 }
 0x302   : > { %2172 = vmatpush.bf16.msra.mxu1 %v8854_v26  ;;  %v11842_v13 = vpop.f32.mrf.mxu3  ;;  %v11850_v22 = vpop.f32.mrf.mxu2 }
 0x306   : > { %2173 = vmatpush.bf16.msra.mxu1 %v8830_v52 }
 0x30a   : > { %2174 = vmatpush.bf16.msra.mxu1 %v8806_v24  ;;  %v11844_v30 = vpop.f32.mrf.mxu3 }
 0x30b   : > { %2063 = vmatmul.bf16.gmra.mxu2 %v11744_v45  ;;  %2151 = vmatmul.bf16.gmra.mxu1 %v11813_v19 }
 0x30c   : > { %2112 = vmatmul.bf16.gmra.mxu3 %v11744_v45 }
 0x312   : > { %v11852_v25 = vpop.f32.mrf.mxu3 }
 0x31a   : > { %v11856_v1 = vpop.f32.mrf.mxu3 }
 0x31b   : > { %2156 = vmatmul.bf16.gmra.mxu1 %v11673_v36  ;;  %2224 = vmatmul.bf16.vlgmr.msra.gmra.mxu2 %v11715_v42 }
 0x32b   : > { %2161 = vmatmul.bf16.gmra.mxu1 %v11744_v45  ;;  %2229 = vmatmul.bf16.gmra.mxu2 %v11752_v11 }
 0x33b   : > { %2175 = vmatmul.bf16.vlgmr.msra.gmra.mxu1 %v11715_v42  ;;  %2234 = vmatmul.bf16.gmra.mxu2 %v11765_v57 }
 0x348   : > { %v1995_v43 = vpop.f32.mrf.mxu1 }
 0x34b   : > { %2180 = vmatmul.bf16.gmra.mxu1 %v11752_v11  ;;  %2239 = vmatmul.bf16.gmra.mxu2 %v11778_v54 }
 0x34e   : > { %v2044_v63 = vpop.f32.mrf.mxu2 }
 0x34f   : > { %v2283_v35 = vpack.c.bf16 %v2044_v63, %v1995_v43  ;;  %v11858_v37 = vpop.f32.mrf.mxu3 }
 0x350   : > { %v1997_v4 = vpop.f32.mrf.mxu1 }
 0x351   : > { %v2335_v48 = vunpack.c.l.b16 %v2283_v35  ;;  %v2496_v10 = vunpack.c.h.b16 %v2283_v35 }
 0x356   : > { %v2046_v0 = vpop.f32.mrf.mxu2 }
 0x357   : > { %v2286_v42 = vpack.c.bf16 %v2046_v0, %v1997_v4  ;;  %v11866_v3 = vpop.f32.mrf.mxu3 }
 0x358   : > { %v2000_v26 = vpop.f32.mrf.mxu1 }
 0x359   : > { %v2336_v29 = vunpack.c.l.b16 %v2286_v42  ;;  %v2497_v61 = vunpack.c.h.b16 %v2286_v42 }
 0x35b   : > { %v11860_v17 = vpack.c.b16 %v2336_v29, %v2335_v48  ;;  %v11862_v62 = vpack.c.b16 %v2497_v61, %v2496_v10  ;;  %2185 = vmatmul.bf16.gmra.mxu1 %v11765_v57  ;;  %2244 = vmatmul.bf16.gmra.mxu2 %v11796_v50 }
 0x35e   : > { %v2049_v11 = vpop.f32.mrf.mxu2 }
 0x35f   : > { %v2289_v52 = vpack.c.bf16 %v2049_v11, %v2000_v26  ;;  %v2098_v48 = vpop.f32.mrf.mxu3 }
 0x360   : > { %v2002_v60 = vpop.f32.mrf.mxu1 }
 0x361   : > { %v2337_v35 = vunpack.c.l.b16 %v2289_v52  ;;  %v2498_v4 = vunpack.c.h.b16 %v2289_v52 }
 0x366   : > { %v2051_v24 = vpop.f32.mrf.mxu2 }
 0x367   : > { %v2292_v43 = vpack.c.bf16 %v2051_v24, %v2002_v60  ;;  %v11874_v11 = vpop.f32.mrf.mxu3 }
 0x368   : > { %v2005_v63 = vpop.f32.mrf.mxu1 }
 0x369   : > { %v2338_v0 = vunpack.c.l.b16 %v2292_v43  ;;  %v2499_v42 = vunpack.c.h.b16 %v2292_v43 }
 0x36b   : > { %2190 = vmatmul.bf16.gmra.mxu1 %v11778_v54  ;;  %2249 = vmatmul.bf16.gmra.mxu2 %v11813_v19  ;;  %v11870_v57 = vpack.c.b16 %v2338_v0, %v2337_v35  ;;  %v11872_v10 = vpack.c.b16 %v2499_v42, %v2498_v4 }
 0x36e   : > { %v2054_v29 = vpop.f32.mrf.mxu2 }
 0x36f   : > { %v2295_v61 = vpack.c.bf16 %v2054_v29, %v2005_v63  ;;  %v2103_v63 = vpop.f32.mrf.mxu3 }
 0x370   : > { %v2007_v26 = vpop.f32.mrf.mxu1 }
 0x371   : > { %v2339_v34 = vunpack.c.l.b16 %v2295_v61  ;;  %v2500_v7 = vunpack.c.h.b16 %v2295_v61 }
 0x376   : > { %v2056_v60 = vpop.f32.mrf.mxu2 }
 0x377   : > { %v2298_v24 = vpack.c.bf16 %v2056_v60, %v2007_v26  ;;  %v2105_v29 = vpop.f32.mrf.mxu3  ;;  %v11892_v26 = vpop.f32.mrf.mxu0 }
 0x378   : > { %v2147_v52 = vpop.f32.mrf.mxu1 }
 0x379   : > { %v2340_v43 = vunpack.c.l.b16 %v2298_v24  ;;  %v2501_v55 = vunpack.c.h.b16 %v2298_v24  ;;  %v11876_v5 = vpack.c.bf16 %v2147_v52, %v2098_v48 }
 0x37b   : > { %2195 = vmatmul.bf16.gmra.mxu1 %v11796_v50  ;;  %2254 = vmatmul.bf16.gmra.mxu2 %v11673_v36  ;;  %v11880_v54 = vpack.c.b16 %v2340_v43, %v2339_v34  ;;  %v11882_v35 = vpack.c.b16 %v2501_v55, %v2500_v7 }
 0x37e   : > { %v11884_v4 = vpop.f32.mrf.mxu2 }
 0x37f   : > { %14800 = vst [vmem:[#allocation60_spill] sm:$0xff] %v11884_v4  ;;  %v2108_v34 = vpop.f32.mrf.mxu3  ;;  %v11896_v60 = vpop.f32.mrf.mxu0 }
 0x380   : > { %v2149_v0 = vpop.f32.mrf.mxu1 }
 0x386   : > { %v11886_v42 = vpop.f32.mrf.mxu2 }
 0x387   : > { %v2110_v24 = vpop.f32.mrf.mxu3  ;;  %v11899_v59 = vpop.f32.mrf.mxu0 }
 0x388   : > { %v2152_v61 = vpop.f32.mrf.mxu1 }
 0x38b   : > { %2200 = vmatmul.bf16.gmra.mxu1 %v11813_v19  ;;  %2259 = vmatmul.bf16.gmra.mxu2 %v11744_v45 }
 0x38e   : > { %v11890_v48 = vpop.f32.mrf.mxu2 }
 0x38f   : > { %14801 = vst [vmem:[#allocation61_spill] sm:$0xff] %v11890_v48  ;;  %v2113_v19 = vpop.f32.mrf.mxu3  ;;  %v11904_v51 = vpop.f32.mrf.mxu0 }
 0x390   : > { %v2154_v50 = vpop.f32.mrf.mxu1 }
 0x396   : > { %v11894_v55 = vpop.f32.mrf.mxu2 }
 0x397   : > { %14802 = vst [vmem:[#allocation62_spill] sm:$0xff] %v11894_v55  ;;  %v2115_v38 = vpop.f32.mrf.mxu3 }
 0x398   : > { %v2157_v7 = vpop.f32.mrf.mxu1 }
 0x399   : > { %v2302_v16 = vpack.c.bf16 %v2157_v7, %v2108_v34 }
 0x39b   : > { %2205 = vmatmul.bf16.gmra.mxu1 %v11673_v36 }
 0x39e   : > { %v2225_v52 = vpop.f32.mrf.mxu2 }
 0x3a0   : > { %v2159_v43 = vpop.f32.mrf.mxu1 }
 0x3a1   : > { %v2305_v6 = vpack.c.bf16 %v2159_v43, %v2110_v24 }
 0x3a3   : > { %v2390_v12 = vunpack.c.l.b16 %v2305_v6  ;;  %v2535_v55 = vunpack.c.h.b16 %v2305_v6  ;;  %v2293_v6 = vpack.c.bf16 %v2149_v0, %v11874_v11 }
 0x3a6   : > { %v11901_v56 = vpop.f32.mrf.mxu2 }
 0x3a8   : > { %v2162_v31 = vpop.f32.mrf.mxu1 }
 0x3a9   : > { %v2308_v33 = vpack.c.bf16 %v2162_v31, %v2113_v19  ;;  %v2139_v31 = vpop.f32.mrf.mxu0  ;;  %v2389_v19 = vunpack.c.l.b16 %v2302_v16 }
 0x3ab   : > { %2210 = vmatmul.bf16.gmra.mxu1 %v11744_v45  ;;  %v2391_v2 = vunpack.c.l.b16 %v2308_v33  ;;  %v2536_v36 = vunpack.c.h.b16 %v2308_v33  ;;  %v2399_v33 = vpack.c.b16 %v2390_v12, %v2389_v19  ;;  %v2386_v12 = vunpack.c.l.b16 %v2293_v6 }
 0x3ae   : > { %v2230_v14 = vpop.f32.mrf.mxu2 }
 0x3b0   : > { %v2164_v53 = vpop.f32.mrf.mxu1 }
 0x3b1   : > { %v2311_v18 = vpack.c.bf16 %v2164_v53, %v2115_v38  ;;  %v2534_v38 = vunpack.c.h.b16 %v2302_v16  ;;  %v2299_v53 = vpack.c.bf16 %v2154_v50, %v2105_v29  ;;  %v2531_v29 = vunpack.c.h.b16 %v2293_v6 }
 0x3b3   : > { %v2392_v9 = vunpack.c.l.b16 %v2311_v18  ;;  %v2537_v49 = vunpack.c.h.b16 %v2311_v18  ;;  %v2544_v4 = vpack.c.b16 %v2535_v55, %v2534_v38  ;;  %v2296_v18 = vpack.c.bf16 %v2152_v61, %v2103_v63 }
 0x3b4   : > { %v2530_v61 = vunpack.c.h.b16 %v11876_v5 }
 0x3b5   : > { %v2400_v39 = vpack.c.b16 %v2392_v9, %v2391_v2  ;;  %v2545_v21 = vpack.c.b16 %v2537_v49, %v2536_v36  ;;  %v2142_v9 = vpop.f32.mrf.mxu0  ;;  %v2387_v34 = vunpack.c.l.b16 %v2296_v18  ;;  %v2532_v7 = vunpack.c.h.b16 %v2296_v18 }
 0x3b6   : > { %v11906_v48 = vpop.f32.mrf.mxu2  ;;  %v2542_v11 = vpack.c.b16 %v2531_v29, %v2530_v61  ;;  %v2284_v0 = vpack.c.bf16 %v2142_v9, %v11858_v37 }
 0x3b7   : > { %2409 = vmatpush.bf16.xpose.msra.mxu3 %v2400_v39  ;;  %2554 = vmatpush.bf16.xpose.msra.mxu0 %v2545_v21  ;;  %v2388_v39 = vunpack.c.l.b16 %v2299_v53  ;;  %v2533_v21 = vunpack.c.h.b16 %v2299_v53 }
 0x3b8   : > { %v2176_v45 = vpop.f32.mrf.mxu1  ;;  %v2383_v38 = vunpack.c.l.b16 %v2284_v0  ;;  %v2528_v53 = vunpack.c.h.b16 %v2284_v0  ;;  %v2268_v0 = vpack.c.bf16 %v11806_v47, %v11798_v23  ;;  %v2274_v23 = vpack.c.bf16 %v11824_v32, %v11822_v15 }
 0x3b9   : > { %v11908_v41 = vpack.c.bf16 %v2225_v52, %v2176_v45  ;;  %v2398_v24 = vpack.c.b16 %v2388_v39, %v2387_v34  ;;  %v2543_v52 = vpack.c.b16 %v2533_v21, %v2532_v7  ;;  %v2333_v32 = vunpack.c.l.b16 %v11828_v58 }
 0x3bd   : > { %v2144_v50 = vpop.f32.mrf.mxu0 }
 0x3be   : > { %v2235_v2 = vpop.f32.mrf.mxu2  ;;  %v2287_v43 = vpack.c.bf16 %v2144_v50, %v11866_v3  ;;  %v2278_v3 = vpack.c.bf16 %v11904_v51, %v11852_v25 }
 0x3bf   : > { %2410 = vmatpush.bf16.xpose.msra.mxu3 %v2399_v33  ;;  %2555 = vmatpush.bf16.xpose.msra.mxu0 %v2544_v4  ;;  %v2385_v4 = vunpack.c.l.b16 %v11876_v5  ;;  %v2281_v33 = vpack.c.bf16 %v2139_v31, %v11856_v1  ;;  %v2272_v31 = vpack.c.bf16 %v11896_v60, %v11842_v13 }
 0x3c0   : > { %v11910_v49 = vpop.f32.mrf.mxu1  ;;  %v2384_v19 = vunpack.c.l.b16 %v2287_v43  ;;  %v2381_v7 = vunpack.c.l.b16 %v2278_v3  ;;  %v2526_v6 = vunpack.c.h.b16 %v2278_v3 }
 0x3c1   : > { %v2397_v36 = vpack.c.b16 %v2386_v12, %v2385_v4  ;;  %v2382_v37 = vunpack.c.l.b16 %v2281_v33  ;;  %v2527_v9 = vunpack.c.h.b16 %v2281_v33  ;;  %v2524_v29 = vunpack.c.h.b16 %v2272_v31 }
 0x3c2   : > { %v2396_v5 = vpack.c.b16 %v2384_v19, %v2383_v38  ;;  %v2269_v4 = vpack.c.bf16 %v11892_v26, %v11838_v46  ;;  %v2330_v46 = vunpack.c.l.b16 %v2268_v0  ;;  %v2491_v26 = vunpack.c.h.b16 %v2268_v0 }
 0x3c3   : > { %v2540_v1 = vpack.c.b16 %v2527_v9, %v2526_v6  ;;  %v2490_v33 = vunpack.c.h.b16 %v11794_v28  ;;  %v2493_v9 = vunpack.c.h.b16 %v2274_v23  ;;  %v2492_v6 = vunpack.c.h.b16 %v11817_v27 }
 0x3c4   : > { %v2378_v50 = vunpack.c.l.b16 %v2269_v4  ;;  %v2523_v13 = vunpack.c.h.b16 %v2269_v4 }
 0x3c6   : > { %v11917_v55 = vpop.f32.mrf.mxu2 }
 0x3c7   : > { %2411 = vmatpush.bf16.xpose.msra.mxu3 %v2398_v24  ;;  %2556 = vmatpush.bf16.xpose.msra.mxu0 %v2543_v52  ;;  %v2275_v24 = vpack.c.bf16 %v11899_v59, %v11844_v30  ;;  %v2395_v52 = vpack.c.b16 %v2382_v37, %v2381_v7  ;;  %v2332_v37 = vunpack.c.l.b16 %v2274_v23  ;;  %v2331_v7 = vunpack.c.l.b16 %v11817_v27 }
 0x3c8   : > { %v2181_v16 = vpop.f32.mrf.mxu1 }
 0x3c9   : > { %v11913_v63 = vpack.c.bf16 %v2230_v14, %v2181_v16  ;;  %v2529_v14 = vunpack.c.h.b16 %v2287_v43  ;;  %v2380_v16 = vunpack.c.l.b16 %v2275_v24  ;;  %v2525_v12 = vunpack.c.h.b16 %v2275_v24 }
 0x3ca   : > { %v2507_v24 = vpack.c.b16 %v2493_v9, %v2492_v6 }
 0x3cb   : > { %v2541_v18 = vpack.c.b16 %v2529_v14, %v2528_v53  ;;  %v2539_v59 = vpack.c.b16 %v2525_v12, %v2524_v29  ;;  %v2329_v53 = vunpack.c.l.b16 %v11794_v28  ;;  %v2346_v28 = vpack.c.b16 %v2332_v37, %v2331_v7 }
 0x3ce   : > { %v2240_v39 = vpop.f32.mrf.mxu2 }
 0x3cf   : > { %2412 = vmatpush.bf16.xpose.msra.mxu3 %v2397_v36  ;;  %2557 = vmatpush.bf16.xpose.msra.mxu0 %v2542_v11  ;;  %v2377_v36 = vunpack.c.l.b16 %v11826_v44  ;;  %v2522_v11 = vunpack.c.h.b16 %v11826_v44 }
 0x3d0   : > { %v11921_v45 = vpop.f32.mrf.mxu1 }
 0x3d1   : > { %v2393_v19 = vpack.c.b16 %v2378_v50, %v2377_v36  ;;  %v2538_v14 = vpack.c.b16 %v2523_v13, %v2522_v11 }
 0x3d6   : > { %v11932_v51 = vpop.f32.mrf.mxu2 }
 0x3d7   : > { %2413 = vmatpush.bf16.xpose.msra.mxu3 %v2396_v5  ;;  %2558 = vmatpush.bf16.xpose.msra.mxu0 %v2541_v18  ;;  %v2345_v5 = vpack.c.b16 %v2330_v46, %v2329_v53  ;;  %v2506_v18 = vpack.c.b16 %v2491_v26, %v2490_v33 }
 0x3d8   : > { %v2186_v21 = vpop.f32.mrf.mxu1 }
 0x3d9   : > { %v11926_v34 = vpack.c.bf16 %v2235_v2, %v2186_v21  ;;  %v2379_v2 = vunpack.c.l.b16 %v2272_v31  ;;  %v2280_v31 = vpack.c.bf16 %v11850_v22, %v11848_v40 }
 0x3db   : > { %v2394_v61 = vpack.c.b16 %v2380_v16, %v2379_v2  ;;  %v2334_v16 = vunpack.c.l.b16 %v2280_v31  ;;  %v2495_v12 = vunpack.c.h.b16 %v2280_v31  ;;  %v2494_v2 = vunpack.c.h.b16 %v11828_v58 }
 0x3dd   : > { %v2347_v4 = vpack.c.b16 %v2334_v16, %v2333_v32 }
 0x3de   : > { %v2245_v43 = vpop.f32.mrf.mxu2 }
 0x3df   : > { %2414 = vmatpush.bf16.xpose.msra.mxu3 %v2395_v52  ;;  %2559 = vmatpush.bf16.xpose.msra.mxu0 %v2540_v1 }
 0x3e0   : > { %v11934_v25 = vpop.f32.mrf.mxu1 }
 0x3e7   : > { %2415 = vmatpush.bf16.xpose.msra.mxu3 %v2394_v61  ;;  %2560 = vmatpush.bf16.xpose.msra.mxu0 %v2539_v59  ;;  %v2508_v61 = vpack.c.b16 %v2495_v12, %v2494_v2 }
 0x3e8   : > { %v2191_v30 = vpop.f32.mrf.mxu1 }
 0x3e9   : > { %v11938_v60 = vpack.c.bf16 %v2240_v39, %v2191_v30  ;;  %v2247_v39 = vpop.f32.mrf.mxu2 }
 0x3eb   : > { %v3025_v2 = vunpack.c.l.b16 %v11938_v60 }
 0x3ef   : > { %2416 = vmatpush.bf16.xpose.msra.mxu3 %v2393_v19  ;;  %2561 = vmatpush.bf16.xpose.msra.mxu0 %v2538_v14 }
 0x3f0   : > { %v11944_v38 = vpop.f32.mrf.mxu1 }
 0x3f1   : > { %v2250_v47 = vpop.f32.mrf.mxu2 }
 0x3f6   : > { %2417 = vmatmul.bf16.vlgmr.msra.gmra.mxu3 %v2345_v5  ;;  %2562 = vmatmul.bf16.vlgmr.msra.gmra.mxu0 %v2506_v18 }
 0x3f8   : > { %v2196_v44 = vpop.f32.mrf.mxu1 }
 0x3f9   : > { %v11948_v3 = vpack.c.bf16 %v2245_v43, %v2196_v44  ;;  %v2252_v52 = vpop.f32.mrf.mxu2 }
 0x3fb   : > { %v3156_v16 = vunpack.c.h.b16 %v11948_v3 }
 0x400   : > { %v2198_v21 = vpop.f32.mrf.mxu1 }
 0x401   : > { %v2255_v29 = vpop.f32.mrf.mxu2  ;;  %v2294_v23 = vpack.c.bf16 %v2247_v39, %v2198_v21  ;;  %v2282_v39 = vpack.c.bf16 %v11917_v55, %v11934_v25  ;;  %v3023_v55 = vunpack.c.l.b16 %v11926_v34  ;;  %v3152_v25 = vunpack.c.h.b16 %v11926_v34 }
 0x403   : > { %v3157_v31 = vunpack.c.h.b16 %v2294_v23 }
 0x405   : > { %v3168_v32 = vpack.c.b16 %v3157_v31, %v3156_v16 }
 0x406   : > { %2422 = vmatmul.bf16.gmra.mxu3 %v2346_v28  ;;  %2567 = vmatmul.bf16.gmra.mxu0 %v2507_v24 }
 0x408   : > { %v2201_v1 = vpop.f32.mrf.mxu1 }
 0x409   : > { %v2257_v59 = vpop.f32.mrf.mxu2 }
 0x410   : > { %v2203_v15 = vpop.f32.mrf.mxu1 }
 0x411   : > { %v2260_v50 = vpop.f32.mrf.mxu2  ;;  %v2300_v26 = vpack.c.bf16 %v2252_v52, %v2203_v15  ;;  %v2288_v52 = vpack.c.bf16 %v11932_v51, %v11944_v38  ;;  %v3154_v51 = vunpack.c.h.b16 %v11938_v60  ;;  %v2276_v38 = vpack.c.bf16 %v11906_v48, %v11921_v45 }
 0x412   : > { %v2270_v60 = vpack.c.bf16 %v11901_v56, %v11910_v49  ;;  %v3019_v49 = vunpack.c.l.b16 %v11908_v41 }
 0x413   : > { %v3030_v37 = vunpack.c.l.b16 %v2300_v26  ;;  %v3159_v9 = vunpack.c.h.b16 %v2300_v26  ;;  %v3026_v21 = vunpack.c.l.b16 %v2288_v52  ;;  %v3155_v12 = vunpack.c.h.b16 %v2288_v52  ;;  %v14806_v26 = vld [vmem:[#allocation58_spill] sm:$0xff] }
 0x414   : > { %v3149_v34 = vunpack.c.h.b16 %v2270_v60  ;;  %v10954_v52 = vmov -1e+30  }
 0x416   : > { %2427 = vmatmul.bf16.gmra.mxu3 %v2347_v4  ;;  %2572 = vmatmul.bf16.gmra.mxu0 %v2508_v61  ;;  %v3038_v4 = vpack.c.b16 %v3026_v21, %v3025_v2  ;;  %v3167_v61 = vpack.c.b16 %v3155_v12, %v3154_v51 }
 0x418   : > { %v2206_v27 = vpop.f32.mrf.mxu1 }
 0x419   : > { %v2262_v13 = vpop.f32.mrf.mxu2  ;;  %v2303_v58 = vpack.c.bf16 %v2255_v29, %v2206_v27  ;;  %v3024_v29 = vunpack.c.l.b16 %v2282_v39  ;;  %v3022_v27 = vunpack.c.l.b16 %v2276_v38 }
 0x41b   : > { %v3160_v44 = vunpack.c.h.b16 %v2303_v58  ;;  %v3037_v48 = vpack.c.b16 %v3024_v29, %v3023_v55 }
 0x420   : > { %v2208_v30 = vpop.f32.mrf.mxu1 }
 0x421   : > { %v2306_v36 = vpack.c.bf16 %v2257_v59, %v2208_v30  ;;  %v3151_v59 = vunpack.c.h.b16 %v2276_v38  ;;  %v3021_v30 = vunpack.c.l.b16 %v11913_v63 }
 0x423   : > { %v3032_v53 = vunpack.c.l.b16 %v2306_v36  ;;  %v3161_v33 = vunpack.c.h.b16 %v2306_v36 }
 0x425   : > { %v3170_v6 = vpack.c.b16 %v3161_v33, %v3160_v44 }
 0x426   : > { %2432 = vmatmul.bf16.gmra.mxu3 %v11860_v17  ;;  %2577 = vmatmul.bf16.gmra.mxu0 %v11862_v62  ;;  %v2297_v17 = vpack.c.bf16 %v2250_v47, %v2201_v1  ;;  %v3031_v62 = vunpack.c.l.b16 %v2303_v58  ;;  %v3027_v1 = vunpack.c.l.b16 %v11948_v3  ;;  %v3153_v3 = vunpack.c.h.b16 %v2282_v39 }
 0x428   : > { %v2211_v40 = vpop.f32.mrf.mxu1  ;;  %v3041_v7 = vpack.c.b16 %v3032_v53, %v3031_v62  ;;  %v3029_v28 = vunpack.c.l.b16 %v2297_v17  ;;  %v3158_v24 = vunpack.c.h.b16 %v2297_v17  ;;  %v3166_v45 = vpack.c.b16 %v3153_v3, %v3152_v25  ;;  %v14807_v53 = vld [vmem:[#allocation61_spill] sm:$0xff] }
 0x429   : > { %v2309_v22 = vpack.c.bf16 %v2260_v50, %v2211_v40  ;;  %v3150_v50 = vunpack.c.h.b16 %v11913_v63  ;;  %v3036_v40 = vpack.c.b16 %v3022_v27, %v3021_v30 }
 0x42a   : > { %v3169_v47 = vpack.c.b16 %v3159_v9, %v3158_v24  ;;  %v14809_v9 = vld [vmem:[#allocation34_spill] sm:$0xff] }
 0x42b   : > { %v3033_v0 = vunpack.c.l.b16 %v2309_v22  ;;  %v3162_v19 = vunpack.c.h.b16 %v2309_v22  ;;  %v3165_v22 = vpack.c.b16 %v3151_v59, %v3150_v50 }
 0x430   : > { %v2213_v43 = vpop.f32.mrf.mxu1 }
 0x431   : > { %v2312_v11 = vpack.c.bf16 %v2262_v13, %v2213_v43  ;;  %v14803_v13 = vld [vmem:[#allocation60_spill] sm:$0xff]  ;;  %v3148_v43 = vunpack.c.h.b16 %v11908_v41  ;;  %v2307_v41 = vpack.c.bf16 %v14807_v53, %v14806_v26 }
 0x432   : > { %v2301_v56 = vpack.c.bf16 %v14803_v13, %v11785_v20  ;;  %v14805_v20 = vld [vmem:[#allocation62_spill] sm:$0xff] }
 0x433   : > { %v3034_v14 = vunpack.c.l.b16 %v2312_v11  ;;  %v3163_v46 = vunpack.c.h.b16 %v2312_v11  ;;  %v3164_v58 = vpack.c.b16 %v3149_v34, %v3148_v43  ;;  %v2504_v17 = vunpack.c.h.b16 %v2307_v41 }
 0x435   : > { %v3042_v5 = vpack.c.b16 %v3034_v14, %v3033_v0  ;;  %v3171_v18 = vpack.c.b16 %v3163_v46, %v3162_v19  ;;  %v2341_v0 = vunpack.c.l.b16 %v2301_v56  ;;  %v2502_v19 = vunpack.c.h.b16 %v2301_v56  ;;  %v14804_v14 = vld [vmem:[#allocation59_spill] sm:$0xff] }
 0x436   : > { %2437 = vmatmul.bf16.gmra.mxu3 %v11870_v57  ;;  %2582 = vmatmul.bf16.gmra.mxu0 %v11872_v10  ;;  %v3028_v57 = vunpack.c.l.b16 %v2294_v23  ;;  %v3040_v10 = vpack.c.b16 %v3030_v37, %v3029_v28  ;;  %v2310_v46 = vpack.c.bf16 %v14805_v20, %v14804_v14  ;;  %v14808_v23 = vld [vmem:[#allocation32_spill] sm:$0xff]  ;;  %v14819_v20 = vld [vmem:[#allocation47_spill] sm:$0xff] }
 0x437   : > { %3051 = vmatpush.bf16.msrb.mxu1 %v3042_v5  ;;  %3180 = vmatpush.bf16.msrb.mxu2 %v3171_v18  ;;  %v2343_v18 = vunpack.c.l.b16 %v2307_v41  ;;  %v951_v37 = vshra.s32 %v14808_v23, 5  ;;  %v787_v31 = vadd.s32 8, %v14808_v23 }
 0x438   : > { %v3039_v15 = vpack.c.b16 %v3028_v57, %v3027_v1  ;;  %v2344_v33 = vunpack.c.l.b16 %v2310_v46  ;;  %v2505_v5 = vunpack.c.h.b16 %v2310_v46  ;;  %v957_v46 = vshra.s32 %v14819_v20, 5 }
 0x439   : > { %v952_v1 = vshra.s32 %v787_v31, 5  ;;  %v797_v20 = vadd.s32 88, %v14808_v23 }
 0x43a   : > { %v2352_v62 = vpack.c.b16 %v2344_v33, %v2343_v18  ;;  %v2513_v44 = vpack.c.b16 %v2505_v5, %v2504_v17  ;;  %v793_v18 = vadd.s32 56, %v14808_v23 }
 0x43b   : > { %3052 = vmatpush.bf16.msrb.mxu1 %v3041_v7  ;;  %3181 = vmatpush.bf16.msrb.mxu2 %v3170_v6  ;;  %v11992_v7 = vshra.s32 %v14809_v9, 5  ;;  %v984_v6 = vand.u32 31, %v14809_v9 }
 0x43d   : > { %vm968_vm13 = vcmp.eq.s32.totalorder %v951_v37, %v11992_v7  ;;  %vm11996_vm14 = vcmp.lt.s32.totalorder %v984_v6, 17  ;;  %vm969_vm0 = vcmp.eq.s32.totalorder %v952_v1, %v11992_v7  ;;  %vm974_vm10 = vcmp.eq.s32.totalorder %v957_v46, %v11992_v7 }
 0x43e   : > { %vm986_vm15 = vmand %vm968_vm13, %vm11996_vm14 }
 0x43f   : > { %3053 = vmatpush.bf16.msrb.mxu1 %v3040_v10  ;;  %3182 = vmatpush.bf16.msrb.mxu2 %v3169_v47  ;;  %v12003_v57 = vsel %vm986_vm15, 0.0, %v10954_v52  ;;  %vm987_vm1 = vmand %vm969_vm0, %vm11996_vm14 }
 0x440   : > { %14812 = vst [vmem:[#allocation60_spill] sm:$0xff] %v12003_v57  ;;  %v12019_v38 = vsel %vm987_vm1, 0.0, %v10954_v52  ;;  %vm992_vm11 = vmand %vm974_vm10, %vm11996_vm14 }
 0x441   : > { %14814 = vst [vmem:[#allocation59_spill] sm:$0xff] %v12019_v38  ;;  %v12094_v6 = vsel %vm992_vm11, 0.0, %v10954_v52 }
 0x442   : > { %14821 = vst [vmem:[#allocation34_spill] sm:$0xff] %v12094_v6 }
 0x443   : > { %3054 = vmatpush.bf16.msrb.mxu1 %v3039_v15  ;;  %3183 = vmatpush.bf16.msrb.mxu2 %v3168_v32  ;;  %v14813_v15 = vld [vmem:[#allocation37_spill] sm:$0xff] }
 0x444   : > { %v953_v32 = vshra.s32 %v14813_v15, 5 }
 0x446   : > { %2442 = vmatmul.bf16.gmra.mxu3 %v11880_v54  ;;  %2587 = vmatmul.bf16.gmra.mxu0 %v11882_v35  ;;  %v2304_v54 = vpack.c.bf16 %v11886_v42, %v11792_v8  ;;  %v3020_v35 = vunpack.c.l.b16 %v2270_v60  ;;  %vm970_vm2 = vcmp.eq.s32.totalorder %v953_v32, %v11992_v7 }
 0x447   : > { %3055 = vmatpush.bf16.msrb.mxu1 %v3038_v4  ;;  %3184 = vmatpush.bf16.msrb.mxu2 %v3167_v61  ;;  %v789_v4 = vadd.s32 24, %v14808_v23  ;;  %vm988_vm3 = vmand %vm970_vm2, %vm11996_vm14 }
 0x448   : > { %v2342_v36 = vunpack.c.l.b16 %v2304_v54  ;;  %v2503_v63 = vunpack.c.h.b16 %v2304_v54  ;;  %v3035_v11 = vpack.c.b16 %v3020_v35, %v3019_v49  ;;  %v12034_v59 = vsel %vm988_vm3, 0.0, %v10954_v52  ;;  %v14816_v54 = vld [vmem:[#allocation42_spill] sm:$0xff] }
 0x449   : > { %v954_v25 = vshra.s32 %v789_v4, 5  ;;  %14815 = vst [vmem:[#allocation62_spill] sm:$0xff] %v12034_v59  ;;  %v955_v35 = vshra.s32 %v14816_v54, 5  ;;  %v791_v49 = vadd.s32 40, %v14808_v23 }
 0x44a   : > { %v2351_v8 = vpack.c.b16 %v2342_v36, %v2341_v0  ;;  %v2512_v42 = vpack.c.b16 %v2503_v63, %v2502_v19 }
 0x44b   : > { %3056 = vmatpush.bf16.msrb.mxu1 %v3037_v48  ;;  %3185 = vmatpush.bf16.msrb.mxu2 %v3166_v45  ;;  %vm971_vm4 = vcmp.eq.s32.totalorder %v954_v25, %v11992_v7  ;;  %vm972_vm6 = vcmp.eq.s32.totalorder %v955_v35, %v11992_v7  ;;  %v956_v63 = vshra.s32 %v791_v49, 5 }
 0x44c   : > { %vm989_vm5 = vmand %vm971_vm4, %vm11996_vm14 }
 0x44d   : > { %vm990_vm7 = vmand %vm972_vm6, %vm11996_vm14  ;;  %vm973_vm8 = vcmp.eq.s32.totalorder %v956_v63, %v11992_v7 }
 0x44e   : > { %v12064_v0 = vsel %vm990_vm7, 0.0, %v10954_v52  ;;  %vm991_vm9 = vmand %vm973_vm8, %vm11996_vm14 }
 0x44f   : > { %3057 = vmatpush.bf16.msrb.mxu1 %v3036_v40  ;;  %3186 = vmatpush.bf16.msrb.mxu2 %v3165_v22  ;;  %v12049_v22 = vsel %vm989_vm5, 0.0, %v10954_v52  ;;  %14818 = vst [vmem:[#allocation61_spill] sm:$0xff] %v12064_v0  ;;  %v12079_v41 = vsel %vm991_vm9, 0.0, %v10954_v52 }
 0x450   : > { %14817 = vst [vmem:[#allocation58_spill] sm:$0xff] %v12049_v22 }
 0x451   : > { %14820 = vst [vmem:[#allocation32_spill] sm:$0xff] %v12079_v41 }
 0x453   : > { %3058 = vmatpush.bf16.msrb.mxu1 %v3035_v11  ;;  %3187 = vmatpush.bf16.msrb.mxu2 %v3164_v58 }
 0x456   : > { %2447 = vmatmul.bf16.gmra.mxu3 %v2351_v8  ;;  %2592 = vmatmul.bf16.gmra.mxu0 %v2512_v42 }
 0x466   : > { %2452 = vmatmul.bf16.gmra.mxu3 %v2352_v62  ;;  %2597 = vmatmul.bf16.gmra.mxu0 %v2513_v44  ;;  %v958_v44 = vshra.s32 %v793_v18, 5 }
 0x468   : > { %vm975_vm12 = vcmp.eq.s32.totalorder %v958_v44, %v11992_v7 }
 0x469   : > { %vm993_vm13 = vmand %vm975_vm12, %vm11996_vm14 }
 0x46a   : > { %v12109_v32 = vsel %vm993_vm13, 0.0, %v10954_v52 }
 0x46b   : > { %14823 = vst [vmem:[#allocation37_spill] sm:$0xff] %v12109_v32 }
 0x473   : > { %v2563_v24 = vpop.f32.mrf.mxu0 }
 0x474   : > { %v2603_v10 = vmul.f32 0.17677669, %v2563_v24 }
 0x476   : > { %v12007_v47 = vadd.f32 %v2603_v10, %v12003_v57 }
 0x478   : > { %2667 = vmax.xlane.f32.xlu1 %v12007_v47 }
 0x479   : > { %v2418_v16 = vpop.f32.mrf.mxu3 }
 0x47a   : > { %v2458_v39 = vmul.f32 0.17677669, %v2418_v16  ;;  %v14822_v16 = vld [vmem:[#allocation51_spill] sm:$0xff] }
 0x47b   : > { %v2565_v21 = vpop.f32.mrf.mxu0 }
 0x47c   : > { %v12012_v12 = vadd.f32 %v2458_v39, %v12003_v57  ;;  %v2604_v2 = vmul.f32 0.17677669, %v2565_v21  ;;  %v959_v39 = vshra.s32 %v14822_v16, 5 }
 0x47e   : > { %2635 = vmax.xlane.f32.xlu2 %v12012_v12  ;;  %v12024_v61 = vadd.f32 %v2604_v2, %v12019_v38  ;;  %vm976_vm15 = vcmp.eq.s32.totalorder %v959_v39, %v11992_v7 }
 0x47f   : > { %vm994_vm0 = vmand %vm976_vm15, %vm11996_vm14 }
 0x481   : > { %v2420_v51 = vpop.f32.mrf.mxu3 }
 0x482   : > { %v2459_v29 = vmul.f32 0.17677669, %v2420_v51 }
 0x483   : > { %v2568_v3 = vpop.f32.mrf.mxu0 }
 0x484   : > { %v12027_v55 = vadd.f32 %v2459_v29, %v12019_v38  ;;  %v2605_v60 = vmul.f32 0.17677669, %v2568_v3  ;;  %v795_v29 = vadd.s32 72, %v14808_v23 }
 0x486   : > { %2669 = vmax.xlane.f32.xlu2 %v12024_v61  ;;  %2637 = vmax.xlane.f32.xlu0 %v12027_v55  ;;  %v12038_v30 = vadd.f32 %v2605_v60, %v12034_v59  ;;  %v960_v25 = vshra.s32 %v795_v29, 5 }
 0x488   : > { %vm977_vm1 = vcmp.eq.s32.totalorder %v960_v25, %v11992_v7 }
 0x489   : > { %v2423_v27 = vpop.f32.mrf.mxu3  ;;  %vm995_vm2 = vmand %vm977_vm1, %vm11996_vm14 }
 0x48a   : > { %v2460_v48 = vmul.f32 0.17677669, %v2423_v27  ;;  %v12139_v63 = vsel %vm995_vm2, 0.0, %v10954_v52 }
 0x48b   : > { %v2570_v45 = vpop.f32.mrf.mxu0  ;;  %14826 = vst [vmem:[#allocation47_spill] sm:$0xff] %v12139_v63 }
 0x48c   : > { %v12041_v50 = vadd.f32 %v2460_v48, %v12034_v59  ;;  %v2606_v34 = vmul.f32 0.17677669, %v2570_v45  ;;  %v12124_v48 = vsel %vm994_vm0, 0.0, %v10954_v52 }
 0x48d   : > { %14824 = vst [vmem:[#allocation42_spill] sm:$0xff] %v12124_v48 }
 0x48e   : > { %2671 = vmax.xlane.f32.xlu2 %v12038_v30  ;;  %2639 = vmax.xlane.f32.xlu0 %v12041_v50  ;;  %v12054_v43 = vadd.f32 %v2606_v34, %v12049_v22 }
 0x491   : > { %v2425_v40 = vpop.f32.mrf.mxu3 }
 0x492   : > { %v2461_v13 = vmul.f32 0.17677669, %v2425_v40  ;;  %v14825_v40 = vld [vmem:[#allocation54_spill] sm:$0xff] }
 0x493   : > { %v2573_v56 = vpop.f32.mrf.mxu0 }
 0x494   : > { %v12057_v36 = vadd.f32 %v2461_v13, %v12049_v22  ;;  %v2607_v11 = vmul.f32 0.17677669, %v2573_v56  ;;  %v961_v13 = vshra.s32 %v14825_v40, 5 }
 0x496   : > { %2673 = vmax.xlane.f32.xlu0 %v12054_v43  ;;  %2641 = vmax.xlane.f32.xlu1 %v12057_v36  ;;  %v12068_v42 = vadd.f32 %v2607_v11, %v12064_v0  ;;  %vm978_vm3 = vcmp.eq.s32.totalorder %v961_v13, %v11992_v7 }
 0x497   : > { %vm996_vm4 = vmand %vm978_vm3, %vm11996_vm14 }
 0x499   : > { %v2428_v58 = vpop.f32.mrf.mxu3 }
 0x49a   : > { %v2462_v19 = vmul.f32 0.17677669, %v2428_v58 }
 0x49b   : > { %v2575_v8 = vpop.f32.mrf.mxu0 }
 0x49c   : > { %v12071_v14 = vadd.f32 %v2462_v19, %v12064_v0  ;;  %v2608_v26 = vmul.f32 0.17677669, %v2575_v8 }
 0x49e   : > { %2675 = vmax.xlane.f32.xlu0 %v12068_v42  ;;  %2643 = vmax.xlane.f32.xlu1 %v12071_v14  ;;  %v12084_v17 = vadd.f32 %v2608_v26, %v12079_v41 }
 0x4a1   : > { %v2430_v53 = vpop.f32.mrf.mxu3 }
 0x4a2   : > { %v2463_v33 = vmul.f32 0.17677669, %v2430_v53  ;;  %v12154_v53 = vsel %vm996_vm4, 0.0, %v10954_v52 }
 0x4a3   : > { %v2578_v5 = vpop.f32.mrf.mxu0  ;;  %14827 = vst [vmem:[#allocation51_spill] sm:$0xff] %v12154_v53 }
 0x4a4   : > { %v12087_v62 = vadd.f32 %v2463_v33, %v12079_v41  ;;  %v2609_v37 = vmul.f32 0.17677669, %v2578_v5  ;;  %v962_v33 = vshra.s32 %v797_v20, 5 }
 0x4a6   : > { %2677 = vmax.xlane.f32.xlu1 %v12084_v17  ;;  %2645 = vmax.xlane.f32.xlu2 %v12087_v62  ;;  %v12098_v10 = vadd.f32 %v2609_v37, %v12094_v6  ;;  %vm979_vm5 = vcmp.eq.s32.totalorder %v962_v33, %v11992_v7 }
 0x4a7   : > { %vm997_vm6 = vmand %vm979_vm5, %vm11996_vm14 }
 0x4a9   : > { %v2433_v9 = vpop.f32.mrf.mxu3 }
 0x4aa   : > { %v2464_v24 = vmul.f32 0.17677669, %v2433_v9 }
 0x4ab   : > { %v2580_v31 = vpop.f32.mrf.mxu0 }
 0x4ac   : > { %v12101_v1 = vadd.f32 %v2464_v24, %v12094_v6  ;;  %v2610_v21 = vmul.f32 0.17677669, %v2580_v31  ;;  %v12168_v24 = vsel %vm997_vm6, 0.0, %v10954_v52 }
 0x4ad   : > { %14828 = vst [vmem:[#allocation54_spill] sm:$0xff] %v12168_v24 }
 0x4ae   : > { %2679 = vmax.xlane.f32.xlu1 %v12098_v10  ;;  %2647 = vmax.xlane.f32.xlu2 %v12101_v1  ;;  %v12114_v3 = vadd.f32 %v2610_v21, %v12109_v32 }
 0x4b1   : > { %v2435_v15 = vpop.f32.mrf.mxu3 }
 0x4b2   : > { %v2465_v2 = vmul.f32 0.17677669, %v2435_v15 }
 0x4b3   : > { %v2583_v51 = vpop.f32.mrf.mxu0 }
 0x4b4   : > { %v12117_v4 = vadd.f32 %v2465_v2, %v12109_v32  ;;  %v2611_v60 = vmul.f32 0.17677669, %v2583_v51  ;;  %v14829_v51 = vld [vmem:[#allocation33_spill] sm:$0xff] }
 0x4b5   : > { %v963_v29 = vshra.s32 %v14829_v51, 5 }
 0x4b6   : > { %2681 = vmax.xlane.f32.xlu2 %v12114_v3  ;;  %2649 = vmax.xlane.f32.xlu0 %v12117_v4  ;;  %v12128_v35 = vadd.f32 %v2611_v60, %v12124_v48 }
 0x4b7   : > { %vm980_vm7 = vcmp.eq.s32.totalorder %v963_v29, %v11992_v7 }
 0x4b8   : > { %vm998_vm8 = vmand %vm980_vm7, %vm11996_vm14 }
 0x4b9   : > { %v2438_v27 = vpop.f32.mrf.mxu3 }
 0x4ba   : > { %v2466_v45 = vmul.f32 0.17677669, %v2438_v27 }
 0x4bb   : > { %v2585_v54 = vpop.f32.mrf.mxu0 }
 0x4bc   : > { %v12131_v34 = vadd.f32 %v2466_v45, %v12124_v48  ;;  %v2612_v56 = vmul.f32 0.17677669, %v2585_v54 }
 0x4be   : > { %2683 = vmax.xlane.f32.xlu0 %v12128_v35  ;;  %2651 = vmax.xlane.f32.xlu1 %v12131_v34  ;;  %v12143_v58 = vadd.f32 %v2612_v56, %v12139_v63 }
 0x4c1   : > { %v2440_v49 = vpop.f32.mrf.mxu3 }
 0x4c2   : > { %v2467_v11 = vmul.f32 0.17677669, %v2440_v49 }
 0x4c3   : > { %v2588_v8 = vpop.f32.mrf.mxu0 }
 0x4c4   : > { %v12146_v19 = vadd.f32 %v2467_v11, %v12139_v63  ;;  %v2613_v46 = vmul.f32 0.17677669, %v2588_v8  ;;  %v12188_v11 = vsel %vm998_vm8, 0.0, %v10954_v52 }
 0x4c5   : > { %14830 = vst [vmem:[#allocation33_spill] sm:$0xff] %v12188_v11 }
 0x4c6   : > { %2685 = vmax.xlane.f32.xlu1 %v12143_v58  ;;  %2653 = vmax.xlane.f32.xlu2 %v12146_v19  ;;  %v12157_v18 = vadd.f32 %v2613_v46, %v12154_v53 }
 0x4c9   : > { %v2443_v26 = vpop.f32.mrf.mxu3 }
 0x4ca   : > { %v2468_v5 = vmul.f32 0.17677669, %v2443_v26 }
 0x4cb   : > { %v2590_v46 = vpop.f32.mrf.mxu0 }
 0x4cc   : > { %v12160_v44 = vadd.f32 %v2468_v5, %v12154_v53 }
 0x4ce   : > { %2687 = vmax.xlane.f32.xlu2 %v12157_v18  ;;  %2655 = vmax.xlane.f32.xlu0 %v12160_v44 }
 0x4d1   : > { %v2445_v37 = vpop.f32.mrf.mxu3 }
 0x4d2   : > { %v2469_v9 = vmul.f32 0.17677669, %v2445_v37 }
 0x4d3   : > { %v2593_v51 = vpop.f32.mrf.mxu0 }
 0x4d4   : > { %v12171_v31 = vadd.f32 %v2469_v9, %v12168_v24 }
 0x4d6   : > { %2657 = vmax.xlane.f32.xlu1 %v12171_v31 }
 0x4d9   : > { %v2448_v27 = vpop.f32.mrf.mxu3 }
 0x4da   : > { %v2470_v45 = vmul.f32 0.17677669, %v2448_v27  ;;  %v799_v27 = vadd.s32 104, %v14808_v23 }
 0x4dc   : > { %v12192_v8 = vadd.f32 %v2470_v45, %v12188_v11 }
 0x4eb   : > { %v2668_v16 = vpop.xlane.xlu1 %2667 }
 0x4ec   : > { %v2715_v39 = vsub.f32 %v12007_v47, %v2668_v16  ;;  %v2614_v16 = vmul.f32 0.17677669, %v2590_v46 }
 0x4ee   : > { %v2763_v21 = vmul.f32 1.442695, %v2715_v39 }
 0x4f0   : > { %10002 = vpow2.f32 %v2763_v21 }
 0x4f1   : > { %v2636_v15 = vpop.xlane.xlu2 %2635 }
 0x4f2   : > { %v2699_v2 = vsub.f32 %v12012_v12, %v2636_v15 }
 0x4f4   : > { %v2731_v25 = vmul.f32 1.442695, %v2699_v2 }
 0x4f6   : > { %v12177_v60 = vpop.eup %10002  ;;  %10004 = vpow2.f32 %v2731_v25 }
 0x4f7   : > { %2827 = vadd.xlane.f32.xlu2 %v12177_v60 }
 0x4f9   : > { %v2670_v54 = vpop.xlane.xlu2 %2669  ;;  %v2638_v40 = vpop.xlane.xlu0 %2637 }
 0x4fa   : > { %v2716_v47 = vsub.f32 %v12024_v61, %v2670_v54  ;;  %v2700_v12 = vsub.f32 %v12027_v55, %v2638_v40  ;;  %v2450_v40 = vpop.f32.mrf.mxu3 }
 0x4fc   : > { %v12185_v13 = vpop.eup %10004  ;;  %v2765_v56 = vmul.f32 1.442695, %v2716_v47  ;;  %v2733_v49 = vmul.f32 1.442695, %v2700_v12 }
 0x4fd   : > { %2795 = vadd.xlane.f32.xlu0 %v12185_v13 }
 0x4fe   : > { %10006 = vpow2.f32 %v2765_v56 }
 0x4ff   : > { %10008 = vpow2.f32 %v2733_v49  ;;  %2659 = vmax.xlane.f32.xlu2 %v12192_v8 }
 0x501   : > { %v2672_v20 = vpop.xlane.xlu2 %2671  ;;  %v2640_v61 = vpop.xlane.xlu0 %2639 }
 0x502   : > { %v2717_v55 = vsub.f32 %v12038_v30, %v2672_v20  ;;  %v2701_v26 = vsub.f32 %v12041_v50, %v2640_v61  ;;  %v12206_v50 = vadd.f32 %v2614_v16, %v12168_v24 }
 0x504   : > { %v12197_v33 = vpop.eup %10006  ;;  %v2767_v5 = vmul.f32 1.442695, %v2717_v55  ;;  %v2735_v37 = vmul.f32 1.442695, %v2701_v26  ;;  %v2595_v26 = vpop.f32.mrf.mxu0 }
 0x505   : > { %v12199_v9 = vpop.eup %10008  ;;  %2829 = vadd.xlane.f32.xlu0 %v12197_v33 }
 0x506   : > { %10010 = vpow2.f32 %v2767_v5  ;;  %2797 = vadd.xlane.f32.xlu1 %v12199_v9  ;;  %v2616_v5 = vmul.f32 0.17677669, %v2595_v26 }
 0x507   : > { %10012 = vpow2.f32 %v2735_v37 }
 0x509   : > { %v2674_v39 = vpop.xlane.xlu0 %2673  ;;  %v2642_v21 = vpop.xlane.xlu1 %2641 }
 0x50a   : > { %v2718_v15 = vsub.f32 %v12054_v43, %v2674_v39  ;;  %v2702_v30 = vsub.f32 %v12057_v36, %v2642_v21  ;;  %v2615_v43 = vmul.f32 0.17677669, %v2593_v51  ;;  %v964_v36 = vshra.s32 %v799_v27, 5 }
 0x50c   : > { %v12208_v2 = vpop.eup %10010  ;;  %v2769_v29 = vmul.f32 1.442695, %v2718_v15  ;;  %v2737_v25 = vmul.f32 1.442695, %v2702_v30  ;;  %v12220_v20 = vadd.f32 %v2615_v43, %v12188_v11  ;;  %vm12223_vm9 = vcmp.eq.s32.totalorder %v964_v36, %v11992_v7  ;;  %v2453_v30 = vpop.f32.mrf.mxu3 }
 0x50d   : > { %v12211_v45 = vpop.eup %10012  ;;  %2689 = vmax.xlane.f32.xlu0 %v12206_v50  ;;  %vm999_vm10 = vmand %vm12223_vm9, %vm11996_vm14  ;;  %v801_v36 = vadd.s32 120, %v14808_v23 }
 0x50e   : > { %10014 = vpow2.f32 %v2769_v29  ;;  %2831 = vadd.xlane.f32.xlu1 %v12208_v2  ;;  %2799 = vadd.xlane.f32.xlu2 %v12211_v45  ;;  %v12240_v15 = vsel %vm999_vm10, 0.0, %v10954_v52 }
 0x50f   : > { %10016 = vpow2.f32 %v2737_v25  ;;  %14833 = vst [vmem:[#allocation63_spill] sm:$0xff] %v12240_v15  ;;  %v12248_v43 = vadd.f32 %v2616_v5, %v12240_v15 }
 0x511   : > { %v2644_v54 = vpop.xlane.xlu1 %2643  ;;  %v2676_v47 = vpop.xlane.xlu0 %2675 }
 0x512   : > { %v2703_v12 = vsub.f32 %v12071_v14, %v2644_v54  ;;  %v2719_v55 = vsub.f32 %v12068_v42, %v2676_v47  ;;  %v2471_v14 = vmul.f32 0.17677669, %v2450_v40  ;;  %v966_v40 = vshra.s32 %v801_v36, 5 }
 0x514   : > { %v12217_v56 = vpop.eup %10014  ;;  %v2739_v49 = vmul.f32 1.442695, %v2703_v12  ;;  %v2771_v37 = vmul.f32 1.442695, %v2719_v55  ;;  %v12243_v25 = vadd.f32 %v2471_v14, %v12240_v15  ;;  %vm12268_vm12 = vcmp.eq.s32.totalorder %v966_v40, %v11992_v7  ;;  %v2455_v5 = vpop.f32.mrf.mxu3 }
 0x515   : > { %v12227_v46 = vpop.eup %10016  ;;  %vm1001_vm15 = vmand %vm12268_vm12, %vm11996_vm14 }
 0x516   : > { %2801 = vadd.xlane.f32.xlu0 %v12227_v46  ;;  %2691 = vmax.xlane.f32.xlu1 %v12220_v20  ;;  %10018 = vpow2.f32 %v2739_v49 }
 0x517   : > { %2833 = vadd.xlane.f32.xlu2 %v12217_v56  ;;  %10020 = vpow2.f32 %v2771_v37 }
 0x519   : > { %v2678_v16 = vpop.xlane.xlu1 %2677  ;;  %v2646_v39 = vpop.xlane.xlu2 %2645 }
 0x51a   : > { %v2720_v42 = vsub.f32 %v12084_v17, %v2678_v16  ;;  %v2704_v21 = vsub.f32 %v12087_v62, %v2646_v39  ;;  %v14834_v17 = vld [vmem:[#allocation40_spill] sm:$0xff] }
 0x51b   : > { %v965_v62 = vshra.s32 %v14834_v17, 5 }
 0x51c   : > { %v2773_v51 = vmul.f32 1.442695, %v2720_v42  ;;  %v2741_v29 = vmul.f32 1.442695, %v2704_v21  ;;  %v12245_v27 = vpop.eup %10018 }
 0x51d   : > { %v12256_v12 = vpop.eup %10020  ;;  %vm12261_vm11 = vcmp.eq.s32.totalorder %v965_v62, %v11992_v7  ;;  %v2473_v7 = vmul.f32 0.17677669, %v2455_v5 }
 0x51e   : > { %10022 = vpow2.f32 %v2773_v51  ;;  %2803 = vadd.xlane.f32.xlu1 %v12245_v27  ;;  %2661 = vmax.xlane.f32.xlu0 %v12243_v25  ;;  %vm1000_vm13 = vmand %vm12261_vm11, %vm11996_vm14  ;;  %v2598_v51 = vpop.f32.mrf.mxu0 }
 0x51f   : > { %10024 = vpow2.f32 %v2741_v29  ;;  %2693 = vmax.xlane.f32.xlu2 %v12248_v43  ;;  %v12287_v29 = vsel %vm1000_vm13, 0.0, %v10954_v52  ;;  %v2617_v5 = vmul.f32 0.17677669, %v2598_v51 }
 0x520   : > { %14839 = vst [vmem:[#allocation40_spill] sm:$0xff] %v12287_v29 }
 0x521   : > { %v2648_v54 = vpop.xlane.xlu2 %2647  ;;  %v2680_v26 = vpop.xlane.xlu1 %2679 }
 0x522   : > { %v2705_v47 = vsub.f32 %v12101_v1, %v2648_v54  ;;  %v2472_v1 = vmul.f32 0.17677669, %v2453_v30  ;;  %v2721_v37 = vsub.f32 %v12098_v10, %v2680_v26  ;;  %v12290_v30 = vsel %vm1001_vm15, 0.0, %v10954_v52 }
 0x523   : > { %14840 = vst [vmem:[#allocation64_spill] sm:$0xff] %v12290_v30  ;;  %v12298_v54 = vadd.f32 %v2473_v7, %v12290_v30 }
 0x524   : > { %v12258_v49 = vpop.eup %10022  ;;  %v2743_v61 = vmul.f32 1.442695, %v2705_v47  ;;  %v2775_v10 = vmul.f32 1.442695, %v2721_v37  ;;  %v12293_v17 = vadd.f32 %v2472_v1, %v12287_v29 }
 0x525   : > { %v12265_v55 = vpop.eup %10024 }
 0x526   : > { %2837 = vadd.xlane.f32.xlu1 %v12258_v49  ;;  %2835 = vadd.xlane.f32.xlu0 %v12256_v12  ;;  %10026 = vpow2.f32 %v2743_v61  ;;  %v2600_v23 = vpop.f32.mrf.mxu0 }
 0x527   : > { %2805 = vadd.xlane.f32.xlu2 %v12265_v55  ;;  %v2618_v1 = vmul.f32 0.17677669, %v2600_v23 }
 0x529   : > { %v2682_v16 = vpop.xlane.xlu2 %2681  ;;  %v2650_v39 = vpop.xlane.xlu0 %2649 }
 0x52a   : > { %v2722_v42 = vsub.f32 %v12114_v3, %v2682_v16  ;;  %v2706_v21 = vsub.f32 %v12117_v4, %v2650_v39 }
 0x52c   : > { %v2777_v36 = vmul.f32 1.442695, %v2722_v42  ;;  %v2745_v28 = vmul.f32 1.442695, %v2706_v21  ;;  %v12295_v62 = vpop.eup %10026  ;;  %v12317_v21 = vadd.f32 %v2617_v5, %v12287_v29 }
 0x52e   : > { %10028 = vpow2.f32 %v2777_v36  ;;  %2807 = vadd.xlane.f32.xlu0 %v12295_v62  ;;  %2663 = vmax.xlane.f32.xlu1 %v12293_v17 }
 0x52f   : > { %10030 = vpow2.f32 %v2745_v28  ;;  %2665 = vmax.xlane.f32.xlu2 %v12298_v54 }
 0x530   : > { %10032 = vpow2.f32 %v2775_v10  ;;  %v12320_v10 = vadd.f32 %v2618_v1, %v12290_v30 }
 0x531   : > { %v2652_v52 = vpop.xlane.xlu1 %2651  ;;  %v2684_v3 = vpop.xlane.xlu0 %2683 }
 0x532   : > { %v2707_v4 = vsub.f32 %v12131_v34, %v2652_v52  ;;  %v2723_v26 = vsub.f32 %v12128_v35, %v2684_v3 }
 0x534   : > { %v12304_v40 = vpop.eup %10028  ;;  %v2747_v47 = vmul.f32 1.442695, %v2707_v4  ;;  %v2779_v34 = vmul.f32 1.442695, %v2723_v26 }
 0x535   : > { %v12306_v61 = vpop.eup %10030 }
 0x536   : > { %v12309_v14 = vpop.eup %10032  ;;  %2841 = vadd.xlane.f32.xlu0 %v12304_v40  ;;  %2809 = vadd.xlane.f32.xlu1 %v12306_v61  ;;  %10034 = vpow2.f32 %v2747_v47 }
 0x537   : > { %2839 = vadd.xlane.f32.xlu2 %v12309_v14  ;;  %10036 = vpow2.f32 %v2779_v34 }
 0x539   : > { %v2686_v37 = vpop.xlane.xlu1 %2685  ;;  %v2654_v7 = vpop.xlane.xlu2 %2653 }
 0x53a   : > { %v2724_v16 = vsub.f32 %v12143_v58, %v2686_v37  ;;  %v2708_v39 = vsub.f32 %v12146_v19, %v2654_v7 }
 0x53c   : > { %v2781_v42 = vmul.f32 1.442695, %v2724_v16  ;;  %v2749_v35 = vmul.f32 1.442695, %v2708_v39  ;;  %v12322_v36 = vpop.eup %10034 }
 0x53d   : > { %v12329_v52 = vpop.eup %10036 }
 0x53e   : > { %10038 = vpow2.f32 %v2781_v42  ;;  %2695 = vmax.xlane.f32.xlu0 %v12317_v21  ;;  %2697 = vmax.xlane.f32.xlu1 %v12320_v10 }
 0x53f   : > { %10040 = vpow2.f32 %v2749_v35  ;;  %2811 = vadd.xlane.f32.xlu2 %v12322_v36 }
 0x541   : > { %v2688_v58 = vpop.xlane.xlu2 %2687  ;;  %v2656_v19 = vpop.xlane.xlu0 %2655 }
 0x542   : > { %v2725_v51 = vsub.f32 %v12157_v18, %v2688_v58  ;;  %v2709_v28 = vsub.f32 %v12160_v44, %v2656_v19 }
 0x544   : > { %v12331_v3 = vpop.eup %10038  ;;  %v2783_v4 = vmul.f32 1.442695, %v2725_v51  ;;  %v2751_v47 = vmul.f32 1.442695, %v2709_v28 }
 0x545   : > { %v12333_v23 = vpop.eup %10040 }
 0x546   : > { %10042 = vpow2.f32 %v2783_v4  ;;  %2813 = vadd.xlane.f32.xlu0 %v12333_v23  ;;  %2843 = vadd.xlane.f32.xlu1 %v12329_v52 }
 0x547   : > { %10044 = vpow2.f32 %v2751_v47  ;;  %2845 = vadd.xlane.f32.xlu2 %v12331_v3 }
 0x549   : > { %v2658_v26 = vpop.xlane.xlu1 %2657 }
 0x54a   : > { %v2710_v18 = vsub.f32 %v12171_v31, %v2658_v26 }
 0x54c   : > { %v12339_v44 = vpop.eup %10042  ;;  %v2753_v5 = vmul.f32 1.442695, %v2710_v18 }
 0x54d   : > { %v12341_v1 = vpop.eup %10044 }
 0x54e   : > { %10046 = vpow2.f32 %v2753_v5  ;;  %2815 = vadd.xlane.f32.xlu0 %v12341_v1 }
 0x54f   : > { %2847 = vadd.xlane.f32.xlu2 %v12339_v44 }
 0x554   : > { %v12345_v34 = vpop.eup %10046 }
 0x555   : > { %2817 = vadd.xlane.f32.xlu1 %v12345_v34 }
 0x56a   : > { %v2828_v37 = vpop.xlane.xlu2 %2827 }
 0x56b   : > { %10048 = vrcp.f32 %v2828_v37 }
 0x570   : > { %v2796_v7 = vpop.xlane.xlu0 %2795 }
 0x571   : > { %10050 = vrcp.f32 %v2796_v7  ;;  %v10049_v35 = vpop.eup %10048 }
 0x572   : > { %v2660_v16 = vpop.xlane.xlu2 %2659  ;;  %v2907_v51 = vmul.f32 %v10049_v35, %v12177_v60 }
 0x573   : > { %v2711_v31 = vsub.f32 %v12192_v8, %v2660_v16 }
 0x574   : > { %v2939_v8 = vpack.c.bf16 %v2907_v51, %v2907_v51 }
 0x575   : > { %v2755_v39 = vmul.f32 1.442695, %v2711_v31 }
 0x577   : > { %10052 = vpow2.f32 %v2755_v39  ;;  %v10051_v19 = vpop.eup %10050 }
 0x578   : > { %v2830_v42 = vpop.xlane.xlu0 %2829  ;;  %v2891_v4 = vmul.f32 %v10051_v19, %v12185_v13  ;;  %v3116_v13 = vunpack.c.l.b16 %v2939_v8 }
 0x579   : > { %10054 = vrcp.f32 %v2830_v42  ;;  %v2798_v58 = vpop.xlane.xlu1 %2797 }
 0x57a   : > { %10056 = vrcp.f32 %v2798_v58  ;;  %v2923_v37 = vpack.c.bf16 %v2891_v4, %v2891_v4 }
 0x57c   : > { %v2971_v19 = vunpack.c.l.b16 %v2923_v37 }
 0x57d   : > { %v12350_v28 = vpop.eup %10052 }
 0x57e   : > { %2819 = vadd.xlane.f32.xlu1 %v12350_v28 }
 0x57f   : > { %v10055_v47 = vpop.eup %10054 }
 0x580   : > { %v10057_v26 = vpop.eup %10056  ;;  %v2908_v18 = vmul.f32 %v10055_v47, %v12197_v33  ;;  %v2690_v5 = vpop.xlane.xlu0 %2689 }
 0x581   : > { %v2892_v7 = vmul.f32 %v10057_v26, %v12199_v9  ;;  %v2726_v16 = vsub.f32 %v12206_v50, %v2690_v5  ;;  %v2832_v31 = vpop.xlane.xlu1 %2831  ;;  %v2800_v39 = vpop.xlane.xlu2 %2799 }
 0x582   : > { %v2940_v60 = vpack.c.bf16 %v2908_v18, %v2908_v18  ;;  %10058 = vrcp.f32 %v2832_v31 }
 0x583   : > { %v2924_v42 = vpack.c.bf16 %v2892_v7, %v2892_v7  ;;  %v2785_v35 = vmul.f32 1.442695, %v2726_v16  ;;  %10060 = vrcp.f32 %v2800_v39 }
 0x584   : > { %v3117_v58 = vunpack.c.l.b16 %v2940_v60 }
 0x585   : > { %v2972_v30 = vunpack.c.l.b16 %v2924_v42  ;;  %10062 = vpow2.f32 %v2785_v35 }
 0x586   : > { %v3132_v51 = vpack.c.b16 %v3117_v58, %v3116_v13 }
 0x587   : > { %v2987_v33 = vpack.c.b16 %v2972_v30, %v2971_v19 }
 0x588   : > { %3188 = vmatmul.bf16.vlgmr.msrb.gmra.mxu2 %v3132_v51  ;;  %v10059_v4 = vpop.eup %10058 }
 0x589   : > { %v2802_v47 = vpop.xlane.xlu0 %2801  ;;  %v2692_v9 = vpop.xlane.xlu1 %2691  ;;  %3059 = vmatmul.bf16.vlgmr.msrb.gmra.mxu1 %v2987_v33  ;;  %v2909_v30 = vmul.f32 %v10059_v4, %v12208_v2 }
 0x58a   : > { %v10061_v50 = vpop.eup %10060  ;;  %10064 = vrcp.f32 %v2802_v47  ;;  %v2727_v26 = vsub.f32 %v12220_v20, %v2692_v9  ;;  %v2834_v18 = vpop.xlane.xlu2 %2833 }
 0x58b   : > { %v12358_v5 = vpop.eup %10062  ;;  %10066 = vrcp.f32 %v2834_v18  ;;  %v2893_v37 = vmul.f32 %v10061_v50, %v12211_v45  ;;  %v2941_v58 = vpack.c.bf16 %v2909_v30, %v2909_v30 }
 0x58c   : > { %v2787_v8 = vmul.f32 1.442695, %v2727_v26  ;;  %2849 = vadd.xlane.f32.xlu0 %v12358_v5 }
 0x58d   : > { %v2925_v42 = vpack.c.bf16 %v2893_v37, %v2893_v37  ;;  %v3118_v9 = vunpack.c.l.b16 %v2941_v58 }
 0x58e   : > { %10068 = vpow2.f32 %v2787_v8 }
 0x58f   : > { %v2973_v47 = vunpack.c.l.b16 %v2925_v42 }
 0x590   : > { %v10065_v7 = vpop.eup %10064 }
 0x591   : > { %v10067_v16 = vpop.eup %10066  ;;  %v2804_v31 = vpop.xlane.xlu1 %2803  ;;  %v2894_v60 = vmul.f32 %v10065_v7, %v12227_v46 }
 0x592   : > { %v2662_v39 = vpop.xlane.xlu0 %2661  ;;  %v2694_v20 = vpop.xlane.xlu2 %2693  ;;  %v2910_v13 = vmul.f32 %v10067_v16, %v12217_v56  ;;  %10070 = vrcp.f32 %v2804_v31 }
 0x593   : > { %v2712_v35 = vsub.f32 %v12243_v25, %v2662_v39  ;;  %v2728_v19 = vsub.f32 %v12248_v43, %v2694_v20  ;;  %v2926_v51 = vpack.c.bf16 %v2894_v60, %v2894_v60 }
 0x594   : > { %v12367_v45 = vpop.eup %10068  ;;  %v2942_v2 = vpack.c.bf16 %v2910_v13, %v2910_v13 }
 0x595   : > { %v2757_v33 = vmul.f32 1.442695, %v2712_v35  ;;  %v2789_v4 = vmul.f32 1.442695, %v2728_v19  ;;  %2851 = vadd.xlane.f32.xlu0 %v12367_v45  ;;  %v2974_v46 = vunpack.c.l.b16 %v2926_v51 }
 0x596   : > { %v3119_v50 = vunpack.c.l.b16 %v2942_v2 }
 0x597   : > { %10072 = vpow2.f32 %v2757_v33  ;;  %v2988_v25 = vpack.c.b16 %v2974_v46, %v2973_v47 }
 0x598   : > { %10074 = vpow2.f32 %v2789_v4  ;;  %v3133_v56 = vpack.c.b16 %v3119_v50, %v3118_v9  ;;  %v10071_v8 = vpop.eup %10070 }
 0x599   : > { %v2838_v26 = vpop.xlane.xlu1 %2837  ;;  %3064 = vmatmul.bf16.gmra.mxu1 %v2988_v25  ;;  %v2895_v7 = vmul.f32 %v10071_v8, %v12245_v27 }
 0x59a   : > { %v2836_v18 = vpop.xlane.xlu0 %2835  ;;  %10076 = vrcp.f32 %v2838_v26  ;;  %v2806_v43 = vpop.xlane.xlu2 %2805  ;;  %3193 = vmatmul.bf16.gmra.mxu2 %v3133_v56 }
 0x59b   : > { %10078 = vrcp.f32 %v2806_v43  ;;  %v2927_v19 = vpack.c.bf16 %v2895_v7, %v2895_v7 }
 0x59c   : > { %10080 = vrcp.f32 %v2836_v18 }
 0x59d   : > { %v12370_v37 = vpop.eup %10072 }
 0x59e   : > { %v12372_v30 = vpop.eup %10074  ;;  %2821 = vadd.xlane.f32.xlu2 %v12370_v37 }
 0x59f   : > { %2853 = vadd.xlane.f32.xlu1 %v12372_v30 }
 0x5a0   : > { %v10077_v16 = vpop.eup %10076 }
 0x5a1   : > { %v10079_v31 = vpop.eup %10078  ;;  %v2664_v60 = vpop.xlane.xlu1 %2663  ;;  %v2912_v42 = vmul.f32 %v10077_v16, %v12258_v49  ;;  %v2975_v49 = vunpack.c.l.b16 %v2927_v19 }
 0x5a2   : > { %v2808_v39 = vpop.xlane.xlu0 %2807  ;;  %v10081_v20 = vpop.eup %10080  ;;  %v2713_v35 = vsub.f32 %v12293_v17, %v2664_v60  ;;  %v2896_v58 = vmul.f32 %v10079_v31, %v12265_v55 }
 0x5a3   : > { %v2666_v13 = vpop.xlane.xlu2 %2665  ;;  %v2911_v33 = vmul.f32 %v10081_v20, %v12256_v12  ;;  %v2944_v2 = vpack.c.bf16 %v2912_v42, %v2912_v42  ;;  %10082 = vrcp.f32 %v2808_v39 }
 0x5a4   : > { %v2714_v51 = vsub.f32 %v12298_v54, %v2666_v13  ;;  %v2759_v4 = vmul.f32 1.442695, %v2713_v35  ;;  %v2928_v27 = vpack.c.bf16 %v2896_v58, %v2896_v58 }
 0x5a5   : > { %v2943_v46 = vpack.c.bf16 %v2911_v33, %v2911_v33  ;;  %v3121_v9 = vunpack.c.l.b16 %v2944_v2 }
 0x5a6   : > { %v2761_v47 = vmul.f32 1.442695, %v2714_v51  ;;  %10084 = vpow2.f32 %v2759_v4  ;;  %v2976_v50 = vunpack.c.l.b16 %v2928_v27 }
 0x5a7   : > { %v3120_v17 = vunpack.c.l.b16 %v2943_v46 }
 0x5a8   : > { %10086 = vpow2.f32 %v2761_v47  ;;  %v2989_v25 = vpack.c.b16 %v2976_v50, %v2975_v49 }
 0x5a9   : > { %v2810_v55 = vpop.xlane.xlu1 %2809  ;;  %v3134_v26 = vpack.c.b16 %v3121_v9, %v3120_v17  ;;  %v10083_v12 = vpop.eup %10082 }
 0x5aa   : > { %v2842_v56 = vpop.xlane.xlu0 %2841  ;;  %3069 = vmatmul.bf16.gmra.mxu1 %v2989_v25  ;;  %v2897_v8 = vmul.f32 %v10083_v12, %v12295_v62  ;;  %v9646_v25 = vld [vmem:[#allocation14 + $0x78] sm:$0xff] }
 0x5ab   : > { %10088 = vrcp.f32 %v2842_v56  ;;  %v2840_v54 = vpop.xlane.xlu2 %2839  ;;  %3198 = vmatmul.bf16.gmra.mxu2 %v3134_v26  ;;  %3422 = vmatpush.bf16.msrb.mxu0 %v9646_v25  ;;  %v9641_v25 = vld [vmem:[#allocation14 + $0x50] sm:$0xff] }
 0x5ac   : > { %10090 = vrcp.f32 %v2810_v55  ;;  %v12382_v18 = vpop.eup %10084  ;;  %v2929_v19 = vpack.c.bf16 %v2897_v8, %v2897_v8  ;;  %v9637_v55 = vld [vmem:[#allocation14 + $0x30] sm:$0xff] }
 0x5ad   : > { %10092 = vrcp.f32 %v2840_v54  ;;  %2823 = vadd.xlane.f32.xlu2 %v12382_v18 }
 0x5ae   : > { %v12384_v43 = vpop.eup %10086 }
 0x5af   : > { %2825 = vadd.xlane.f32.xlu0 %v12384_v43 }
 0x5b1   : > { %v10089_v7 = vpop.eup %10088  ;;  %v2698_v39 = vpop.xlane.xlu1 %2697 }
 0x5b2   : > { %v10091_v16 = vpop.eup %10090  ;;  %v2696_v31 = vpop.xlane.xlu0 %2695  ;;  %v2914_v60 = vmul.f32 %v10089_v7, %v12304_v40  ;;  %v2730_v35 = vsub.f32 %v12320_v10, %v2698_v39  ;;  %v2977_v40 = vunpack.c.l.b16 %v2929_v19 }
 0x5b3   : > { %v10093_v42 = vpop.eup %10092  ;;  %v2729_v20 = vsub.f32 %v12317_v21, %v2696_v31  ;;  %v2812_v13 = vpop.xlane.xlu2 %2811  ;;  %v2898_v58 = vmul.f32 %v10091_v16, %v12306_v61 }
 0x5b4   : > { %v2913_v51 = vmul.f32 %v10093_v42, %v12309_v14  ;;  %v2946_v33 = vpack.c.bf16 %v2914_v60, %v2914_v60  ;;  %v2793_v62 = vmul.f32 1.442695, %v2730_v35  ;;  %10094 = vrcp.f32 %v2812_v13  ;;  %v9638_v14 = vld [vmem:[#allocation14 + $0x38] sm:$0xff] }
 0x5b5   : > { %v2791_v2 = vmul.f32 1.442695, %v2729_v20  ;;  %v2930_v4 = vpack.c.bf16 %v2898_v58, %v2898_v58  ;;  %3373 = vmatpush.bf16.msrb.mxu3 %v9638_v14  ;;  %v9632_v14 = vld [vmem:[#allocation14 + $0x8] sm:$0xff] }
 0x5b6   : > { %v2945_v27 = vpack.c.bf16 %v2913_v51, %v2913_v51  ;;  %v3123_v47 = vunpack.c.l.b16 %v2946_v33 }
 0x5b7   : > { %10096 = vpow2.f32 %v2791_v2  ;;  %v2978_v46 = vunpack.c.l.b16 %v2930_v4 }
 0x5b8   : > { %10098 = vpow2.f32 %v2793_v62  ;;  %v3122_v21 = vunpack.c.l.b16 %v2945_v27 }
 0x5b9   : > { %v2990_v9 = vpack.c.b16 %v2978_v46, %v2977_v40  ;;  %v2844_v49 = vpop.xlane.xlu1 %2843  ;;  %3374 = vmatpush.bf16.msrb.mxu3 %v9637_v55  ;;  %v9645_v40 = vld [vmem:[#allocation14 + $0x70] sm:$0xff]  ;;  %v9636_v46 = vld [vmem:[#allocation14 + $0x28] sm:$0xff]  ;;  %v9631_v55 = vld [vmem:[#allocation14] sm:$0xff] }
 0x5ba   : > { %v2814_v10 = vpop.xlane.xlu0 %2813  ;;  %v3135_v50 = vpack.c.b16 %v3123_v47, %v3122_v21  ;;  %v10095_v61 = vpop.eup %10094  ;;  %3423 = vmatpush.bf16.msrb.mxu0 %v9645_v40 }
 0x5bb   : > { %10100 = vrcp.f32 %v2814_v10  ;;  %v2846_v17 = vpop.xlane.xlu2 %2845  ;;  %3074 = vmatmul.bf16.gmra.mxu1 %v2990_v9  ;;  %v2899_v54 = vmul.f32 %v10095_v61, %v12322_v36  ;;  %v9635_v10 = vld [vmem:[#allocation14 + $0x20] sm:$0xff]  ;;  %v9634_v61 = vld [vmem:[#allocation14 + $0x18] sm:$0xff] }
 0x5bc   : > { %10102 = vrcp.f32 %v2844_v49  ;;  %3203 = vmatmul.bf16.gmra.mxu2 %v3135_v50  ;;  %v9644_v49 = vld [vmem:[#allocation14 + $0x68] sm:$0xff] }
 0x5bd   : > { %v12394_v56 = vpop.eup %10096  ;;  %10104 = vrcp.f32 %v2846_v17  ;;  %v2931_v31 = vpack.c.bf16 %v2899_v54, %v2899_v54  ;;  %3375 = vmatpush.bf16.msrb.mxu3 %v9636_v46  ;;  %v9643_v17 = vld [vmem:[#allocation14 + $0x60] sm:$0xff]  ;;  %v9640_v54 = vld [vmem:[#allocation14 + $0x48] sm:$0xff] }
 0x5be   : > { %v12396_v26 = vpop.eup %10098  ;;  %2855 = vadd.xlane.f32.xlu1 %v12394_v56  ;;  %3424 = vmatpush.bf16.msrb.mxu0 %v9644_v49 }
 0x5bf   : > { %2857 = vadd.xlane.f32.xlu2 %v12396_v26  ;;  %v2979_v13 = vunpack.c.l.b16 %v2931_v31 }
 0x5c1   : > { %v10101_v12 = vpop.eup %10100  ;;  %3376 = vmatpush.bf16.msrb.mxu3 %v9635_v10 }
 0x5c2   : > { %v10103_v8 = vpop.eup %10102  ;;  %v2816_v7 = vpop.xlane.xlu0 %2815  ;;  %v2900_v16 = vmul.f32 %v10101_v12, %v12333_v23  ;;  %3425 = vmatpush.bf16.msrb.mxu0 %v9643_v17  ;;  %v9639_v12 = vld [vmem:[#allocation14 + $0x40] sm:$0xff] }
 0x5c3   : > { %v10105_v39 = vpop.eup %10104  ;;  %v2915_v60 = vmul.f32 %v10103_v8, %v12329_v52  ;;  %10106 = vrcp.f32 %v2816_v7  ;;  %v2848_v8 = vpop.xlane.xlu2 %2847 }
 0x5c4   : > { %v2932_v42 = vpack.c.bf16 %v2900_v16, %v2900_v16  ;;  %v2916_v20 = vmul.f32 %v10105_v39, %v12331_v3 }
 0x5c5   : > { %v2947_v35 = vpack.c.bf16 %v2915_v60, %v2915_v60  ;;  %3377 = vmatpush.bf16.msrb.mxu3 %v9634_v61 }
 0x5c6   : > { %v2980_v58 = vunpack.c.l.b16 %v2932_v42  ;;  %v2948_v36 = vpack.c.bf16 %v2916_v20, %v2916_v20 }
 0x5c7   : > { %v3124_v19 = vunpack.c.l.b16 %v2947_v35 }
 0x5c8   : > { %v2991_v51 = vpack.c.b16 %v2980_v58, %v2979_v13  ;;  %v3125_v33 = vunpack.c.l.b16 %v2948_v36  ;;  %v2818_v2 = vpop.xlane.xlu1 %2817 }
 0x5c9   : > { %v10107_v62 = vpop.eup %10106  ;;  %10108 = vrcp.f32 %v2818_v2 }
 0x5ca   : > { %v3136_v4 = vpack.c.b16 %v3125_v33, %v3124_v19  ;;  %v2901_v23 = vmul.f32 %v10107_v62, %v12341_v1  ;;  %v9633_v1 = vld [vmem:[#allocation14 + $0x10] sm:$0xff]  ;;  %10110 = vrcp.f32 %v2848_v8 }
 0x5cb   : > { %3079 = vmatmul.bf16.gmra.mxu1 %v2991_v51  ;;  %3378 = vmatpush.bf16.msrb.mxu3 %v9633_v1 }
 0x5cc   : > { %3208 = vmatmul.bf16.gmra.mxu2 %v3136_v4  ;;  %v2933_v47 = vpack.c.bf16 %v2901_v23, %v2901_v23 }
 0x5ce   : > { %v2981_v21 = vunpack.c.l.b16 %v2933_v47 }
 0x5cf   : > { %v10109_v52 = vpop.eup %10108  ;;  %3379 = vmatpush.bf16.msrb.mxu3 %v9632_v14 }
 0x5d0   : > { %v2902_v27 = vmul.f32 %v10109_v52, %v12345_v34  ;;  %v9642_v34 = vld [vmem:[#allocation14 + $0x58] sm:$0xff]  ;;  %v10111_v16 = vpop.eup %10110 }
 0x5d1   : > { %3426 = vmatpush.bf16.msrb.mxu0 %v9642_v34  ;;  %v2917_v31 = vmul.f32 %v10111_v16, %v12339_v44 }
 0x5d2   : > { %v2934_v3 = vpack.c.bf16 %v2902_v27, %v2902_v27 }
 0x5d3   : > { %3380 = vmatpush.bf16.msrb.mxu3 %v9631_v55  ;;  %v2949_v20 = vpack.c.bf16 %v2917_v31, %v2917_v31 }
 0x5d4   : > { %v2982_v9 = vunpack.c.l.b16 %v2934_v3 }
 0x5d5   : > { %3427 = vmatpush.bf16.msrb.mxu0 %v9641_v25  ;;  %v3126_v19 = vunpack.c.l.b16 %v2949_v20 }
 0x5d6   : > { %v2992_v50 = vpack.c.b16 %v2982_v9, %v2981_v21 }
 0x5d9   : > { %3428 = vmatpush.bf16.msrb.mxu0 %v9640_v54 }
 0x5db   : > { %3084 = vmatmul.bf16.gmra.mxu1 %v2992_v50 }
 0x5dd   : > { %3429 = vmatpush.bf16.msrb.mxu0 %v9639_v12 }
 0x5f1   : > { %v2820_v35 = vpop.xlane.xlu1 %2819 }
 0x5ff   : > { %v2850_v7 = vpop.xlane.xlu0 %2849 }
 0x600   : > { %10112 = vrcp.f32 %v2850_v7 }
 0x601   : > { %10114 = vrcp.f32 %v2820_v35 }
 0x606   : > { %v10113_v39 = vpop.eup %10112  ;;  %v3060_v60 = vpop.f32.mrf.mxu1 }
 0x607   : > { %v2918_v42 = vmul.f32 %v10113_v39, %v12358_v5  ;;  %v10115_v23 = vpop.eup %10114 }
 0x608   : > { %v2852_v13 = vpop.xlane.xlu0 %2851  ;;  %v2903_v47 = vmul.f32 %v10115_v23, %v12350_v28 }
 0x609   : > { %v2950_v58 = vpack.c.bf16 %v2918_v42, %v2918_v42  ;;  %10116 = vrcp.f32 %v2852_v13 }
 0x60a   : > { %v2935_v10 = vpack.c.bf16 %v2903_v47, %v2903_v47 }
 0x60b   : > { %v3189_v36 = vpop.f32.mrf.mxu2  ;;  %v3127_v51 = vunpack.c.l.b16 %v2950_v58 }
 0x60c   : > { %v2983_v1 = vunpack.c.l.b16 %v2935_v10 }
 0x60d   : > { %v3137_v33 = vpack.c.b16 %v3127_v51, %v3126_v19 }
 0x60e   : > { %v3062_v2 = vpop.f32.mrf.mxu1 }
 0x60f   : > { %v3229_v62 = vpack.c.bf16 %v3062_v2, %v3060_v60  ;;  %3213 = vmatmul.bf16.gmra.mxu2 %v3137_v33  ;;  %v10117_v52 = vpop.eup %10116 }
 0x610   : > { %v2919_v3 = vmul.f32 %v10117_v52, %v12367_v45 }
 0x611   : > { %v2822_v4 = vpop.xlane.xlu2 %2821  ;;  %3381 = vmatmul.bf16.vlgmr.msrb.gmra.mxu3 %v3229_v62 }
 0x612   : > { %v2854_v44 = vpop.xlane.xlu1 %2853  ;;  %10118 = vrcp.f32 %v2822_v4  ;;  %v2951_v50 = vpack.c.bf16 %v2919_v3, %v2919_v3 }
 0x613   : > { %10120 = vrcp.f32 %v2854_v44  ;;  %v3191_v5 = vpop.f32.mrf.mxu2 }
 0x614   : > { %v3230_v27 = vpack.c.bf16 %v3191_v5, %v3189_v36  ;;  %v3128_v25 = vunpack.c.l.b16 %v2951_v50 }
 0x616   : > { %v3065_v40 = vpop.f32.mrf.mxu1  ;;  %3430 = vmatmul.bf16.vlgmr.msrb.gmra.mxu0 %v3230_v27 }
 0x618   : > { %v10119_v46 = vpop.eup %10118 }
 0x619   : > { %v10121_v21 = vpop.eup %10120  ;;  %v2904_v9 = vmul.f32 %v10119_v46, %v12370_v37 }
 0x61a   : > { %v2920_v49 = vmul.f32 %v10121_v21, %v12372_v30 }
 0x61b   : > { %v2936_v61 = vpack.c.bf16 %v2904_v9, %v2904_v9 }
 0x61c   : > { %v2952_v17 = vpack.c.bf16 %v2920_v49, %v2920_v49 }
 0x61d   : > { %v2984_v34 = vunpack.c.l.b16 %v2936_v61  ;;  %v3194_v14 = vpop.f32.mrf.mxu2 }
 0x61e   : > { %v3129_v55 = vunpack.c.l.b16 %v2952_v17  ;;  %v3067_v28 = vpop.f32.mrf.mxu1 }
 0x61f   : > { %v2993_v54 = vpack.c.b16 %v2984_v34, %v2983_v1  ;;  %v3231_v45 = vpack.c.bf16 %v3067_v28, %v3065_v40 }
 0x620   : > { %v3138_v12 = vpack.c.b16 %v3129_v55, %v3128_v25  ;;  %v2824_v8 = vpop.xlane.xlu2 %2823 }
 0x621   : > { %3089 = vmatmul.bf16.gmra.mxu1 %v2993_v54  ;;  %10122 = vrcp.f32 %v2824_v8  ;;  %3386 = vmatmul.bf16.gmra.mxu3 %v3231_v45  ;;  %v12419_v8 = vld [vmem:[%s14618_s9] ss:$0 sm:$0xff] }
 0x622   : > { %v2826_v7 = vpop.xlane.xlu0 %2825  ;;  %3218 = vmatmul.bf16.gmra.mxu2 %v3138_v12 }
 0x623   : > { %10124 = vrcp.f32 %v2826_v7  ;;  %v14841_v7 = vld [vmem:[#allocation36_spill] sm:$0xff] }
 0x625   : > { %v3196_v37 = vpop.f32.mrf.mxu2 }
 0x626   : > { %v3232_v30 = vpack.c.bf16 %v3196_v37, %v3194_v14 }
 0x627   : > { %v10123_v16 = vpop.eup %10122  ;;  %v3070_v31 = vpop.f32.mrf.mxu1 }
 0x628   : > { %3435 = vmatmul.bf16.gmra.mxu0 %v3232_v30  ;;  %v2905_v60 = vmul.f32 %v10123_v16, %v12382_v18 }
 0x629   : > { %v10125_v39 = vpop.eup %10124 }
 0x62a   : > { %v2906_v42 = vmul.f32 %v10125_v39, %v12384_v43  ;;  %v2937_v20 = vpack.c.bf16 %v2905_v60, %v2905_v60  ;;  %v14842_v60 = vld [vmem:[#allocation35_spill] sm:$0xff] }
 0x62c   : > { %v2938_v35 = vpack.c.bf16 %v2906_v42, %v2906_v42  ;;  %v2985_v13 = vunpack.c.l.b16 %v2937_v20 }
 0x62e   : > { %v2986_v58 = vunpack.c.l.b16 %v2938_v35  ;;  %v3199_v36 = vpop.f32.mrf.mxu2 }
 0x62f   : > { %v3072_v19 = vpop.f32.mrf.mxu1 }
 0x630   : > { %v2994_v51 = vpack.c.b16 %v2986_v58, %v2985_v13  ;;  %v3233_v33 = vpack.c.bf16 %v3072_v19, %v3070_v31  ;;  %v14843_v58 = vld [vmem:[#allocation38_spill] sm:$0xff] }
 0x631   : > { %v2856_v2 = vpop.xlane.xlu1 %2855 }
 0x632   : > { %10126 = vrcp.f32 %v2856_v2  ;;  %v2858_v62 = vpop.xlane.xlu2 %2857  ;;  %3094 = vmatmul.bf16.gmra.mxu1 %v2994_v51  ;;  %3391 = vmatmul.bf16.gmra.mxu3 %v3233_v33 }
 0x633   : > { %10128 = vrcp.f32 %v2858_v62 }
 0x636   : > { %v3201_v4 = vpop.f32.mrf.mxu2 }
 0x637   : > { %v3234_v44 = vpack.c.bf16 %v3201_v4, %v3199_v36 }
 0x638   : > { %v10127_v23 = vpop.eup %10126  ;;  %v3075_v18 = vpop.f32.mrf.mxu1 }
 0x639   : > { %v10129_v52 = vpop.eup %10128  ;;  %v2921_v43 = vmul.f32 %v10127_v23, %v12394_v56  ;;  %3440 = vmatmul.bf16.gmra.mxu0 %v3234_v44 }
 0x63a   : > { %v2922_v5 = vmul.f32 %v10129_v52, %v12396_v26 }
 0x63b   : > { %v2953_v27 = vpack.c.bf16 %v2921_v43, %v2921_v43 }
 0x63c   : > { %v2954_v47 = vpack.c.bf16 %v2922_v5, %v2922_v5 }
 0x63d   : > { %v3130_v3 = vunpack.c.l.b16 %v2953_v27 }
 0x63e   : > { %v3131_v40 = vunpack.c.l.b16 %v2954_v47 }
 0x63f   : > { %v3204_v46 = vpop.f32.mrf.mxu2 }
 0x640   : > { %v3077_v21 = vpop.f32.mrf.mxu1  ;;  %v3139_v9 = vpack.c.b16 %v3131_v40, %v3130_v3 }
 0x641   : > { %v3235_v10 = vpack.c.bf16 %v3077_v21, %v3075_v18  ;;  %v14844_v18 = vld [vmem:[#allocation43_spill] sm:$0xff] }
 0x642   : > { %3223 = vmatmul.bf16.gmra.mxu2 %v3139_v9  ;;  %v14845_v9 = vld [vmem:[#allocation45_spill] sm:$0xff] }
 0x643   : > { %3396 = vmatmul.bf16.gmra.mxu3 %v3235_v10 }
 0x647   : > { %v3206_v49 = vpop.f32.mrf.mxu2 }
 0x648   : > { %v3236_v50 = vpack.c.bf16 %v3206_v49, %v3204_v46  ;;  %v3080_v61 = vpop.f32.mrf.mxu1 }
 0x64a   : > { %3445 = vmatmul.bf16.gmra.mxu0 %v3236_v50 }
 0x64f   : > { %v3209_v17 = vpop.f32.mrf.mxu2 }
 0x650   : > { %v3082_v1 = vpop.f32.mrf.mxu1 }
 0x651   : > { %v3237_v56 = vpack.c.bf16 %v3082_v1, %v3080_v61 }
 0x653   : > { %3401 = vmatmul.bf16.gmra.mxu3 %v3237_v56 }
 0x657   : > { %v3211_v34 = vpop.f32.mrf.mxu2 }
 0x658   : > { %v3238_v26 = vpack.c.bf16 %v3211_v34, %v3209_v17  ;;  %v3085_v14 = vpop.f32.mrf.mxu1 }
 0x65a   : > { %3450 = vmatmul.bf16.gmra.mxu0 %v3238_v26  ;;  %v14846_v26 = vld [vmem:[#allocation48_spill] sm:$0xff] }
 0x660   : > { %v3087_v25 = vpop.f32.mrf.mxu1 }
 0x661   : > { %v3239_v55 = vpack.c.bf16 %v3087_v25, %v3085_v14 }
 0x663   : > { %3406 = vmatmul.bf16.gmra.mxu3 %v3239_v55 }
 0x692   : > { %v3214_v28 = vpop.f32.mrf.mxu2 }
 0x693   : > { %v3431_v54 = vpop.f32.mrf.mxu0 }
 0x694   : > { %v3382_v45 = vpop.f32.mrf.mxu3 }
 0x695   : > { %v3432_v12 = vadd.f32 %v3431_v54, %v3382_v45 }
 0x697   : > { %v3471_v37 = vadd.f32 %v3432_v12, %v14841_v7  ;;  %v14847_v12 = vld [vmem:[#allocation49_spill] sm:$0xff] }
 0x699   : > { %v12423_v30 = vadd.f32 %v12419_v8, %v3471_v37 }
 0x69a   : > { %v3216_v16 = vpop.f32.mrf.mxu2 }
 0x69b   : > { %v3240_v31 = vpack.c.bf16 %v3216_v16, %v3214_v28  ;;  %v3433_v39 = vpop.f32.mrf.mxu0  ;;  %v3509_v42 = vmul.f32 %v14842_v60, %v12423_v30 }
 0x69c   : > { %v3384_v20 = vpop.f32.mrf.mxu3 }
 0x69d   : > { %v3434_v35 = vadd.f32 %v3433_v39, %v3384_v20  ;;  %3525 = vadd.xlane.f32.xlu0 %v3509_v42  ;;  %3455 = vmatmul.bf16.gmra.mxu0 %v3240_v31 }
 0x69e   : > { %v3090_v13 = vpop.f32.mrf.mxu1 }
 0x69f   : > { %v3472_v36 = vadd.f32 %v3434_v35, %v14843_v58  ;;  %v14848_v35 = vld [vmem:[#allocation50_spill] sm:$0xff] }
 0x6a1   : > { %v12429_v19 = vadd.f32 %v12419_v8, %v3472_v36 }
 0x6a3   : > { %v3510_v51 = vmul.f32 %v14842_v60, %v12429_v19 }
 0x6a4   : > { %v3387_v2 = vpop.f32.mrf.mxu3 }
 0x6a5   : > { %v3219_v33 = vpop.f32.mrf.mxu2  ;;  %v3436_v62 = vpop.f32.mrf.mxu0  ;;  %3527 = vadd.xlane.f32.xlu1 %v3510_v51 }
 0x6a6   : > { %v3092_v4 = vpop.f32.mrf.mxu1  ;;  %v3437_v23 = vadd.f32 %v3436_v62, %v3387_v2 }
 0x6a7   : > { %v3241_v44 = vpack.c.bf16 %v3092_v4, %v3090_v13 }
 0x6a8   : > { %v3473_v52 = vadd.f32 %v3437_v23, %v14844_v18  ;;  %v14849_v23 = vld [vmem:[#allocation52_spill] sm:$0xff] }
 0x6a9   : > { %3411 = vmatmul.bf16.gmra.mxu3 %v3241_v44 }
 0x6aa   : > { %v12435_v43 = vadd.f32 %v12419_v8, %v3473_v52 }
 0x6ac   : > { %v3389_v27 = vpop.f32.mrf.mxu3  ;;  %v3511_v47 = vmul.f32 %v14842_v60, %v12435_v43 }
 0x6ad   : > { %v3221_v5 = vpop.f32.mrf.mxu2  ;;  %v3438_v40 = vpop.f32.mrf.mxu0 }
 0x6ae   : > { %v3242_v3 = vpack.c.bf16 %v3221_v5, %v3219_v33  ;;  %v3439_v46 = vadd.f32 %v3438_v40, %v3389_v27  ;;  %3529 = vadd.xlane.f32.xlu2 %v3511_v47 }
 0x6af   : > { %v3095_v21 = vpop.f32.mrf.mxu1 }
 0x6b0   : > { %3460 = vmatmul.bf16.gmra.mxu0 %v3242_v3  ;;  %v3474_v10 = vadd.f32 %v3439_v46, %v14845_v9  ;;  %v14850_v3 = vld [vmem:[#allocation53_spill] sm:$0xff] }
 0x6b2   : > { %v12441_v49 = vadd.f32 %v12419_v8, %v3474_v10 }
 0x6b4   : > { %v3512_v50 = vmul.f32 %v14842_v60, %v12441_v49 }
 0x6b5   : > { %v3392_v61 = vpop.f32.mrf.mxu3 }
 0x6b6   : > { %v3441_v17 = vpop.f32.mrf.mxu0  ;;  %3531 = vadd.xlane.f32.xlu0 %v3512_v50 }
 0x6b7   : > { %v3097_v1 = vpop.f32.mrf.mxu1  ;;  %v3442_v56 = vadd.f32 %v3441_v17, %v3392_v61 }
 0x6b8   : > { %v3243_v34 = vpack.c.bf16 %v3097_v1, %v3095_v21 }
 0x6b9   : > { %v3475_v14 = vadd.f32 %v3442_v56, %v14846_v26 }
 0x6ba   : > { %3416 = vmatmul.bf16.gmra.mxu3 %v3243_v34  ;;  %v14851_v34 = vld [vmem:[#allocation55_spill] sm:$0xff] }
 0x6bb   : > { %v12447_v25 = vadd.f32 %v12419_v8, %v3475_v14 }
 0x6bd   : > { %v3394_v55 = vpop.f32.mrf.mxu3  ;;  %v3513_v28 = vmul.f32 %v14842_v60, %v12447_v25 }
 0x6be   : > { %v3443_v54 = vpop.f32.mrf.mxu0 }
 0x6bf   : > { %v3444_v45 = vadd.f32 %v3443_v54, %v3394_v55  ;;  %3533 = vadd.xlane.f32.xlu1 %v3513_v28 }
 0x6c1   : > { %v3476_v7 = vadd.f32 %v3444_v45, %v14847_v12 }
 0x6c3   : > { %v12453_v37 = vadd.f32 %v12419_v8, %v3476_v7 }
 0x6c5   : > { %v3224_v16 = vpop.f32.mrf.mxu2  ;;  %v3514_v39 = vmul.f32 %v14842_v60, %v12453_v37 }
 0x6c6   : > { %v3397_v31 = vpop.f32.mrf.mxu3 }
 0x6c7   : > { %v3446_v42 = vpop.f32.mrf.mxu0  ;;  %3535 = vadd.xlane.f32.xlu2 %v3514_v39  ;;  %v14852_v39 = vld [vmem:[#allocation56_spill] sm:$0xff] }
 0x6c8   : > { %v3447_v20 = vadd.f32 %v3446_v42, %v3397_v31 }
 0x6ca   : > { %v3477_v13 = vadd.f32 %v3447_v20, %v14848_v35 }
 0x6cc   : > { %v12459_v58 = vadd.f32 %v12419_v8, %v3477_v13 }
 0x6cd   : > { %v3226_v36 = vpop.f32.mrf.mxu2 }
 0x6ce   : > { %v3244_v51 = vpack.c.bf16 %v3226_v36, %v3224_v16  ;;  %v3399_v33 = vpop.f32.mrf.mxu3  ;;  %v3515_v2 = vmul.f32 %v14842_v60, %v12459_v58 }
 0x6cf   : > { %v3448_v62 = vpop.f32.mrf.mxu0 }
 0x6d0   : > { %v3449_v4 = vadd.f32 %v3448_v62, %v3399_v33  ;;  %3537 = vadd.xlane.f32.xlu0 %v3515_v2  ;;  %3465 = vmatmul.bf16.gmra.mxu0 %v3244_v51 }
 0x6d2   : > { %v3478_v44 = vadd.f32 %v3449_v4, %v14849_v23 }
 0x6d4   : > { %v12465_v18 = vadd.f32 %v12419_v8, %v3478_v44 }
 0x6d6   : > { %v3402_v52 = vpop.f32.mrf.mxu3  ;;  %v3516_v5 = vmul.f32 %v14842_v60, %v12465_v18 }
 0x6d7   : > { %v3451_v27 = vpop.f32.mrf.mxu0 }
 0x6d8   : > { %v3452_v47 = vadd.f32 %v3451_v27, %v3402_v52  ;;  %3539 = vadd.xlane.f32.xlu1 %v3516_v5  ;;  %v14853_v52 = vld [vmem:[#allocation57_spill] sm:$0xff] }
 0x6da   : > { %v3479_v40 = vadd.f32 %v3452_v47, %v14850_v3 }
 0x6dc   : > { %v12471_v46 = vadd.f32 %v12419_v8, %v3479_v40 }
 0x6de   : > { %v3517_v21 = vmul.f32 %v14842_v60, %v12471_v46  ;;  %v3404_v9 = vpop.f32.mrf.mxu3 }
 0x6df   : > { %v3453_v10 = vpop.f32.mrf.mxu0 }
 0x6e0   : > { %3541 = vadd.xlane.f32.xlu1 %v3517_v21  ;;  %v3454_v17 = vadd.f32 %v3453_v10, %v3404_v9 }
 0x6e2   : > { %v3480_v26 = vadd.f32 %v3454_v17, %v14851_v34  ;;  %v14854_v17 = vld [vmem:[#allocation39_spill] sm:$0xff] }
 0x6e4   : > { %v12483_v12 = vadd.f32 %v12419_v8, %v3480_v26 }
 0x6e6   : > { %v3407_v28 = vpop.f32.mrf.mxu3  ;;  %v3518_v35 = vmul.f32 %v14842_v60, %v12483_v12 }
 0x6ee   : > { %v3409_v33 = vpop.f32.mrf.mxu3 }
 0x710   : > { %v3526_v50 = vpop.xlane.xlu0 %3525 }
 0x711   : > { %v3557_v61 = vmul.f32 0.015625, %v3526_v50 }
 0x713   : > { %v3573_v1 = vsub.f32 %v12423_v30, %v3557_v61 }
 0x715   : > { %v12477_v56 = vmul.f32 %v14842_v60, %v3573_v1 }
 0x717   : > { %v3605_v14 = vmul.f32 %v12477_v56, %v12477_v56 }
 0x718   : > { %v3528_v55 = vpop.xlane.xlu1 %3527 }
 0x719   : > { %v3558_v54 = vmul.f32 0.015625, %v3528_v55  ;;  %3621 = vadd.xlane.f32.xlu2 %v3605_v14 }
 0x71a   : > { %v3456_v45 = vpop.f32.mrf.mxu0 }
 0x71b   : > { %v3574_v7 = vsub.f32 %v12429_v19, %v3558_v54  ;;  %v3457_v16 = vadd.f32 %v3456_v45, %v3407_v28 }
 0x71d   : > { %v12487_v31 = vmul.f32 %v14842_v60, %v3574_v7  ;;  %v3481_v42 = vadd.f32 %v3457_v16, %v14852_v39 }
 0x71f   : > { %v3606_v20 = vmul.f32 %v12487_v31, %v12487_v31  ;;  %v12495_v2 = vadd.f32 %v12419_v8, %v3481_v42 }
 0x721   : > { %v3530_v13 = vpop.xlane.xlu2 %3529  ;;  %3623 = vadd.xlane.f32.xlu0 %v3606_v20  ;;  %3543 = vadd.xlane.f32.xlu2 %v3518_v35  ;;  %v3519_v44 = vmul.f32 %v14842_v60, %v12495_v2  ;;  %v14855_v20 = vld [vmem:[#allocation41_spill] sm:$0xff] }
 0x722   : > { %v3559_v36 = vmul.f32 0.015625, %v3530_v13  ;;  %v3458_v51 = vpop.f32.mrf.mxu0 }
 0x723   : > { %v3459_v4 = vadd.f32 %v3458_v51, %v3409_v33 }
 0x724   : > { %v3575_v62 = vsub.f32 %v12435_v43, %v3559_v36 }
 0x725   : > { %v3482_v5 = vadd.f32 %v3459_v4, %v14853_v52  ;;  %v9101_v4 = vld [vmem:[#allocation17 + $0x70] sm:$0xf]  ;;  %v9661_v52 = vld [vmem:[#allocation17 + $0x74] sm:$0xf] }
 0x726   : > { %v12499_v23 = vmul.f32 %v14842_v60, %v3575_v62 }
 0x727   : > { %v12507_v21 = vadd.f32 %v12419_v8, %v3482_v5 }
 0x728   : > { %v3607_v27 = vmul.f32 %v12499_v23, %v12499_v23 }
 0x729   : > { %v3532_v47 = vpop.xlane.xlu0 %3531  ;;  %3545 = vadd.xlane.f32.xlu2 %v3519_v44  ;;  %v3520_v26 = vmul.f32 %v14842_v60, %v12507_v21  ;;  %v9662_v44 = vld [vmem:[#allocation17 + $0x74] sm:$0xf0] }
 0x72a   : > { %v3560_v3 = vmul.f32 0.015625, %v3532_v47  ;;  %3625 = vadd.xlane.f32.xlu0 %v3607_v27  ;;  %v9102_v5 = vor.u32 %v9662_v44, %v9101_v4  ;;  %v9103_v27 = vld [vmem:[#allocation17 + $0x78] sm:$0xf0] }
 0x72c   : > { %v3412_v40 = vpop.f32.mrf.mxu3  ;;  %v3576_v9 = vsub.f32 %v12441_v49, %v3560_v3  ;;  %v9106_v3 = vor.u32 %v9661_v52, %v9103_v27  ;;  %4009 = vmatpush.bf16.msra.mxu1 %v9102_v5  ;;  %v14857_v27 = vld [vmem:[#allocation46_spill] sm:$0xff] }
 0x72d   : > { %v3461_v10 = vpop.f32.mrf.mxu0 }
 0x72e   : > { %v3462_v50 = vadd.f32 %v3461_v10, %v3412_v40  ;;  %v12511_v61 = vmul.f32 %v14842_v60, %v3576_v9  ;;  %4058 = vmatpush.bf16.msra.mxu2 %v9106_v3 }
 0x730   : > { %v3483_v1 = vadd.f32 %v3462_v50, %v14854_v17  ;;  %v3608_v34 = vmul.f32 %v12511_v61, %v12511_v61 }
 0x732   : > { %v3534_v14 = vpop.xlane.xlu1 %3533  ;;  %3627 = vadd.xlane.f32.xlu1 %v3608_v34  ;;  %3547 = vadd.xlane.f32.xlu0 %v3520_v26  ;;  %v12519_v54 = vadd.f32 %v12419_v8, %v3483_v1 }
 0x733   : > { %v3561_v55 = vmul.f32 0.015625, %v3534_v14 }
 0x734   : > { %v3414_v28 = vpop.f32.mrf.mxu3  ;;  %v3521_v42 = vmul.f32 %v14842_v60, %v12519_v54 }
 0x735   : > { %v3463_v45 = vpop.f32.mrf.mxu0  ;;  %v3577_v7 = vsub.f32 %v12447_v25, %v3561_v55 }
 0x736   : > { %v3464_v16 = vadd.f32 %v3463_v45, %v3414_v28 }
 0x737   : > { %v12523_v39 = vmul.f32 %v14842_v60, %v3577_v7 }
 0x738   : > { %v3484_v35 = vadd.f32 %v3464_v16, %v14855_v20  ;;  %v14856_v16 = vld [vmem:[#allocation44_spill] sm:$0xff] }
 0x739   : > { %v3609_v13 = vmul.f32 %v12523_v39, %v12523_v39 }
 0x73a   : > { %v3536_v36 = vpop.xlane.xlu2 %3535  ;;  %3549 = vadd.xlane.f32.xlu0 %v3521_v42  ;;  %v12531_v33 = vadd.f32 %v12419_v8, %v3484_v35 }
 0x73b   : > { %v3562_v51 = vmul.f32 0.015625, %v3536_v36  ;;  %3629 = vadd.xlane.f32.xlu1 %v3609_v13 }
 0x73c   : > { %v3522_v9 = vmul.f32 %v14842_v60, %v12531_v33 }
 0x73d   : > { %v3578_v62 = vsub.f32 %v12453_v37, %v3562_v51  ;;  %v3417_v26 = vpop.f32.mrf.mxu3 }
 0x73f   : > { %v12535_v47 = vmul.f32 %v14842_v60, %v3578_v62 }
 0x741   : > { %v3610_v40 = vmul.f32 %v12535_v47, %v12535_v47 }
 0x743   : > { %v3538_v10 = vpop.xlane.xlu0 %3537  ;;  %3631 = vadd.xlane.f32.xlu2 %v3610_v40  ;;  %3551 = vadd.xlane.f32.xlu1 %v3522_v9 }
 0x744   : > { %v3563_v50 = vmul.f32 0.015625, %v3538_v10 }
 0x745   : > { %v3419_v4 = vpop.f32.mrf.mxu3 }
 0x746   : > { %v3579_v17 = vsub.f32 %v12459_v58, %v3563_v50 }
 0x748   : > { %v12543_v1 = vmul.f32 %v14842_v60, %v3579_v17  ;;  %v9093_v17 = vld [vmem:[#allocation17 + $0x60] sm:$0xf] }
 0x74a   : > { %v3611_v34 = vmul.f32 %v12543_v1, %v12543_v1 }
 0x74b   : > { %v3540_v14 = vpop.xlane.xlu1 %3539 }
 0x74c   : > { %v3564_v55 = vmul.f32 0.015625, %v3540_v14  ;;  %3633 = vadd.xlane.f32.xlu2 %v3611_v34  ;;  %v9660_v34 = vld [vmem:[#allocation17 + $0x64] sm:$0xf0] }
 0x74d   : > { %v3466_v28 = vpop.f32.mrf.mxu0  ;;  %v9094_v14 = vor.u32 %v9660_v34, %v9093_v17  ;;  %v9061_v34 = vld [vmem:[#allocation17 + $0x20] sm:$0xf] }
 0x74e   : > { %v3580_v45 = vsub.f32 %v12465_v18, %v3564_v55  ;;  %v3467_v7 = vadd.f32 %v3466_v28, %v3417_v26  ;;  %v9659_v26 = vld [vmem:[#allocation17 + $0x64] sm:$0xf]  ;;  %v9095_v55 = vld [vmem:[#allocation17 + $0x68] sm:$0xf0] }
 0x74f   : > { %v9098_v28 = vor.u32 %v9659_v26, %v9095_v55  ;;  %4010 = vmatpush.bf16.msra.mxu1 %v9094_v14  ;;  %v9652_v26 = vld [vmem:[#allocation17 + $0x24] sm:$0xf0]  ;;  %v9651_v14 = vld [vmem:[#allocation17 + $0x24] sm:$0xf] }
 0x750   : > { %v3485_v42 = vadd.f32 %v3467_v7, %v14856_v16  ;;  %v12550_v20 = vmul.f32 %v14842_v60, %v3580_v45  ;;  %v9085_v45 = vld [vmem:[#allocation17 + $0x50] sm:$0xf]  ;;  %v9658_v7 = vld [vmem:[#allocation17 + $0x54] sm:$0xf0]  ;;  %v9062_v55 = vor.u32 %v9652_v26, %v9061_v34 }
 0x751   : > { %4059 = vmatpush.bf16.msra.mxu2 %v9098_v28  ;;  %v9086_v16 = vor.u32 %v9658_v7, %v9085_v45  ;;  %v9063_v28 = vld [vmem:[#allocation17 + $0x28] sm:$0xf0]  ;;  %v9053_v7 = vld [vmem:[#allocation17 + $0x10] sm:$0xf] }
 0x752   : > { %v12553_v35 = vadd.f32 %v12419_v8, %v3485_v42  ;;  %v3612_v13 = vmul.f32 %v12550_v20, %v12550_v20  ;;  %v9087_v42 = vld [vmem:[#allocation17 + $0x58] sm:$0xf0]  ;;  %v9066_v45 = vor.u32 %v9651_v14, %v9063_v28 }
 0x753   : > { %v3542_v36 = vpop.xlane.xlu1 %3541  ;;  %4011 = vmatpush.bf16.msra.mxu1 %v9086_v16  ;;  %v9649_v16 = vld [vmem:[#allocation17 + $0x14] sm:$0xf] }
 0x754   : > { %v3565_v51 = vmul.f32 0.015625, %v3542_v36  ;;  %3635 = vadd.xlane.f32.xlu0 %v3612_v13  ;;  %v3523_v62 = vmul.f32 %v14842_v60, %v12553_v35  ;;  %v9077_v36 = vld [vmem:[#allocation17 + $0x40] sm:$0xf] }
 0x755   : > { %v3468_v44 = vpop.f32.mrf.mxu0 }
 0x756   : > { %v3581_v52 = vsub.f32 %v12471_v46, %v3565_v51  ;;  %v3469_v5 = vadd.f32 %v3468_v44, %v3419_v4  ;;  %3553 = vadd.xlane.f32.xlu1 %v3523_v62  ;;  %v9656_v51 = vld [vmem:[#allocation17 + $0x44] sm:$0xf0]  ;;  %v9655_v62 = vld [vmem:[#allocation17 + $0x44] sm:$0xf]  ;;  %v9079_v44 = vld [vmem:[#allocation17 + $0x48] sm:$0xf0] }
 0x757   : > { %v9078_v4 = vor.u32 %v9656_v51, %v9077_v36  ;;  %v9055_v36 = vld [vmem:[#allocation17 + $0x18] sm:$0xf0] }
 0x758   : > { %v3486_v3 = vadd.f32 %v3469_v5, %v14857_v27  ;;  %v12562_v40 = vmul.f32 %v14842_v60, %v3581_v52  ;;  %v9082_v52 = vor.u32 %v9655_v62, %v9079_v44  ;;  %v9069_v5 = vld [vmem:[#allocation17 + $0x30] sm:$0xf]  ;;  %v9654_v27 = vld [vmem:[#allocation17 + $0x34] sm:$0xf0]  ;;  %v9058_v62 = vor.u32 %v9649_v16, %v9055_v36  ;;  %v9045_v44 = vld [vmem:[#allocation17] sm:$0xf] }
 0x759   : > { %4012 = vmatpush.bf16.msra.mxu1 %v9078_v4 }
 0x75a   : > { %v12565_v9 = vadd.f32 %v12419_v8, %v3486_v3  ;;  %v3613_v10 = vmul.f32 %v12562_v40, %v12562_v40  ;;  %v9657_v8 = vld [vmem:[#allocation17 + $0x54] sm:$0xf] }
 0x75b   : > { %v9090_v13 = vor.u32 %v9657_v8, %v9087_v42  ;;  %v9653_v3 = vld [vmem:[#allocation17 + $0x34] sm:$0xf]  ;;  %v9650_v8 = vld [vmem:[#allocation17 + $0x14] sm:$0xf0] }
 0x75c   : > { %3637 = vadd.xlane.f32.xlu0 %v3613_v10  ;;  %v3524_v50 = vmul.f32 %v14842_v60, %v12565_v9  ;;  %v9070_v10 = vor.u32 %v9654_v27, %v9069_v5  ;;  %v9647_v27 = vld [vmem:[#allocation17 + $0x4] sm:$0xf] }
 0x75d   : > { %4060 = vmatpush.bf16.msra.mxu2 %v9090_v13  ;;  %v9054_v13 = vor.u32 %v9650_v8, %v9053_v7 }
 0x75e   : > { %3555 = vadd.xlane.f32.xlu2 %v3524_v50  ;;  %v9071_v50 = vld [vmem:[#allocation17 + $0x38] sm:$0xf0]  ;;  %4013 = vmatpush.bf16.msra.mxu1 %v9070_v10 }
 0x75f   : > { %v9074_v17 = vor.u32 %v9653_v3, %v9071_v50  ;;  %v9047_v3 = vld [vmem:[#allocation17 + $0x8] sm:$0xf0] }
 0x760   : > { %v9050_v10 = vor.u32 %v9647_v27, %v9047_v3 }
 0x761   : > { %4061 = vmatpush.bf16.msra.mxu2 %v9082_v52  ;;  %v9648_v52 = vld [vmem:[#allocation17 + $0x4] sm:$0xf0] }
 0x762   : > { %4014 = vmatpush.bf16.msra.mxu1 %v9062_v55  ;;  %v9046_v5 = vor.u32 %v9648_v52, %v9045_v44 }
 0x765   : > { %4062 = vmatpush.bf16.msra.mxu2 %v9074_v17 }
 0x766   : > { %4015 = vmatpush.bf16.msra.mxu1 %v9054_v13 }
 0x769   : > { %4063 = vmatpush.bf16.msra.mxu2 %v9066_v45 }
 0x76a   : > { %4016 = vmatpush.bf16.msra.mxu1 %v9046_v5 }
 0x76d   : > { %4064 = vmatpush.bf16.msra.mxu2 %v9058_v62 }
 0x771   : > { %4065 = vmatpush.bf16.msra.mxu2 %v9050_v10 }
 0x78c   : > { %v3622_v42 = vpop.xlane.xlu2 %3621 }
 0x78d   : > { %v3653_v51 = vmul.f32 0.015625, %v3622_v42 }
 0x78f   : > { %v3669_v4 = vadd.f32 1e-05, %v3653_v51 }
 0x791   : > { %10130 = vrsqrt.f32 %v3669_v4  ;;  %vm3691_vm0 = vweird.f32 %v3669_v4 }
 0x794   : > { %v3624_v50 = vpop.xlane.xlu0 %3623  ;;  %v3544_v17 = vpop.xlane.xlu2 %3543 }
 0x795   : > { %v3654_v34 = vmul.f32 0.015625, %v3624_v50  ;;  %v3566_v26 = vmul.f32 0.015625, %v3544_v17 }
 0x797   : > { %v10131_v14 = vpop.eup %10130  ;;  %v3670_v55 = vadd.f32 1e-05, %v3654_v34  ;;  %v3582_v28 = vsub.f32 %v12483_v12, %v3566_v26 }
 0x798   : > { %v3686_v45 = vmul.f32 %v10131_v14, %v3669_v4  ;;  %vm3692_vm14 = vweird.f32 %v10131_v14 }
 0x799   : > { %10132 = vrsqrt.f32 %v3670_v55  ;;  %v12573_v7 = vmul.f32 %v14842_v60, %v3582_v28  ;;  %vm3693_vm1 = vmor %vm3691_vm0, %vm3692_vm14  ;;  %vm3701_vm3 = vweird.f32 %v3670_v55 }
 0x79a   : > { %v3687_v8 = vmul.f32 %v10131_v14, %v3686_v45 }
 0x79b   : > { %v3614_v16 = vmul.f32 %v12573_v7, %v12573_v7 }
 0x79c   : > { %v3688_v42 = vmul.f32 0.5, %v3687_v8  ;;  %v3546_v13 = vpop.xlane.xlu2 %3545 }
 0x79d   : > { %v3626_v36 = vpop.xlane.xlu0 %3625  ;;  %v3567_v51 = vmul.f32 0.015625, %v3546_v13  ;;  %3639 = vadd.xlane.f32.xlu1 %v3614_v16 }
 0x79e   : > { %v3689_v62 = vsub.f32 1.5, %v3688_v42  ;;  %v3655_v44 = vmul.f32 0.015625, %v3626_v36 }
 0x79f   : > { %v10133_v52 = vpop.eup %10132  ;;  %v3583_v5 = vsub.f32 %v12495_v2, %v3567_v51  ;;  %v12583_v51 = vld [vmem:[#allocation16] ss:$0 sm:$0xff] }
 0x7a0   : > { %v3696_v27 = vmul.f32 %v10133_v52, %v3670_v55  ;;  %v3671_v3 = vadd.f32 1e-05, %v3655_v44  ;;  %v3690_v10 = vmul.f32 %v10131_v14, %v3689_v62  ;;  %vm3702_vm2 = vweird.f32 %v10133_v52 }
 0x7a1   : > { %v12579_v50 = vmul.f32 %v14842_v60, %v3583_v5  ;;  %vm3703_vm4 = vmor %vm3701_vm3, %vm3702_vm2 }
 0x7a2   : > { %v3697_v17 = vmul.f32 %v10133_v52, %v3696_v27  ;;  %10134 = vrsqrt.f32 %v3671_v3  ;;  %v3694_v28 = vsel %vm3693_vm1, %v10131_v14, %v3690_v10  ;;  %vm3711_vm6 = vweird.f32 %v3671_v3 }
 0x7a3   : > { %v3615_v34 = vmul.f32 %v12579_v50, %v12579_v50  ;;  %v3845_v62 = vmul.f32 %v3694_v28, %v12477_v56  ;;  %v12597_v56 = vld [vmem:[%s14620_s11] ss:$0 sm:$0xff] }
 0x7a4   : > { %v3698_v26 = vmul.f32 0.5, %v3697_v17 }
 0x7a5   : > { %v3628_v45 = vpop.xlane.xlu1 %3627  ;;  %v3548_v8 = vpop.xlane.xlu0 %3547  ;;  %3641 = vadd.xlane.f32.xlu2 %v3615_v34  ;;  %v3864_v55 = vmul.f32 %v12583_v51, %v3845_v62 }
 0x7a6   : > { %v3699_v16 = vsub.f32 1.5, %v3698_v26  ;;  %v3656_v42 = vmul.f32 0.015625, %v3628_v45  ;;  %v3568_v13 = vmul.f32 0.015625, %v3548_v8 }
 0x7a8   : > { %v10135_v36 = vpop.eup %10134  ;;  %v3700_v4 = vmul.f32 %v10133_v52, %v3699_v16  ;;  %v3672_v44 = vadd.f32 1e-05, %v3656_v42  ;;  %v3584_v5 = vsub.f32 %v12507_v21, %v3568_v13 }
 0x7a9   : > { %v3706_v27 = vmul.f32 %v10135_v36, %v3671_v3  ;;  %vm3712_vm5 = vweird.f32 %v10135_v36 }
 0x7aa   : > { %v3704_v14 = vsel %vm3703_vm4, %v10133_v52, %v3700_v4  ;;  %10136 = vrsqrt.f32 %v3672_v44  ;;  %v12588_v10 = vmul.f32 %v14842_v60, %v3584_v5  ;;  %v3883_v5 = vadd.f32 %v12597_v56, %v3864_v55  ;;  %vm3713_vm7 = vmor %vm3711_vm6, %vm3712_vm5 }
 0x7ab   : > { %v3846_v17 = vmul.f32 %v3704_v14, %v12487_v31  ;;  %v3707_v34 = vmul.f32 %v10135_v36, %v3706_v27  ;;  %vm3721_vm9 = vweird.f32 %v3672_v44 }
 0x7ac   : > { %v3616_v26 = vmul.f32 %v12588_v10, %v12588_v10 }
 0x7ad   : > { %v3865_v28 = vmul.f32 %v12583_v51, %v3846_v17  ;;  %v3708_v52 = vmul.f32 0.5, %v3707_v34  ;;  %v3550_v45 = vpop.xlane.xlu0 %3549 }
 0x7ae   : > { %v3630_v8 = vpop.xlane.xlu1 %3629  ;;  %v3569_v16 = vmul.f32 0.015625, %v3550_v45  ;;  %3643 = vadd.xlane.f32.xlu0 %v3616_v26 }
 0x7af   : > { %v3709_v42 = vsub.f32 1.5, %v3708_v52  ;;  %v3657_v31 = vmul.f32 0.015625, %v3630_v8  ;;  %v3884_v13 = vadd.f32 %v12597_v56, %v3865_v28 }
 0x7b0   : > { %v10137_v62 = vpop.eup %10136  ;;  %v3585_v4 = vsub.f32 %v12519_v54, %v3569_v16 }
 0x7b1   : > { %v3710_v27 = vmul.f32 %v10135_v36, %v3709_v42  ;;  %v3716_v14 = vmul.f32 %v10137_v62, %v3672_v44  ;;  %v3673_v29 = vadd.f32 1e-05, %v3657_v31  ;;  %v3899_v15 = vpack.c.bf16 %v3884_v13, %v3883_v5 }
 0x7b2   : > { %v12604_v17 = vmul.f32 %v14842_v60, %v3585_v4  ;;  %vm3722_vm8 = vweird.f32 %v10137_v62 }
 0x7b3   : > { %v3717_v34 = vmul.f32 %v10137_v62, %v3716_v14  ;;  %10138 = vrsqrt.f32 %v3673_v29  ;;  %4017 = vmatmul.bf16.vlgmr.msra.gmra.mxu1 %v3899_v15  ;;  %4066 = vmatmul.bf16.vlgmr.msra.gmra.mxu2 %v3899_v15  ;;  %v3714_v28 = vsel %vm3713_vm7, %v10135_v36, %v3710_v27  ;;  %vm3723_vm10 = vmor %vm3721_vm9, %vm3722_vm8  ;;  %vm3731_vm12 = vweird.f32 %v3673_v29 }
 0x7b4   : > { %v3617_v26 = vmul.f32 %v12604_v17, %v12604_v17  ;;  %v3847_v31 = vmul.f32 %v3714_v28, %v12499_v23 }
 0x7b5   : > { %v3718_v52 = vmul.f32 0.5, %v3717_v34 }
 0x7b6   : > { %v3632_v55 = vpop.xlane.xlu2 %3631  ;;  %v3552_v45 = vpop.xlane.xlu1 %3551  ;;  %3645 = vadd.xlane.f32.xlu1 %v3617_v26  ;;  %v3866_v26 = vmul.f32 %v12583_v51, %v3847_v31 }
 0x7b7   : > { %v3719_v8 = vsub.f32 1.5, %v3718_v52  ;;  %v3658_v16 = vmul.f32 0.015625, %v3632_v55  ;;  %v3570_v42 = vmul.f32 0.015625, %v3552_v45 }
 0x7b9   : > { %v10139_v3 = vpop.eup %10138  ;;  %v3720_v13 = vmul.f32 %v10137_v62, %v3719_v8  ;;  %v3674_v4 = vadd.f32 1e-05, %v3658_v16  ;;  %v3586_v15 = vsub.f32 %v12531_v33, %v3570_v42 }
 0x7ba   : > { %v3726_v5 = vmul.f32 %v10139_v3, %v3673_v29  ;;  %vm3732_vm11 = vweird.f32 %v10139_v3 }
 0x7bb   : > { %v3724_v14 = vsel %vm3723_vm10, %v10137_v62, %v3720_v13  ;;  %10140 = vrsqrt.f32 %v3674_v4  ;;  %v12611_v36 = vmul.f32 %v14842_v60, %v3586_v15  ;;  %v3885_v62 = vadd.f32 %v12597_v56, %v3866_v26  ;;  %vm3733_vm13 = vmor %vm3731_vm12, %vm3732_vm11 }
 0x7bc   : > { %v3727_v27 = vmul.f32 %v10139_v3, %v3726_v5  ;;  %v3848_v34 = vmul.f32 %v3724_v14, %v12511_v61  ;;  %vm3741_vm14 = vweird.f32 %v3674_v4 }
 0x7bd   : > { %v3618_v23 = vmul.f32 %v12611_v36, %v12611_v36 }
 0x7be   : > { %v3728_v28 = vmul.f32 0.5, %v3727_v27  ;;  %v3867_v52 = vmul.f32 %v12583_v51, %v3848_v34 }
 0x7bf   : > { %v3634_v44 = vpop.xlane.xlu2 %3633  ;;  %3647 = vadd.xlane.f32.xlu2 %v3618_v23 }
 0x7c0   : > { %v3659_v55 = vmul.f32 0.015625, %v3634_v44  ;;  %v3729_v45 = vsub.f32 1.5, %v3728_v28  ;;  %v3886_v8 = vadd.f32 %v12597_v56, %v3867_v52 }
 0x7c1   : > { %v10141_v16 = vpop.eup %10140 }
 0x7c2   : > { %v3675_v42 = vadd.f32 1e-05, %v3659_v55  ;;  %v3730_v13 = vmul.f32 %v10139_v3, %v3729_v45  ;;  %v3736_v61 = vmul.f32 %v10141_v16, %v3674_v4  ;;  %v3900_v31 = vpack.c.bf16 %v3886_v8, %v3885_v62 }
 0x7c3   : > { %vm3742_vm15 = vweird.f32 %v10141_v16 }
 0x7c4   : > { %10142 = vrsqrt.f32 %v3675_v42  ;;  %v3737_v15 = vmul.f32 %v10141_v16, %v3736_v61  ;;  %4022 = vmatmul.bf16.gmra.mxu1 %v3900_v31  ;;  %4071 = vmatmul.bf16.gmra.mxu2 %v3900_v31  ;;  %v3734_v5 = vsel %vm3733_vm13, %v10139_v3, %v3730_v13  ;;  %vm3743_vm0 = vmor %vm3741_vm14, %vm3742_vm15  ;;  %vm3751_vm2 = vweird.f32 %v3675_v42 }
 0x7c5   : > { %v3849_v55 = vmul.f32 %v3734_v5, %v12523_v39 }
 0x7c6   : > { %v3738_v14 = vmul.f32 0.5, %v3737_v15 }
 0x7c7   : > { %v3636_v27 = vpop.xlane.xlu0 %3635  ;;  %v3868_v31 = vmul.f32 %v12583_v51, %v3849_v55 }
 0x7c8   : > { %v3660_v34 = vmul.f32 0.015625, %v3636_v27  ;;  %v3739_v23 = vsub.f32 1.5, %v3738_v14 }
 0x7c9   : > { %v3554_v26 = vpop.xlane.xlu1 %3553 }
 0x7ca   : > { %v10143_v28 = vpop.eup %10142  ;;  %v3676_v44 = vadd.f32 1e-05, %v3660_v34  ;;  %v3571_v52 = vmul.f32 0.015625, %v3554_v26  ;;  %v3740_v45 = vmul.f32 %v10141_v16, %v3739_v23 }
 0x7cb   : > { %v3746_v62 = vmul.f32 %v10143_v28, %v3675_v42  ;;  %vm3752_vm1 = vweird.f32 %v10143_v28 }
 0x7cc   : > { %10144 = vrsqrt.f32 %v3676_v44  ;;  %v3587_v29 = vsub.f32 %v12553_v35, %v3571_v52  ;;  %v3744_v8 = vsel %vm3743_vm0, %v10141_v16, %v3740_v45  ;;  %v3887_v16 = vadd.f32 %v12597_v56, %v3868_v31  ;;  %vm3753_vm3 = vmor %vm3751_vm2, %vm3752_vm1 }
 0x7cd   : > { %v3747_v3 = vmul.f32 %v10143_v28, %v3746_v62  ;;  %v3850_v61 = vmul.f32 %v3744_v8, %v12535_v47  ;;  %vm3761_vm5 = vweird.f32 %v3676_v44 }
 0x7ce   : > { %v12623_v13 = vmul.f32 %v14842_v60, %v3587_v29 }
 0x7cf   : > { %v3748_v15 = vmul.f32 0.5, %v3747_v3  ;;  %v3869_v4 = vmul.f32 %v12583_v51, %v3850_v61 }
 0x7d0   : > { %v3619_v39 = vmul.f32 %v12623_v13, %v12623_v13 }
 0x7d1   : > { %v3749_v5 = vsub.f32 1.5, %v3748_v15  ;;  %v3556_v14 = vpop.xlane.xlu2 %3555  ;;  %v3888_v23 = vadd.f32 %v12597_v56, %v3869_v4 }
 0x7d2   : > { %v10145_v27 = vpop.eup %10144  ;;  %v3572_v34 = vmul.f32 0.015625, %v3556_v14  ;;  %3649 = vadd.xlane.f32.xlu0 %v3619_v39 }
 0x7d3   : > { %v3750_v26 = vmul.f32 %v10143_v28, %v3749_v5  ;;  %v3756_v47 = vmul.f32 %v10145_v27, %v3676_v44  ;;  %v3901_v55 = vpack.c.bf16 %v3888_v23, %v3887_v16  ;;  %vm3762_vm4 = vweird.f32 %v10145_v27  ;;  %v3638_v16 = vpop.xlane.xlu0 %3637 }
 0x7d4   : > { %v3588_v52 = vsub.f32 %v12565_v9, %v3572_v34  ;;  %vm3763_vm6 = vmor %vm3761_vm5, %vm3762_vm4  ;;  %v3661_v23 = vmul.f32 0.015625, %v3638_v16 }
 0x7d5   : > { %v3757_v45 = vmul.f32 %v10145_v27, %v3756_v47  ;;  %4027 = vmatmul.bf16.gmra.mxu1 %v3901_v55  ;;  %4076 = vmatmul.bf16.gmra.mxu2 %v3901_v55  ;;  %v3754_v29 = vsel %vm3753_vm3, %v10143_v28, %v3750_v26 }
 0x7d6   : > { %v12634_v62 = vmul.f32 %v14842_v60, %v3588_v52  ;;  %v3851_v31 = vmul.f32 %v3754_v29, %v12543_v1  ;;  %v3677_v1 = vadd.f32 1e-05, %v3661_v23  ;;  %v9678_v29 = vld [vmem:[#allocation19 + $0x78] sm:$0xff] }
 0x7d7   : > { %v3758_v8 = vmul.f32 0.5, %v3757_v45  ;;  %4588 = vmatpush.bf16.msra.mxu0 %v9678_v29 }
 0x7d8   : > { %v3620_v3 = vmul.f32 %v12634_v62, %v12634_v62  ;;  %v3870_v4 = vmul.f32 %v12583_v51, %v3851_v31  ;;  %10146 = vrsqrt.f32 %v3677_v1  ;;  %v9669_v31 = vld [vmem:[#allocation19 + $0x30] sm:$0xff]  ;;  %vm3771_vm8 = vweird.f32 %v3677_v1 }
 0x7d9   : > { %v3759_v61 = vsub.f32 1.5, %v3758_v8 }
 0x7da   : > { %3651 = vadd.xlane.f32.xlu1 %v3620_v3  ;;  %v3889_v28 = vadd.f32 %v12597_v56, %v3870_v4 }
 0x7db   : > { %v3760_v15 = vmul.f32 %v10145_v27, %v3759_v61 }
 0x7dd   : > { %v3764_v42 = vsel %vm3763_vm6, %v10145_v27, %v3760_v15  ;;  %v9670_v27 = vld [vmem:[#allocation19 + $0x38] sm:$0xff] }
 0x7de   : > { %v3852_v39 = vmul.f32 %v3764_v42, %v12550_v20  ;;  %v10147_v44 = vpop.eup %10146  ;;  %4539 = vmatpush.bf16.msra.mxu3 %v9670_v27 }
 0x7df   : > { %v3766_v26 = vmul.f32 %v10147_v44, %v3677_v1  ;;  %vm3772_vm7 = vweird.f32 %v10147_v44 }
 0x7e0   : > { %v3871_v5 = vmul.f32 %v12583_v51, %v3852_v39  ;;  %vm3773_vm9 = vmor %vm3771_vm8, %vm3772_vm7 }
 0x7e1   : > { %v3767_v47 = vmul.f32 %v10147_v44, %v3766_v26  ;;  %v9667_v26 = vld [vmem:[#allocation19 + $0x20] sm:$0xff] }
 0x7e2   : > { %v3890_v14 = vadd.f32 %v12597_v56, %v3871_v5  ;;  %4540 = vmatpush.bf16.msra.mxu3 %v9669_v31  ;;  %v9668_v5 = vld [vmem:[#allocation19 + $0x28] sm:$0xff] }
 0x7e3   : > { %v3768_v45 = vmul.f32 0.5, %v3767_v47 }
 0x7e4   : > { %v3902_v34 = vpack.c.bf16 %v3890_v14, %v3889_v28  ;;  %v9677_v14 = vld [vmem:[#allocation19 + $0x70] sm:$0xff] }
 0x7e5   : > { %v3769_v8 = vsub.f32 1.5, %v3768_v45  ;;  %4589 = vmatpush.bf16.msra.mxu0 %v9677_v14  ;;  %v9676_v45 = vld [vmem:[#allocation19 + $0x68] sm:$0xff] }
 0x7e6   : > { %4032 = vmatmul.bf16.gmra.mxu1 %v3902_v34  ;;  %4081 = vmatmul.bf16.gmra.mxu2 %v3902_v34 }
 0x7e7   : > { %v3770_v39 = vmul.f32 %v10147_v44, %v3769_v8  ;;  %4541 = vmatpush.bf16.msra.mxu3 %v9668_v5 }
 0x7e9   : > { %v3774_v34 = vsel %vm3773_vm9, %v10147_v44, %v3770_v39  ;;  %4590 = vmatpush.bf16.msra.mxu0 %v9676_v45  ;;  %v9666_v44 = vld [vmem:[#allocation19 + $0x18] sm:$0xff]  ;;  %v9664_v45 = vld [vmem:[#allocation19 + $0x8] sm:$0xff] }
 0x7eb   : > { %4542 = vmatpush.bf16.msra.mxu3 %v9667_v26 }
 0x7ef   : > { %4543 = vmatpush.bf16.msra.mxu3 %v9666_v44 }
 0x810   : > { %v3640_v20 = vpop.xlane.xlu1 %3639 }
 0x811   : > { %v3662_v52 = vmul.f32 0.015625, %v3640_v20 }
 0x813   : > { %v3678_v55 = vadd.f32 1e-05, %v3662_v52  ;;  %v3853_v52 = vmul.f32 %v3774_v34, %v12562_v40  ;;  %v9675_v40 = vld [vmem:[#allocation19 + $0x60] sm:$0xff] }
 0x814   : > { %4591 = vmatpush.bf16.msra.mxu0 %v9675_v40  ;;  %v9663_v40 = vld [vmem:[#allocation19] sm:$0xff] }
 0x815   : > { %10148 = vrsqrt.f32 %v3678_v55  ;;  %vm3781_vm11 = vweird.f32 %v3678_v55  ;;  %v3872_v39 = vmul.f32 %v12583_v51, %v3853_v52 }
 0x818   : > { %v3642_v3 = vpop.xlane.xlu2 %3641 }
 0x819   : > { %v3663_v61 = vmul.f32 0.015625, %v3642_v3 }
 0x81b   : > { %v10149_v15 = vpop.eup %10148  ;;  %v12644_v42 = vadd.f32 1e-05, %v3663_v61 }
 0x81c   : > { %v3776_v4 = vmul.f32 %v10149_v15, %v3678_v55  ;;  %vm3782_vm10 = vweird.f32 %v10149_v15 }
 0x81d   : > { %10150 = vrsqrt.f32 %v12644_v42  ;;  %vm3783_vm12 = vmor %vm3781_vm11, %vm3782_vm10  ;;  %vm3791_vm15 = vweird.f32 %v12644_v42 }
 0x81e   : > { %v3777_v28 = vmul.f32 %v10149_v15, %v3776_v4 }
 0x820   : > { %v3778_v16 = vmul.f32 0.5, %v3777_v28  ;;  %v9665_v28 = vld [vmem:[#allocation19 + $0x10] sm:$0xff] }
 0x821   : > { %v3644_v23 = vpop.xlane.xlu0 %3643  ;;  %4544 = vmatpush.bf16.msra.mxu3 %v9665_v28 }
 0x822   : > { %v3779_v27 = vsub.f32 1.5, %v3778_v16  ;;  %v3664_v47 = vmul.f32 0.015625, %v3644_v23  ;;  %v3891_v16 = vadd.f32 %v12597_v56, %v3872_v39  ;;  %v9674_v23 = vld [vmem:[#allocation19 + $0x58] sm:$0xff] }
 0x823   : > { %v12647_v20 = vpop.eup %10150  ;;  %4592 = vmatpush.bf16.msra.mxu0 %v9674_v23 }
 0x824   : > { %v3780_v29 = vmul.f32 %v10149_v15, %v3779_v27  ;;  %v3786_v1 = vmul.f32 %v12647_v20, %v12644_v42  ;;  %v3680_v8 = vadd.f32 1e-05, %v3664_v47  ;;  %vm3792_vm13 = vweird.f32 %v12647_v20 }
 0x825   : > { %4545 = vmatpush.bf16.msra.mxu3 %v9664_v45  ;;  %vm12669_vm14 = vmor %vm3791_vm15, %vm3792_vm13 }
 0x826   : > { %v3784_v3 = vsel %vm3783_vm12, %v10149_v15, %v3780_v29  ;;  %v3787_v61 = vmul.f32 %v12647_v20, %v3786_v1  ;;  %10152 = vrsqrt.f32 %v3680_v8  ;;  %vm3801_vm1 = vweird.f32 %v3680_v8 }
 0x827   : > { %v3854_v31 = vmul.f32 %v3784_v3, %v12573_v7  ;;  %v3923_v7 = vld [vmem:[%s14858_s18] sm:$0x3]  ;;  %v9673_v3 = vld [vmem:[#allocation19 + $0x50] sm:$0xff] }
 0x828   : > { %v3788_v4 = vmul.f32 0.5, %v3787_v61  ;;  %v12666_v1 = vperm.slane %v3923_v7, 0  ;;  %4593 = vmatpush.bf16.msra.mxu0 %v9673_v3 }
 0x829   : > { %v3646_v5 = vpop.xlane.xlu1 %3645  ;;  %v3873_v55 = vmul.f32 %v12583_v51, %v3854_v31  ;;  %4546 = vmatpush.bf16.msra.mxu3 %v9663_v40 }
 0x82a   : > { %v3789_v14 = vsub.f32 1.5, %v3788_v4  ;;  %v3665_v34 = vmul.f32 0.015625, %v3646_v5 }
 0x82b   : > { %v3892_v15 = vadd.f32 %v12597_v56, %v3873_v55 }
 0x82c   : > { %v10153_v26 = vpop.eup %10152  ;;  %v12661_v27 = vadd.f32 1e-05, %v3665_v34  ;;  %v3790_v29 = vmul.f32 %v12647_v20, %v3789_v14  ;;  %v9672_v14 = vld [vmem:[#allocation19 + $0x48] sm:$0xff] }
 0x82d   : > { %v3796_v47 = vmul.f32 %v10153_v26, %v3680_v8  ;;  %v3903_v52 = vpack.c.bf16 %v3892_v15, %v3891_v16  ;;  %vm3802_vm0 = vweird.f32 %v10153_v26  ;;  %v12683_v15 = vperm.slane %v3923_v7, 1  ;;  %4594 = vmatpush.bf16.msra.mxu0 %v9672_v14 }
 0x82e   : > { %10154 = vrsqrt.f32 %v12661_v27  ;;  %v3794_v4 = vsel %vm12669_vm14, %v12647_v20, %v3790_v29  ;;  %vm3803_vm2 = vmor %vm3801_vm1, %vm3802_vm0  ;;  %vm3811_vm4 = vweird.f32 %v12661_v27 }
 0x82f   : > { %v3797_v44 = vmul.f32 %v10153_v26, %v3796_v47  ;;  %4037 = vmatmul.bf16.gmra.mxu1 %v3903_v52  ;;  %4086 = vmatmul.bf16.gmra.mxu2 %v3903_v52  ;;  %v3855_v52 = vmul.f32 %v3794_v4, %v12579_v50 }
 0x830   : > { %v4018_v39 = vpop.f32.mrf.mxu1 }
 0x831   : > { %v3798_v31 = vmul.f32 0.5, %v3797_v44  ;;  %v12677_v5 = vadd.f32 %v4018_v39, %v12666_v1  ;;  %v9671_v44 = vld [vmem:[#allocation19 + $0x40] sm:$0xff]  ;;  %v3874_v50 = vmul.f32 %v12583_v51, %v3855_v52 }
 0x832   : > { %v3648_v55 = vpop.xlane.xlu2 %3647  ;;  %4595 = vmatpush.bf16.msra.mxu0 %v9671_v44 }
 0x833   : > { %v3799_v28 = vsub.f32 1.5, %v3798_v31  ;;  %v3666_v42 = vmul.f32 0.015625, %v3648_v55  ;;  %v4107_v16 = vmul.f32 %v12677_v5, %v12677_v5 }
 0x834   : > { %v12679_v34 = vpop.eup %10154 }
 0x835   : > { %v3800_v23 = vmul.f32 %v10153_v26, %v3799_v28  ;;  %v3806_v20 = vmul.f32 %v12679_v34, %v12661_v27  ;;  %v12687_v47 = vadd.f32 1e-05, %v3666_v42  ;;  %v4139_v45 = vmul.f32 %v4107_v16, %v12677_v5 }
 0x836   : > { %v4067_v7 = vpop.f32.mrf.mxu2  ;;  %vm3812_vm3 = vweird.f32 %v12679_v34 }
 0x837   : > { %v3804_v29 = vsel %vm3803_vm2, %v10153_v26, %v3800_v23  ;;  %v3807_v8 = vmul.f32 %v12679_v34, %v3806_v20  ;;  %10156 = vrsqrt.f32 %v12687_v47  ;;  %v4171_v3 = vmul.f32 0.044715, %v4139_v45  ;;  %vm12715_vm5 = vmor %vm3811_vm4, %vm3812_vm3 }
 0x838   : > { %v12694_v61 = vadd.f32 %v4067_v7, %v12683_v15  ;;  %v3856_v31 = vmul.f32 %v3804_v29, %v12588_v10  ;;  %v4020_v40 = vpop.f32.mrf.mxu1  ;;  %v3893_v45 = vadd.f32 %v12597_v56, %v3874_v50  ;;  %vm3821_vm7 = vweird.f32 %v12687_v47 }
 0x839   : > { %v3808_v39 = vmul.f32 0.5, %v3807_v8  ;;  %v4203_v4 = vadd.f32 %v4171_v3, %v12677_v5  ;;  %v12702_v55 = vadd.f32 %v4020_v40, %v12666_v1 }
 0x83a   : > { %v4108_v26 = vmul.f32 %v12694_v61, %v12694_v61  ;;  %v3875_v28 = vmul.f32 %v12583_v51, %v3856_v31 }
 0x83b   : > { %v3809_v42 = vsub.f32 1.5, %v3808_v39  ;;  %v4235_v14 = vmul.f32 0.7978846, %v4203_v4  ;;  %v4109_v10 = vmul.f32 %v12702_v55, %v12702_v55 }
 0x83c   : > { %v4140_v16 = vmul.f32 %v4108_v26, %v12694_v61  ;;  %v3894_v23 = vadd.f32 %v12597_v56, %v3875_v28 }
 0x83d   : > { %v10157_v20 = vpop.eup %10156  ;;  %v3810_v52 = vmul.f32 %v12679_v34, %v3809_v42  ;;  %v4141_v7 = vmul.f32 %v4109_v10, %v12702_v55  ;;  %10158 = vtanh.f32 %v4235_v14 }
 0x83e   : > { %v3816_v29 = vmul.f32 %v10157_v20, %v12687_v47  ;;  %v4172_v8 = vmul.f32 0.044715, %v4140_v16  ;;  %v4069_v44 = vpop.f32.mrf.mxu2  ;;  %v3904_v3 = vpack.c.bf16 %v3894_v23, %v3893_v45  ;;  %vm3822_vm6 = vweird.f32 %v10157_v20 }
 0x83f   : > { %v12721_v4 = vadd.f32 %v4069_v44, %v12683_v15  ;;  %v3814_v50 = vsel %vm12715_vm5, %v12679_v34, %v3810_v52  ;;  %v4173_v27 = vmul.f32 0.044715, %v4141_v7  ;;  %vm3823_vm8 = vmor %vm3821_vm7, %vm3822_vm6 }
 0x840   : > { %v3817_v39 = vmul.f32 %v10157_v20, %v3816_v29  ;;  %v4204_v40 = vadd.f32 %v4172_v8, %v12694_v61  ;;  %4042 = vmatmul.bf16.gmra.mxu1 %v3904_v3  ;;  %4091 = vmatmul.bf16.gmra.mxu2 %v3904_v3  ;;  %v3857_v7 = vmul.f32 %v3814_v50, %v12604_v17 }
 0x841   : > { %v4023_v26 = vpop.f32.mrf.mxu1  ;;  %v4110_v16 = vmul.f32 %v12721_v4, %v12721_v4  ;;  %v4205_v10 = vadd.f32 %v4173_v27, %v12702_v55 }
 0x842   : > { %v3818_v28 = vmul.f32 0.5, %v3817_v39  ;;  %v4236_v42 = vmul.f32 0.7978846, %v4204_v40  ;;  %v12729_v14 = vadd.f32 %v4023_v26, %v12666_v1 }
 0x843   : > { %v4142_v45 = vmul.f32 %v4110_v16, %v12721_v4  ;;  %v4237_v29 = vmul.f32 0.7978846, %v4205_v10  ;;  %v10159_v44 = vpop.eup %10158  ;;  %v3876_v10 = vmul.f32 %v12583_v51, %v3857_v7 }
 0x844   : > { %v3819_v23 = vsub.f32 1.5, %v3818_v28  ;;  %v4111_v34 = vmul.f32 %v12729_v14, %v12729_v14  ;;  %10160 = vtanh.f32 %v4236_v42  ;;  %v4299_v17 = vadd.f32 1.0, %v10159_v44 }
 0x845   : > { %v3650_v52 = vpop.xlane.xlu0 %3649  ;;  %v4174_v31 = vmul.f32 0.044715, %v4142_v45  ;;  %10162 = vtanh.f32 %v4237_v29 }
 0x846   : > { %v3667_v8 = vmul.f32 0.015625, %v3650_v52  ;;  %v3820_v3 = vmul.f32 %v10157_v20, %v3819_v23  ;;  %v4143_v39 = vmul.f32 %v4111_v34, %v12729_v14 }
 0x847   : > { %v4072_v27 = vpop.f32.mrf.mxu2  ;;  %v4206_v28 = vadd.f32 %v4174_v31, %v12721_v4  ;;  %v4331_v31 = vmul.f32 0.5, %v4299_v17 }
 0x848   : > { %v12738_v40 = vadd.f32 1e-05, %v3667_v8  ;;  %v3824_v26 = vsel %vm3823_vm8, %v10157_v20, %v3820_v3  ;;  %v4175_v42 = vmul.f32 0.044715, %v4143_v39  ;;  %v12742_v16 = vadd.f32 %v4072_v27, %v12683_v15 }
 0x849   : > { %v4025_v50 = vpop.f32.mrf.mxu1  ;;  %v3858_v47 = vmul.f32 %v3824_v26, %v12611_v36  ;;  %v4238_v23 = vmul.f32 0.7978846, %v4206_v28  ;;  %v3895_v27 = vadd.f32 %v12597_v56, %v3876_v10 }
 0x84a   : > { %10164 = vrsqrt.f32 %v12738_v40  ;;  %v4207_v45 = vadd.f32 %v4175_v42, %v12729_v14  ;;  %v4112_v20 = vmul.f32 %v12742_v16, %v12742_v16  ;;  %v12751_v34 = vadd.f32 %v4025_v50, %v12666_v1  ;;  %v10161_v52 = vpop.eup %10160 }
 0x84b   : > { %v3877_v29 = vmul.f32 %v12583_v51, %v3858_v47  ;;  %10166 = vtanh.f32 %v4238_v23  ;;  %v10163_v3 = vpop.eup %10162  ;;  %v4300_v28 = vadd.f32 1.0, %v10161_v52  ;;  %vm3831_vm10 = vweird.f32 %v12738_v40 }
 0x84c   : > { %v4239_v8 = vmul.f32 0.7978846, %v4207_v45  ;;  %v4144_v44 = vmul.f32 %v4112_v20, %v12742_v16  ;;  %v4113_v36 = vmul.f32 %v12751_v34, %v12751_v34  ;;  %v4301_v42 = vadd.f32 1.0, %v10163_v3 }
 0x84d   : > { %v3652_v7 = vpop.xlane.xlu1 %3651  ;;  %v3896_v26 = vadd.f32 %v12597_v56, %v3877_v29  ;;  %v4363_v29 = vmul.f32 %v4331_v31, %v12677_v5 }
 0x84e   : > { %v3668_v39 = vmul.f32 0.015625, %v3652_v7  ;;  %v4176_v50 = vmul.f32 0.044715, %v4144_v44  ;;  %v4145_v47 = vmul.f32 %v4113_v36, %v12751_v34  ;;  %v4333_v24 = vmul.f32 0.5, %v4301_v42 }
 0x84f   : > { %v4074_v20 = vpop.f32.mrf.mxu2  ;;  %v3905_v11 = vpack.c.bf16 %v3896_v26, %v3895_v27  ;;  %10168 = vtanh.f32 %v4239_v8  ;;  %v4332_v7 = vmul.f32 0.5, %v4300_v28 }
 0x850   : > { %v12760_v23 = vpop.eup %10164  ;;  %v12762_v45 = vadd.f32 1e-05, %v3668_v39  ;;  %v4208_v10 = vadd.f32 %v4176_v50, %v12742_v16  ;;  %v4177_v52 = vmul.f32 0.044715, %v4145_v47  ;;  %v12770_v44 = vadd.f32 %v4074_v20, %v12683_v15 }
 0x851   : > { %v3826_v17 = vmul.f32 %v12760_v23, %v12738_v40  ;;  %4047 = vmatmul.bf16.gmra.mxu1 %v3905_v11  ;;  %4096 = vmatmul.bf16.gmra.mxu2 %v3905_v11  ;;  %v10167_v36 = vpop.eup %10166  ;;  %v4365_v3 = vmul.f32 %v4333_v24, %v12702_v55  ;;  %vm3832_vm9 = vweird.f32 %v12760_v23 }
 0x852   : > { %10170 = vrsqrt.f32 %v12762_v45  ;;  %v4240_v39 = vmul.f32 0.7978846, %v4208_v10  ;;  %v4028_v27 = vpop.f32.mrf.mxu1  ;;  %v4302_v26 = vadd.f32 1.0, %v10167_v36  ;;  %v4209_v42 = vadd.f32 %v4177_v52, %v12751_v34  ;;  %vm12790_vm11 = vmor %vm3831_vm10, %vm3832_vm9 }
 0x853   : > { %v3827_v8 = vmul.f32 %v12760_v23, %v3826_v17  ;;  %v4114_v5 = vmul.f32 %v12770_v44, %v12770_v44  ;;  %v12778_v31 = vadd.f32 %v4028_v27, %v12666_v1  ;;  %v4395_v50 = vpack.c.bf16 %v4365_v3, %v4363_v29 }
 0x854   : > { %v4334_v11 = vmul.f32 0.5, %v4302_v26  ;;  %v4241_v20 = vmul.f32 0.7978846, %v4209_v42  ;;  %v4364_v17 = vmul.f32 %v4332_v7, %v12694_v61  ;;  %10172 = vtanh.f32 %v4240_v39 }
 0x855   : > { %v3828_v47 = vmul.f32 0.5, %v3827_v8  ;;  %v4146_v28 = vmul.f32 %v4114_v5, %v12770_v44  ;;  %v4115_v24 = vmul.f32 %v12778_v31, %v12778_v31  ;;  %v10169_v55 = vpop.eup %10168  ;;  %4547 = vmatmul.bf16.vlgmr.msra.gmra.mxu3 %v4395_v50  ;;  %vm3841_vm13 = vweird.f32 %v12762_v45 }
 0x856   : > { %v4366_v36 = vmul.f32 %v4334_v11, %v12721_v4  ;;  %10174 = vtanh.f32 %v4241_v20 }
 0x857   : > { %v3829_v10 = vsub.f32 1.5, %v3828_v47  ;;  %v4178_v29 = vmul.f32 0.044715, %v4146_v28  ;;  %v4147_v3 = vmul.f32 %v4115_v24, %v12778_v31  ;;  %v4303_v47 = vadd.f32 1.0, %v10169_v55 }
 0x858   : > { %v10171_v52 = vpop.eup %10170  ;;  %v4077_v26 = vpop.f32.mrf.mxu2  ;;  %v4396_v61 = vpack.c.bf16 %v4366_v36, %v4364_v17 }
 0x859   : > { %v3830_v8 = vmul.f32 %v12760_v23, %v3829_v10  ;;  %v3836_v27 = vmul.f32 %v10171_v52, %v12762_v45  ;;  %v4210_v39 = vadd.f32 %v4178_v29, %v12770_v44  ;;  %v4179_v42 = vmul.f32 0.044715, %v4147_v3 }
 0x85a   : > { %v12796_v4 = vadd.f32 %v4077_v26, %v12683_v15  ;;  %v4030_v40 = vpop.f32.mrf.mxu1  ;;  %4596 = vmatmul.bf16.vlgmr.msra.gmra.mxu0 %v4396_v61  ;;  %v10173_v17 = vpop.eup %10172  ;;  %vm3842_vm12 = vweird.f32 %v10171_v52 }
 0x85b   : > { %v3834_v5 = vsel %vm12790_vm11, %v12760_v23, %v3830_v8  ;;  %v3837_v50 = vmul.f32 %v10171_v52, %v3836_v27  ;;  %v4242_v11 = vmul.f32 0.7978846, %v4210_v39  ;;  %v4211_v20 = vadd.f32 %v4179_v42, %v12778_v31  ;;  %vm12814_vm15 = vmor %vm3841_vm13, %vm3842_vm12 }
 0x85c   : > { %v4116_v28 = vmul.f32 %v12796_v4, %v12796_v4  ;;  %v12805_v24 = vadd.f32 %v4030_v40, %v12666_v1  ;;  %v10175_v36 = vpop.eup %10174  ;;  %v4335_v27 = vmul.f32 0.5, %v4303_v47  ;;  %v3859_v26 = vmul.f32 %v3834_v5, %v12623_v13 }
 0x85d   : > { %v3838_v10 = vmul.f32 0.5, %v3837_v50  ;;  %v4243_v29 = vmul.f32 0.7978846, %v4211_v20  ;;  %10176 = vtanh.f32 %v4242_v11  ;;  %v4305_v8 = vadd.f32 1.0, %v10175_v36 }
 0x85e   : > { %v4148_v23 = vmul.f32 %v4116_v28, %v12796_v4  ;;  %v4117_v55 = vmul.f32 %v12805_v24, %v12805_v24  ;;  %v4304_v40 = vadd.f32 1.0, %v10173_v17  ;;  %v4367_v45 = vmul.f32 %v4335_v27, %v12729_v14 }
 0x85f   : > { %v3839_v3 = vsub.f32 1.5, %v3838_v10  ;;  %v4337_v50 = vmul.f32 0.5, %v4305_v8  ;;  %10178 = vtanh.f32 %v4243_v29  ;;  %v3878_v10 = vmul.f32 %v12583_v51, %v3859_v26 }
 0x860   : > { %v4180_v7 = vmul.f32 0.044715, %v4148_v23  ;;  %v4149_v39 = vmul.f32 %v4117_v55, %v12805_v24  ;;  %v4079_v42 = vpop.f32.mrf.mxu2 }
 0x861   : > { %v3840_v61 = vmul.f32 %v10171_v52, %v3839_v3  ;;  %v12820_v13 = vadd.f32 %v4079_v42, %v12683_v15  ;;  %v4369_v17 = vmul.f32 %v4337_v50, %v12751_v34 }
 0x862   : > { %v4212_v11 = vadd.f32 %v4180_v7, %v12796_v4  ;;  %v4181_v47 = vmul.f32 0.044715, %v4149_v39  ;;  %v4336_v39 = vmul.f32 0.5, %v4304_v40 }
 0x863   : > { %v3844_v5 = vsel %vm12814_vm15, %v10171_v52, %v3840_v61  ;;  %v4033_v28 = vpop.f32.mrf.mxu1  ;;  %v10177_v36 = vpop.eup %10176  ;;  %v4118_v55 = vmul.f32 %v12820_v13, %v12820_v13  ;;  %v4397_v8 = vpack.c.bf16 %v4369_v17, %v4367_v45 }
 0x864   : > { %v4244_v23 = vmul.f32 0.7978846, %v4212_v11  ;;  %v4213_v29 = vadd.f32 %v4181_v47, %v12805_v24  ;;  %v12831_v3 = vadd.f32 %v4033_v28, %v12666_v1  ;;  %v3860_v52 = vmul.f32 %v3844_v5, %v12634_v62 }
 0x865   : > { %v4306_v7 = vadd.f32 1.0, %v10177_v36  ;;  %v4150_v34 = vmul.f32 %v4118_v55, %v12820_v13  ;;  %4552 = vmatmul.bf16.gmra.mxu3 %v4397_v8  ;;  %v10179_v42 = vpop.eup %10178  ;;  %v3897_v62 = vadd.f32 %v12597_v56, %v3878_v10  ;;  %v4368_v47 = vmul.f32 %v4336_v39, %v12742_v16 }
 0x866   : > { %v4245_v14 = vmul.f32 0.7978846, %v4213_v29  ;;  %v4119_v27 = vmul.f32 %v12831_v3, %v12831_v3  ;;  %10180 = vtanh.f32 %v4244_v23  ;;  %v3879_v26 = vmul.f32 %v12583_v51, %v3860_v52 }
 0x867   : > { %v4338_v61 = vmul.f32 0.5, %v4306_v7  ;;  %v4182_v50 = vmul.f32 0.044715, %v4150_v34  ;;  %v4307_v29 = vadd.f32 1.0, %v10179_v42 }
 0x868   : > { %v4151_v20 = vmul.f32 %v4119_v27, %v12831_v3  ;;  %10182 = vtanh.f32 %v4245_v14  ;;  %v3898_v40 = vadd.f32 %v12597_v56, %v3879_v26 }
 0x869   : > { %v4082_v11 = vpop.f32.mrf.mxu2  ;;  %v4370_v5 = vmul.f32 %v4338_v61, %v12770_v44  ;;  %v4214_v28 = vadd.f32 %v4182_v50, %v12820_v13  ;;  %v4339_v34 = vmul.f32 0.5, %v4307_v29 }
 0x86a   : > { %v4183_v45 = vmul.f32 0.044715, %v4151_v20  ;;  %v12845_v51 = vadd.f32 %v4082_v11, %v12683_v15  ;;  %v3906_v36 = vpack.c.bf16 %v3898_v40, %v3897_v62 }
 0x86b   : > { %v4035_v17 = vpop.f32.mrf.mxu1  ;;  %v4398_v23 = vpack.c.bf16 %v4370_v5, %v4368_v47  ;;  %v4246_v55 = vmul.f32 0.7978846, %v4214_v28  ;;  %v4371_v40 = vmul.f32 %v4339_v34, %v12778_v31 }
 0x86c   : > { %v4215_v8 = vadd.f32 %v4183_v45, %v12831_v3  ;;  %v4120_v56 = vmul.f32 %v12845_v51, %v12845_v51  ;;  %v4036_v16 = vadd.f32 %v4035_v17, %v12666_v1  ;;  %v10181_v10 = vpop.eup %10180  ;;  %4052 = vmatmul.bf16.gmra.mxu1 %v3906_v36  ;;  %4101 = vmatmul.bf16.gmra.mxu2 %v3906_v36 }
 0x86d   : > { %4601 = vmatmul.bf16.gmra.mxu0 %v4398_v23  ;;  %10184 = vtanh.f32 %v4246_v55  ;;  %v4308_v50 = vadd.f32 1.0, %v10181_v10 }
 0x86e   : > { %v10183_v44 = vpop.eup %10182  ;;  %v4247_v52 = vmul.f32 0.7978846, %v4215_v8  ;;  %v4152_v7 = vmul.f32 %v4120_v56, %v12845_v51  ;;  %v4121_v39 = vmul.f32 %v4036_v16, %v4036_v16 }
 0x86f   : > { %v4309_v14 = vadd.f32 1.0, %v10183_v44  ;;  %v4340_v29 = vmul.f32 0.5, %v4308_v50 }
 0x870   : > { %v4184_v27 = vmul.f32 0.044715, %v4152_v7  ;;  %v4153_v26 = vmul.f32 %v4121_v39, %v4036_v16  ;;  %10186 = vtanh.f32 %v4247_v52 }
 0x871   : > { %v4084_v61 = vpop.f32.mrf.mxu2  ;;  %v4341_v42 = vmul.f32 0.5, %v4309_v14  ;;  %v4372_v52 = vmul.f32 %v4340_v29, %v12796_v4 }
 0x872   : > { %v4216_v20 = vadd.f32 %v4184_v27, %v12845_v51  ;;  %v4185_v11 = vmul.f32 0.044715, %v4153_v26  ;;  %v4085_v62 = vadd.f32 %v4084_v61, %v12683_v15 }
 0x873   : > { %v4373_v47 = vmul.f32 %v4341_v42, %v12805_v24  ;;  %v10185_v5 = vpop.eup %10184 }
 0x874   : > { %v4248_v28 = vmul.f32 0.7978846, %v4216_v20  ;;  %v4217_v45 = vadd.f32 %v4185_v11, %v4036_v16  ;;  %v4122_v17 = vmul.f32 %v4085_v62, %v4085_v62  ;;  %v4310_v23 = vadd.f32 1.0, %v10185_v5 }
 0x875   : > { %v4399_v36 = vpack.c.bf16 %v4373_v47, %v4371_v40 }
 0x876   : > { %v4249_v55 = vmul.f32 0.7978846, %v4217_v45  ;;  %v4154_v8 = vmul.f32 %v4122_v17, %v4085_v62  ;;  %10188 = vtanh.f32 %v4248_v28  ;;  %v4342_v56 = vmul.f32 0.5, %v4310_v23  ;;  %v10187_v10 = vpop.eup %10186 }
 0x877   : > { %4557 = vmatmul.bf16.gmra.mxu3 %v4399_v36  ;;  %v4311_v39 = vadd.f32 1.0, %v10187_v10 }
 0x878   : > { %v4186_v44 = vmul.f32 0.044715, %v4154_v8  ;;  %10190 = vtanh.f32 %v4249_v55  ;;  %v4374_v31 = vmul.f32 %v4342_v56, %v12820_v13 }
 0x879   : > { %v4343_v61 = vmul.f32 0.5, %v4311_v39 }
 0x87a   : > { %v4218_v24 = vadd.f32 %v4186_v44, %v4085_v62  ;;  %v4400_v7 = vpack.c.bf16 %v4374_v31, %v4372_v52 }
 0x87b   : > { %v4375_v20 = vmul.f32 %v4343_v61, %v12831_v3 }
 0x87c   : > { %v4250_v14 = vmul.f32 0.7978846, %v4218_v24  ;;  %v10189_v34 = vpop.eup %10188 }
 0x87d   : > { %4606 = vmatmul.bf16.gmra.mxu0 %v4400_v7  ;;  %v4312_v50 = vadd.f32 1.0, %v10189_v34 }
 0x87e   : > { %v10191_v27 = vpop.eup %10190  ;;  %10192 = vtanh.f32 %v4250_v14 }
 0x87f   : > { %v4313_v26 = vadd.f32 1.0, %v10191_v27  ;;  %v4344_v5 = vmul.f32 0.5, %v4312_v50 }
 0x881   : > { %v4345_v42 = vmul.f32 0.5, %v4313_v26  ;;  %v4376_v28 = vmul.f32 %v4344_v5, %v12845_v51 }
 0x883   : > { %v4377_v11 = vmul.f32 %v4345_v42, %v4036_v16 }
 0x884   : > { %v10193_v40 = vpop.eup %10192 }
 0x885   : > { %v4401_v47 = vpack.c.bf16 %v4377_v11, %v4375_v20  ;;  %v4314_v4 = vadd.f32 1.0, %v10193_v40 }
 0x887   : > { %4562 = vmatmul.bf16.gmra.mxu3 %v4401_v47  ;;  %v4346_v13 = vmul.f32 0.5, %v4314_v4 }
 0x889   : > { %v4378_v45 = vmul.f32 %v4346_v13, %v4085_v62 }
 0x88b   : > { %v4402_v17 = vpack.c.bf16 %v4378_v45, %v4376_v28 }
 0x88d   : > { %4611 = vmatmul.bf16.gmra.mxu0 %v4402_v17 }
 0x8ac   : > { %v4038_v36 = vpop.f32.mrf.mxu1 }
 0x8ad   : > { %v4039_v23 = vadd.f32 %v4038_v36, %v12666_v1 }
 0x8af   : > { %v4123_v29 = vmul.f32 %v4039_v23, %v4039_v23 }
 0x8b1   : > { %v4155_v55 = vmul.f32 %v4123_v29, %v4039_v23 }
 0x8b2   : > { %v4087_v8 = vpop.f32.mrf.mxu2 }
 0x8b3   : > { %v4187_v56 = vmul.f32 0.044715, %v4155_v55  ;;  %v12862_v3 = vadd.f32 %v4087_v8, %v12683_v15 }
 0x8b4   : > { %v4040_v16 = vpop.f32.mrf.mxu1 }
 0x8b5   : > { %v4219_v10 = vadd.f32 %v4187_v56, %v4039_v23  ;;  %v4124_v44 = vmul.f32 %v12862_v3, %v12862_v3  ;;  %v4041_v51 = vadd.f32 %v4040_v16, %v12666_v1 }
 0x8b7   : > { %v4251_v62 = vmul.f32 0.7978846, %v4219_v10  ;;  %v4156_v52 = vmul.f32 %v4124_v44, %v12862_v3  ;;  %v4125_v31 = vmul.f32 %v4041_v51, %v4041_v51 }
 0x8b9   : > { %v4188_v24 = vmul.f32 0.044715, %v4156_v52  ;;  %v4157_v7 = vmul.f32 %v4125_v31, %v4041_v51  ;;  %10194 = vtanh.f32 %v4251_v62 }
 0x8ba   : > { %v4089_v39 = vpop.f32.mrf.mxu2 }
 0x8bb   : > { %v4220_v14 = vadd.f32 %v4188_v24, %v12862_v3  ;;  %v4189_v34 = vmul.f32 0.044715, %v4157_v7  ;;  %v4090_v27 = vadd.f32 %v4089_v39, %v12683_v15 }
 0x8bd   : > { %v4252_v26 = vmul.f32 0.7978846, %v4220_v14  ;;  %v4221_v61 = vadd.f32 %v4189_v34, %v4041_v51  ;;  %v4126_v42 = vmul.f32 %v4090_v27, %v4090_v27  ;;  %v4043_v50 = vpop.f32.mrf.mxu1 }
 0x8be   : > { %v12871_v40 = vadd.f32 %v4043_v50, %v12666_v1 }
 0x8bf   : > { %v4253_v20 = vmul.f32 0.7978846, %v4221_v61  ;;  %v4158_v11 = vmul.f32 %v4126_v42, %v4090_v27  ;;  %10196 = vtanh.f32 %v4252_v26  ;;  %v10195_v47 = vpop.eup %10194 }
 0x8c0   : > { %v4127_v5 = vmul.f32 %v12871_v40, %v12871_v40  ;;  %v4315_v17 = vadd.f32 1.0, %v10195_v47 }
 0x8c1   : > { %v4190_v4 = vmul.f32 0.044715, %v4158_v11  ;;  %10198 = vtanh.f32 %v4253_v20 }
 0x8c2   : > { %v4159_v28 = vmul.f32 %v4127_v5, %v12871_v40  ;;  %v4347_v31 = vmul.f32 0.5, %v4315_v17 }
 0x8c3   : > { %v4222_v13 = vadd.f32 %v4190_v4, %v4090_v27  ;;  %v4092_v45 = vpop.f32.mrf.mxu2 }
 0x8c4   : > { %v4191_v29 = vmul.f32 0.044715, %v4159_v28  ;;  %v12877_v55 = vadd.f32 %v4092_v45, %v12683_v15  ;;  %v4379_v50 = vmul.f32 %v4347_v31, %v4039_v23 }
 0x8c5   : > { %v4254_v36 = vmul.f32 0.7978846, %v4222_v13  ;;  %v10197_v8 = vpop.eup %10196  ;;  %v4045_v56 = vpop.f32.mrf.mxu1 }
 0x8c6   : > { %v4223_v10 = vadd.f32 %v4191_v29, %v12871_v40  ;;  %v4128_v44 = vmul.f32 %v12877_v55, %v12877_v55  ;;  %v12883_v62 = vadd.f32 %v4045_v56, %v12666_v1  ;;  %v4316_v34 = vadd.f32 1.0, %v10197_v8 }
 0x8c7   : > { %v10199_v16 = vpop.eup %10198  ;;  %10200 = vtanh.f32 %v4254_v36 }
 0x8c8   : > { %v4317_v52 = vadd.f32 1.0, %v10199_v16  ;;  %v4255_v24 = vmul.f32 0.7978846, %v4223_v10  ;;  %v4160_v7 = vmul.f32 %v4128_v44, %v12877_v55  ;;  %v4129_v39 = vmul.f32 %v12883_v62, %v12883_v62 }
 0x8c9   : > { %v4348_v17 = vmul.f32 0.5, %v4316_v34 }
 0x8ca   : > { %v4349_v14 = vmul.f32 0.5, %v4317_v52  ;;  %v4192_v26 = vmul.f32 0.044715, %v4160_v7  ;;  %v4161_v61 = vmul.f32 %v4129_v39, %v12883_v62  ;;  %10202 = vtanh.f32 %v4255_v24 }
 0x8cb   : > { %v4094_v42 = vpop.f32.mrf.mxu2  ;;  %v4380_v44 = vmul.f32 %v4348_v17, %v12862_v3 }
 0x8cc   : > { %v4381_v20 = vmul.f32 %v4349_v14, %v4041_v51  ;;  %v4224_v47 = vadd.f32 %v4192_v26, %v12877_v55  ;;  %v4193_v4 = vmul.f32 0.044715, %v4161_v61  ;;  %v12891_v5 = vadd.f32 %v4094_v42, %v12683_v15 }
 0x8cd   : > { %v10201_v11 = vpop.eup %10200 }
 0x8ce   : > { %v4048_v13 = vpop.f32.mrf.mxu1  ;;  %v4403_v28 = vpack.c.bf16 %v4381_v20, %v4379_v50  ;;  %v4318_v45 = vadd.f32 1.0, %v10201_v11  ;;  %v4256_v36 = vmul.f32 0.7978846, %v4224_v47  ;;  %v4225_v29 = vadd.f32 %v4193_v4, %v12883_v62 }
 0x8cf   : > { %v4130_v8 = vmul.f32 %v12891_v5, %v12891_v5  ;;  %v12897_v23 = vadd.f32 %v4048_v13, %v12666_v1 }
 0x8d0   : > { %4567 = vmatmul.bf16.gmra.mxu3 %v4403_v28  ;;  %v4350_v51 = vmul.f32 0.5, %v4318_v45  ;;  %v4257_v56 = vmul.f32 0.7978846, %v4225_v29  ;;  %10204 = vtanh.f32 %v4256_v36  ;;  %v10203_v31 = vpop.eup %10202 }
 0x8d1   : > { %v4162_v16 = vmul.f32 %v4130_v8, %v12891_v5  ;;  %v4131_v10 = vmul.f32 %v12897_v23, %v12897_v23  ;;  %v4319_v50 = vadd.f32 1.0, %v10203_v31  ;;  %v12920_v8 = vld [vmem:[%s14867_s29] ss:$0 sm:$0xff]  ;;  %s14935_s29 = sld [smem:[#allocation83_spill]] }
 0x8d2   : > { %v4382_v52 = vmul.f32 %v4350_v51, %v4090_v27  ;;  %10206 = vtanh.f32 %v4257_v56 }
 0x8d3   : > { %v4194_v24 = vmul.f32 0.044715, %v4162_v16  ;;  %v4163_v7 = vmul.f32 %v4131_v10, %v12897_v23  ;;  %v4351_v56 = vmul.f32 0.5, %v4319_v50 }
 0x8d4   : > { %v4097_v39 = vpop.f32.mrf.mxu2  ;;  %v4404_v14 = vpack.c.bf16 %v4382_v52, %v4380_v44 }
 0x8d5   : > { %v4226_v34 = vadd.f32 %v4194_v24, %v12891_v5  ;;  %v4195_v26 = vmul.f32 0.044715, %v4163_v7  ;;  %v12906_v61 = vadd.f32 %v4097_v39, %v12683_v15 }
 0x8d6   : > { %v4050_v42 = vpop.f32.mrf.mxu1  ;;  %4616 = vmatmul.bf16.gmra.mxu0 %v4404_v14  ;;  %v10205_v47 = vpop.eup %10204 }
 0x8d7   : > { %v4258_v20 = vmul.f32 0.7978846, %v4226_v34  ;;  %v4227_v3 = vadd.f32 %v4195_v26, %v12897_v23  ;;  %v4132_v27 = vmul.f32 %v12906_v61, %v12906_v61  ;;  %v12912_v11 = vadd.f32 %v4050_v42, %v12666_v1  ;;  %v4597_v4 = vpop.f32.mrf.mxu0 }
 0x8d8   : > { %v10207_v13 = vpop.eup %10206  ;;  %v4548_v36 = vpop.f32.mrf.mxu3  ;;  %v4320_v24 = vadd.f32 1.0, %v10205_v47  ;;  %v4383_v26 = vmul.f32 %v4351_v56, %v12871_v40 }
 0x8d9   : > { %v4259_v28 = vmul.f32 0.7978846, %v4227_v3  ;;  %v4164_v45 = vmul.f32 %v4132_v27, %v12906_v61  ;;  %v4133_v17 = vmul.f32 %v12912_v11, %v12912_v11  ;;  %10208 = vtanh.f32 %v4258_v20 }
 0x8da   : > { %v4598_v29 = vadd.f32 %v4597_v4, %v4548_v36  ;;  %v4321_v51 = vadd.f32 1.0, %v10207_v13 }
 0x8db   : > { %v4196_v16 = vmul.f32 0.044715, %v4164_v45  ;;  %v4165_v10 = vmul.f32 %v4133_v17, %v12912_v11  ;;  %10210 = vtanh.f32 %v4259_v28  ;;  %v4352_v28 = vmul.f32 0.5, %v4320_v24 }
 0x8dc   : > { %v4637_v44 = vadd.f32 %v4598_v29, %v12423_v30  ;;  %v4099_v52 = vpop.f32.mrf.mxu2  ;;  %v4353_v31 = vmul.f32 0.5, %v4321_v51 }
 0x8dd   : > { %v4228_v7 = vadd.f32 %v4196_v16, %v12906_v61  ;;  %v4197_v39 = vmul.f32 0.044715, %v4165_v10  ;;  %v12926_v14 = vadd.f32 %v4099_v52, %v12683_v15  ;;  %v4384_v16 = vmul.f32 %v4352_v28, %v12877_v55 }
 0x8de   : > { %v12929_v34 = vadd.f32 %v12920_v8, %v4637_v44  ;;  %v4385_v42 = vmul.f32 %v4353_v31, %v12883_v62 }
 0x8df   : > { %v10209_v50 = vpop.eup %10208  ;;  %v4260_v20 = vmul.f32 0.7978846, %v4228_v7  ;;  %v4229_v30 = vadd.f32 %v4197_v39, %v12912_v11  ;;  %v4134_v3 = vmul.f32 %v12926_v14, %v12926_v14  ;;  %v4599_v27 = vpop.f32.mrf.mxu0 }
 0x8e0   : > { %14869 = vst [vmem:[#allocation36_spill] sm:$0xff] %v12929_v34  ;;  %v4677_v47 = vmul.f32 %v14842_v60, %v12929_v34  ;;  %v4405_v4 = vpack.c.bf16 %v4385_v42, %v4383_v26  ;;  %v4322_v13 = vadd.f32 1.0, %v10209_v50  ;;  %v4550_v40 = vpop.f32.mrf.mxu3 }
 0x8e1   : > { %v4261_v45 = vmul.f32 0.7978846, %v4229_v30  ;;  %v4166_v17 = vmul.f32 %v4134_v3, %v12926_v14  ;;  %10212 = vtanh.f32 %v4260_v20  ;;  %v4600_v62 = vadd.f32 %v4599_v27, %v4550_v40  ;;  %v10211_v29 = vpop.eup %10210 }
 0x8e2   : > { %4693 = vadd.xlane.f32.xlu2 %v4677_v47  ;;  %4572 = vmatmul.bf16.gmra.mxu3 %v4405_v4  ;;  %v4354_v36 = vmul.f32 0.5, %v4322_v13  ;;  %v4323_v24 = vadd.f32 1.0, %v10211_v29 }
 0x8e3   : > { %v4198_v51 = vmul.f32 0.044715, %v4166_v17  ;;  %10214 = vtanh.f32 %v4261_v45  ;;  %v4638_v56 = vadd.f32 %v4600_v62, %v12429_v19 }
 0x8e4   : > { %v4386_v10 = vmul.f32 %v4354_v36, %v12891_v5  ;;  %v4355_v30 = vmul.f32 0.5, %v4323_v24 }
 0x8e5   : > { %v4230_v44 = vadd.f32 %v4198_v51, %v12926_v14  ;;  %v12944_v52 = vadd.f32 %v12920_v8, %v4638_v56 }
 0x8e6   : > { %v4406_v31 = vpack.c.bf16 %v4386_v10, %v4384_v16  ;;  %v4387_v45 = vmul.f32 %v4355_v30, %v12897_v23 }
 0x8e7   : > { %14870 = vst [vmem:[#allocation38_spill] sm:$0xff] %v12944_v52  ;;  %v4262_v7 = vmul.f32 0.7978846, %v4230_v44  ;;  %v10213_v39 = vpop.eup %10212  ;;  %v4678_v26 = vmul.f32 %v14842_v60, %v12944_v52 }
 0x8e8   : > { %4621 = vmatmul.bf16.gmra.mxu0 %v4406_v31  ;;  %v4553_v19 = vpop.f32.mrf.mxu3  ;;  %v4324_v27 = vadd.f32 1.0, %v10213_v39 }
 0x8e9   : > { %v10215_v42 = vpop.eup %10214  ;;  %v4053_v50 = vpop.f32.mrf.mxu1  ;;  %10216 = vtanh.f32 %v4262_v7  ;;  %4695 = vadd.xlane.f32.xlu0 %v4678_v26 }
 0x8ea   : > { %v12949_v55 = vadd.f32 %v4053_v50, %v12666_v1  ;;  %v4602_v5 = vpop.f32.mrf.mxu0  ;;  %v4325_v20 = vadd.f32 1.0, %v10215_v42  ;;  %v4356_v29 = vmul.f32 0.5, %v4324_v27 }
 0x8eb   : > { %v4603_v3 = vadd.f32 %v4602_v5, %v4553_v19 }
 0x8ec   : > { %v4135_v47 = vmul.f32 %v12949_v55, %v12949_v55  ;;  %v4357_v4 = vmul.f32 0.5, %v4325_v20  ;;  %v4388_v42 = vmul.f32 %v4356_v29, %v12906_v61 }
 0x8ed   : > { %v4639_v13 = vadd.f32 %v4603_v3, %v12435_v43 }
 0x8ee   : > { %v4167_v28 = vmul.f32 %v4135_v47, %v12949_v55  ;;  %v4389_v17 = vmul.f32 %v4357_v4, %v12912_v11 }
 0x8ef   : > { %v10217_v40 = vpop.eup %10216  ;;  %v12958_v62 = vadd.f32 %v12920_v8, %v4639_v13  ;;  %v4102_v36 = vpop.f32.mrf.mxu2 }
 0x8f0   : > { %v4199_v51 = vmul.f32 0.044715, %v4167_v28  ;;  %v12961_v56 = vadd.f32 %v4102_v36, %v12683_v15  ;;  %v4407_v16 = vpack.c.bf16 %v4389_v17, %v4387_v45  ;;  %v4326_v10 = vadd.f32 1.0, %v10217_v40  ;;  %v4555_v43 = vpop.f32.mrf.mxu3 }
 0x8f1   : > { %14871 = vst [vmem:[#allocation43_spill] sm:$0xff] %v12958_v62  ;;  %v4055_v44 = vpop.f32.mrf.mxu1  ;;  %v4679_v31 = vmul.f32 %v14842_v60, %v12958_v62 }
 0x8f2   : > { %v4231_v23 = vadd.f32 %v4199_v51, %v12949_v55  ;;  %v4136_v11 = vmul.f32 %v12961_v56, %v12961_v56  ;;  %v4056_v24 = vadd.f32 %v4055_v44, %v12666_v1  ;;  %v4604_v7 = vpop.f32.mrf.mxu0  ;;  %4577 = vmatmul.bf16.gmra.mxu3 %v4407_v16  ;;  %v4358_v39 = vmul.f32 0.5, %v4326_v10 }
 0x8f3   : > { %v4605_v26 = vadd.f32 %v4604_v7, %v4555_v43  ;;  %4697 = vadd.xlane.f32.xlu1 %v4679_v31 }
 0x8f4   : > { %v4263_v50 = vmul.f32 0.7978846, %v4231_v23  ;;  %v4168_v19 = vmul.f32 %v4136_v11, %v12961_v56  ;;  %v4137_v5 = vmul.f32 %v4056_v24, %v4056_v24  ;;  %v4390_v20 = vmul.f32 %v4358_v39, %v12926_v14 }
 0x8f5   : > { %v4640_v30 = vadd.f32 %v4605_v26, %v12441_v49 }
 0x8f6   : > { %v4200_v3 = vmul.f32 0.044715, %v4168_v19  ;;  %v4169_v27 = vmul.f32 %v4137_v5, %v4056_v24  ;;  %v4408_v47 = vpack.c.bf16 %v4390_v20, %v4388_v42  ;;  %10218 = vtanh.f32 %v4263_v50 }
 0x8f7   : > { %v12974_v1 = vadd.f32 %v12920_v8, %v4640_v30  ;;  %v4104_v4 = vpop.f32.mrf.mxu2 }
 0x8f8   : > { %v4232_v13 = vadd.f32 %v4200_v3, %v12961_v56  ;;  %v4201_v28 = vmul.f32 0.044715, %v4169_v27  ;;  %v4105_v61 = vadd.f32 %v4104_v4, %v12683_v15  ;;  %4626 = vmatmul.bf16.gmra.mxu0 %v4408_v47 }
 0x8f9   : > { %14872 = vst [vmem:[#allocation45_spill] sm:$0xff] %v12974_v1  ;;  %v4680_v14 = vmul.f32 %v14842_v60, %v12974_v1 }
 0x8fa   : > { %v4558_v45 = vpop.f32.mrf.mxu3  ;;  %v4264_v17 = vmul.f32 0.7978846, %v4232_v13  ;;  %v4233_v49 = vadd.f32 %v4201_v28, %v4056_v24  ;;  %v4138_v40 = vmul.f32 %v4105_v61, %v4105_v61  ;;  %v4607_v36 = vpop.f32.mrf.mxu0 }
 0x8fb   : > { %v4608_v29 = vadd.f32 %v4607_v36, %v4558_v45  ;;  %4699 = vadd.xlane.f32.xlu2 %v4680_v14 }
 0x8fc   : > { %v4265_v51 = vmul.f32 0.7978846, %v4233_v49  ;;  %v4170_v16 = vmul.f32 %v4138_v40, %v4105_v61  ;;  %10220 = vtanh.f32 %v4264_v17  ;;  %v10219_v44 = vpop.eup %10218 }
 0x8fd   : > { %v4641_v10 = vadd.f32 %v4608_v29, %v12447_v25  ;;  %v4327_v7 = vadd.f32 1.0, %v10219_v44 }
 0x8fe   : > { %v4202_v43 = vmul.f32 0.044715, %v4170_v16  ;;  %10222 = vtanh.f32 %v4265_v51 }
 0x8ff   : > { %v12982_v15 = vadd.f32 %v12920_v8, %v4641_v10  ;;  %v4359_v20 = vmul.f32 0.5, %v4327_v7 }
 0x900   : > { %v4234_v31 = vadd.f32 %v4202_v43, %v4105_v61 }
 0x901   : > { %14873 = vst [vmem:[#allocation48_spill] sm:$0xff] %v12982_v15  ;;  %v4681_v11 = vmul.f32 %v14842_v60, %v12982_v15  ;;  %v4391_v13 = vmul.f32 %v4359_v20, %v12949_v55 }
 0x902   : > { %v4560_v23 = vpop.f32.mrf.mxu3  ;;  %v4266_v39 = vmul.f32 0.7978846, %v4234_v31  ;;  %v4609_v26 = vpop.f32.mrf.mxu0 }
 0x903   : > { %v10221_v42 = vpop.eup %10220  ;;  %v4610_v50 = vadd.f32 %v4609_v26, %v4560_v23  ;;  %4701 = vadd.xlane.f32.xlu0 %v4681_v11 }
 0x904   : > { %v10223_v19 = vpop.eup %10222  ;;  %10224 = vtanh.f32 %v4266_v39  ;;  %v4328_v27 = vadd.f32 1.0, %v10221_v42 }
 0x905   : > { %v4642_v25 = vadd.f32 %v4610_v50, %v12453_v37  ;;  %v4329_v5 = vadd.f32 1.0, %v10223_v19 }
 0x906   : > { %v4360_v40 = vmul.f32 0.5, %v4328_v27 }
 0x907   : > { %v12988_v30 = vadd.f32 %v12920_v8, %v4642_v25  ;;  %v4361_v3 = vmul.f32 0.5, %v4329_v5 }
 0x908   : > { %v4392_v16 = vmul.f32 %v4360_v40, %v12961_v56 }
 0x909   : > { %14874 = vst [vmem:[#allocation49_spill] sm:$0xff] %v12988_v30  ;;  %v4682_v4 = vmul.f32 %v14842_v60, %v12988_v30  ;;  %v4393_v28 = vmul.f32 %v4361_v3, %v4056_v24 }
 0x90a   : > { %v4563_v47 = vpop.f32.mrf.mxu3  ;;  %v10225_v45 = vpop.eup %10224 }
 0x90b   : > { %v4612_v14 = vpop.f32.mrf.mxu0  ;;  %4703 = vadd.xlane.f32.xlu1 %v4682_v4  ;;  %v4409_v49 = vpack.c.bf16 %v4393_v28, %v4391_v13  ;;  %v4330_v37 = vadd.f32 1.0, %v10225_v45 }
 0x90c   : > { %v4613_v17 = vadd.f32 %v4612_v14, %v4563_v47 }
 0x90d   : > { %4582 = vmatmul.bf16.gmra.mxu3 %v4409_v49  ;;  %v4362_v29 = vmul.f32 0.5, %v4330_v37 }
 0x90e   : > { %v4643_v36 = vadd.f32 %v4613_v17, %v12459_v58 }
 0x90f   : > { %v4394_v10 = vmul.f32 %v4362_v29, %v4105_v61 }
 0x910   : > { %v12995_v51 = vadd.f32 %v12920_v8, %v4643_v36 }
 0x911   : > { %v4410_v24 = vpack.c.bf16 %v4394_v10, %v4392_v16 }
 0x912   : > { %14875 = vst [vmem:[#allocation50_spill] sm:$0xff] %v12995_v51  ;;  %v4565_v44 = vpop.f32.mrf.mxu3  ;;  %v4683_v55 = vmul.f32 %v14842_v60, %v12995_v51 }
 0x913   : > { %v4614_v43 = vpop.f32.mrf.mxu0  ;;  %4631 = vmatmul.bf16.gmra.mxu0 %v4410_v24 }
 0x914   : > { %v4615_v31 = vadd.f32 %v4614_v43, %v4565_v44  ;;  %4705 = vadd.xlane.f32.xlu2 %v4683_v55 }
 0x916   : > { %v4644_v23 = vadd.f32 %v4615_v31, %v12465_v18 }
 0x918   : > { %v13002_v58 = vadd.f32 %v12920_v8, %v4644_v23 }
 0x91a   : > { %14876 = vst [vmem:[#allocation52_spill] sm:$0xff] %v13002_v58  ;;  %v4684_v11 = vmul.f32 %v14842_v60, %v13002_v58 }
 0x91c   : > { %4707 = vadd.xlane.f32.xlu0 %v4684_v11 }
 0x953   : > { %v4568_v56 = vpop.f32.mrf.mxu3  ;;  %v4617_v61 = vpop.f32.mrf.mxu0 }
 0x954   : > { %v4618_v7 = vadd.f32 %v4617_v61, %v4568_v56 }
 0x955   : > { %v4694_v39 = vpop.xlane.xlu2 %4693 }
 0x956   : > { %v4645_v26 = vadd.f32 %v4618_v7, %v12471_v46  ;;  %v4725_v42 = vmul.f32 0.015625, %v4694_v39 }
 0x958   : > { %v13008_v50 = vadd.f32 %v12920_v8, %v4645_v26  ;;  %v4741_v19 = vsub.f32 %v12929_v34, %v4725_v42 }
 0x95a   : > { %14877 = vst [vmem:[#allocation53_spill] sm:$0xff] %v13008_v50  ;;  %v4685_v18 = vmul.f32 %v14842_v60, %v13008_v50  ;;  %v13014_v25 = vmul.f32 %v14842_v60, %v4741_v19 }
 0x95b   : > { %v4619_v5 = vpop.f32.mrf.mxu0  ;;  %v4570_v20 = vpop.f32.mrf.mxu3 }
 0x95c   : > { %v4620_v3 = vadd.f32 %v4619_v5, %v4570_v20  ;;  %4709 = vadd.xlane.f32.xlu0 %v4685_v18  ;;  %v4773_v27 = vmul.f32 %v13014_v25, %v13014_v25  ;;  %v4696_v46 = vpop.xlane.xlu0 %4695 }
 0x95d   : > { %v4726_v47 = vmul.f32 0.015625, %v4696_v46 }
 0x95e   : > { %v4646_v4 = vadd.f32 %v4620_v3, %v12483_v12  ;;  %4789 = vadd.xlane.f32.xlu1 %v4773_v27 }
 0x95f   : > { %v4742_v13 = vsub.f32 %v12944_v52, %v4726_v47 }
 0x960   : > { %v13021_v28 = vadd.f32 %v12920_v8, %v4646_v4 }
 0x961   : > { %v13024_v45 = vmul.f32 %v14842_v60, %v4742_v13 }
 0x962   : > { %14878 = vst [vmem:[#allocation55_spill] sm:$0xff] %v13021_v28  ;;  %v4686_v14 = vmul.f32 %v14842_v60, %v13021_v28 }
 0x963   : > { %v4774_v17 = vmul.f32 %v13024_v45, %v13024_v45 }
 0x965   : > { %v4573_v49 = vpop.f32.mrf.mxu3  ;;  %v4622_v37 = vpop.f32.mrf.mxu0  ;;  %4791 = vadd.xlane.f32.xlu2 %v4774_v17 }
 0x966   : > { %v4698_v40 = vpop.xlane.xlu1 %4697  ;;  %v4623_v36 = vadd.f32 %v4622_v37, %v4573_v49  ;;  %4711 = vadd.xlane.f32.xlu1 %v4686_v14 }
 0x967   : > { %v4727_v12 = vmul.f32 0.015625, %v4698_v40 }
 0x968   : > { %v4647_v29 = vadd.f32 %v4623_v36, %v12495_v2 }
 0x969   : > { %v4743_v16 = vsub.f32 %v12958_v62, %v4727_v12 }
 0x96a   : > { %v13033_v10 = vadd.f32 %v12920_v8, %v4647_v29 }
 0x96b   : > { %v13036_v44 = vmul.f32 %v14842_v60, %v4743_v16 }
 0x96c   : > { %14879 = vst [vmem:[#allocation56_spill] sm:$0xff] %v13033_v10  ;;  %v4687_v55 = vmul.f32 %v14842_v60, %v13033_v10 }
 0x96d   : > { %v4575_v24 = vpop.f32.mrf.mxu3  ;;  %v4624_v43 = vpop.f32.mrf.mxu0  ;;  %v4775_v31 = vmul.f32 %v13036_v44, %v13036_v44 }
 0x96e   : > { %v4625_v23 = vadd.f32 %v4624_v43, %v4575_v24  ;;  %v4700_v11 = vpop.xlane.xlu2 %4699  ;;  %4713 = vadd.xlane.f32.xlu1 %v4687_v55 }
 0x96f   : > { %v4728_v2 = vmul.f32 0.015625, %v4700_v11  ;;  %4793 = vadd.xlane.f32.xlu2 %v4775_v31 }
 0x970   : > { %v4648_v56 = vadd.f32 %v4625_v23, %v12507_v21 }
 0x971   : > { %v4744_v61 = vsub.f32 %v12974_v1, %v4728_v2 }
 0x972   : > { %v13045_v7 = vadd.f32 %v12920_v8, %v4648_v56 }
 0x973   : > { %v13048_v39 = vmul.f32 %v14842_v60, %v4744_v61 }
 0x974   : > { %14880 = vst [vmem:[#allocation57_spill] sm:$0xff] %v13045_v7  ;;  %v4688_v26 = vmul.f32 %v14842_v60, %v13045_v7 }
 0x975   : > { %v4578_v42 = vpop.f32.mrf.mxu3  ;;  %v4627_v19 = vpop.f32.mrf.mxu0  ;;  %v4776_v18 = vmul.f32 %v13048_v39, %v13048_v39 }
 0x976   : > { %v4702_v5 = vpop.xlane.xlu0 %4701  ;;  %v4628_v20 = vadd.f32 %v4627_v19, %v4578_v42 }
 0x977   : > { %v4729_v3 = vmul.f32 0.015625, %v4702_v5  ;;  %4715 = vadd.xlane.f32.xlu2 %v4688_v26  ;;  %4795 = vadd.xlane.f32.xlu0 %v4776_v18 }
 0x978   : > { %v4649_v21 = vadd.f32 %v4628_v20, %v12519_v54 }
 0x979   : > { %v4745_v27 = vsub.f32 %v12982_v15, %v4729_v3 }
 0x97a   : > { %v13057_v46 = vadd.f32 %v12920_v8, %v4649_v21 }
 0x97b   : > { %v13060_v47 = vmul.f32 %v14842_v60, %v4745_v27 }
 0x97c   : > { %14881 = vst [vmem:[#allocation39_spill] sm:$0xff] %v13057_v46  ;;  %v4689_v4 = vmul.f32 %v14842_v60, %v13057_v46 }
 0x97d   : > { %v4580_v13 = vpop.f32.mrf.mxu3  ;;  %v4629_v14 = vpop.f32.mrf.mxu0  ;;  %v4777_v17 = vmul.f32 %v13060_v47, %v13060_v47 }
 0x97e   : > { %v4704_v49 = vpop.xlane.xlu1 %4703  ;;  %v4630_v37 = vadd.f32 %v4629_v14, %v4580_v13 }
 0x97f   : > { %v4730_v40 = vmul.f32 0.015625, %v4704_v49  ;;  %4717 = vadd.xlane.f32.xlu2 %v4689_v4  ;;  %4797 = vadd.xlane.f32.xlu0 %v4777_v17  ;;  %v9342_v17 = vld [vmem:[#allocation13 + $0x2d0] sm:$0xf]  ;;  %v9724_v49 = vld [vmem:[#allocation13 + $0x2e4] sm:$0xf0] }
 0x980   : > { %v4650_v54 = vadd.f32 %v4630_v37, %v12531_v33  ;;  %v9721_v37 = vld [vmem:[#allocation13 + $0x2d4] sm:$0xf] }
 0x981   : > { %v4746_v36 = vsub.f32 %v12988_v30, %v4730_v40  ;;  %v9343_v40 = vor.u32 %v9724_v49, %v9342_v17  ;;  %v9296_v17 = vld [vmem:[#allocation13 + $0x288] sm:$0xf0]  ;;  %v9302_v49 = vld [vmem:[#allocation13 + $0x278] sm:$0xf] }
 0x982   : > { %v13069_v12 = vadd.f32 %v12920_v8, %v4650_v54  ;;  %v9344_v54 = vld [vmem:[#allocation13 + $0x2e8] sm:$0xf0] }
 0x983   : > { %v13072_v29 = vmul.f32 %v14842_v60, %v4746_v36  ;;  %v9350_v36 = vld [vmem:[#allocation13 + $0x2d8] sm:$0xf]  ;;  %5364 = vmatpush.bf16.msrb.mxu1 %v9343_v40 }
 0x984   : > { %14882 = vst [vmem:[#allocation41_spill] sm:$0xff] %v13069_v12  ;;  %v4690_v16 = vmul.f32 %v14842_v60, %v13069_v12 }
 0x985   : > { %v4778_v55 = vmul.f32 %v13072_v29, %v13072_v29 }
 0x987   : > { %v4706_v24 = vpop.xlane.xlu2 %4705  ;;  %4799 = vadd.xlane.f32.xlu1 %v4778_v55  ;;  %4719 = vadd.xlane.f32.xlu0 %v4690_v16  ;;  %v9725_v16 = vld [vmem:[#allocation13 + $0x2ec] sm:$0xf0]  ;;  %v9347_v55 = vor.u32 %v9721_v37, %v9344_v54 }
 0x988   : > { %v4731_v43 = vmul.f32 0.015625, %v4706_v24  ;;  %v9351_v24 = vor.u32 %v9725_v16, %v9350_v36  ;;  %v9713_v37 = vld [vmem:[#allocation13 + $0x28c] sm:$0xf0]  ;;  %v9710_v36 = vld [vmem:[#allocation13 + $0x27c] sm:$0xf] }
 0x989   : > { %5413 = vmatpush.bf16.msrb.mxu2 %v9347_v55  ;;  %v9303_v54 = vor.u32 %v9713_v37, %v9302_v49  ;;  %v9304_v16 = vld [vmem:[#allocation13 + $0x290] sm:$0xf0]  ;;  %v9698_v49 = vld [vmem:[#allocation13 + $0x21c] sm:$0xf] }
 0x98a   : > { %v4747_v33 = vsub.f32 %v12995_v51, %v4731_v43  ;;  %v9722_v43 = vld [vmem:[#allocation13 + $0x2dc] sm:$0xf]  ;;  %5462 = vmatpush.bf16.msrb.mxu3 %v9351_v24  ;;  %v9307_v55 = vor.u32 %v9710_v36, %v9304_v16  ;;  %v9270_v24 = vld [vmem:[#allocation13 + $0x240] sm:$0xf]  ;;  %v9256_v37 = vld [vmem:[#allocation13 + $0x230] sm:$0xf0] }
 0x98b   : > { %v9694_v36 = vld [vmem:[#allocation13 + $0x1f4] sm:$0xf0]  ;;  %v9691_v16 = vld [vmem:[#allocation13 + $0x1e4] sm:$0xf] }
 0x98c   : > { %v13080_v31 = vmul.f32 %v14842_v60, %v4747_v33  ;;  %v9352_v33 = vld [vmem:[#allocation13 + $0x2f0] sm:$0xf0] }
 0x98e   : > { %v4779_v23 = vmul.f32 %v13080_v31, %v13080_v31 }
 0x98f   : > { %v4708_v11 = vpop.xlane.xlu0 %4707 }
 0x990   : > { %v4732_v2 = vmul.f32 0.015625, %v4708_v11  ;;  %4801 = vadd.xlane.f32.xlu1 %v4779_v23  ;;  %v4583_v56 = vpop.f32.mrf.mxu3  ;;  %v4632_v61 = vpop.f32.mrf.mxu0  ;;  %v9718_v23 = vld [vmem:[#allocation13 + $0x2b4] sm:$0xf0]  ;;  %v9715_v11 = vld [vmem:[#allocation13 + $0x2a4] sm:$0xf] }
 0x991   : > { %v4633_v42 = vadd.f32 %v4632_v61, %v4583_v56  ;;  %v9320_v56 = vld [vmem:[#allocation13 + $0x2b8] sm:$0xf0]  ;;  %v9326_v61 = vld [vmem:[#allocation13 + $0x2a8] sm:$0xf] }
 0x992   : > { %v4748_v26 = vsub.f32 %v13002_v58, %v4732_v2 }
 0x993   : > { %v4651_v18 = vadd.f32 %v4633_v42, %v12553_v35  ;;  %v9323_v42 = vor.u32 %v9715_v11, %v9320_v56  ;;  %v9707_v11 = vld [vmem:[#allocation13 + $0x25c] sm:$0xf0] }
 0x994   : > { %v13086_v19 = vmul.f32 %v14842_v60, %v4748_v26  ;;  %v9719_v26 = vld [vmem:[#allocation13 + $0x2bc] sm:$0xf0] }
 0x995   : > { %v13090_v5 = vadd.f32 %v12920_v8, %v4651_v18  ;;  %v9327_v18 = vor.u32 %v9719_v26, %v9326_v61  ;;  %5414 = vmatpush.bf16.msrb.mxu2 %v9323_v42  ;;  %v9704_v61 = vld [vmem:[#allocation13 + $0x24c] sm:$0xf]  ;;  %v9280_v26 = vld [vmem:[#allocation13 + $0x260] sm:$0xf0] }
 0x996   : > { %v4780_v20 = vmul.f32 %v13086_v19, %v13086_v19  ;;  %v9283_v42 = vor.u32 %v9704_v61, %v9280_v26  ;;  %v9198_v61 = vld [vmem:[#allocation13 + $0x1b0] sm:$0xf]  ;;  %v9688_v26 = vld [vmem:[#allocation13 + $0x1c4] sm:$0xf0] }
 0x997   : > { %14883 = vst [vmem:[#allocation44_spill] sm:$0xff] %v13090_v5  ;;  %v4691_v3 = vmul.f32 %v14842_v60, %v13090_v5  ;;  %5463 = vmatpush.bf16.msrb.mxu3 %v9327_v18  ;;  %v9246_v18 = vld [vmem:[#allocation13 + $0x210] sm:$0xf] }
 0x998   : > { %4803 = vadd.xlane.f32.xlu2 %v4780_v20  ;;  %v4585_v21 = vpop.f32.mrf.mxu3  ;;  %v4634_v27 = vpop.f32.mrf.mxu0  ;;  %v9716_v20 = vld [vmem:[#allocation13 + $0x2ac] sm:$0xf] }
 0x999   : > { %v4635_v4 = vadd.f32 %v4634_v27, %v4585_v21  ;;  %4721 = vadd.xlane.f32.xlu0 %v4691_v3  ;;  %v9328_v3 = vld [vmem:[#allocation13 + $0x2c0] sm:$0xf0]  ;;  %v9294_v27 = vld [vmem:[#allocation13 + $0x270] sm:$0xf] }
 0x99a   : > { %v9331_v21 = vor.u32 %v9716_v20, %v9328_v3  ;;  %v9700_v20 = vld [vmem:[#allocation13 + $0x224] sm:$0xf0]  ;;  %v9697_v3 = vld [vmem:[#allocation13 + $0x214] sm:$0xf] }
 0x99b   : > { %v4652_v13 = vadd.f32 %v4635_v4, %v12565_v9  ;;  %v9355_v9 = vor.u32 %v9722_v43, %v9352_v33  ;;  %v9712_v4 = vld [vmem:[#allocation13 + $0x284] sm:$0xf0]  ;;  %5464 = vmatpush.bf16.msrb.mxu3 %v9303_v54  ;;  %v9706_v43 = vld [vmem:[#allocation13 + $0x254] sm:$0xf0]  ;;  %v9703_v33 = vld [vmem:[#allocation13 + $0x244] sm:$0xf] }
 0x99c   : > { %v9222_v54 = vld [vmem:[#allocation13 + $0x1e0] sm:$0xf] }
 0x99d   : > { %v13098_v14 = vadd.f32 %v12920_v8, %v4652_v13  ;;  %v9318_v8 = vld [vmem:[#allocation13 + $0x2a0] sm:$0xf]  ;;  %5511 = vmatpush.bf16.msrb.mxu0 %v9355_v9  ;;  %v9709_v13 = vld [vmem:[#allocation13 + $0x274] sm:$0xf]  ;;  %v9271_v9 = vor.u32 %v9706_v43, %v9270_v24  ;;  %v9224_v24 = vld [vmem:[#allocation13 + $0x1f8] sm:$0xf0] }
 0x99e   : > { %v9319_v2 = vor.u32 %v9718_v23, %v9318_v8  ;;  %v9299_v40 = vor.u32 %v9709_v13, %v9296_v17  ;;  %v9272_v8 = vld [vmem:[#allocation13 + $0x258] sm:$0xf0]  ;;  %v9278_v23 = vld [vmem:[#allocation13 + $0x248] sm:$0xf]  ;;  %v9701_v13 = vld [vmem:[#allocation13 + $0x22c] sm:$0xf0] }
 0x99f   : > { %14884 = vst [vmem:[#allocation46_spill] sm:$0xff] %v13098_v14  ;;  %v4692_v35 = vmul.f32 %v14842_v60, %v13098_v14  ;;  %v9279_v56 = vor.u32 %v9707_v11, %v9278_v23  ;;  %v9230_v43 = vld [vmem:[#allocation13 + $0x1e8] sm:$0xf]  ;;  %v9692_v23 = vld [vmem:[#allocation13 + $0x1ec] sm:$0xf] }
 0x9a0   : > { %5365 = vmatpush.bf16.msrb.mxu1 %v9319_v2  ;;  %5415 = vmatpush.bf16.msrb.mxu2 %v9299_v40  ;;  %v9275_v2 = vor.u32 %v9703_v33, %v9272_v8  ;;  %v9259_v40 = vor.u32 %v9698_v49, %v9256_v37  ;;  %v9695_v33 = vld [vmem:[#allocation13 + $0x1fc] sm:$0xf0]  ;;  %v9232_v11 = vld [vmem:[#allocation13 + $0x200] sm:$0xf0] }
 0x9a1   : > { %4723 = vadd.xlane.f32.xlu1 %v4692_v35  ;;  %5512 = vmatpush.bf16.msrb.mxu0 %v9331_v21  ;;  %v9295_v35 = vor.u32 %v9712_v4, %v9294_v27  ;;  %v9247_v21 = vor.u32 %v9700_v20, %v9246_v18  ;;  %v9248_v27 = vld [vmem:[#allocation13 + $0x228] sm:$0xf0]  ;;  %v9254_v4 = vld [vmem:[#allocation13 + $0x218] sm:$0xf]  ;;  %v9231_v8 = vor.u32 %v9695_v33, %v9230_v43 }
 0x9a2   : > { %5465 = vmatpush.bf16.msrb.mxu3 %v9279_v56  ;;  %v9255_v17 = vor.u32 %v9701_v13, %v9254_v4  ;;  %v9199_v20 = vor.u32 %v9688_v26, %v9198_v61  ;;  %v9689_v13 = vld [vmem:[#allocation13 + $0x1cc] sm:$0xf0] }
 0x9a4   : > { %5366 = vmatpush.bf16.msrb.mxu1 %v9295_v35  ;;  %5416 = vmatpush.bf16.msrb.mxu2 %v9275_v2  ;;  %v9251_v35 = vor.u32 %v9697_v3, %v9248_v27  ;;  %v9235_v2 = vor.u32 %v9692_v23, %v9232_v11  ;;  %v9200_v3 = vld [vmem:[#allocation13 + $0x1c8] sm:$0xf0]  ;;  %v9683_v11 = vld [vmem:[#allocation13 + $0x19c] sm:$0xf0] }
 0x9a5   : > { %5513 = vmatpush.bf16.msrb.mxu0 %v9307_v55  ;;  %v9223_v55 = vor.u32 %v9694_v36, %v9222_v54  ;;  %v9174_v36 = vld [vmem:[#allocation13 + $0x180] sm:$0xf] }
 0x9a6   : > { %5466 = vmatpush.bf16.msrb.mxu3 %v9255_v17  ;;  %v9208_v17 = vld [vmem:[#allocation13 + $0x1d0] sm:$0xf0] }
 0x9a8   : > { %5367 = vmatpush.bf16.msrb.mxu1 %v9271_v9  ;;  %5417 = vmatpush.bf16.msrb.mxu2 %v9251_v35  ;;  %v9227_v9 = vor.u32 %v9691_v16, %v9224_v24  ;;  %v9686_v35 = vld [vmem:[#allocation13 + $0x1bc] sm:$0xf]  ;;  %v9682_v16 = vld [vmem:[#allocation13 + $0x194] sm:$0xf0] }
 0x9a9   : > { %5514 = vmatpush.bf16.msrb.mxu0 %v9283_v42  ;;  %v9685_v42 = vld [vmem:[#allocation13 + $0x1b4] sm:$0xf]  ;;  %v9211_v54 = vor.u32 %v9686_v35, %v9208_v17  ;;  %v9175_v33 = vor.u32 %v9682_v16, %v9174_v36 }
 0x9aa   : > { %5467 = vmatpush.bf16.msrb.mxu3 %v9231_v8  ;;  %v9203_v4 = vor.u32 %v9685_v42, %v9200_v3  ;;  %v9182_v8 = vld [vmem:[#allocation13 + $0x188] sm:$0xf] }
 0x9ab   : > { %v9183_v26 = vor.u32 %v9683_v11, %v9182_v8 }
 0x9ac   : > { %5368 = vmatpush.bf16.msrb.mxu1 %v9247_v21  ;;  %5418 = vmatpush.bf16.msrb.mxu2 %v9227_v9  ;;  %v9206_v21 = vld [vmem:[#allocation13 + $0x1b8] sm:$0xf]  ;;  %v9176_v9 = vld [vmem:[#allocation13 + $0x198] sm:$0xf0] }
 0x9ad   : > { %5515 = vmatpush.bf16.msrb.mxu0 %v9259_v40  ;;  %v9207_v40 = vor.u32 %v9689_v13, %v9206_v21 }
 0x9af   : > { %5468 = vmatpush.bf16.msrb.mxu3 %v9207_v40 }
 0x9b0   : > { %5369 = vmatpush.bf16.msrb.mxu1 %v9223_v55  ;;  %5419 = vmatpush.bf16.msrb.mxu2 %v9203_v4  ;;  %v9679_v55 = vld [vmem:[#allocation13 + $0x184] sm:$0xf] }
 0x9b1   : > { %5516 = vmatpush.bf16.msrb.mxu0 %v9235_v2  ;;  %v9179_v23 = vor.u32 %v9679_v55, %v9176_v9  ;;  %v9680_v2 = vld [vmem:[#allocation13 + $0x18c] sm:$0xf] }
 0x9b3   : > { %5469 = vmatpush.bf16.msrb.mxu3 %v9183_v26 }
 0x9b4   : > { %5370 = vmatpush.bf16.msrb.mxu1 %v9199_v20  ;;  %5420 = vmatpush.bf16.msrb.mxu2 %v9179_v23 }
 0x9b5   : > { %5517 = vmatpush.bf16.msrb.mxu0 %v9211_v54 }
 0x9b8   : > { %5371 = vmatpush.bf16.msrb.mxu1 %v9175_v33 }
 0x9cf   : > { %v4710_v56 = vpop.xlane.xlu0 %4709 }
 0x9d0   : > { %v4733_v18 = vmul.f32 0.015625, %v4710_v56  ;;  %v9184_v56 = vld [vmem:[#allocation13 + $0x1a0] sm:$0xf0] }
 0x9d1   : > { %v4790_v27 = vpop.xlane.xlu1 %4789  ;;  %v9187_v42 = vor.u32 %v9680_v2, %v9184_v56 }
 0x9d2   : > { %v4749_v49 = vsub.f32 %v13008_v50, %v4733_v18  ;;  %v4821_v37 = vmul.f32 0.015625, %v4790_v27  ;;  %v9681_v50 = vld [vmem:[#allocation13 + $0x194] sm:$0xf] }
 0x9d3   : > { %5518 = vmatpush.bf16.msrb.mxu0 %v9187_v42 }
 0x9d4   : > { %v13104_v24 = vmul.f32 %v14842_v60, %v4749_v49  ;;  %v4837_v43 = vadd.f32 1e-05, %v4821_v37 }
 0x9d6   : > { %10226 = vrsqrt.f32 %v4837_v43  ;;  %v4781_v61 = vmul.f32 %v13104_v24, %v13104_v24  ;;  %vm4859_vm0 = vweird.f32 %v4837_v43 }
 0x9d8   : > { %4805 = vadd.xlane.f32.xlu2 %v4781_v61  ;;  %v4792_v20 = vpop.xlane.xlu2 %4791 }
 0x9d9   : > { %v4712_v18 = vpop.xlane.xlu1 %4711  ;;  %v4822_v21 = vmul.f32 0.015625, %v4792_v20 }
 0x9da   : > { %v4734_v3 = vmul.f32 0.015625, %v4712_v18 }
 0x9db   : > { %v4838_v13 = vadd.f32 1e-05, %v4822_v21 }
 0x9dc   : > { %v10227_v27 = vpop.eup %10226  ;;  %v4750_v4 = vsub.f32 %v13021_v28, %v4734_v3  ;;  %v9684_v28 = vld [vmem:[#allocation13 + $0x1a4] sm:$0xf0] }
 0x9dd   : > { %v4854_v35 = vmul.f32 %v10227_v27, %v4837_v43  ;;  %10228 = vrsqrt.f32 %v4838_v13  ;;  %vm4860_vm14 = vweird.f32 %v10227_v27  ;;  %vm4869_vm3 = vweird.f32 %v4838_v13 }
 0x9de   : > { %v13110_v17 = vmul.f32 %v14842_v60, %v4750_v4  ;;  %vm4861_vm1 = vmor %vm4859_vm0, %vm4860_vm14 }
 0x9df   : > { %v4855_v49 = vmul.f32 %v10227_v27, %v4854_v35 }
 0x9e0   : > { %v4782_v37 = vmul.f32 %v13110_v17, %v13110_v17 }
 0x9e1   : > { %v4856_v40 = vmul.f32 0.5, %v4855_v49  ;;  %v4714_v54 = vpop.xlane.xlu1 %4713  ;;  %v13123_v49 = vld [vmem:[%s14614_s5 + $0x1] ss:$0 sm:$0xff] }
 0x9e2   : > { %v4735_v36 = vmul.f32 0.015625, %v4714_v54  ;;  %v4794_v16 = vpop.xlane.xlu2 %4793  ;;  %4807 = vadd.xlane.f32.xlu0 %v4782_v37 }
 0x9e3   : > { %v4857_v55 = vsub.f32 1.5, %v4856_v40  ;;  %v4823_v33 = vmul.f32 0.015625, %v4794_v16  ;;  %v10229_v9 = vpop.eup %10228 }
 0x9e4   : > { %v4751_v8 = vsub.f32 %v13033_v10, %v4735_v36  ;;  %v4864_v11 = vmul.f32 %v10229_v9, %v4838_v13  ;;  %vm4870_vm2 = vweird.f32 %v10229_v9 }
 0x9e5   : > { %v4858_v23 = vmul.f32 %v10227_v27, %v4857_v55  ;;  %v4839_v2 = vadd.f32 1e-05, %v4823_v33  ;;  %vm4871_vm4 = vmor %vm4869_vm3, %vm4870_vm2  ;;  %v13130_v33 = vld [vmem:[#allocation11 + $0x1] ss:$0 sm:$0xff] }
 0x9e6   : > { %v13116_v56 = vmul.f32 %v14842_v60, %v4751_v8  ;;  %v4865_v61 = vmul.f32 %v10229_v9, %v4864_v11 }
 0x9e7   : > { %10230 = vrsqrt.f32 %v4839_v2  ;;  %v4862_v42 = vsel %vm4861_vm1, %v10227_v27, %v4858_v23  ;;  %vm4879_vm6 = vweird.f32 %v4839_v2 }
 0x9e8   : > { %v4783_v26 = vmul.f32 %v13116_v56, %v13116_v56  ;;  %v4866_v18 = vmul.f32 0.5, %v4865_v61  ;;  %v5013_v43 = vmul.f32 %v4862_v42, %v13014_v25 }
 0x9ea   : > { %v4796_v20 = vpop.xlane.xlu0 %4795  ;;  %v4716_v3 = vpop.xlane.xlu2 %4715  ;;  %4809 = vadd.xlane.f32.xlu1 %v4783_v26  ;;  %v4867_v21 = vsub.f32 1.5, %v4866_v18  ;;  %v5032_v8 = vmul.f32 %v13123_v49, %v5013_v43 }
 0x9eb   : > { %v4824_v4 = vmul.f32 0.015625, %v4796_v20  ;;  %v4736_v35 = vmul.f32 0.015625, %v4716_v3 }
 0x9ec   : > { %v4868_v40 = vmul.f32 %v10229_v9, %v4867_v21  ;;  %v5051_v20 = vadd.f32 %v13130_v33, %v5032_v8 }
 0x9ed   : > { %v10231_v37 = vpop.eup %10230  ;;  %v4840_v54 = vadd.f32 1e-05, %v4824_v4  ;;  %v4752_v27 = vsub.f32 %v13045_v7, %v4736_v35  ;;  %v9705_v7 = vld [vmem:[#allocation13 + $0x254] sm:$0xf] }
 0x9ee   : > { %v4874_v36 = vmul.f32 %v10231_v37, %v4839_v2  ;;  %v4872_v16 = vsel %vm4871_vm4, %v10229_v9, %v4868_v40  ;;  %vm4880_vm5 = vweird.f32 %v10231_v37 }
 0x9ef   : > { %10232 = vrsqrt.f32 %v4840_v54  ;;  %v13128_v55 = vmul.f32 %v14842_v60, %v4752_v27  ;;  %v5014_v23 = vmul.f32 %v4872_v16, %v13024_v45  ;;  %vm4881_vm7 = vmor %vm4879_vm6, %vm4880_vm5  ;;  %vm4889_vm9 = vweird.f32 %v4840_v54 }
 0x9f0   : > { %v4875_v25 = vmul.f32 %v10231_v37, %v4874_v36 }
 0x9f1   : > { %v4784_v13 = vmul.f32 %v13128_v55, %v13128_v55  ;;  %v5033_v11 = vmul.f32 %v13123_v49, %v5014_v23 }
 0x9f2   : > { %v4876_v61 = vmul.f32 0.5, %v4875_v25  ;;  %v4798_v26 = vpop.xlane.xlu0 %4797  ;;  %v4718_v42 = vpop.xlane.xlu2 %4717 }
 0x9f3   : > { %v4825_v9 = vmul.f32 0.015625, %v4798_v26  ;;  %v4737_v18 = vmul.f32 0.015625, %v4718_v42  ;;  %4811 = vadd.xlane.f32.xlu2 %v4784_v13  ;;  %v5052_v3 = vadd.f32 %v13130_v33, %v5033_v11 }
 0x9f4   : > { %v4877_v21 = vsub.f32 1.5, %v4876_v61 }
 0x9f5   : > { %v10233_v4 = vpop.eup %10232  ;;  %v4841_v35 = vadd.f32 1e-05, %v4825_v9  ;;  %v4753_v45 = vsub.f32 %v13057_v46, %v4737_v18  ;;  %v13140_v43 = vpack.c.bf16 %v5052_v3, %v5051_v20 }
 0x9f6   : > { %v4878_v40 = vmul.f32 %v10231_v37, %v4877_v21  ;;  %v4884_v27 = vmul.f32 %v10233_v4, %v4840_v54  ;;  %vm4890_vm8 = vweird.f32 %v10233_v4 }
 0x9f7   : > { %10234 = vrsqrt.f32 %v4841_v35  ;;  %v13143_v36 = vmul.f32 %v14842_v60, %v4753_v45  ;;  %5372 = vmatmul.bf16.vlgmr.msrb.gmra.mxu1 %v13140_v43  ;;  %5421 = vmatmul.bf16.vlgmr.msrb.gmra.mxu2 %v13140_v43  ;;  %vm4891_vm10 = vmor %vm4889_vm9, %vm4890_vm8  ;;  %vm4899_vm12 = vweird.f32 %v4841_v35 }
 0x9f8   : > { %v4885_v16 = vmul.f32 %v10233_v4, %v4884_v27  ;;  %5470 = vmatmul.bf16.vlgmr.msrb.gmra.mxu3 %v13140_v43  ;;  %5519 = vmatmul.bf16.vlgmr.msrb.gmra.mxu0 %v13140_v43  ;;  %v4882_v23 = vsel %vm4881_vm7, %v10231_v37, %v4878_v40 }
 0x9f9   : > { %v4785_v8 = vmul.f32 %v13143_v36, %v13143_v36  ;;  %v5015_v9 = vmul.f32 %v4882_v23, %v13036_v44 }
 0x9fa   : > { %v4886_v25 = vmul.f32 0.5, %v4885_v16  ;;  %v4800_v13 = vpop.xlane.xlu1 %4799  ;;  %v4720_v11 = vpop.xlane.xlu0 %4719 }
 0x9fb   : > { %v4826_v61 = vmul.f32 0.015625, %v4800_v13  ;;  %v4738_v26 = vmul.f32 0.015625, %v4720_v11  ;;  %4813 = vadd.xlane.f32.xlu0 %v4785_v8  ;;  %v5034_v27 = vmul.f32 %v13123_v49, %v5015_v9 }
 0x9fc   : > { %v4887_v2 = vsub.f32 1.5, %v4886_v25 }
 0x9fd   : > { %v10235_v42 = vpop.eup %10234  ;;  %v4842_v18 = vadd.f32 1e-05, %v4826_v61  ;;  %v4754_v20 = vsub.f32 %v13069_v12, %v4738_v26  ;;  %v5053_v61 = vadd.f32 %v13130_v33, %v5034_v27 }
 0x9fe   : > { %v4888_v3 = vmul.f32 %v10233_v4, %v4887_v2  ;;  %v4894_v21 = vmul.f32 %v10235_v42, %v4841_v35  ;;  %vm4900_vm11 = vweird.f32 %v10235_v42 }
 0x9ff   : > { %10236 = vrsqrt.f32 %v4842_v18  ;;  %v13154_v37 = vmul.f32 %v14842_v60, %v4754_v20  ;;  %vm4901_vm13 = vmor %vm4899_vm12, %vm4900_vm11  ;;  %vm4909_vm14 = vweird.f32 %v4842_v18 }
 0xa00   : > { %v4892_v45 = vsel %vm4891_vm10, %v10233_v4, %v4888_v3  ;;  %v4895_v40 = vmul.f32 %v10235_v42, %v4894_v21 }
 0xa01   : > { %v5016_v16 = vmul.f32 %v4892_v45, %v13048_v39  ;;  %v4786_v44 = vmul.f32 %v13154_v37, %v13154_v37 }
 0xa02   : > { %v4896_v8 = vmul.f32 0.5, %v4895_v40 }
 0xa03   : > { %v4802_v23 = vpop.xlane.xlu1 %4801  ;;  %v5035_v25 = vmul.f32 %v13123_v49, %v5016_v16  ;;  %4815 = vadd.xlane.f32.xlu1 %v4786_v44 }
 0xa04   : > { %v4827_v54 = vmul.f32 0.015625, %v4802_v23  ;;  %v4897_v13 = vsub.f32 1.5, %v4896_v8 }
 0xa05   : > { %v10237_v11 = vpop.eup %10236  ;;  %v5054_v4 = vadd.f32 %v13130_v33, %v5035_v25 }
 0xa06   : > { %v4843_v26 = vadd.f32 1e-05, %v4827_v54  ;;  %v4898_v2 = vmul.f32 %v10235_v42, %v4897_v13  ;;  %v4904_v9 = vmul.f32 %v10237_v11, %v4842_v18  ;;  %vm4910_vm15 = vweird.f32 %v10237_v11 }
 0xa07   : > { %v13163_v39 = vpack.c.bf16 %v5054_v4, %v5053_v61  ;;  %vm4911_vm0 = vmor %vm4909_vm14, %vm4910_vm15 }
 0xa08   : > { %10238 = vrsqrt.f32 %v4843_v26  ;;  %v4905_v20 = vmul.f32 %v10237_v11, %v4904_v9  ;;  %v4902_v3 = vsel %vm4901_vm13, %v10235_v42, %v4898_v2  ;;  %vm4919_vm2 = vweird.f32 %v4843_v26 }
 0xa09   : > { %5377 = vmatmul.bf16.gmra.mxu1 %v13163_v39  ;;  %5426 = vmatmul.bf16.gmra.mxu2 %v13163_v39  ;;  %v5017_v35 = vmul.f32 %v4902_v3, %v13060_v47 }
 0xa0a   : > { %v4906_v21 = vmul.f32 0.5, %v4905_v20  ;;  %5475 = vmatmul.bf16.gmra.mxu3 %v13163_v39  ;;  %5524 = vmatmul.bf16.gmra.mxu0 %v13163_v39 }
 0xa0b   : > { %v4804_v45 = vpop.xlane.xlu2 %4803  ;;  %v5036_v4 = vmul.f32 %v13123_v49, %v5017_v35 }
 0xa0c   : > { %v4828_v40 = vmul.f32 0.015625, %v4804_v45  ;;  %v4907_v27 = vsub.f32 1.5, %v4906_v21  ;;  %v4722_v16 = vpop.xlane.xlu0 %4721 }
 0xa0d   : > { %v4739_v23 = vmul.f32 0.015625, %v4722_v16 }
 0xa0e   : > { %v10239_v44 = vpop.eup %10238  ;;  %v4844_v8 = vadd.f32 1e-05, %v4828_v40  ;;  %v4908_v25 = vmul.f32 %v10237_v11, %v4907_v27  ;;  %v5055_v40 = vadd.f32 %v13130_v33, %v5036_v4 }
 0xa0f   : > { %v4914_v54 = vmul.f32 %v10239_v44, %v4843_v26  ;;  %v4755_v42 = vsub.f32 %v13090_v5, %v4739_v23  ;;  %vm4920_vm1 = vweird.f32 %v10239_v44 }
 0xa10   : > { %10240 = vrsqrt.f32 %v4844_v8  ;;  %v4912_v13 = vsel %vm4911_vm0, %v10237_v11, %v4908_v25  ;;  %vm4921_vm3 = vmor %vm4919_vm2, %vm4920_vm1  ;;  %vm4929_vm5 = vweird.f32 %v4844_v8 }
 0xa11   : > { %v4915_v61 = vmul.f32 %v10239_v44, %v4914_v54  ;;  %v5018_v2 = vmul.f32 %v4912_v13, %v13072_v29  ;;  %v13174_v9 = vmul.f32 %v14842_v60, %v4755_v42 }
 0xa13   : > { %v4916_v20 = vmul.f32 0.5, %v4915_v61  ;;  %v5037_v47 = vmul.f32 %v13123_v49, %v5018_v2  ;;  %v4787_v18 = vmul.f32 %v13174_v9, %v13174_v9 }
 0xa14   : > { %v4724_v21 = vpop.xlane.xlu1 %4723 }
 0xa15   : > { %v4917_v3 = vsub.f32 1.5, %v4916_v20  ;;  %v5056_v11 = vadd.f32 %v13130_v33, %v5037_v47  ;;  %v4740_v27 = vmul.f32 0.015625, %v4724_v21  ;;  %4817 = vadd.xlane.f32.xlu2 %v4787_v18 }
 0xa16   : > { %v10241_v45 = vpop.eup %10240 }
 0xa17   : > { %v4918_v16 = vmul.f32 %v10239_v44, %v4917_v3  ;;  %v4924_v29 = vmul.f32 %v10241_v45, %v4844_v8  ;;  %v13181_v35 = vpack.c.bf16 %v5056_v11, %v5055_v40  ;;  %v4756_v23 = vsub.f32 %v13098_v14, %v4740_v27 }
 0xa18   : > { %vm4930_vm4 = vweird.f32 %v10241_v45 }
 0xa19   : > { %v4925_v25 = vmul.f32 %v10241_v45, %v4924_v29  ;;  %v13185_v54 = vmul.f32 %v14842_v60, %v4756_v23  ;;  %5382 = vmatmul.bf16.gmra.mxu1 %v13181_v35  ;;  %5431 = vmatmul.bf16.gmra.mxu2 %v13181_v35  ;;  %v4922_v42 = vsel %vm4921_vm3, %v10239_v44, %v4918_v16  ;;  %vm4931_vm6 = vmor %vm4929_vm5, %vm4930_vm4 }
 0xa1a   : > { %5480 = vmatmul.bf16.gmra.mxu3 %v13181_v35  ;;  %5529 = vmatmul.bf16.gmra.mxu0 %v13181_v35  ;;  %v5019_v26 = vmul.f32 %v4922_v42, %v13080_v31 }
 0xa1b   : > { %v4926_v13 = vmul.f32 0.5, %v4925_v25  ;;  %v4788_v61 = vmul.f32 %v13185_v54, %v13185_v54 }
 0xa1c   : > { %v5038_v47 = vmul.f32 %v13123_v49, %v5019_v26 }
 0xa1d   : > { %v4927_v4 = vsub.f32 1.5, %v4926_v13  ;;  %4819 = vadd.xlane.f32.xlu0 %v4788_v61 }
 0xa1e   : > { %v5057_v3 = vadd.f32 %v13130_v33, %v5038_v47 }
 0xa1f   : > { %v4928_v2 = vmul.f32 %v10241_v45, %v4927_v4 }
 0xa21   : > { %v4932_v20 = vsel %vm4931_vm6, %v10241_v45, %v4928_v2 }
 0xa22   : > { %v5020_v44 = vmul.f32 %v4932_v20, %v13086_v19 }
 0xa24   : > { %v5039_v18 = vmul.f32 %v13123_v49, %v5020_v44 }
 0xa26   : > { %v5058_v21 = vadd.f32 %v13130_v33, %v5039_v18 }
 0xa28   : > { %v13199_v40 = vpack.c.bf16 %v5058_v21, %v5057_v3 }
 0xa2a   : > { %5387 = vmatmul.bf16.gmra.mxu1 %v13199_v40  ;;  %5436 = vmatmul.bf16.gmra.mxu2 %v13199_v40 }
 0xa2b   : > { %5485 = vmatmul.bf16.gmra.mxu3 %v13199_v40  ;;  %5534 = vmatmul.bf16.gmra.mxu0 %v13199_v40 }
 0xa4b   : > { %v4806_v31 = vpop.xlane.xlu2 %4805 }
 0xa4c   : > { %v4829_v8 = vmul.f32 0.015625, %v4806_v31 }
 0xa4e   : > { %v4845_v45 = vadd.f32 1e-05, %v4829_v8 }
 0xa50   : > { %10242 = vrsqrt.f32 %v4845_v45  ;;  %vm4939_vm8 = vweird.f32 %v4845_v45 }
 0xa55   : > { %v4808_v19 = vpop.xlane.xlu0 %4807 }
 0xa56   : > { %v10243_v11 = vpop.eup %10242  ;;  %v4830_v27 = vmul.f32 0.015625, %v4808_v19 }
 0xa57   : > { %v4934_v16 = vmul.f32 %v10243_v11, %v4845_v45  ;;  %vm4940_vm7 = vweird.f32 %v10243_v11 }
 0xa58   : > { %v4846_v29 = vadd.f32 1e-05, %v4830_v27  ;;  %vm4941_vm9 = vmor %vm4939_vm8, %vm4940_vm7 }
 0xa59   : > { %v4935_v23 = vmul.f32 %v10243_v11, %v4934_v16 }
 0xa5a   : > { %10244 = vrsqrt.f32 %v4846_v29  ;;  %vm4949_vm11 = vweird.f32 %v4846_v29 }
 0xa5b   : > { %v4936_v25 = vmul.f32 0.5, %v4935_v23 }
 0xa5d   : > { %v4937_v42 = vsub.f32 1.5, %v4936_v25  ;;  %v4810_v13 = vpop.xlane.xlu1 %4809 }
 0xa5e   : > { %v4831_v61 = vmul.f32 0.015625, %v4810_v13 }
 0xa5f   : > { %v4938_v2 = vmul.f32 %v10243_v11, %v4937_v42 }
 0xa60   : > { %v10245_v4 = vpop.eup %10244  ;;  %v4847_v26 = vadd.f32 1e-05, %v4831_v61 }
 0xa61   : > { %v4944_v20 = vmul.f32 %v10245_v4, %v4846_v29  ;;  %v4942_v44 = vsel %vm4941_vm9, %v10243_v11, %v4938_v2  ;;  %vm4950_vm10 = vweird.f32 %v10245_v4 }
 0xa62   : > { %10246 = vrsqrt.f32 %v4847_v26  ;;  %v5021_v19 = vmul.f32 %v4942_v44, %v13104_v24  ;;  %vm4951_vm12 = vmor %vm4949_vm11, %vm4950_vm10  ;;  %vm4959_vm15 = vweird.f32 %v4847_v26 }
 0xa63   : > { %v4945_v47 = vmul.f32 %v10245_v4, %v4944_v20 }
 0xa64   : > { %v5040_v45 = vmul.f32 %v13123_v49, %v5021_v19 }
 0xa65   : > { %v4946_v18 = vmul.f32 0.5, %v4945_v47 }
 0xa66   : > { %v4812_v3 = vpop.xlane.xlu2 %4811  ;;  %v5059_v24 = vadd.f32 %v13130_v33, %v5040_v45 }
 0xa67   : > { %v4947_v21 = vsub.f32 1.5, %v4946_v18  ;;  %v4832_v31 = vmul.f32 0.015625, %v4812_v3 }
 0xa68   : > { %v10247_v8 = vpop.eup %10246 }
 0xa69   : > { %v4948_v27 = vmul.f32 %v10245_v4, %v4947_v21  ;;  %v4954_v16 = vmul.f32 %v10247_v8, %v4847_v26  ;;  %v4848_v23 = vadd.f32 1e-05, %v4832_v31  ;;  %vm4960_vm13 = vweird.f32 %v10247_v8 }
 0xa6a   : > { %vm4961_vm14 = vmor %vm4959_vm15, %vm4960_vm13 }
 0xa6b   : > { %v4952_v25 = vsel %vm4951_vm12, %v10245_v4, %v4948_v27  ;;  %v4955_v42 = vmul.f32 %v10247_v8, %v4954_v16  ;;  %10248 = vrsqrt.f32 %v4848_v23  ;;  %vm4969_vm1 = vweird.f32 %v4848_v23 }
 0xa6c   : > { %v5022_v11 = vmul.f32 %v4952_v25, %v13110_v17 }
 0xa6d   : > { %v4956_v13 = vmul.f32 0.5, %v4955_v42 }
 0xa6e   : > { %v5041_v61 = vmul.f32 %v13123_v49, %v5022_v11  ;;  %v4814_v2 = vpop.xlane.xlu0 %4813 }
 0xa6f   : > { %v4957_v20 = vsub.f32 1.5, %v4956_v13  ;;  %v4833_v47 = vmul.f32 0.015625, %v4814_v2 }
 0xa70   : > { %v5060_v29 = vadd.f32 %v13130_v33, %v5041_v61 }
 0xa71   : > { %v10249_v44 = vpop.eup %10248  ;;  %v13211_v18 = vadd.f32 1e-05, %v4833_v47  ;;  %v4958_v3 = vmul.f32 %v10247_v8, %v4957_v20 }
 0xa72   : > { %v13213_v4 = vpack.c.bf16 %v5060_v29, %v5059_v24  ;;  %v4964_v21 = vmul.f32 %v10249_v44, %v4848_v23  ;;  %vm4970_vm0 = vweird.f32 %v10249_v44 }
 0xa73   : > { %10250 = vrsqrt.f32 %v13211_v18  ;;  %v4962_v19 = vsel %vm4961_vm14, %v10247_v8, %v4958_v3  ;;  %vm4971_vm2 = vmor %vm4969_vm1, %vm4970_vm0  ;;  %vm4979_vm4 = vweird.f32 %v13211_v18 }
 0xa74   : > { %v4965_v17 = vmul.f32 %v10249_v44, %v4964_v21  ;;  %5392 = vmatmul.bf16.gmra.mxu1 %v13213_v4  ;;  %5441 = vmatmul.bf16.gmra.mxu2 %v13213_v4  ;;  %v5373_v31 = vpop.f32.mrf.mxu1  ;;  %v5023_v26 = vmul.f32 %v4962_v19, %v13116_v56 }
 0xa75   : > { %5490 = vmatmul.bf16.gmra.mxu3 %v13213_v4  ;;  %5539 = vmatmul.bf16.gmra.mxu0 %v13213_v4  ;;  %v5520_v25 = vpop.f32.mrf.mxu0 }
 0xa76   : > { %v4966_v27 = vmul.f32 0.5, %v4965_v17  ;;  %v4816_v16 = vpop.xlane.xlu1 %4815  ;;  %v5042_v3 = vmul.f32 %v13123_v49, %v5023_v26 }
 0xa77   : > { %v4834_v42 = vmul.f32 0.015625, %v4816_v16  ;;  %v9358_v16 = vld [vmem:[#allocation13 + $0x2e0] sm:$0xf] }
 0xa78   : > { %v4967_v45 = vsub.f32 1.5, %v4966_v27  ;;  %v5061_v26 = vadd.f32 %v13130_v33, %v5042_v3 }
 0xa79   : > { %v13220_v11 = vpop.eup %10250  ;;  %v13223_v13 = vadd.f32 1e-05, %v4834_v42  ;;  %v9723_v42 = vld [vmem:[#allocation13 + $0x2e4] sm:$0xf] }
 0xa7a   : > { %v4968_v61 = vmul.f32 %v10249_v44, %v4967_v45  ;;  %v4974_v2 = vmul.f32 %v13220_v11, %v13211_v18  ;;  %v5422_v8 = vpop.f32.mrf.mxu2  ;;  %vm4980_vm3 = vweird.f32 %v13220_v11 }
 0xa7b   : > { %10252 = vrsqrt.f32 %v13223_v13  ;;  %v13229_v24 = vpack.c.bf16 %v5422_v8, %v5373_v31  ;;  %v5471_v29 = vpop.f32.mrf.mxu3  ;;  %vm13252_vm5 = vmor %vm4979_vm4, %vm4980_vm3  ;;  %vm4989_vm7 = vweird.f32 %v13223_v13 }
 0xa7c   : > { %v4972_v20 = vsel %vm4971_vm2, %v10249_v44, %v4968_v61  ;;  %v4975_v47 = vmul.f32 %v13220_v11, %v4974_v2  ;;  %v13233_v21 = vpack.c.bf16 %v5520_v25, %v5471_v29  ;;  %v13235_v23 = vpop.f32.mrf.mxu1  ;;  %v9726_v44 = vld [vmem:[#allocation13 + $0x2f4] sm:$0xf0]  ;;  %v9360_v61 = vld [vmem:[#allocation13 + $0x2f8] sm:$0xf0] }
 0xa7d   : > { %v5024_v56 = vmul.f32 %v4972_v20, %v13128_v55  ;;  %v13237_v19 = vpop.f32.mrf.mxu0  ;;  %v9359_v31 = vor.u32 %v9726_v44, %v9358_v16  ;;  %v9363_v25 = vor.u32 %v9723_v42, %v9360_v61  ;;  %v9717_v44 = vld [vmem:[#allocation13 + $0x2b4] sm:$0xf]  ;;  %v9336_v42 = vld [vmem:[#allocation13 + $0x2c8] sm:$0xf0] }
 0xa7e   : > { %v4976_v17 = vmul.f32 0.5, %v4975_v47 }
 0xa7f   : > { %v5043_v27 = vmul.f32 %v13123_v49, %v5024_v56  ;;  %5560 = vmatpush.bf16.msra.mxu1 %v9359_v31  ;;  %5609 = vmatpush.bf16.msra.mxu2 %v9363_v25  ;;  %v9334_v56 = vld [vmem:[#allocation13 + $0x2b0] sm:$0xf]  ;;  %v9339_v31 = vor.u32 %v9717_v44, %v9336_v42  ;;  %v9310_v25 = vld [vmem:[#allocation13 + $0x280] sm:$0xf]  ;;  %v9312_v42 = vld [vmem:[#allocation13 + $0x298] sm:$0xf0] }
 0xa80   : > { %v4977_v45 = vsub.f32 1.5, %v4976_v17  ;;  %v9720_v17 = vld [vmem:[#allocation13 + $0x2c4] sm:$0xf0] }
 0xa81   : > { %v10253_v2 = vpop.eup %10252  ;;  %v5062_v55 = vadd.f32 %v13130_v33, %v5043_v27  ;;  %v9335_v27 = vor.u32 %v9720_v17, %v9334_v56  ;;  %v9711_v56 = vld [vmem:[#allocation13 + $0x284] sm:$0xf] }
 0xa82   : > { %v4978_v8 = vmul.f32 %v13220_v11, %v4977_v45  ;;  %v4984_v20 = vmul.f32 %v10253_v2, %v13223_v13  ;;  %v13247_v29 = vpop.f32.mrf.mxu2  ;;  %vm4990_vm6 = vweird.f32 %v10253_v2 }
 0xa83   : > { %v13245_v47 = vpack.c.bf16 %v5062_v55, %v5061_v26  ;;  %v13250_v16 = vpop.f32.mrf.mxu3  ;;  %5561 = vmatpush.bf16.msra.mxu1 %v9335_v27  ;;  %5610 = vmatpush.bf16.msra.mxu2 %v9339_v31  ;;  %vm4991_vm8 = vmor %vm4989_vm7, %vm4990_vm6  ;;  %v9286_v27 = vld [vmem:[#allocation13 + $0x250] sm:$0xf]  ;;  %v9708_v31 = vld [vmem:[#allocation13 + $0x264] sm:$0xf0] }
 0xa84   : > { %v4985_v3 = vmul.f32 %v10253_v2, %v4984_v20  ;;  %v4982_v61 = vsel %vm13252_vm5, %v13220_v11, %v4978_v8  ;;  %v9714_v20 = vld [vmem:[#allocation13 + $0x294] sm:$0xf0]  ;;  %v9315_v8 = vor.u32 %v9711_v56, %v9312_v42  ;;  %v9287_v46 = vor.u32 %v9708_v31, %v9286_v27  ;;  %v9262_v42 = vld [vmem:[#allocation13 + $0x220] sm:$0xf] }
 0xa85   : > { %5397 = vmatmul.bf16.gmra.mxu1 %v13245_v47  ;;  %5446 = vmatmul.bf16.gmra.mxu2 %v13245_v47  ;;  %v9311_v44 = vor.u32 %v9714_v20, %v9310_v25  ;;  %v5025_v45 = vmul.f32 %v4982_v61, %v13143_v36  ;;  %v9288_v25 = vld [vmem:[#allocation13 + $0x268] sm:$0xf0] }
 0xa86   : > { %v4986_v18 = vmul.f32 0.5, %v4985_v3  ;;  %5495 = vmatmul.bf16.gmra.mxu3 %v13245_v47  ;;  %5544 = vmatmul.bf16.gmra.mxu0 %v13245_v47  ;;  %v5378_v26 = vpop.f32.mrf.mxu1 }
 0xa87   : > { %v5525_v55 = vpop.f32.mrf.mxu0  ;;  %5562 = vmatpush.bf16.msra.mxu1 %v9311_v44  ;;  %5611 = vmatpush.bf16.msra.mxu2 %v9315_v8  ;;  %v5044_v20 = vmul.f32 %v13123_v49, %v5025_v45  ;;  %v9699_v45 = vld [vmem:[#allocation13 + $0x224] sm:$0xf] }
 0xa88   : > { %v4987_v17 = vsub.f32 1.5, %v4986_v18  ;;  %v4818_v14 = vpop.xlane.xlu2 %4817 }
 0xa89   : > { %v4835_v11 = vmul.f32 0.015625, %v4818_v14 }
 0xa8a   : > { %v4988_v3 = vmul.f32 %v10253_v2, %v4987_v17  ;;  %v9291_v17 = vor.u32 %v9705_v7, %v9288_v25  ;;  %v9238_v25 = vld [vmem:[#allocation13 + $0x1f0] sm:$0xf] }
 0xa8b   : > { %v13265_v5 = vadd.f32 1e-05, %v4835_v11  ;;  %5563 = vmatpush.bf16.msra.mxu1 %v9287_v46  ;;  %v9702_v11 = vld [vmem:[#allocation13 + $0x234] sm:$0xf0]  ;;  %v9696_v46 = vld [vmem:[#allocation13 + $0x204] sm:$0xf0] }
 0xa8c   : > { %v4992_v12 = vsel %vm4991_vm8, %v10253_v2, %v4988_v3  ;;  %v5427_v18 = vpop.f32.mrf.mxu2  ;;  %5612 = vmatpush.bf16.msra.mxu2 %v9291_v17  ;;  %v9239_v17 = vor.u32 %v9696_v46, %v9238_v25  ;;  %v9190_v25 = vld [vmem:[#allocation13 + $0x190] sm:$0xf] }
 0xa8d   : > { %v5026_v14 = vmul.f32 %v4992_v12, %v13154_v37  ;;  %10254 = vrsqrt.f32 %v13265_v5  ;;  %v13270_v36 = vpack.c.bf16 %v5427_v18, %v5378_v26  ;;  %v5476_v13 = vpop.f32.mrf.mxu3  ;;  %v9263_v12 = vor.u32 %v9702_v11, %v9262_v42  ;;  %v9264_v37 = vld [vmem:[#allocation13 + $0x238] sm:$0xf0]  ;;  %v9693_v42 = vld [vmem:[#allocation13 + $0x1f4] sm:$0xf]  ;;  %v9240_v11 = vld [vmem:[#allocation13 + $0x208] sm:$0xf0] }
 0xa8e   : > { %v13272_v61 = vpack.c.bf16 %v5525_v55, %v5476_v13  ;;  %v13274_v56 = vpop.f32.mrf.mxu1  ;;  %v5063_v26 = vadd.f32 %v13130_v33, %v5044_v20  ;;  %v9267_v27 = vor.u32 %v9699_v45, %v9264_v37  ;;  %v9687_v37 = vld [vmem:[#allocation13 + $0x1c4] sm:$0xf]  ;;  %v9191_v58 = vor.u32 %v9684_v28, %v9190_v25 }
 0xa8f   : > { %v5045_v2 = vmul.f32 %v13123_v49, %v5026_v14  ;;  %v13277_v44 = vpop.f32.mrf.mxu0  ;;  %5564 = vmatpush.bf16.msra.mxu1 %v9263_v12  ;;  %v9690_v12 = vld [vmem:[#allocation13 + $0x1d4] sm:$0xf0]  ;;  %vm4999_vm10 = vweird.f32 %v13265_v5 }
 0xa90   : > { %v4820_v8 = vpop.xlane.xlu0 %4819  ;;  %5613 = vmatpush.bf16.msra.mxu2 %v9267_v27  ;;  %v9216_v27 = vld [vmem:[#allocation13 + $0x1d8] sm:$0xf0] }
 0xa91   : > { %v5064_v55 = vadd.f32 %v13130_v33, %v5045_v2  ;;  %v4836_v3 = vmul.f32 0.015625, %v4820_v8  ;;  %v9243_v2 = vor.u32 %v9693_v42, %v9240_v11  ;;  %v9214_v8 = vld [vmem:[#allocation13 + $0x1c0] sm:$0xf]  ;;  %v9219_v10 = vor.u32 %v9687_v37, %v9216_v27  ;;  %v9192_v42 = vld [vmem:[#allocation13 + $0x1a8] sm:$0xf0] }
 0xa93   : > { %v10255_v31 = vpop.eup %10254  ;;  %v13281_v7 = vpack.c.bf16 %v5064_v55, %v5063_v26  ;;  %v4852_v18 = vadd.f32 1e-05, %v4836_v3  ;;  %5565 = vmatpush.bf16.msra.mxu1 %v9239_v17  ;;  %v9215_v3 = vor.u32 %v9690_v12, %v9214_v8 }
 0xa94   : > { %v4994_v14 = vmul.f32 %v10255_v31, %v13265_v5  ;;  %v13284_v13 = vpop.f32.mrf.mxu2  ;;  %5614 = vmatpush.bf16.msra.mxu2 %v9243_v2  ;;  %vm5000_vm9 = vweird.f32 %v10255_v31 }
 0xa95   : > { %10256 = vrsqrt.f32 %v4852_v18  ;;  %v13286_v20 = vpop.f32.mrf.mxu3  ;;  %5402 = vmatmul.bf16.gmra.mxu1 %v13281_v7  ;;  %5451 = vmatmul.bf16.gmra.mxu2 %v13281_v7  ;;  %vm5001_vm11 = vmor %vm4999_vm10, %vm5000_vm9  ;;  %vm5009_vm13 = vweird.f32 %v4852_v18 }
 0xa96   : > { %v4995_v45 = vmul.f32 %v10255_v31, %v4994_v14  ;;  %5500 = vmatmul.bf16.gmra.mxu3 %v13281_v7  ;;  %5549 = vmatmul.bf16.gmra.mxu0 %v13281_v7  ;;  %v5383_v55 = vpop.f32.mrf.mxu1 }
 0xa97   : > { %v5530_v46 = vpop.f32.mrf.mxu0  ;;  %5566 = vmatpush.bf16.msra.mxu1 %v9215_v3 }
 0xa98   : > { %v4996_v26 = vmul.f32 0.5, %v4995_v45  ;;  %5615 = vmatpush.bf16.msra.mxu2 %v9219_v10  ;;  %v9195_v45 = vor.u32 %v9681_v50, %v9192_v42 }
 0xa9a   : > { %v4997_v14 = vsub.f32 1.5, %v4996_v26 }
 0xa9b   : > { %v10257_v11 = vpop.eup %10256  ;;  %5567 = vmatpush.bf16.msra.mxu1 %v9191_v58 }
 0xa9c   : > { %v4998_v51 = vmul.f32 %v10255_v31, %v4997_v14  ;;  %v5004_v17 = vmul.f32 %v10257_v11, %v4852_v18  ;;  %v5432_v30 = vpop.f32.mrf.mxu2  ;;  %5616 = vmatpush.bf16.msra.mxu2 %v9195_v45  ;;  %vm5010_vm12 = vweird.f32 %v10257_v11 }
 0xa9d   : > { %v13292_v15 = vpack.c.bf16 %v5432_v30, %v5383_v55  ;;  %v5481_v2 = vpop.f32.mrf.mxu3  ;;  %vm5011_vm15 = vmor %vm5009_vm13, %vm5010_vm12 }
 0xa9e   : > { %v5005_v8 = vmul.f32 %v10257_v11, %v5004_v17  ;;  %v13295_v12 = vpack.c.bf16 %v5530_v46, %v5481_v2  ;;  %v5002_v37 = vsel %vm5001_vm11, %v10255_v31, %v4998_v51  ;;  %v13297_v3 = vpop.f32.mrf.mxu1 }
 0xa9f   : > { %v5027_v10 = vmul.f32 %v5002_v37, %v13174_v9  ;;  %v13300_v50 = vpop.f32.mrf.mxu0 }
 0xaa0   : > { %v5006_v26 = vmul.f32 0.5, %v5005_v8 }
 0xaa1   : > { %v5046_v51 = vmul.f32 %v13123_v49, %v5027_v10 }
 0xaa2   : > { %v5007_v28 = vsub.f32 1.5, %v5006_v26 }
 0xaa3   : > { %v5065_v25 = vadd.f32 %v13130_v33, %v5046_v51 }
 0xaa4   : > { %v5008_v30 = vmul.f32 %v10257_v11, %v5007_v28  ;;  %v13302_v55 = vpop.f32.mrf.mxu2 }
 0xaa5   : > { %v13304_v5 = vpop.f32.mrf.mxu3 }
 0xaa6   : > { %v5012_v27 = vsel %vm5011_vm15, %v10257_v11, %v5008_v30 }
 0xaa7   : > { %v5028_v58 = vmul.f32 %v5012_v27, %v13185_v54  ;;  %v5388_v46 = vpop.f32.mrf.mxu1 }
 0xaa8   : > { %v5535_v18 = vpop.f32.mrf.mxu0 }
 0xaa9   : > { %v5047_v31 = vmul.f32 %v13123_v49, %v5028_v58 }
 0xaab   : > { %v5066_v9 = vadd.f32 %v13130_v33, %v5047_v31 }
 0xaad   : > { %v5437_v42 = vpop.f32.mrf.mxu2  ;;  %v5074_v14 = vpack.c.bf16 %v5066_v9, %v5065_v25 }
 0xaae   : > { %v13311_v17 = vpack.c.bf16 %v5437_v42, %v5388_v46  ;;  %v5486_v45 = vpop.f32.mrf.mxu3 }
 0xaaf   : > { %v13313_v2 = vpack.c.bf16 %v5535_v18, %v5486_v45  ;;  %5407 = vmatmul.bf16.gmra.mxu1 %v5074_v14  ;;  %5456 = vmatmul.bf16.gmra.mxu2 %v5074_v14  ;;  %v13321_v49 = vpop.f32.mrf.mxu1 }
 0xab0   : > { %5505 = vmatmul.bf16.gmra.mxu3 %v5074_v14  ;;  %5554 = vmatmul.bf16.gmra.mxu0 %v5074_v14  ;;  %v13323_v33 = vpop.f32.mrf.mxu0 }
 0xab5   : > { %v13325_v54 = vpop.f32.mrf.mxu2 }
 0xab6   : > { %v13329_v11 = vpop.f32.mrf.mxu3 }
 0xabf   : > { %5568 = vmatmul.bf16.vlgmr.msra.gmra.mxu1 %v13140_v43  ;;  %5617 = vmatmul.bf16.vlgmr.msra.gmra.mxu2 %v13140_v43 }
 0xacf   : > { %5573 = vmatmul.bf16.gmra.mxu1 %v13163_v39  ;;  %5622 = vmatmul.bf16.gmra.mxu2 %v13163_v39 }
 0xadf   : > { %5578 = vmatmul.bf16.gmra.mxu1 %v13181_v35  ;;  %5627 = vmatmul.bf16.gmra.mxu2 %v13181_v35 }
 0xaef   : > { %5583 = vmatmul.bf16.gmra.mxu1 %v13199_v40  ;;  %5632 = vmatmul.bf16.gmra.mxu2 %v13199_v40 }
 0xaf1   : > { %v5393_v43 = vpop.f32.mrf.mxu1 }
 0xaf2   : > { %v5540_v8 = vpop.f32.mrf.mxu0 }
 0xaf7   : > { %v5442_v37 = vpop.f32.mrf.mxu2 }
 0xaf8   : > { %v13331_v39 = vpack.c.bf16 %v5442_v37, %v5393_v43  ;;  %v5491_v26 = vpop.f32.mrf.mxu3 }
 0xaf9   : > { %v13333_v28 = vpack.c.bf16 %v5540_v8, %v5491_v26  ;;  %v13335_v35 = vpop.f32.mrf.mxu1 }
 0xafa   : > { %v13341_v30 = vpop.f32.mrf.mxu0 }
 0xaff   : > { %v13337_v10 = vpop.f32.mrf.mxu2  ;;  %5588 = vmatmul.bf16.gmra.mxu1 %v13213_v4  ;;  %5637 = vmatmul.bf16.gmra.mxu2 %v13213_v4 }
 0xb00   : > { %v13343_v40 = vpop.f32.mrf.mxu3 }
 0xb02   : > { %v5398_v27 = vpop.f32.mrf.mxu1 }
 0xb03   : > { %v5545_v31 = vpop.f32.mrf.mxu0 }
 0xb08   : > { %v5447_v51 = vpop.f32.mrf.mxu2 }
 0xb09   : > { %v13345_v58 = vpack.c.bf16 %v5447_v51, %v5398_v27  ;;  %v5496_v25 = vpop.f32.mrf.mxu3 }
 0xb0a   : > { %v13347_v9 = vpop.f32.mrf.mxu1 }
 0xb0b   : > { %v5547_v42 = vpop.f32.mrf.mxu0 }
 0xb0f   : > { %5593 = vmatmul.bf16.gmra.mxu1 %v13245_v47  ;;  %5642 = vmatmul.bf16.gmra.mxu2 %v13245_v47 }
 0xb10   : > { %v13351_v46 = vpop.f32.mrf.mxu2 }
 0xb11   : > { %v5498_v4 = vpop.f32.mrf.mxu3 }
 0xb12   : > { %v5403_v18 = vpop.f32.mrf.mxu1 }
 0xb13   : > { %v5550_v8 = vpop.f32.mrf.mxu0 }
 0xb18   : > { %v5452_v45 = vpop.f32.mrf.mxu2 }
 0xb19   : > { %v13353_v43 = vpack.c.bf16 %v5452_v45, %v5403_v18  ;;  %v5501_v37 = vpop.f32.mrf.mxu3 }
 0xb1a   : > { %v13357_v26 = vpop.f32.mrf.mxu1  ;;  %v5695_v57 = vpack.c.bf16 %v5550_v8, %v5501_v37  ;;  %v5923_v37 = vunpack.c.h.b16 %v13333_v28 }
 0xb1b   : > { %14887 = vst [vmem:[#allocation65_spill] sm:$0xff] %v13353_v43  ;;  %v5552_v27 = vpop.f32.mrf.mxu0  ;;  %v5689_v43 = vpack.c.bf16 %v5545_v31, %v5496_v25 }
 0xb1f   : > { %5598 = vmatmul.bf16.gmra.mxu1 %v13281_v7  ;;  %5647 = vmatmul.bf16.gmra.mxu2 %v13281_v7 }
 0xb20   : > { %v13359_v51 = vpop.f32.mrf.mxu2 }
 0xb21   : > { %v5503_v47 = vpop.f32.mrf.mxu3 }
 0xb22   : > { %v5698_v59 = vpack.c.bf16 %v5552_v27, %v5503_v47 }
 0xb2c   : > { %v5408_v1 = vpop.f32.mrf.mxu1 }
 0xb2d   : > { %v5555_v62 = vpop.f32.mrf.mxu0 }
 0xb2f   : > { %5603 = vmatmul.bf16.gmra.mxu1 %v5074_v14  ;;  %5652 = vmatmul.bf16.gmra.mxu2 %v5074_v14 }
 0xb32   : > { %v5457_v52 = vpop.f32.mrf.mxu2 }
 0xb33   : > { %v13361_v60 = vpack.c.bf16 %v5457_v52, %v5408_v1  ;;  %v5506_v18 = vpop.f32.mrf.mxu3 }
 0xb34   : > { %v13363_v45 = vpop.f32.mrf.mxu1  ;;  %v5701_v34 = vpack.c.bf16 %v5555_v62, %v5506_v18  ;;  %v5783_v62 = vunpack.c.l.b16 %v5698_v59  ;;  %v5928_v18 = vunpack.c.h.b16 %v5698_v59  ;;  %v5686_v59 = vpack.c.bf16 %v13341_v30, %v13343_v40 }
 0xb35   : > { %14888 = vst [vmem:[#allocation66_spill] sm:$0xff] %v13361_v60  ;;  %v5557_v7 = vpop.f32.mrf.mxu0 }
 0xb36   : > { %14889 = vst [vmem:[#allocation67_spill] sm:$0xff] %v13363_v45  ;;  %v5784_v6 = vunpack.c.l.b16 %v5701_v34  ;;  %v5929_v41 = vunpack.c.h.b16 %v5701_v34  ;;  %v5779_v31 = vunpack.c.l.b16 %v5686_v59  ;;  %v5924_v25 = vunpack.c.h.b16 %v5686_v59 }
 0xb38   : > { %v5935_v30 = vpack.c.b16 %v5924_v25, %v5923_v37 }
 0xb3a   : > { %v13365_v53 = vpop.f32.mrf.mxu2 }
 0xb3b   : > { %14890 = vst [vmem:[#allocation68_spill] sm:$0xff] %v13365_v53  ;;  %v5508_v63 = vpop.f32.mrf.mxu3  ;;  %v5782_v53 = vunpack.c.l.b16 %v5695_v57 }
 0xb3c   : > { %v5704_v48 = vpack.c.bf16 %v5557_v7, %v5508_v63  ;;  %v5569_v32 = vpop.f32.mrf.mxu1  ;;  %v5927_v63 = vunpack.c.h.b16 %v5695_v57  ;;  %v5692_v7 = vpack.c.bf16 %v5547_v42, %v5498_v4  ;;  %v5778_v4 = vunpack.c.l.b16 %v13333_v28 }
 0xb3d   : > { %v5792_v45 = vpack.c.b16 %v5783_v62, %v5782_v53  ;;  %v5921_v62 = vunpack.c.h.b16 %v13313_v2 }
 0xb3e   : > { %v5785_v0 = vunpack.c.l.b16 %v5704_v48  ;;  %v5930_v22 = vunpack.c.h.b16 %v5704_v48  ;;  %v5937_v34 = vpack.c.b16 %v5928_v18, %v5927_v63  ;;  %v5790_v27 = vpack.c.b16 %v5779_v31, %v5778_v4 }
 0xb3f   : > { %v5674_v18 = vpack.c.bf16 %v13300_v50, %v13304_v5  ;;  %v5662_v31 = vpack.c.bf16 %v13237_v19, %v13250_v16 }
 0xb40   : > { %v5793_v14 = vpack.c.b16 %v5785_v0, %v5784_v6  ;;  %v5938_v38 = vpack.c.b16 %v5930_v22, %v5929_v41  ;;  %v5781_v22 = vunpack.c.l.b16 %v5692_v7  ;;  %v5926_v41 = vunpack.c.h.b16 %v5692_v7 }
 0xb41   : > { %v5780_v6 = vunpack.c.l.b16 %v5689_v43  ;;  %v5775_v7 = vunpack.c.l.b16 %v5674_v18  ;;  %v5771_v4 = vunpack.c.l.b16 %v5662_v31  ;;  %v5916_v37 = vunpack.c.h.b16 %v5662_v31 }
 0xb42   : > { %5802 = vmatpush.bf16.xpose.msra.mxu3 %v5793_v14  ;;  %5947 = vmatpush.bf16.xpose.msra.mxu0 %v5938_v38  ;;  %v5618_v52 = vpop.f32.mrf.mxu2  ;;  %v5726_v31 = vunpack.c.l.b16 %v13292_v15 }
 0xb43   : > { %v13367_v1 = vpack.c.bf16 %v5618_v52, %v5569_v32  ;;  %v5925_v32 = vunpack.c.h.b16 %v5689_v43  ;;  %v5791_v48 = vpack.c.b16 %v5781_v22, %v5780_v6  ;;  %v5680_v43 = vpack.c.bf16 %v13323_v33, %v13329_v11 }
 0xb44   : > { %v13369_v60 = vpop.f32.mrf.mxu1  ;;  %v5776_v52 = vunpack.c.l.b16 %v13313_v2  ;;  %v5668_v2 = vpack.c.bf16 %v13277_v44, %v13286_v20 }
 0xb45   : > { %v5936_v8 = vpack.c.b16 %v5926_v41, %v5925_v32  ;;  %v5777_v47 = vunpack.c.l.b16 %v5680_v43  ;;  %v5774_v41 = vunpack.c.l.b16 %v13295_v12 }
 0xb46   : > { %v5773_v32 = vunpack.c.l.b16 %v5668_v2  ;;  %v5918_v59 = vunpack.c.h.b16 %v5668_v2  ;;  %v5724_v2 = vunpack.c.l.b16 %v13270_v36 }
 0xb47   : > { %v5789_v28 = vpack.c.b16 %v5777_v47, %v5776_v52  ;;  %v5788_v6 = vpack.c.b16 %v5775_v7, %v5774_v41 }
 0xb4a   : > { %5803 = vmatpush.bf16.xpose.msra.mxu3 %v5792_v45  ;;  %5948 = vmatpush.bf16.xpose.msra.mxu0 %v5937_v34  ;;  %v13371_v0 = vpop.f32.mrf.mxu2  ;;  %v5922_v45 = vunpack.c.h.b16 %v5680_v43  ;;  %v5920_v34 = vunpack.c.h.b16 %v5674_v18  ;;  %v5883_v18 = vunpack.c.h.b16 %v13229_v24 }
 0xb4c   : > { %v5574_v38 = vpop.f32.mrf.mxu1  ;;  %v5934_v63 = vpack.c.b16 %v5922_v45, %v5921_v62  ;;  %v5722_v62 = vunpack.c.l.b16 %v13229_v24  ;;  %v5885_v24 = vunpack.c.h.b16 %v13270_v36 }
 0xb52   : > { %5804 = vmatpush.bf16.xpose.msra.mxu3 %v5791_v48  ;;  %5949 = vmatpush.bf16.xpose.msra.mxu0 %v5936_v8  ;;  %v5623_v57 = vpop.f32.mrf.mxu2  ;;  %v5772_v8 = vunpack.c.l.b16 %v13272_v61 }
 0xb53   : > { %v13375_v53 = vpack.c.bf16 %v5623_v57, %v5574_v38  ;;  %v5919_v38 = vunpack.c.h.b16 %v13295_v12  ;;  %v5917_v57 = vunpack.c.h.b16 %v13272_v61  ;;  %v5661_v61 = vpack.c.bf16 %v13247_v29, %v13235_v23 }
 0xb54   : > { %v13377_v42 = vpop.f32.mrf.mxu1  ;;  %v5787_v12 = vpack.c.b16 %v5773_v32, %v5772_v8  ;;  %v5667_v29 = vpack.c.bf16 %v13284_v13, %v13274_v56 }
 0xb55   : > { %v5933_v50 = vpack.c.b16 %v5920_v34, %v5919_v38  ;;  %v5932_v25 = vpack.c.b16 %v5918_v59, %v5917_v57  ;;  %v5723_v45 = vunpack.c.l.b16 %v5661_v61 }
 0xb56   : > { %v5725_v34 = vunpack.c.l.b16 %v5667_v29  ;;  %v5886_v41 = vunpack.c.h.b16 %v5667_v29 }
 0xb5a   : > { %5805 = vmatpush.bf16.xpose.msra.mxu3 %v5790_v27  ;;  %5950 = vmatpush.bf16.xpose.msra.mxu0 %v5935_v30  ;;  %v13383_v40 = vpop.f32.mrf.mxu2  ;;  %v5770_v27 = vunpack.c.l.b16 %v13233_v21  ;;  %v5915_v30 = vunpack.c.h.b16 %v13233_v21 }
 0xb5c   : > { %v5579_v14 = vpop.f32.mrf.mxu1  ;;  %v5786_v47 = vpack.c.b16 %v5771_v4, %v5770_v27  ;;  %v5931_v19 = vpack.c.b16 %v5916_v37, %v5915_v30  ;;  %v5679_v37 = vpack.c.bf16 %v13325_v54, %v13321_v49 }
 0xb5e   : > { %v5729_v30 = vunpack.c.l.b16 %v5679_v37 }
 0xb62   : > { %5806 = vmatpush.bf16.xpose.msra.mxu3 %v5789_v28  ;;  %5951 = vmatpush.bf16.xpose.msra.mxu0 %v5934_v63  ;;  %v5628_v33 = vpop.f32.mrf.mxu2  ;;  %v5738_v28 = vpack.c.b16 %v5723_v45, %v5722_v62 }
 0xb63   : > { %v13389_v11 = vpack.c.bf16 %v5628_v33, %v5579_v14  ;;  %v5884_v14 = vunpack.c.h.b16 %v5661_v61  ;;  %v5889_v61 = vunpack.c.h.b16 %v13311_v17 }
 0xb64   : > { %v13391_v22 = vpop.f32.mrf.mxu1 }
 0xb65   : > { %v5899_v63 = vpack.c.b16 %v5884_v14, %v5883_v18  ;;  %v5685_v14 = vpack.c.bf16 %v13337_v10, %v13335_v35 }
 0xb67   : > { %v5731_v49 = vunpack.c.l.b16 %v5685_v14  ;;  %v5892_v54 = vunpack.c.h.b16 %v5685_v14 }
 0xb6a   : > { %5807 = vmatpush.bf16.xpose.msra.mxu3 %v5788_v6  ;;  %5952 = vmatpush.bf16.xpose.msra.mxu0 %v5933_v50  ;;  %v13397_v5 = vpop.f32.mrf.mxu2  ;;  %v5739_v6 = vpack.c.b16 %v5725_v34, %v5724_v2  ;;  %v5900_v50 = vpack.c.b16 %v5886_v41, %v5885_v24 }
 0xb6c   : > { %v5584_v48 = vpop.f32.mrf.mxu1 }
 0xb72   : > { %5808 = vmatpush.bf16.xpose.msra.mxu3 %v5787_v12  ;;  %5953 = vmatpush.bf16.xpose.msra.mxu0 %v5932_v25  ;;  %v5633_v44 = vpop.f32.mrf.mxu2  ;;  %v5887_v12 = vunpack.c.h.b16 %v13292_v15 }
 0xb73   : > { %v13403_v20 = vpack.c.bf16 %v5633_v44, %v5584_v48  ;;  %v5673_v48 = vpack.c.bf16 %v13302_v55, %v13297_v3  ;;  %v5890_v3 = vunpack.c.h.b16 %v5679_v37  ;;  %v5728_v55 = vunpack.c.l.b16 %v13311_v17 }
 0xb74   : > { %v13405_v43 = vpop.f32.mrf.mxu1 }
 0xb75   : > { %v5727_v56 = vunpack.c.l.b16 %v5673_v48  ;;  %v5888_v13 = vunpack.c.h.b16 %v5673_v48  ;;  %v6547_v14 = vunpack.c.h.b16 %v13403_v20 }
 0xb77   : > { %v5740_v25 = vpack.c.b16 %v5727_v56, %v5726_v31  ;;  %v5901_v44 = vpack.c.b16 %v5888_v13, %v5887_v12 }
 0xb7a   : > { %5809 = vmatpush.bf16.xpose.msra.mxu3 %v5786_v47  ;;  %5954 = vmatpush.bf16.xpose.msra.mxu0 %v5931_v19  ;;  %v13411_v16 = vpop.f32.mrf.mxu2  ;;  %v5741_v47 = vpack.c.b16 %v5729_v30, %v5728_v55  ;;  %v5902_v19 = vpack.c.b16 %v5890_v3, %v5889_v61 }
 0xb7c   : > { %v5589_v52 = vpop.f32.mrf.mxu1 }
 0xb81   : > { %5810 = vmatmul.bf16.vlgmr.msra.gmra.mxu3 %v5738_v28  ;;  %5955 = vmatmul.bf16.vlgmr.msra.gmra.mxu0 %v5899_v63  ;;  %v5730_v63 = vunpack.c.l.b16 %v13331_v39 }
 0xb82   : > { %v5638_v21 = vpop.f32.mrf.mxu2 }
 0xb83   : > { %v13415_v33 = vpack.c.bf16 %v5638_v21, %v5589_v52  ;;  %v5891_v21 = vunpack.c.h.b16 %v13331_v39  ;;  %v5742_v48 = vpack.c.b16 %v5731_v49, %v5730_v63 }
 0xb84   : > { %v13417_v23 = vpop.f32.mrf.mxu1 }
 0xb85   : > { %v5903_v35 = vpack.c.b16 %v5892_v54, %v5891_v21  ;;  %v6416_v54 = vunpack.c.l.b16 %v13389_v11  ;;  %v6414_v21 = vunpack.c.l.b16 %v13375_v53 }
 0xb8a   : > { %v13421_v7 = vpop.f32.mrf.mxu2 }
 0xb8b   : > { %v5687_v39 = vpack.c.bf16 %v13421_v7, %v13417_v23  ;;  %v6420_v23 = vunpack.c.l.b16 %v13415_v33  ;;  %v6549_v7 = vunpack.c.h.b16 %v13415_v33  ;;  %v5669_v33 = vpack.c.bf16 %v13383_v40, %v13377_v42 }
 0xb8c   : > { %v5594_v38 = vpop.f32.mrf.mxu1 }
 0xb8d   : > { %v6544_v63 = vunpack.c.h.b16 %v5669_v33 }
 0xb91   : > { %5815 = vmatmul.bf16.gmra.mxu3 %v5739_v6  ;;  %5960 = vmatmul.bf16.gmra.mxu0 %v5900_v50 }
 0xb92   : > { %v5643_v32 = vpop.f32.mrf.mxu2 }
 0xb93   : > { %v5690_v31 = vpack.c.bf16 %v5643_v32, %v5594_v38  ;;  %v5681_v38 = vpack.c.bf16 %v13411_v16, %v13405_v43  ;;  %v6421_v32 = vunpack.c.l.b16 %v5687_v39  ;;  %v5732_v43 = vunpack.c.l.b16 %v13345_v58 }
 0xb94   : > { %v5596_v59 = vpop.f32.mrf.mxu1  ;;  %v5893_v16 = vunpack.c.h.b16 %v13345_v58  ;;  %v6545_v58 = vunpack.c.h.b16 %v13389_v11 }
 0xb95   : > { %v6422_v37 = vunpack.c.l.b16 %v5690_v31 }
 0xb9a   : > { %v5645_v8 = vpop.f32.mrf.mxu2 }
 0xb9b   : > { %v5693_v10 = vpack.c.bf16 %v5645_v8, %v5596_v59  ;;  %v5691_v59 = vpack.c.bf16 %v13351_v46, %v13347_v9  ;;  %v6550_v8 = vunpack.c.h.b16 %v5687_v39  ;;  %v6548_v9 = vunpack.c.h.b16 %v5681_v38 }
 0xb9c   : > { %v5599_v57 = vpop.f32.mrf.mxu1  ;;  %v6432_v46 = vpack.c.b16 %v6421_v32, %v6420_v23 }
 0xb9d   : > { %v5733_v55 = vunpack.c.l.b16 %v5691_v59  ;;  %v5894_v61 = vunpack.c.h.b16 %v5691_v59  ;;  %v6560_v49 = vpack.c.b16 %v6548_v9, %v6547_v14 }
 0xba1   : > { %5820 = vmatmul.bf16.gmra.mxu3 %v5740_v25  ;;  %5965 = vmatmul.bf16.gmra.mxu0 %v5901_v44  ;;  %v6423_v44 = vunpack.c.l.b16 %v5693_v10 }
 0xba2   : > { %v5648_v36 = vpop.f32.mrf.mxu2 }
 0xba3   : > { %v5696_v24 = vpack.c.bf16 %v5648_v36, %v5599_v57  ;;  %v6433_v30 = vpack.c.b16 %v6423_v44, %v6422_v37 }
 0xba4   : > { %v5601_v4 = vpop.f32.mrf.mxu1 }
 0xba5   : > { %v6424_v12 = vunpack.c.l.b16 %v5696_v24  ;;  %v6553_v25 = vunpack.c.h.b16 %v5696_v24  ;;  %v6412_v24 = vunpack.c.l.b16 %v13367_v1 }
 0xbaa   : > { %v5650_v27 = vpop.f32.mrf.mxu2 }
 0xbab   : > { %v5699_v17 = vpack.c.bf16 %v5650_v27, %v5601_v4  ;;  %v6552_v4 = vunpack.c.h.b16 %v5693_v10  ;;  %v6551_v27 = vunpack.c.h.b16 %v5690_v31 }
 0xbac   : > { %v5604_v45 = vpop.f32.mrf.mxu1 }
 0xbad   : > { %v6425_v56 = vunpack.c.l.b16 %v5699_v17  ;;  %v6554_v13 = vunpack.c.h.b16 %v5699_v17  ;;  %v6562_v3 = vpack.c.b16 %v6552_v4, %v6551_v27  ;;  %v6543_v17 = vunpack.c.h.b16 %v13375_v53  ;;  %v14891_v53 = vld [vmem:[#allocation65_spill] sm:$0xff]  ;;  %v14895_v27 = vld [vmem:[#allocation60_spill] sm:$0xff] }
 0xbae   : > { %v5895_v10 = vunpack.c.h.b16 %v14891_v53 }
 0xbaf   : > { %v6434_v57 = vpack.c.b16 %v6425_v56, %v6424_v12  ;;  %v6563_v36 = vpack.c.b16 %v6554_v13, %v6553_v25  ;;  %v14892_v56 = vld [vmem:[#allocation67_spill] sm:$0xff]  ;;  %v14893_v13 = vld [vmem:[#allocation68_spill] sm:$0xff]  ;;  %v14894_v25 = vld [vmem:[#allocation66_spill] sm:$0xff] }
 0xbb0   : > { %v5703_v31 = vpack.c.bf16 %v14893_v13, %v14892_v56  ;;  %v5736_v39 = vunpack.c.l.b16 %v14894_v25  ;;  %v5897_v44 = vunpack.c.h.b16 %v14894_v25  ;;  %v14902_v56 = vld [vmem:[#allocation37_spill] sm:$0xff] }
 0xbb1   : > { %5825 = vmatmul.bf16.gmra.mxu3 %v5741_v47  ;;  %5970 = vmatmul.bf16.gmra.mxu0 %v5902_v19  ;;  %v5675_v47 = vpack.c.bf16 %v13397_v5, %v13391_v22  ;;  %v6419_v19 = vunpack.c.l.b16 %v5681_v38 }
 0xbb2   : > { %v5653_v15 = vpop.f32.mrf.mxu2  ;;  %v5898_v12 = vunpack.c.h.b16 %v5703_v31 }
 0xbb3   : > { %v5702_v52 = vpack.c.bf16 %v5653_v15, %v5604_v45  ;;  %v6561_v45 = vpack.c.b16 %v6550_v8, %v6549_v7  ;;  %v6418_v15 = vunpack.c.l.b16 %v13403_v20  ;;  %v6417_v22 = vunpack.c.l.b16 %v5675_v47 }
 0xbb4   : > { %v5606_v62 = vpop.f32.mrf.mxu1  ;;  %v6546_v5 = vunpack.c.h.b16 %v5675_v47  ;;  %v5663_v20 = vpack.c.bf16 %v13371_v0, %v13369_v60  ;;  %v6541_v60 = vunpack.c.h.b16 %v13367_v1  ;;  %v5737_v1 = vunpack.c.l.b16 %v5703_v31 }
 0xbb5   : > { %v6426_v29 = vunpack.c.l.b16 %v5702_v52  ;;  %v6555_v34 = vunpack.c.h.b16 %v5702_v52  ;;  %v5743_v52 = vpack.c.b16 %v5733_v55, %v5732_v43  ;;  %v6430_v42 = vpack.c.b16 %v6417_v22, %v6416_v54 }
 0xbb6   : > { %v6559_v40 = vpack.c.b16 %v6546_v5, %v6545_v58  ;;  %v6542_v11 = vunpack.c.h.b16 %v5663_v20  ;;  %v5745_v4 = vpack.c.b16 %v5737_v1, %v5736_v39  ;;  %v14898_v5 = vld [vmem:[#allocation58_spill] sm:$0xff] }
 0xbba   : > { %v5655_v18 = vpop.f32.mrf.mxu2 }
 0xbbb   : > { %v5705_v28 = vpack.c.bf16 %v5655_v18, %v5606_v62  ;;  %v5904_v62 = vpack.c.b16 %v5894_v61, %v5893_v16  ;;  %v6431_v18 = vpack.c.b16 %v6419_v19, %v6418_v15  ;;  %v14896_v61 = vld [vmem:[#allocation59_spill] sm:$0xff]  ;;  %v14897_v16 = vld [vmem:[#allocation62_spill] sm:$0xff] }
 0xbbd   : > { %v6427_v41 = vunpack.c.l.b16 %v5705_v28  ;;  %v6556_v2 = vunpack.c.h.b16 %v5705_v28  ;;  %v6415_v28 = vunpack.c.l.b16 %v5669_v33 }
 0xbbf   : > { %v6435_v6 = vpack.c.b16 %v6427_v41, %v6426_v29  ;;  %v6564_v50 = vpack.c.b16 %v6556_v2, %v6555_v34  ;;  %v5697_v29 = vpack.c.bf16 %v13359_v51, %v13357_v26  ;;  %v6413_v34 = vunpack.c.l.b16 %v5663_v20 }
 0xbc0   : > { %v6429_v41 = vpack.c.b16 %v6415_v28, %v6414_v21  ;;  %v6558_v2 = vpack.c.b16 %v6544_v63, %v6543_v17  ;;  %v14899_v63 = vld [vmem:[#allocation61_spill] sm:$0xff] }
 0xbc1   : > { %5830 = vmatmul.bf16.gmra.mxu3 %v5742_v48  ;;  %5975 = vmatmul.bf16.gmra.mxu0 %v5903_v35  ;;  %v5735_v0 = vunpack.c.l.b16 %v5697_v29  ;;  %v6557_v48 = vpack.c.b16 %v6542_v11, %v6541_v60  ;;  %v5734_v35 = vunpack.c.l.b16 %v14891_v53  ;;  %v14900_v11 = vld [vmem:[#allocation32_spill] sm:$0xff] }
 0xbc2   : > { %6444 = vmatpush.bf16.msrb.mxu1 %v6435_v6  ;;  %6573 = vmatpush.bf16.msrb.mxu2 %v6564_v50  ;;  %v5896_v6 = vunpack.c.h.b16 %v5697_v29  ;;  %v6428_v50 = vpack.c.b16 %v6413_v34, %v6412_v24 }
 0xbc3   : > { %v5744_v26 = vpack.c.b16 %v5735_v0, %v5734_v35 }
 0xbc4   : > { %v5905_v51 = vpack.c.b16 %v5896_v6, %v5895_v10 }
 0xbc6   : > { %6445 = vmatpush.bf16.msrb.mxu1 %v6434_v57  ;;  %6574 = vmatpush.bf16.msrb.mxu2 %v6563_v36  ;;  %v5906_v57 = vpack.c.b16 %v5898_v12, %v5897_v44  ;;  %v14903_v44 = vld [vmem:[#allocation42_spill] sm:$0xff] }
 0xbca   : > { %6446 = vmatpush.bf16.msrb.mxu1 %v6433_v30  ;;  %6575 = vmatpush.bf16.msrb.mxu2 %v6562_v3 }
 0xbce   : > { %6447 = vmatpush.bf16.msrb.mxu1 %v6432_v46  ;;  %6576 = vmatpush.bf16.msrb.mxu2 %v6561_v45 }
 0xbd1   : > { %5835 = vmatmul.bf16.gmra.mxu3 %v5743_v52  ;;  %5980 = vmatmul.bf16.gmra.mxu0 %v5904_v62 }
 0xbd2   : > { %6448 = vmatpush.bf16.msrb.mxu1 %v6431_v18  ;;  %6577 = vmatpush.bf16.msrb.mxu2 %v6560_v49 }
 0xbd6   : > { %6449 = vmatpush.bf16.msrb.mxu1 %v6430_v42  ;;  %6578 = vmatpush.bf16.msrb.mxu2 %v6559_v40 }
 0xbda   : > { %6450 = vmatpush.bf16.msrb.mxu1 %v6429_v41  ;;  %6579 = vmatpush.bf16.msrb.mxu2 %v6558_v2 }
 0xbde   : > { %6451 = vmatpush.bf16.msrb.mxu1 %v6428_v50  ;;  %6580 = vmatpush.bf16.msrb.mxu2 %v6557_v48  ;;  %v14901_v50 = vld [vmem:[#allocation34_spill] sm:$0xff] }
 0xbe1   : > { %5840 = vmatmul.bf16.gmra.mxu3 %v5744_v26  ;;  %5985 = vmatmul.bf16.gmra.mxu0 %v5905_v51 }
 0xbf1   : > { %5845 = vmatmul.bf16.gmra.mxu3 %v5745_v4  ;;  %5990 = vmatmul.bf16.gmra.mxu0 %v5906_v57 }
 0xbfe   : > { %v5956_v36 = vpop.f32.mrf.mxu0 }
 0xbff   : > { %v5996_v37 = vmul.f32 0.17677669, %v5956_v36 }
 0xc01   : > { %v13470_v59 = vadd.f32 %v5996_v37, %v14895_v27 }
 0xc03   : > { %6060 = vmax.xlane.f32.xlu0 %v13470_v59 }
 0xc04   : > { %v5811_v38 = vpop.f32.mrf.mxu3 }
 0xc05   : > { %v5851_v32 = vmul.f32 0.17677669, %v5811_v38  ;;  %v14904_v38 = vld [vmem:[#allocation47_spill] sm:$0xff] }
 0xc06   : > { %v5958_v8 = vpop.f32.mrf.mxu0 }
 0xc07   : > { %v13474_v30 = vadd.f32 %v5851_v32, %v14895_v27  ;;  %v5997_v3 = vmul.f32 0.17677669, %v5958_v8 }
 0xc09   : > { %6028 = vmax.xlane.f32.xlu1 %v13474_v30  ;;  %v13478_v47 = vadd.f32 %v5997_v3, %v14896_v61 }
 0xc0c   : > { %v5813_v23 = vpop.f32.mrf.mxu3 }
 0xc0d   : > { %v5852_v7 = vmul.f32 0.17677669, %v5813_v23 }
 0xc0e   : > { %v5961_v55 = vpop.f32.mrf.mxu0 }
 0xc0f   : > { %v13481_v19 = vadd.f32 %v5852_v7, %v14896_v61  ;;  %v5998_v9 = vmul.f32 0.17677669, %v5961_v55  ;;  %v14905_v61 = vld [vmem:[#allocation51_spill] sm:$0xff] }
 0xc11   : > { %6062 = vmax.xlane.f32.xlu1 %v13478_v47  ;;  %6030 = vmax.xlane.f32.xlu2 %v13481_v19  ;;  %v13486_v15 = vadd.f32 %v5998_v9, %v14897_v16 }
 0xc14   : > { %v5816_v46 = vpop.f32.mrf.mxu3 }
 0xc15   : > { %v5853_v45 = vmul.f32 0.17677669, %v5816_v46 }
 0xc16   : > { %v5963_v43 = vpop.f32.mrf.mxu0 }
 0xc17   : > { %v13489_v14 = vadd.f32 %v5853_v45, %v14897_v16  ;;  %v5999_v33 = vmul.f32 0.17677669, %v5963_v43  ;;  %v14906_v16 = vld [vmem:[#allocation54_spill] sm:$0xff] }
 0xc19   : > { %6064 = vmax.xlane.f32.xlu1 %v13486_v15  ;;  %6032 = vmax.xlane.f32.xlu2 %v13489_v14  ;;  %v13494_v18 = vadd.f32 %v5999_v33, %v14898_v5 }
 0xc1c   : > { %v5818_v52 = vpop.f32.mrf.mxu3 }
 0xc1d   : > { %v5854_v62 = vmul.f32 0.17677669, %v5818_v52 }
 0xc1e   : > { %v5966_v22 = vpop.f32.mrf.mxu0 }
 0xc1f   : > { %v13497_v49 = vadd.f32 %v5854_v62, %v14898_v5  ;;  %v6000_v54 = vmul.f32 0.17677669, %v5966_v22 }
 0xc21   : > { %6066 = vmax.xlane.f32.xlu2 %v13494_v18  ;;  %6034 = vmax.xlane.f32.xlu0 %v13497_v49  ;;  %v13502_v42 = vadd.f32 %v6000_v54, %v14899_v63 }
 0xc24   : > { %v5821_v58 = vpop.f32.mrf.mxu3 }
 0xc25   : > { %v5855_v20 = vmul.f32 0.17677669, %v5821_v58 }
 0xc26   : > { %v5968_v28 = vpop.f32.mrf.mxu0 }
 0xc27   : > { %v13505_v40 = vadd.f32 %v5855_v20, %v14899_v63  ;;  %v6001_v21 = vmul.f32 0.17677669, %v5968_v28 }
 0xc29   : > { %6068 = vmax.xlane.f32.xlu2 %v13502_v42  ;;  %6036 = vmax.xlane.f32.xlu0 %v13505_v40  ;;  %v13510_v41 = vadd.f32 %v6001_v21, %v14900_v11 }
 0xc2c   : > { %v5823_v17 = vpop.f32.mrf.mxu3 }
 0xc2d   : > { %v5856_v29 = vmul.f32 0.17677669, %v5823_v17 }
 0xc2e   : > { %v5971_v34 = vpop.f32.mrf.mxu0 }
 0xc2f   : > { %v13513_v2 = vadd.f32 %v5856_v29, %v14900_v11  ;;  %v6002_v24 = vmul.f32 0.17677669, %v5971_v34 }
 0xc31   : > { %6070 = vmax.xlane.f32.xlu0 %v13510_v41  ;;  %6038 = vmax.xlane.f32.xlu1 %v13513_v2  ;;  %v13518_v48 = vadd.f32 %v6002_v24, %v14901_v50 }
 0xc34   : > { %v5826_v60 = vpop.f32.mrf.mxu3 }
 0xc35   : > { %v5857_v0 = vmul.f32 0.17677669, %v5826_v60  ;;  %v14907_v60 = vld [vmem:[#allocation33_spill] sm:$0xff] }
 0xc36   : > { %v5973_v6 = vpop.f32.mrf.mxu0 }
 0xc37   : > { %v13521_v53 = vadd.f32 %v5857_v0, %v14901_v50  ;;  %v6003_v35 = vmul.f32 0.17677669, %v5973_v6 }
 0xc39   : > { %6072 = vmax.xlane.f32.xlu0 %v13518_v48  ;;  %6040 = vmax.xlane.f32.xlu1 %v13521_v53  ;;  %v13526_v13 = vadd.f32 %v6003_v35, %v14902_v56 }
 0xc3c   : > { %v5828_v10 = vpop.f32.mrf.mxu3 }
 0xc3d   : > { %v5858_v26 = vmul.f32 0.17677669, %v5828_v10 }
 0xc3e   : > { %v5976_v51 = vpop.f32.mrf.mxu0 }
 0xc3f   : > { %v13529_v31 = vadd.f32 %v5858_v26, %v14902_v56  ;;  %v6004_v1 = vmul.f32 0.17677669, %v5976_v51 }
 0xc41   : > { %6074 = vmax.xlane.f32.xlu1 %v13526_v13  ;;  %6042 = vmax.xlane.f32.xlu2 %v13529_v31  ;;  %v13534_v4 = vadd.f32 %v6004_v1, %v14903_v44 }
 0xc44   : > { %v5831_v12 = vpop.f32.mrf.mxu3 }
 0xc45   : > { %v5859_v25 = vmul.f32 0.17677669, %v5831_v12 }
 0xc46   : > { %v5978_v39 = vpop.f32.mrf.mxu0 }
 0xc47   : > { %v13537_v57 = vadd.f32 %v5859_v25, %v14903_v44  ;;  %v6005_v36 = vmul.f32 0.17677669, %v5978_v39 }
 0xc49   : > { %6076 = vmax.xlane.f32.xlu2 %v13534_v4  ;;  %6044 = vmax.xlane.f32.xlu0 %v13537_v57  ;;  %v13542_v32 = vadd.f32 %v6005_v36, %v14904_v38 }
 0xc4c   : > { %v5833_v37 = vpop.f32.mrf.mxu3 }
 0xc4d   : > { %v5860_v27 = vmul.f32 0.17677669, %v5833_v37 }
 0xc4e   : > { %v5981_v3 = vpop.f32.mrf.mxu0 }
 0xc4f   : > { %v13545_v8 = vadd.f32 %v5860_v27, %v14904_v38  ;;  %v6006_v23 = vmul.f32 0.17677669, %v5981_v3 }
 0xc51   : > { %6078 = vmax.xlane.f32.xlu0 %v13542_v32  ;;  %6046 = vmax.xlane.f32.xlu1 %v13545_v8  ;;  %v13550_v9 = vadd.f32 %v6006_v23, %v14905_v61 }
 0xc54   : > { %v5836_v7 = vpop.f32.mrf.mxu3 }
 0xc55   : > { %v5861_v55 = vmul.f32 0.17677669, %v5836_v7 }
 0xc56   : > { %v5983_v50 = vpop.f32.mrf.mxu0 }
 0xc57   : > { %v13553_v46 = vadd.f32 %v5861_v55, %v14905_v61  ;;  %v6007_v56 = vmul.f32 0.17677669, %v5983_v50 }
 0xc59   : > { %6080 = vmax.xlane.f32.xlu1 %v13550_v9  ;;  %6048 = vmax.xlane.f32.xlu2 %v13553_v46 }
 0xc5c   : > { %v5838_v45 = vpop.f32.mrf.mxu3 }
 0xc5d   : > { %v5862_v43 = vmul.f32 0.17677669, %v5838_v45 }
 0xc5e   : > { %v5986_v44 = vpop.f32.mrf.mxu0 }
 0xc5f   : > { %v13558_v33 = vadd.f32 %v5862_v43, %v14906_v16 }
 0xc61   : > { %6050 = vmax.xlane.f32.xlu0 %v13558_v33 }
 0xc64   : > { %v5841_v28 = vpop.f32.mrf.mxu3 }
 0xc65   : > { %v5863_v63 = vmul.f32 0.17677669, %v5841_v28  ;;  %v14908_v28 = vld [vmem:[#allocation63_spill] sm:$0xff] }
 0xc6c   : > { %v5843_v38 = vpop.f32.mrf.mxu3 }
 0xc76   : > { %v6061_v52 = vpop.xlane.xlu0 %6060 }
 0xc77   : > { %v6108_v62 = vsub.f32 %v13470_v59, %v6061_v52  ;;  %v5864_v52 = vmul.f32 0.17677669, %v5843_v38 }
 0xc79   : > { %v6156_v22 = vmul.f32 1.442695, %v6108_v62 }
 0xc7b   : > { %10258 = vpow2.f32 %v6156_v22 }
 0xc7c   : > { %v6029_v5 = vpop.xlane.xlu1 %6028 }
 0xc7d   : > { %v6092_v54 = vsub.f32 %v13474_v30, %v6029_v5  ;;  %v13571_v30 = vadd.f32 %v5863_v63, %v14907_v60  ;;  %v13610_v63 = vadd.f32 %v5864_v52, %v14908_v28 }
 0xc7f   : > { %v6124_v58 = vmul.f32 1.442695, %v6092_v54 }
 0xc81   : > { %v13563_v20 = vpop.eup %10258  ;;  %10260 = vpow2.f32 %v6124_v58 }
 0xc82   : > { %6220 = vadd.xlane.f32.xlu1 %v13563_v20 }
 0xc84   : > { %v6063_v21 = vpop.xlane.xlu1 %6062  ;;  %v6031_v17 = vpop.xlane.xlu2 %6030 }
 0xc85   : > { %v6109_v29 = vsub.f32 %v13478_v47, %v6063_v21  ;;  %v6093_v34 = vsub.f32 %v13481_v19, %v6031_v17 }
 0xc87   : > { %v13568_v59 = vpop.eup %10260  ;;  %v6158_v11 = vmul.f32 1.442695, %v6109_v29  ;;  %v6126_v24 = vmul.f32 1.442695, %v6093_v34 }
 0xc88   : > { %6188 = vadd.xlane.f32.xlu2 %v13568_v59 }
 0xc89   : > { %10262 = vpow2.f32 %v6158_v11 }
 0xc8a   : > { %10264 = vpow2.f32 %v6126_v24  ;;  %6052 = vmax.xlane.f32.xlu1 %v13571_v30 }
 0xc8c   : > { %v6065_v0 = vpop.xlane.xlu1 %6064  ;;  %v6033_v6 = vpop.xlane.xlu2 %6032 }
 0xc8d   : > { %v6110_v47 = vsub.f32 %v13486_v15, %v6065_v0  ;;  %v6094_v19 = vsub.f32 %v13489_v14, %v6033_v6  ;;  %v13586_v14 = vadd.f32 %v6007_v56, %v14906_v16  ;;  %v5988_v16 = vpop.f32.mrf.mxu0 }
 0xc8f   : > { %v13577_v35 = vpop.eup %10262  ;;  %v6160_v10 = vmul.f32 1.442695, %v6110_v47  ;;  %v6128_v26 = vmul.f32 1.442695, %v6094_v19 }
 0xc90   : > { %v13579_v51 = vpop.eup %10264  ;;  %6222 = vadd.xlane.f32.xlu2 %v13577_v35 }
 0xc91   : > { %10266 = vpow2.f32 %v6160_v10  ;;  %6190 = vadd.xlane.f32.xlu0 %v13579_v51 }
 0xc92   : > { %10268 = vpow2.f32 %v6128_v26 }
 0xc94   : > { %v6067_v1 = vpop.xlane.xlu2 %6066  ;;  %v6035_v12 = vpop.xlane.xlu0 %6034 }
 0xc95   : > { %v6111_v25 = vsub.f32 %v13494_v18, %v6067_v1  ;;  %v6095_v15 = vsub.f32 %v13497_v49, %v6035_v12  ;;  %v6008_v18 = vmul.f32 0.17677669, %v5986_v44  ;;  %v5991_v12 = vpop.f32.mrf.mxu0 }
 0xc97   : > { %v13588_v39 = vpop.eup %10266  ;;  %v6162_v36 = vmul.f32 1.442695, %v6111_v25  ;;  %v6130_v37 = vmul.f32 1.442695, %v6095_v15  ;;  %v13599_v55 = vadd.f32 %v6008_v18, %v14907_v60  ;;  %v14909_v25 = vld [vmem:[#allocation40_spill] sm:$0xff] }
 0xc98   : > { %v13590_v27 = vpop.eup %10268  ;;  %6082 = vmax.xlane.f32.xlu2 %v13586_v14 }
 0xc99   : > { %10270 = vpow2.f32 %v6162_v36  ;;  %6224 = vadd.xlane.f32.xlu0 %v13588_v39  ;;  %6192 = vadd.xlane.f32.xlu1 %v13590_v27 }
 0xc9a   : > { %10272 = vpow2.f32 %v6130_v37 }
 0xc9c   : > { %v6037_v49 = vpop.xlane.xlu0 %6036  ;;  %v6069_v3 = vpop.xlane.xlu2 %6068 }
 0xc9d   : > { %v6096_v23 = vsub.f32 %v13505_v40, %v6037_v49  ;;  %v6112_v43 = vsub.f32 %v13502_v42, %v6069_v3  ;;  %v6009_v40 = vmul.f32 0.17677669, %v5988_v16  ;;  %v5846_v42 = vpop.f32.mrf.mxu3  ;;  %v14910_v49 = vld [vmem:[#allocation64_spill] sm:$0xff] }
 0xc9e   : > { %v5865_v47 = vmul.f32 0.17677669, %v5846_v42 }
 0xc9f   : > { %v13596_v7 = vpop.eup %10270  ;;  %v6132_v61 = vmul.f32 1.442695, %v6096_v23  ;;  %v6164_v62 = vmul.f32 1.442695, %v6112_v43  ;;  %v13615_v34 = vadd.f32 %v6009_v40, %v14908_v28  ;;  %v5993_v43 = vpop.f32.mrf.mxu0  ;;  %v6010_v40 = vmul.f32 0.17677669, %v5991_v12 }
 0xca0   : > { %v13601_v45 = vpop.eup %10272  ;;  %v13634_v15 = vadd.f32 %v5865_v47, %v14909_v25 }
 0xca1   : > { %6194 = vadd.xlane.f32.xlu2 %v13601_v45  ;;  %6084 = vmax.xlane.f32.xlu0 %v13599_v55  ;;  %10274 = vpow2.f32 %v6132_v61 }
 0xca2   : > { %6226 = vadd.xlane.f32.xlu1 %v13596_v7  ;;  %10276 = vpow2.f32 %v6164_v62  ;;  %v6011_v62 = vmul.f32 0.17677669, %v5993_v43 }
 0xca4   : > { %v6071_v22 = vpop.xlane.xlu0 %6070  ;;  %v6039_v5 = vpop.xlane.xlu1 %6038  ;;  %v13661_v28 = vadd.f32 %v6011_v62, %v14910_v49 }
 0xca5   : > { %v6113_v54 = vsub.f32 %v13510_v41, %v6071_v22  ;;  %v6097_v58 = vsub.f32 %v13513_v2, %v6039_v5  ;;  %v5848_v50 = vpop.f32.mrf.mxu3 }
 0xca7   : > { %v6166_v21 = vmul.f32 1.442695, %v6113_v54  ;;  %v6134_v17 = vmul.f32 1.442695, %v6097_v58  ;;  %v13612_v29 = vpop.eup %10274 }
 0xca8   : > { %v13621_v11 = vpop.eup %10276 }
 0xca9   : > { %10278 = vpow2.f32 %v6166_v21  ;;  %6196 = vadd.xlane.f32.xlu0 %v13612_v29  ;;  %6054 = vmax.xlane.f32.xlu2 %v13610_v63 }
 0xcaa   : > { %10280 = vpow2.f32 %v6134_v17  ;;  %6086 = vmax.xlane.f32.xlu1 %v13615_v34 }
 0xcac   : > { %v6041_v41 = vpop.xlane.xlu1 %6040  ;;  %v6073_v6 = vpop.xlane.xlu0 %6072 }
 0xcad   : > { %v6098_v2 = vsub.f32 %v13521_v53, %v6041_v41  ;;  %v6114_v19 = vsub.f32 %v13518_v48, %v6073_v6  ;;  %v5866_v53 = vmul.f32 0.17677669, %v5848_v50 }
 0xcaf   : > { %v13623_v24 = vpop.eup %10278  ;;  %v6136_v60 = vmul.f32 1.442695, %v6098_v2  ;;  %v6168_v44 = vmul.f32 1.442695, %v6114_v19  ;;  %v13639_v38 = vadd.f32 %v5866_v53, %v14910_v49 }
 0xcb0   : > { %v13625_v0 = vpop.eup %10280 }
 0xcb1   : > { %6230 = vadd.xlane.f32.xlu0 %v13623_v24  ;;  %6228 = vadd.xlane.f32.xlu2 %v13621_v11  ;;  %10282 = vpow2.f32 %v6136_v60 }
 0xcb2   : > { %6198 = vadd.xlane.f32.xlu1 %v13625_v0 }
 0xcb4   : > { %v6075_v10 = vpop.xlane.xlu1 %6074  ;;  %v6043_v26 = vpop.xlane.xlu2 %6042 }
 0xcb5   : > { %v6115_v56 = vsub.f32 %v13526_v13, %v6075_v10  ;;  %v6099_v1 = vsub.f32 %v13529_v31, %v6043_v26 }
 0xcb7   : > { %v6170_v36 = vmul.f32 1.442695, %v6115_v56  ;;  %v6138_v37 = vmul.f32 1.442695, %v6099_v1  ;;  %v13636_v18 = vpop.eup %10282 }
 0xcb9   : > { %10284 = vpow2.f32 %v6170_v36  ;;  %6200 = vadd.xlane.f32.xlu2 %v13636_v18  ;;  %6056 = vmax.xlane.f32.xlu0 %v13634_v15 }
 0xcba   : > { %10286 = vpow2.f32 %v6138_v37  ;;  %6058 = vmax.xlane.f32.xlu1 %v13639_v38 }
 0xcbb   : > { %10288 = vpow2.f32 %v6168_v44 }
 0xcbc   : > { %v6045_v48 = vpop.xlane.xlu0 %6044  ;;  %v6077_v13 = vpop.xlane.xlu2 %6076 }
 0xcbd   : > { %v6100_v31 = vsub.f32 %v13537_v57, %v6045_v48  ;;  %v6116_v16 = vsub.f32 %v13534_v4, %v6077_v13  ;;  %v13658_v4 = vadd.f32 %v6010_v40, %v14909_v25 }
 0xcbf   : > { %v13645_v3 = vpop.eup %10284  ;;  %v6140_v23 = vmul.f32 1.442695, %v6100_v31  ;;  %v6172_v57 = vmul.f32 1.442695, %v6116_v16 }
 0xcc0   : > { %v13647_v61 = vpop.eup %10286 }
 0xcc1   : > { %v13650_v52 = vpop.eup %10288  ;;  %6234 = vadd.xlane.f32.xlu2 %v13645_v3  ;;  %6202 = vadd.xlane.f32.xlu0 %v13647_v61  ;;  %10290 = vpow2.f32 %v6140_v23 }
 0xcc2   : > { %6232 = vadd.xlane.f32.xlu1 %v13650_v52  ;;  %10292 = vpow2.f32 %v6172_v57 }
 0xcc4   : > { %v6079_v22 = vpop.xlane.xlu0 %6078  ;;  %v6047_v5 = vpop.xlane.xlu1 %6046 }
 0xcc5   : > { %v6117_v54 = vsub.f32 %v13542_v32, %v6079_v22  ;;  %v6101_v58 = vsub.f32 %v13545_v8, %v6047_v5 }
 0xcc7   : > { %v6174_v42 = vmul.f32 1.442695, %v6117_v54  ;;  %v6142_v21 = vmul.f32 1.442695, %v6101_v58  ;;  %v13663_v17 = vpop.eup %10290 }
 0xcc8   : > { %v13670_v60 = vpop.eup %10292 }
 0xcc9   : > { %10294 = vpow2.f32 %v6174_v42  ;;  %6088 = vmax.xlane.f32.xlu2 %v13658_v4  ;;  %6090 = vmax.xlane.f32.xlu0 %v13661_v28 }
 0xcca   : > { %10296 = vpow2.f32 %v6142_v21  ;;  %6204 = vadd.xlane.f32.xlu1 %v13663_v17 }
 0xccc   : > { %v6081_v32 = vpop.xlane.xlu1 %6080  ;;  %v6049_v8 = vpop.xlane.xlu2 %6048 }
 0xccd   : > { %v6118_v41 = vsub.f32 %v13550_v9, %v6081_v32  ;;  %v6102_v2 = vsub.f32 %v13553_v46, %v6049_v8 }
 0xccf   : > { %v13672_v6 = vpop.eup %10294  ;;  %v6176_v50 = vmul.f32 1.442695, %v6118_v41  ;;  %v6144_v47 = vmul.f32 1.442695, %v6102_v2 }
 0xcd0   : > { %v13674_v19 = vpop.eup %10296 }
 0xcd1   : > { %10298 = vpow2.f32 %v6176_v50  ;;  %6206 = vadd.xlane.f32.xlu2 %v13674_v19  ;;  %6236 = vadd.xlane.f32.xlu0 %v13670_v60 }
 0xcd2   : > { %10300 = vpow2.f32 %v6144_v47  ;;  %6238 = vadd.xlane.f32.xlu1 %v13672_v6 }
 0xcd4   : > { %v6051_v53 = vpop.xlane.xlu0 %6050 }
 0xcd5   : > { %v6103_v9 = vsub.f32 %v13558_v33, %v6051_v53 }
 0xcd7   : > { %v13680_v46 = vpop.eup %10298  ;;  %v6146_v10 = vmul.f32 1.442695, %v6103_v9 }
 0xcd8   : > { %v13682_v26 = vpop.eup %10300 }
 0xcd9   : > { %10302 = vpow2.f32 %v6146_v10  ;;  %6208 = vadd.xlane.f32.xlu2 %v13682_v26 }
 0xcda   : > { %6240 = vadd.xlane.f32.xlu1 %v13680_v46 }
 0xcdf   : > { %v13686_v56 = vpop.eup %10302 }
 0xce0   : > { %6210 = vadd.xlane.f32.xlu0 %v13686_v56 }
 0xcf5   : > { %v6221_v1 = vpop.xlane.xlu1 %6220 }
 0xcf6   : > { %10304 = vrcp.f32 %v6221_v1 }
 0xcfb   : > { %v6189_v12 = vpop.xlane.xlu2 %6188 }
 0xcfc   : > { %10306 = vrcp.f32 %v6189_v12  ;;  %v10305_v37 = vpop.eup %10304 }
 0xcfd   : > { %v6053_v25 = vpop.xlane.xlu1 %6052  ;;  %v6300_v13 = vmul.f32 %v10305_v37, %v13563_v20 }
 0xcfe   : > { %v6104_v33 = vsub.f32 %v13571_v30, %v6053_v25 }
 0xcff   : > { %v6332_v30 = vpack.c.bf16 %v6300_v13, %v6300_v13 }
 0xd00   : > { %v6148_v44 = vmul.f32 1.442695, %v6104_v33 }
 0xd02   : > { %10308 = vpow2.f32 %v6148_v44  ;;  %v10307_v48 = vpop.eup %10306 }
 0xd03   : > { %v6223_v36 = vpop.xlane.xlu2 %6222  ;;  %v6284_v23 = vmul.f32 %v10307_v48, %v13568_v59  ;;  %v6509_v59 = vunpack.c.l.b16 %v6332_v30 }
 0xd04   : > { %10310 = vrcp.f32 %v6223_v36  ;;  %v6191_v49 = vpop.xlane.xlu0 %6190 }
 0xd05   : > { %10312 = vrcp.f32 %v6191_v49  ;;  %v6316_v57 = vpack.c.bf16 %v6284_v23, %v6284_v23 }
 0xd07   : > { %v6364_v8 = vunpack.c.l.b16 %v6316_v57 }
 0xd08   : > { %v13691_v31 = vpop.eup %10308 }
 0xd09   : > { %6212 = vadd.xlane.f32.xlu0 %v13691_v31 }
 0xd0a   : > { %v10311_v43 = vpop.eup %10310 }
 0xd0b   : > { %v10313_v16 = vpop.eup %10312  ;;  %v6301_v40 = vmul.f32 %v10311_v43, %v13577_v35  ;;  %v6083_v62 = vpop.xlane.xlu2 %6082 }
 0xd0c   : > { %v6285_v22 = vmul.f32 %v10313_v16, %v13579_v51  ;;  %v6119_v5 = vsub.f32 %v13586_v14, %v6083_v62  ;;  %v6225_v54 = vpop.xlane.xlu0 %6224  ;;  %v6193_v58 = vpop.xlane.xlu1 %6192 }
 0xd0d   : > { %v6333_v20 = vpack.c.bf16 %v6301_v40, %v6301_v40  ;;  %10314 = vrcp.f32 %v6225_v54 }
 0xd0e   : > { %v6317_v42 = vpack.c.bf16 %v6285_v22, %v6285_v22  ;;  %v6178_v21 = vmul.f32 1.442695, %v6119_v5  ;;  %10316 = vrcp.f32 %v6193_v58 }
 0xd0f   : > { %v6510_v32 = vunpack.c.l.b16 %v6333_v20 }
 0xd10   : > { %v6365_v41 = vunpack.c.l.b16 %v6317_v42  ;;  %10318 = vpow2.f32 %v6178_v21 }
 0xd11   : > { %v6525_v2 = vpack.c.b16 %v6510_v32, %v6509_v59 }
 0xd12   : > { %v6380_v35 = vpack.c.b16 %v6365_v41, %v6364_v8 }
 0xd13   : > { %6581 = vmatmul.bf16.vlgmr.msrb.gmra.mxu2 %v6525_v2  ;;  %v10315_v50 = vpop.eup %10314 }
 0xd14   : > { %v6195_v47 = vpop.xlane.xlu2 %6194  ;;  %v6085_v51 = vpop.xlane.xlu0 %6084  ;;  %6452 = vmatmul.bf16.vlgmr.msrb.gmra.mxu1 %v6380_v35  ;;  %v6302_v25 = vmul.f32 %v10315_v50, %v13588_v39 }
 0xd15   : > { %v10317_v14 = vpop.eup %10316  ;;  %10320 = vrcp.f32 %v6195_v47  ;;  %v6120_v53 = vsub.f32 %v13599_v55, %v6085_v51  ;;  %v6227_v9 = vpop.xlane.xlu1 %6226 }
 0xd16   : > { %v13699_v10 = vpop.eup %10318  ;;  %10322 = vrcp.f32 %v6227_v9  ;;  %v6286_v12 = vmul.f32 %v10317_v14, %v13590_v27  ;;  %v6334_v43 = vpack.c.bf16 %v6302_v25, %v6302_v25 }
 0xd17   : > { %v6180_v1 = vmul.f32 1.442695, %v6120_v53  ;;  %6242 = vadd.xlane.f32.xlu2 %v13699_v10 }
 0xd18   : > { %v6318_v48 = vpack.c.bf16 %v6286_v12, %v6286_v12  ;;  %v6511_v22 = vunpack.c.l.b16 %v6334_v43 }
 0xd19   : > { %10324 = vpow2.f32 %v6180_v1 }
 0xd1a   : > { %v6366_v57 = vunpack.c.l.b16 %v6318_v48 }
 0xd1b   : > { %v10321_v33 = vpop.eup %10320 }
 0xd1c   : > { %v10323_v44 = vpop.eup %10322  ;;  %v6197_v36 = vpop.xlane.xlu0 %6196  ;;  %v6287_v49 = vmul.f32 %v10321_v33, %v13601_v45 }
 0xd1d   : > { %v6055_v37 = vpop.xlane.xlu2 %6054  ;;  %v6087_v55 = vpop.xlane.xlu1 %6086  ;;  %v6303_v23 = vmul.f32 %v10323_v44, %v13596_v7  ;;  %10326 = vrcp.f32 %v6197_v36 }
 0xd1e   : > { %v6105_v13 = vsub.f32 %v13610_v63, %v6055_v37  ;;  %v6121_v16 = vsub.f32 %v13615_v34, %v6087_v55  ;;  %v6319_v30 = vpack.c.bf16 %v6287_v49, %v6287_v49 }
 0xd1f   : > { %v13708_v27 = vpop.eup %10324  ;;  %v6335_v39 = vpack.c.bf16 %v6303_v23, %v6303_v23 }
 0xd20   : > { %v6150_v40 = vmul.f32 1.442695, %v6105_v13  ;;  %v6182_v62 = vmul.f32 1.442695, %v6121_v16  ;;  %6244 = vadd.xlane.f32.xlu2 %v13708_v27  ;;  %v6367_v45 = vunpack.c.l.b16 %v6319_v30 }
 0xd21   : > { %v6512_v5 = vunpack.c.l.b16 %v6335_v39 }
 0xd22   : > { %10328 = vpow2.f32 %v6150_v40  ;;  %v6381_v63 = vpack.c.b16 %v6367_v45, %v6366_v57 }
 0xd23   : > { %10330 = vpow2.f32 %v6182_v62  ;;  %v6526_v7 = vpack.c.b16 %v6512_v5, %v6511_v22  ;;  %v10327_v20 = vpop.eup %10326 }
 0xd24   : > { %v6231_v54 = vpop.xlane.xlu0 %6230  ;;  %6457 = vmatmul.bf16.gmra.mxu1 %v6381_v63  ;;  %v6288_v59 = vmul.f32 %v10327_v20, %v13612_v29 }
 0xd25   : > { %v6229_v58 = vpop.xlane.xlu2 %6228  ;;  %10332 = vrcp.f32 %v6231_v54  ;;  %v6199_v34 = vpop.xlane.xlu1 %6198  ;;  %6586 = vmatmul.bf16.gmra.mxu2 %v6526_v7 }
 0xd26   : > { %10334 = vrcp.f32 %v6199_v34  ;;  %v6320_v53 = vpack.c.bf16 %v6288_v59, %v6288_v59 }
 0xd27   : > { %10336 = vrcp.f32 %v6229_v58 }
 0xd28   : > { %v13711_v42 = vpop.eup %10328 }
 0xd29   : > { %v13713_v21 = vpop.eup %10330  ;;  %6214 = vadd.xlane.f32.xlu1 %v13711_v42 }
 0xd2a   : > { %6246 = vadd.xlane.f32.xlu0 %v13713_v21 }
 0xd2b   : > { %v10333_v32 = vpop.eup %10332 }
 0xd2c   : > { %v10335_v8 = vpop.eup %10334  ;;  %v6057_v2 = vpop.xlane.xlu0 %6056  ;;  %v6305_v35 = vmul.f32 %v10333_v32, %v13623_v24  ;;  %v6368_v24 = vunpack.c.l.b16 %v6320_v53 }
 0xd2d   : > { %v6201_v41 = vpop.xlane.xlu2 %6200  ;;  %v10337_v50 = vpop.eup %10336  ;;  %v6106_v47 = vsub.f32 %v13634_v15, %v6057_v2  ;;  %v6289_v14 = vmul.f32 %v10335_v8, %v13625_v0 }
 0xd2e   : > { %v6059_v51 = vpop.xlane.xlu1 %6058  ;;  %v6304_v1 = vmul.f32 %v10337_v50, %v13621_v11  ;;  %v6337_v12 = vpack.c.bf16 %v6305_v35, %v6305_v35  ;;  %10338 = vrcp.f32 %v6201_v41 }
 0xd2f   : > { %v6107_v9 = vsub.f32 %v13639_v38, %v6059_v51  ;;  %v6152_v25 = vmul.f32 1.442695, %v6106_v47  ;;  %v6321_v29 = vpack.c.bf16 %v6289_v14, %v6289_v14  ;;  %v9742_v47 = vld [vmem:[#allocation14 + $0xf8] sm:$0xff]  ;;  %v9733_v14 = vld [vmem:[#allocation14 + $0xb0] sm:$0xff] }
 0xd30   : > { %v6336_v44 = vpack.c.bf16 %v6304_v1, %v6304_v1  ;;  %v6514_v36 = vunpack.c.l.b16 %v6337_v12  ;;  %6816 = vmatpush.bf16.msrb.mxu0 %v9742_v47 }
 0xd31   : > { %v6154_v33 = vmul.f32 1.442695, %v6107_v9  ;;  %10340 = vpow2.f32 %v6152_v25  ;;  %v6369_v37 = vunpack.c.l.b16 %v6321_v29 }
 0xd32   : > { %v6513_v15 = vunpack.c.l.b16 %v6336_v44 }
 0xd33   : > { %10342 = vpow2.f32 %v6154_v33  ;;  %v6382_v49 = vpack.c.b16 %v6369_v37, %v6368_v24 }
 0xd34   : > { %v6203_v0 = vpop.xlane.xlu0 %6202  ;;  %v6527_v55 = vpack.c.b16 %v6514_v36, %v6513_v15  ;;  %v10339_v11 = vpop.eup %10338 }
 0xd35   : > { %v6235_v48 = vpop.xlane.xlu2 %6234  ;;  %6462 = vmatmul.bf16.gmra.mxu1 %v6382_v49  ;;  %v6290_v43 = vmul.f32 %v10339_v11, %v13636_v18 }
 0xd36   : > { %10344 = vrcp.f32 %v6235_v48  ;;  %v6233_v38 = vpop.xlane.xlu1 %6232  ;;  %6591 = vmatmul.bf16.gmra.mxu2 %v6527_v55 }
 0xd37   : > { %10346 = vrcp.f32 %v6203_v0  ;;  %v13723_v13 = vpop.eup %10340  ;;  %v6322_v7 = vpack.c.bf16 %v6290_v43, %v6290_v43 }
 0xd38   : > { %10348 = vrcp.f32 %v6233_v38  ;;  %6216 = vadd.xlane.f32.xlu1 %v13723_v13 }
 0xd39   : > { %v13725_v23 = vpop.eup %10342 }
 0xd3a   : > { %6218 = vadd.xlane.f32.xlu2 %v13725_v23 }
 0xd3c   : > { %v10345_v16 = vpop.eup %10344  ;;  %v6091_v39 = vpop.xlane.xlu0 %6090 }
 0xd3d   : > { %v10347_v30 = vpop.eup %10346  ;;  %v6089_v40 = vpop.xlane.xlu2 %6088  ;;  %v6307_v62 = vmul.f32 %v10345_v16, %v13645_v3  ;;  %v6123_v22 = vsub.f32 %v13661_v28, %v6091_v39  ;;  %v6370_v3 = vunpack.c.l.b16 %v6322_v7  ;;  %v9741_v39 = vld [vmem:[#allocation14 + $0xf0] sm:$0xff]  ;;  %v9730_v7 = vld [vmem:[#allocation14 + $0x98] sm:$0xff] }
 0xd3e   : > { %v10349_v57 = vpop.eup %10348  ;;  %v6122_v45 = vsub.f32 %v13658_v4, %v6089_v40  ;;  %v6205_v5 = vpop.xlane.xlu1 %6204  ;;  %v6291_v63 = vmul.f32 %v10347_v30, %v13647_v61  ;;  %6817 = vmatpush.bf16.msrb.mxu0 %v9741_v39 }
 0xd3f   : > { %v6306_v54 = vmul.f32 %v10349_v57, %v13650_v52  ;;  %v6339_v58 = vpack.c.bf16 %v6307_v62, %v6307_v62  ;;  %v6186_v18 = vmul.f32 1.442695, %v6123_v22  ;;  %10350 = vrcp.f32 %v6205_v5  ;;  %v9734_v52 = vld [vmem:[#allocation14 + $0xb8] sm:$0xff]  ;;  %v9732_v62 = vld [vmem:[#allocation14 + $0xa8] sm:$0xff]  ;;  %v9731_v22 = vld [vmem:[#allocation14 + $0xa0] sm:$0xff] }
 0xd40   : > { %v6184_v34 = vmul.f32 1.442695, %v6122_v45  ;;  %v6323_v20 = vpack.c.bf16 %v6291_v63, %v6291_v63  ;;  %6767 = vmatpush.bf16.msrb.mxu3 %v9734_v52  ;;  %v9740_v5 = vld [vmem:[#allocation14 + $0xe8] sm:$0xff] }
 0xd41   : > { %v6338_v59 = vpack.c.bf16 %v6306_v54, %v6306_v54  ;;  %v6516_v32 = vunpack.c.l.b16 %v6339_v58  ;;  %v9739_v54 = vld [vmem:[#allocation14 + $0xe0] sm:$0xff]  ;;  %v9728_v58 = vld [vmem:[#allocation14 + $0x88] sm:$0xff] }
 0xd42   : > { %10352 = vpow2.f32 %v6184_v34  ;;  %v6371_v8 = vunpack.c.l.b16 %v6323_v20  ;;  %6818 = vmatpush.bf16.msrb.mxu0 %v9740_v5  ;;  %v9737_v34 = vld [vmem:[#allocation14 + $0xd0] sm:$0xff]  ;;  %v9736_v20 = vld [vmem:[#allocation14 + $0xc8] sm:$0xff] }
 0xd43   : > { %10354 = vpow2.f32 %v6186_v18  ;;  %v6515_v4 = vunpack.c.l.b16 %v6338_v59  ;;  %v9727_v18 = vld [vmem:[#allocation14 + $0x80] sm:$0xff] }
 0xd44   : > { %v6383_v41 = vpack.c.b16 %v6371_v8, %v6370_v3  ;;  %v6237_v2 = vpop.xlane.xlu0 %6236  ;;  %6768 = vmatpush.bf16.msrb.mxu3 %v9733_v14  ;;  %v9735_v59 = vld [vmem:[#allocation14 + $0xc0] sm:$0xff] }
 0xd45   : > { %v6207_v28 = vpop.xlane.xlu2 %6206  ;;  %v6528_v35 = vpack.c.b16 %v6516_v32, %v6515_v4  ;;  %v10351_v61 = vpop.eup %10350 }
 0xd46   : > { %10356 = vrcp.f32 %v6207_v28  ;;  %v6239_v50 = vpop.xlane.xlu1 %6238  ;;  %6467 = vmatmul.bf16.gmra.mxu1 %v6383_v41  ;;  %v6292_v9 = vmul.f32 %v10351_v61, %v13663_v17  ;;  %6819 = vmatpush.bf16.msrb.mxu0 %v9739_v54 }
 0xd47   : > { %10358 = vrcp.f32 %v6237_v2  ;;  %6596 = vmatmul.bf16.gmra.mxu2 %v6528_v35 }
 0xd48   : > { %v13735_v51 = vpop.eup %10352  ;;  %10360 = vrcp.f32 %v6239_v50  ;;  %v6324_v33 = vpack.c.bf16 %v6292_v9, %v6292_v9  ;;  %6769 = vmatpush.bf16.msrb.mxu3 %v9732_v62 }
 0xd49   : > { %v13737_v53 = vpop.eup %10354  ;;  %6248 = vadd.xlane.f32.xlu0 %v13735_v51 }
 0xd4a   : > { %6250 = vadd.xlane.f32.xlu1 %v13737_v53  ;;  %v6372_v49 = vunpack.c.l.b16 %v6324_v33 }
 0xd4c   : > { %v10357_v1 = vpop.eup %10356  ;;  %6770 = vmatpush.bf16.msrb.mxu3 %v9731_v22 }
 0xd4d   : > { %v10359_v12 = vpop.eup %10358  ;;  %v6209_v25 = vpop.xlane.xlu2 %6208  ;;  %v6293_v29 = vmul.f32 %v10357_v1, %v13674_v19 }
 0xd4e   : > { %v10361_v44 = vpop.eup %10360  ;;  %v6308_v36 = vmul.f32 %v10359_v12, %v13670_v60  ;;  %10362 = vrcp.f32 %v6209_v25  ;;  %v6241_v32 = vpop.xlane.xlu1 %6240 }
 0xd4f   : > { %v6325_v24 = vpack.c.bf16 %v6293_v29, %v6293_v29  ;;  %v6309_v37 = vmul.f32 %v10361_v44, %v13672_v6 }
 0xd50   : > { %v6340_v15 = vpack.c.bf16 %v6308_v36, %v6308_v36  ;;  %6771 = vmatpush.bf16.msrb.mxu3 %v9730_v7 }
 0xd51   : > { %v6373_v48 = vunpack.c.l.b16 %v6325_v24  ;;  %v6341_v17 = vpack.c.bf16 %v6309_v37, %v6309_v37 }
 0xd52   : > { %v6517_v0 = vunpack.c.l.b16 %v6340_v15 }
 0xd53   : > { %v6384_v55 = vpack.c.b16 %v6373_v48, %v6372_v49  ;;  %v6518_v38 = vunpack.c.l.b16 %v6341_v17  ;;  %v6211_v11 = vpop.xlane.xlu0 %6210 }
 0xd54   : > { %v10363_v43 = vpop.eup %10362  ;;  %10364 = vrcp.f32 %v6211_v11 }
 0xd55   : > { %v6529_v16 = vpack.c.b16 %v6518_v38, %v6517_v0  ;;  %v6294_v19 = vmul.f32 %v10363_v43, %v13682_v26  ;;  %v9729_v26 = vld [vmem:[#allocation14 + $0x90] sm:$0xff]  ;;  %10366 = vrcp.f32 %v6241_v32 }
 0xd56   : > { %6472 = vmatmul.bf16.gmra.mxu1 %v6384_v55  ;;  %6772 = vmatpush.bf16.msrb.mxu3 %v9729_v26 }
 0xd57   : > { %6601 = vmatmul.bf16.gmra.mxu2 %v6529_v16  ;;  %v6326_v40 = vpack.c.bf16 %v6294_v19, %v6294_v19 }
 0xd59   : > { %v6374_v57 = vunpack.c.l.b16 %v6326_v40 }
 0xd5a   : > { %v10365_v60 = vpop.eup %10364  ;;  %6773 = vmatpush.bf16.msrb.mxu3 %v9728_v58 }
 0xd5b   : > { %v6295_v30 = vmul.f32 %v10365_v60, %v13686_v56  ;;  %v9738_v56 = vld [vmem:[#allocation14 + $0xd8] sm:$0xff]  ;;  %v10367_v8 = vpop.eup %10366 }
 0xd5c   : > { %6820 = vmatpush.bf16.msrb.mxu0 %v9738_v56  ;;  %v6310_v4 = vmul.f32 %v10367_v8, %v13680_v46 }
 0xd5d   : > { %v6327_v6 = vpack.c.bf16 %v6295_v30, %v6295_v30 }
 0xd5e   : > { %6774 = vmatpush.bf16.msrb.mxu3 %v9727_v18  ;;  %v6342_v35 = vpack.c.bf16 %v6310_v4, %v6310_v4 }
 0xd5f   : > { %v6375_v45 = vunpack.c.l.b16 %v6327_v6 }
 0xd60   : > { %6821 = vmatpush.bf16.msrb.mxu0 %v9737_v34  ;;  %v6519_v14 = vunpack.c.l.b16 %v6342_v35 }
 0xd61   : > { %v6385_v63 = vpack.c.b16 %v6375_v45, %v6374_v57 }
 0xd64   : > { %6822 = vmatpush.bf16.msrb.mxu0 %v9736_v20 }
 0xd66   : > { %6477 = vmatmul.bf16.gmra.mxu1 %v6385_v63 }
 0xd68   : > { %6823 = vmatpush.bf16.msrb.mxu0 %v9735_v59 }
 0xd7c   : > { %v6213_v61 = vpop.xlane.xlu0 %6212 }
 0xd8a   : > { %v6243_v3 = vpop.xlane.xlu2 %6242 }
 0xd8b   : > { %10368 = vrcp.f32 %v6243_v3 }
 0xd8c   : > { %10370 = vrcp.f32 %v6213_v61 }
 0xd91   : > { %v10369_v41 = vpop.eup %10368  ;;  %v6453_v28 = vpop.f32.mrf.mxu1 }
 0xd92   : > { %v6311_v2 = vmul.f32 %v10369_v41, %v13699_v10  ;;  %v10371_v33 = vpop.eup %10370 }
 0xd93   : > { %v6245_v50 = vpop.xlane.xlu2 %6244  ;;  %v6296_v24 = vmul.f32 %v10371_v33, %v13691_v31 }
 0xd94   : > { %v6343_v52 = vpack.c.bf16 %v6311_v2, %v6311_v2  ;;  %10372 = vrcp.f32 %v6245_v50 }
 0xd95   : > { %v6328_v0 = vpack.c.bf16 %v6296_v24, %v6296_v24 }
 0xd96   : > { %v6582_v47 = vpop.f32.mrf.mxu2  ;;  %v6520_v9 = vunpack.c.l.b16 %v6343_v52 }
 0xd97   : > { %v6376_v16 = vunpack.c.l.b16 %v6328_v0  ;;  %v14911_v0 = vld [vmem:[#allocation36_spill] sm:$0xff] }
 0xd98   : > { %v6530_v1 = vpack.c.b16 %v6520_v9, %v6519_v14 }
 0xd99   : > { %v6455_v12 = vpop.f32.mrf.mxu1 }
 0xd9a   : > { %v6622_v25 = vpack.c.bf16 %v6455_v12, %v6453_v28  ;;  %6606 = vmatmul.bf16.gmra.mxu2 %v6530_v1  ;;  %v10373_v44 = vpop.eup %10372 }
 0xd9b   : > { %v6312_v37 = vmul.f32 %v10373_v44, %v13708_v27 }
 0xd9c   : > { %v6215_v29 = vpop.xlane.xlu1 %6214  ;;  %6775 = vmatmul.bf16.vlgmr.msrb.gmra.mxu3 %v6622_v25 }
 0xd9d   : > { %v6247_v46 = vpop.xlane.xlu0 %6246  ;;  %10374 = vrcp.f32 %v6215_v29  ;;  %v6344_v38 = vpack.c.bf16 %v6312_v37, %v6312_v37 }
 0xd9e   : > { %10376 = vrcp.f32 %v6247_v46  ;;  %v6584_v10 = vpop.f32.mrf.mxu2 }
 0xd9f   : > { %v6623_v36 = vpack.c.bf16 %v6584_v10, %v6582_v47  ;;  %v6521_v30 = vunpack.c.l.b16 %v6344_v38 }
 0xda1   : > { %v6458_v15 = vpop.f32.mrf.mxu1  ;;  %6824 = vmatmul.bf16.vlgmr.msrb.gmra.mxu0 %v6623_v36 }
 0xda3   : > { %v10375_v49 = vpop.eup %10374 }
 0xda4   : > { %v10377_v48 = vpop.eup %10376  ;;  %v6297_v17 = vmul.f32 %v10375_v49, %v13711_v42 }
 0xda5   : > { %v6313_v55 = vmul.f32 %v10377_v48, %v13713_v21 }
 0xda6   : > { %v6329_v11 = vpack.c.bf16 %v6297_v17, %v6297_v17  ;;  %v13760_v17 = vld [vmem:[%s14618_s9 + $0x1] ss:$0 sm:$0xff] }
 0xda7   : > { %v6345_v43 = vpack.c.bf16 %v6313_v55, %v6313_v55 }
 0xda8   : > { %v6377_v19 = vunpack.c.l.b16 %v6329_v11  ;;  %v6587_v60 = vpop.f32.mrf.mxu2 }
 0xda9   : > { %v6522_v40 = vunpack.c.l.b16 %v6345_v43  ;;  %v6460_v31 = vpop.f32.mrf.mxu1 }
 0xdaa   : > { %v6386_v6 = vpack.c.b16 %v6377_v19, %v6376_v16  ;;  %v6624_v27 = vpack.c.bf16 %v6460_v31, %v6458_v15  ;;  %v14912_v19 = vld [vmem:[#allocation35_spill] sm:$0xff] }
 0xdab   : > { %v6531_v39 = vpack.c.b16 %v6522_v40, %v6521_v30  ;;  %v6217_v62 = vpop.xlane.xlu1 %6216 }
 0xdac   : > { %6482 = vmatmul.bf16.gmra.mxu1 %v6386_v6  ;;  %10378 = vrcp.f32 %v6217_v62  ;;  %6780 = vmatmul.bf16.gmra.mxu3 %v6624_v27  ;;  %v14913_v6 = vld [vmem:[#allocation38_spill] sm:$0xff] }
 0xdad   : > { %v6219_v57 = vpop.xlane.xlu2 %6218  ;;  %6611 = vmatmul.bf16.gmra.mxu2 %v6531_v39 }
 0xdae   : > { %10380 = vrcp.f32 %v6219_v57 }
 0xdb0   : > { %v6589_v42 = vpop.f32.mrf.mxu2 }
 0xdb1   : > { %v6625_v21 = vpack.c.bf16 %v6589_v42, %v6587_v60 }
 0xdb2   : > { %v10379_v45 = vpop.eup %10378  ;;  %v6463_v22 = vpop.f32.mrf.mxu1 }
 0xdb3   : > { %6829 = vmatmul.bf16.gmra.mxu0 %v6625_v21  ;;  %v6298_v63 = vmul.f32 %v10379_v45, %v13723_v13 }
 0xdb4   : > { %v10381_v5 = vpop.eup %10380 }
 0xdb5   : > { %v6299_v7 = vmul.f32 %v10381_v5, %v13725_v23  ;;  %v6330_v54 = vpack.c.bf16 %v6298_v63, %v6298_v63  ;;  %v14914_v63 = vld [vmem:[#allocation43_spill] sm:$0xff] }
 0xdb7   : > { %v6331_v26 = vpack.c.bf16 %v6299_v7, %v6299_v7  ;;  %v6378_v56 = vunpack.c.l.b16 %v6330_v54 }
 0xdb9   : > { %v6379_v58 = vunpack.c.l.b16 %v6331_v26  ;;  %v6592_v34 = vpop.f32.mrf.mxu2 }
 0xdba   : > { %v6465_v18 = vpop.f32.mrf.mxu1 }
 0xdbb   : > { %v6387_v20 = vpack.c.b16 %v6379_v58, %v6378_v56  ;;  %v6626_v59 = vpack.c.bf16 %v6465_v18, %v6463_v22 }
 0xdbc   : > { %v6249_v32 = vpop.xlane.xlu0 %6248 }
 0xdbd   : > { %10382 = vrcp.f32 %v6249_v32  ;;  %v6251_v3 = vpop.xlane.xlu1 %6250  ;;  %6487 = vmatmul.bf16.gmra.mxu1 %v6387_v20  ;;  %6785 = vmatmul.bf16.gmra.mxu3 %v6626_v59  ;;  %v14915_v32 = vld [vmem:[#allocation45_spill] sm:$0xff] }
 0xdbe   : > { %10384 = vrcp.f32 %v6251_v3 }
 0xdc1   : > { %v6594_v8 = vpop.f32.mrf.mxu2 }
 0xdc2   : > { %v6627_v41 = vpack.c.bf16 %v6594_v8, %v6592_v34 }
 0xdc3   : > { %v10383_v4 = vpop.eup %10382  ;;  %v6468_v13 = vpop.f32.mrf.mxu1 }
 0xdc4   : > { %v10385_v28 = vpop.eup %10384  ;;  %v6314_v23 = vmul.f32 %v10383_v4, %v13735_v51  ;;  %6834 = vmatmul.bf16.gmra.mxu0 %v6627_v41 }
 0xdc5   : > { %v6315_v2 = vmul.f32 %v10385_v28, %v13737_v53 }
 0xdc6   : > { %v6346_v35 = vpack.c.bf16 %v6314_v23, %v6314_v23 }
 0xdc7   : > { %v6347_v61 = vpack.c.bf16 %v6315_v2, %v6315_v2 }
 0xdc8   : > { %v6523_v50 = vunpack.c.l.b16 %v6346_v35  ;;  %v14916_v35 = vld [vmem:[#allocation48_spill] sm:$0xff] }
 0xdc9   : > { %v6524_v52 = vunpack.c.l.b16 %v6347_v61 }
 0xdca   : > { %v6597_v47 = vpop.f32.mrf.mxu2 }
 0xdcb   : > { %v6470_v14 = vpop.f32.mrf.mxu1  ;;  %v6532_v9 = vpack.c.b16 %v6524_v52, %v6523_v50 }
 0xdcc   : > { %v6628_v1 = vpack.c.bf16 %v6470_v14, %v6468_v13 }
 0xdcd   : > { %6616 = vmatmul.bf16.gmra.mxu2 %v6532_v9 }
 0xdce   : > { %6790 = vmatmul.bf16.gmra.mxu3 %v6628_v1  ;;  %v14917_v1 = vld [vmem:[#allocation49_spill] sm:$0xff] }
 0xdd2   : > { %v6599_v12 = vpop.f32.mrf.mxu2 }
 0xdd3   : > { %v6629_v25 = vpack.c.bf16 %v6599_v12, %v6597_v47  ;;  %v6473_v29 = vpop.f32.mrf.mxu1 }
 0xdd5   : > { %6839 = vmatmul.bf16.gmra.mxu0 %v6629_v25 }
 0xdda   : > { %v6602_v33 = vpop.f32.mrf.mxu2 }
 0xddb   : > { %v6475_v46 = vpop.f32.mrf.mxu1 }
 0xddc   : > { %v6630_v51 = vpack.c.bf16 %v6475_v46, %v6473_v29 }
 0xdde   : > { %6795 = vmatmul.bf16.gmra.mxu3 %v6630_v51 }
 0xde2   : > { %v6604_v44 = vpop.f32.mrf.mxu2 }
 0xde3   : > { %v6631_v53 = vpack.c.bf16 %v6604_v44, %v6602_v33  ;;  %v6478_v10 = vpop.f32.mrf.mxu1 }
 0xde5   : > { %6844 = vmatmul.bf16.gmra.mxu0 %v6631_v53  ;;  %v14918_v53 = vld [vmem:[#allocation50_spill] sm:$0xff] }
 0xdeb   : > { %v6480_v36 = vpop.f32.mrf.mxu1 }
 0xdec   : > { %v6632_v24 = vpack.c.bf16 %v6480_v36, %v6478_v10 }
 0xdee   : > { %6800 = vmatmul.bf16.gmra.mxu3 %v6632_v24 }
 0xe1d   : > { %v6607_v37 = vpop.f32.mrf.mxu2 }
 0xe1e   : > { %v6825_v15 = vpop.f32.mrf.mxu0 }
 0xe1f   : > { %v6776_v49 = vpop.f32.mrf.mxu3 }
 0xe20   : > { %v6826_v48 = vadd.f32 %v6825_v15, %v6776_v49 }
 0xe22   : > { %v6865_v55 = vadd.f32 %v6826_v48, %v14911_v0 }
 0xe24   : > { %v13764_v38 = vadd.f32 %v13760_v17, %v6865_v55  ;;  %v14919_v55 = vld [vmem:[#allocation52_spill] sm:$0xff] }
 0xe25   : > { %v6609_v11 = vpop.f32.mrf.mxu2 }
 0xe26   : > { %v6633_v43 = vpack.c.bf16 %v6609_v11, %v6607_v37  ;;  %v6827_v16 = vpop.f32.mrf.mxu0  ;;  %v6906_v60 = vmul.f32 %v14912_v19, %v13764_v38 }
 0xe27   : > { %v6778_v30 = vpop.f32.mrf.mxu3 }
 0xe28   : > { %v6828_v40 = vadd.f32 %v6827_v16, %v6778_v30  ;;  %6922 = vadd.xlane.f32.xlu2 %v6906_v60  ;;  %6849 = vmatmul.bf16.gmra.mxu0 %v6633_v43 }
 0xe29   : > { %v6483_v31 = vpop.f32.mrf.mxu1 }
 0xe2a   : > { %v6866_v27 = vadd.f32 %v6828_v40, %v14913_v6 }
 0xe2c   : > { %v13770_v39 = vadd.f32 %v13760_v17, %v6866_v27 }
 0xe2e   : > { %v6907_v62 = vmul.f32 %v14912_v19, %v13770_v39 }
 0xe2f   : > { %v6781_v42 = vpop.f32.mrf.mxu3 }
 0xe30   : > { %v6612_v57 = vpop.f32.mrf.mxu2  ;;  %v6830_v21 = vpop.f32.mrf.mxu0  ;;  %6924 = vadd.xlane.f32.xlu0 %v6907_v62 }
 0xe31   : > { %v6485_v45 = vpop.f32.mrf.mxu1  ;;  %v6831_v22 = vadd.f32 %v6830_v21, %v6781_v42 }
 0xe32   : > { %v6634_v5 = vpack.c.bf16 %v6485_v45, %v6483_v31  ;;  %v14920_v31 = vld [vmem:[#allocation53_spill] sm:$0xff] }
 0xe33   : > { %v6867_v7 = vadd.f32 %v6831_v22, %v14914_v63 }
 0xe34   : > { %6805 = vmatmul.bf16.gmra.mxu3 %v6634_v5 }
 0xe35   : > { %v13776_v54 = vadd.f32 %v13760_v17, %v6867_v7  ;;  %v14921_v7 = vld [vmem:[#allocation55_spill] sm:$0xff] }
 0xe37   : > { %v6783_v56 = vpop.f32.mrf.mxu3  ;;  %v6908_v58 = vmul.f32 %v14912_v19, %v13776_v54 }
 0xe38   : > { %v6614_v26 = vpop.f32.mrf.mxu2  ;;  %v6832_v18 = vpop.f32.mrf.mxu0 }
 0xe39   : > { %v6635_v34 = vpack.c.bf16 %v6614_v26, %v6612_v57  ;;  %v6833_v20 = vadd.f32 %v6832_v18, %v6783_v56  ;;  %6926 = vadd.xlane.f32.xlu1 %v6908_v58 }
 0xe3a   : > { %v6488_v59 = vpop.f32.mrf.mxu1 }
 0xe3b   : > { %6854 = vmatmul.bf16.gmra.mxu0 %v6635_v34  ;;  %v6868_v3 = vadd.f32 %v6833_v20, %v14915_v32 }
 0xe3d   : > { %v13782_v8 = vadd.f32 %v13760_v17, %v6868_v3 }
 0xe3f   : > { %v6909_v4 = vmul.f32 %v14912_v19, %v13782_v8 }
 0xe40   : > { %v6786_v41 = vpop.f32.mrf.mxu3 }
 0xe41   : > { %v6835_v13 = vpop.f32.mrf.mxu0  ;;  %6928 = vadd.xlane.f32.xlu2 %v6909_v4 }
 0xe42   : > { %v6490_v28 = vpop.f32.mrf.mxu1  ;;  %v6836_v23 = vadd.f32 %v6835_v13, %v6786_v41  ;;  %v14922_v41 = vld [vmem:[#allocation56_spill] sm:$0xff] }
 0xe43   : > { %v6636_v2 = vpack.c.bf16 %v6490_v28, %v6488_v59 }
 0xe44   : > { %v6869_v61 = vadd.f32 %v6836_v23, %v14916_v35 }
 0xe45   : > { %6810 = vmatmul.bf16.gmra.mxu3 %v6636_v2 }
 0xe46   : > { %v13788_v50 = vadd.f32 %v13760_v17, %v6869_v61 }
 0xe48   : > { %v6788_v52 = vpop.f32.mrf.mxu3  ;;  %v6910_v47 = vmul.f32 %v14912_v19, %v13788_v50 }
 0xe49   : > { %v6837_v14 = vpop.f32.mrf.mxu0 }
 0xe4a   : > { %v6838_v9 = vadd.f32 %v6837_v14, %v6788_v52  ;;  %6930 = vadd.xlane.f32.xlu0 %v6910_v47 }
 0xe4c   : > { %v6870_v12 = vadd.f32 %v6838_v9, %v14917_v1 }
 0xe4e   : > { %v13794_v25 = vadd.f32 %v13760_v17, %v6870_v12 }
 0xe50   : > { %v6617_v29 = vpop.f32.mrf.mxu2  ;;  %v6911_v46 = vmul.f32 %v14912_v19, %v13794_v25 }
 0xe51   : > { %v6791_v33 = vpop.f32.mrf.mxu3 }
 0xe52   : > { %v6840_v51 = vpop.f32.mrf.mxu0  ;;  %6932 = vadd.xlane.f32.xlu1 %v6911_v46 }
 0xe53   : > { %v6841_v44 = vadd.f32 %v6840_v51, %v6791_v33 }
 0xe55   : > { %v6871_v10 = vadd.f32 %v6841_v44, %v14918_v53 }
 0xe57   : > { %v13800_v36 = vadd.f32 %v13760_v17, %v6871_v10 }
 0xe58   : > { %v6619_v24 = vpop.f32.mrf.mxu2 }
 0xe59   : > { %v6637_v37 = vpack.c.bf16 %v6619_v24, %v6617_v29  ;;  %v6793_v15 = vpop.f32.mrf.mxu3  ;;  %v6912_v49 = vmul.f32 %v14912_v19, %v13800_v36  ;;  %v14923_v29 = vld [vmem:[#allocation57_spill] sm:$0xff] }
 0xe5a   : > { %v6842_v48 = vpop.f32.mrf.mxu0 }
 0xe5b   : > { %v6843_v0 = vadd.f32 %v6842_v48, %v6793_v15  ;;  %6934 = vadd.xlane.f32.xlu2 %v6912_v49  ;;  %6859 = vmatmul.bf16.gmra.mxu0 %v6637_v37  ;;  %v14924_v48 = vld [vmem:[#allocation39_spill] sm:$0xff] }
 0xe5d   : > { %v6872_v11 = vadd.f32 %v6843_v0, %v14919_v55 }
 0xe5f   : > { %v13806_v43 = vadd.f32 %v13760_v17, %v6872_v11 }
 0xe61   : > { %v6796_v16 = vpop.f32.mrf.mxu3  ;;  %v6913_v60 = vmul.f32 %v14912_v19, %v13806_v43 }
 0xe62   : > { %v6845_v30 = vpop.f32.mrf.mxu0 }
 0xe63   : > { %v6846_v40 = vadd.f32 %v6845_v30, %v6796_v16  ;;  %6936 = vadd.xlane.f32.xlu0 %v6913_v60 }
 0xe65   : > { %v6873_v6 = vadd.f32 %v6846_v40, %v14920_v31 }
 0xe67   : > { %v13812_v27 = vadd.f32 %v13760_v17, %v6873_v6 }
 0xe69   : > { %v6914_v62 = vmul.f32 %v14912_v19, %v13812_v27  ;;  %v6798_v57 = vpop.f32.mrf.mxu3 }
 0xe6a   : > { %v6847_v42 = vpop.f32.mrf.mxu0 }
 0xe6b   : > { %6938 = vadd.xlane.f32.xlu0 %v6914_v62  ;;  %v6848_v22 = vadd.f32 %v6847_v42, %v6798_v57 }
 0xe6d   : > { %v6874_v26 = vadd.f32 %v6848_v22, %v14921_v7 }
 0xe6f   : > { %v13824_v59 = vadd.f32 %v13760_v17, %v6874_v26 }
 0xe71   : > { %v6801_v34 = vpop.f32.mrf.mxu3  ;;  %v6915_v23 = vmul.f32 %v14912_v19, %v13824_v59 }
 0xe79   : > { %v6803_v52 = vpop.f32.mrf.mxu3 }
 0xe9b   : > { %v6923_v21 = vpop.xlane.xlu2 %6922 }
 0xe9c   : > { %v6954_v45 = vmul.f32 0.015625, %v6923_v21  ;;  %v14925_v21 = vld [vmem:[#allocation41_spill] sm:$0xff] }
 0xe9e   : > { %v6970_v5 = vsub.f32 %v13764_v38, %v6954_v45 }
 0xea0   : > { %v13818_v63 = vmul.f32 %v14912_v19, %v6970_v5 }
 0xea2   : > { %v7002_v56 = vmul.f32 %v13818_v63, %v13818_v63 }
 0xea3   : > { %v6925_v58 = vpop.xlane.xlu0 %6924 }
 0xea4   : > { %v6955_v18 = vmul.f32 0.015625, %v6925_v58  ;;  %7018 = vadd.xlane.f32.xlu1 %v7002_v56 }
 0xea5   : > { %v6850_v20 = vpop.f32.mrf.mxu0 }
 0xea6   : > { %v6971_v32 = vsub.f32 %v13770_v39, %v6955_v18  ;;  %v6851_v3 = vadd.f32 %v6850_v20, %v6801_v34 }
 0xea8   : > { %v13828_v4 = vmul.f32 %v14912_v19, %v6971_v32  ;;  %v6875_v13 = vadd.f32 %v6851_v3, %v14922_v41 }
 0xeaa   : > { %v7003_v28 = vmul.f32 %v13828_v4, %v13828_v4  ;;  %v13836_v47 = vadd.f32 %v13760_v17, %v6875_v13 }
 0xeac   : > { %v6927_v2 = vpop.xlane.xlu1 %6926  ;;  %7020 = vadd.xlane.f32.xlu2 %v7003_v28  ;;  %6940 = vadd.xlane.f32.xlu1 %v6915_v23  ;;  %v6916_v12 = vmul.f32 %v14912_v19, %v13836_v47 }
 0xead   : > { %v6956_v35 = vmul.f32 0.015625, %v6927_v2  ;;  %v6852_v61 = vpop.f32.mrf.mxu0 }
 0xeae   : > { %v6853_v9 = vadd.f32 %v6852_v61, %v6803_v52 }
 0xeaf   : > { %v6972_v14 = vsub.f32 %v13776_v54, %v6956_v35 }
 0xeb0   : > { %v6876_v33 = vadd.f32 %v6853_v9, %v14923_v29  ;;  %v14926_v9 = vld [vmem:[#allocation44_spill] sm:$0xff] }
 0xeb1   : > { %v13840_v1 = vmul.f32 %v14912_v19, %v6972_v14 }
 0xeb2   : > { %v13848_v10 = vadd.f32 %v13760_v17, %v6876_v33 }
 0xeb3   : > { %v7004_v46 = vmul.f32 %v13840_v1, %v13840_v1 }
 0xeb4   : > { %v6929_v51 = vpop.xlane.xlu2 %6928  ;;  %6942 = vadd.xlane.f32.xlu1 %v6916_v12  ;;  %v6917_v11 = vmul.f32 %v14912_v19, %v13848_v10 }
 0xeb5   : > { %v6957_v44 = vmul.f32 0.015625, %v6929_v51  ;;  %7022 = vadd.xlane.f32.xlu2 %v7004_v46 }
 0xeb7   : > { %v6806_v53 = vpop.f32.mrf.mxu3  ;;  %v6973_v24 = vsub.f32 %v13782_v8, %v6957_v44 }
 0xeb8   : > { %v6855_v37 = vpop.f32.mrf.mxu0 }
 0xeb9   : > { %v6856_v15 = vadd.f32 %v6855_v37, %v6806_v53  ;;  %v13852_v49 = vmul.f32 %v14912_v19, %v6973_v24 }
 0xebb   : > { %v6877_v0 = vadd.f32 %v6856_v15, %v14924_v48  ;;  %v7005_v55 = vmul.f32 %v13852_v49, %v13852_v49 }
 0xebd   : > { %v6931_v16 = vpop.xlane.xlu0 %6930  ;;  %7024 = vadd.xlane.f32.xlu0 %v7005_v55  ;;  %6944 = vadd.xlane.f32.xlu2 %v6917_v11  ;;  %v13860_v40 = vadd.f32 %v13760_v17, %v6877_v0  ;;  %v14927_v0 = vld [vmem:[#allocation46_spill] sm:$0xff] }
 0xebe   : > { %v6958_v60 = vmul.f32 0.015625, %v6931_v16 }
 0xebf   : > { %v6808_v30 = vpop.f32.mrf.mxu3  ;;  %v6918_v42 = vmul.f32 %v14912_v19, %v13860_v40 }
 0xec0   : > { %v6857_v31 = vpop.f32.mrf.mxu0  ;;  %v6974_v6 = vsub.f32 %v13788_v50, %v6958_v60 }
 0xec1   : > { %v6858_v62 = vadd.f32 %v6857_v31, %v6808_v30  ;;  %v9489_v30 = vld [vmem:[#allocation17 + $0xf0] sm:$0xf]  ;;  %v9758_v31 = vld [vmem:[#allocation17 + $0xf4] sm:$0xf0] }
 0xec2   : > { %v13864_v57 = vmul.f32 %v14912_v19, %v6974_v6  ;;  %v9757_v6 = vld [vmem:[#allocation17 + $0xf4] sm:$0xf] }
 0xec3   : > { %v6878_v45 = vadd.f32 %v6858_v62, %v14925_v21  ;;  %v9490_v62 = vor.u32 %v9758_v31, %v9489_v30  ;;  %v9745_v30 = vld [vmem:[#allocation17 + $0x94] sm:$0xf] }
 0xec4   : > { %v7006_v22 = vmul.f32 %v13864_v57, %v13864_v57 }
 0xec5   : > { %v6933_v5 = vpop.xlane.xlu1 %6932  ;;  %6946 = vadd.xlane.f32.xlu2 %v6918_v42  ;;  %v13872_v26 = vadd.f32 %v13760_v17, %v6878_v45  ;;  %v9491_v42 = vld [vmem:[#allocation17 + $0xf8] sm:$0xf0]  ;;  %7408 = vmatpush.bf16.msra.mxu1 %v9490_v62  ;;  %v9481_v45 = vld [vmem:[#allocation17 + $0xe0] sm:$0xf] }
 0xec6   : > { %v6959_v7 = vmul.f32 0.015625, %v6933_v5  ;;  %7026 = vadd.xlane.f32.xlu0 %v7006_v22  ;;  %v9494_v21 = vor.u32 %v9757_v6, %v9491_v42  ;;  %v9756_v22 = vld [vmem:[#allocation17 + $0xe4] sm:$0xf0]  ;;  %v9443_v62 = vld [vmem:[#allocation17 + $0x98] sm:$0xf0] }
 0xec7   : > { %v6919_v18 = vmul.f32 %v14912_v19, %v13872_v26  ;;  %v9482_v5 = vor.u32 %v9756_v22, %v9481_v45  ;;  %v9433_v22 = vld [vmem:[#allocation17 + $0x80] sm:$0xf] }
 0xec8   : > { %v6975_v56 = vsub.f32 %v13794_v25, %v6959_v7  ;;  %v6811_v28 = vpop.f32.mrf.mxu3  ;;  %7457 = vmatpush.bf16.msra.mxu2 %v9494_v21  ;;  %v9483_v7 = vld [vmem:[#allocation17 + $0xe8] sm:$0xf0]  ;;  %v9446_v21 = vor.u32 %v9745_v30, %v9443_v62 }
 0xec9   : > { %7409 = vmatpush.bf16.msra.mxu1 %v9482_v5 }
 0xeca   : > { %v13876_v58 = vmul.f32 %v14912_v19, %v6975_v56 }
 0xecc   : > { %v7007_v34 = vmul.f32 %v13876_v58, %v13876_v58 }
 0xece   : > { %v6935_v20 = vpop.xlane.xlu2 %6934  ;;  %7028 = vadd.xlane.f32.xlu1 %v7007_v34  ;;  %6948 = vadd.xlane.f32.xlu0 %v6919_v18  ;;  %v9473_v34 = vld [vmem:[#allocation17 + $0xd0] sm:$0xf]  ;;  %v9754_v18 = vld [vmem:[#allocation17 + $0xd4] sm:$0xf0] }
 0xecf   : > { %v6960_v32 = vmul.f32 0.015625, %v6935_v20  ;;  %v9753_v20 = vld [vmem:[#allocation17 + $0xd4] sm:$0xf] }
 0xed0   : > { %v6813_v53 = vpop.f32.mrf.mxu3 }
 0xed1   : > { %v6976_v3 = vsub.f32 %v13800_v36, %v6960_v32  ;;  %v9474_v32 = vor.u32 %v9754_v18, %v9473_v34 }
 0xed3   : > { %v13884_v41 = vmul.f32 %v14912_v19, %v6976_v3  ;;  %v9475_v3 = vld [vmem:[#allocation17 + $0xd8] sm:$0xf0]  ;;  %7410 = vmatpush.bf16.msra.mxu1 %v9474_v32 }
 0xed5   : > { %v7008_v13 = vmul.f32 %v13884_v41, %v13884_v41 }
 0xed6   : > { %v6937_v23 = vpop.xlane.xlu0 %6936 }
 0xed7   : > { %v6961_v2 = vmul.f32 0.015625, %v6937_v23  ;;  %7030 = vadd.xlane.f32.xlu1 %v7008_v13  ;;  %v9478_v13 = vor.u32 %v9753_v20, %v9475_v3  ;;  %v9752_v23 = vld [vmem:[#allocation17 + $0xc4] sm:$0xf0] }
 0xed8   : > { %v6860_v35 = vpop.f32.mrf.mxu0 }
 0xed9   : > { %v6977_v61 = vsub.f32 %v13806_v43, %v6961_v2  ;;  %v6861_v52 = vadd.f32 %v6860_v35, %v6811_v28  ;;  %v9465_v28 = vld [vmem:[#allocation17 + $0xc0] sm:$0xf]  ;;  %v9751_v2 = vld [vmem:[#allocation17 + $0xc4] sm:$0xf] }
 0xeda   : > { %v9466_v35 = vor.u32 %v9752_v23, %v9465_v28 }
 0xedb   : > { %v13890_v14 = vmul.f32 %v14912_v19, %v6977_v61  ;;  %v6879_v12 = vadd.f32 %v6861_v52, %v14926_v9  ;;  %v9467_v61 = vld [vmem:[#allocation17 + $0xc8] sm:$0xf0]  ;;  %v9457_v9 = vld [vmem:[#allocation17 + $0xb0] sm:$0xf] }
 0xedc   : > { %v9470_v52 = vor.u32 %v9751_v2, %v9467_v61  ;;  %7411 = vmatpush.bf16.msra.mxu1 %v9466_v35 }
 0xedd   : > { %v13894_v29 = vadd.f32 %v13760_v17, %v6879_v12  ;;  %v7009_v33 = vmul.f32 %v13890_v14, %v13890_v14  ;;  %v9750_v12 = vld [vmem:[#allocation17 + $0xb4] sm:$0xf0] }
 0xede   : > { %v6939_v46 = vpop.xlane.xlu0 %6938 }
 0xedf   : > { %v6962_v51 = vmul.f32 0.015625, %v6939_v46  ;;  %7032 = vadd.xlane.f32.xlu2 %v7009_v33  ;;  %v6920_v44 = vmul.f32 %v14912_v19, %v13894_v29  ;;  %v9749_v33 = vld [vmem:[#allocation17 + $0xb4] sm:$0xf]  ;;  %v9458_v46 = vor.u32 %v9750_v12, %v9457_v9 }
 0xee0   : > { %v6862_v24 = vpop.f32.mrf.mxu0 }
 0xee1   : > { %v6978_v37 = vsub.f32 %v13812_v27, %v6962_v51  ;;  %v6863_v15 = vadd.f32 %v6862_v24, %v6813_v53  ;;  %6950 = vadd.xlane.f32.xlu0 %v6920_v44  ;;  %v9459_v51 = vld [vmem:[#allocation17 + $0xb8] sm:$0xf0]  ;;  %7412 = vmatpush.bf16.msra.mxu1 %v9458_v46  ;;  %v9449_v53 = vld [vmem:[#allocation17 + $0xa0] sm:$0xf]  ;;  %v9748_v24 = vld [vmem:[#allocation17 + $0xa4] sm:$0xf0] }
 0xee2   : > { %v9462_v44 = vor.u32 %v9749_v33, %v9459_v51 }
 0xee3   : > { %v13902_v48 = vmul.f32 %v14912_v19, %v6978_v37  ;;  %v6880_v55 = vadd.f32 %v6863_v15, %v14927_v0  ;;  %v9747_v37 = vld [vmem:[#allocation17 + $0xa4] sm:$0xf]  ;;  %v9450_v15 = vor.u32 %v9748_v24, %v9449_v53  ;;  %v9451_v0 = vld [vmem:[#allocation17 + $0xa8] sm:$0xf0] }
 0xee5   : > { %v13906_v11 = vadd.f32 %v13760_v17, %v6880_v55  ;;  %v7010_v16 = vmul.f32 %v13902_v48, %v13902_v48  ;;  %v9755_v17 = vld [vmem:[#allocation17 + $0xe4] sm:$0xf]  ;;  %v9454_v55 = vor.u32 %v9747_v37, %v9451_v0  ;;  %7413 = vmatpush.bf16.msra.mxu1 %v9450_v15 }
 0xee6   : > { %v9486_v56 = vor.u32 %v9755_v17, %v9483_v7  ;;  %v9744_v17 = vld [vmem:[#allocation17 + $0x84] sm:$0xf0]  ;;  %v9743_v7 = vld [vmem:[#allocation17 + $0x84] sm:$0xf] }
 0xee7   : > { %7034 = vadd.xlane.f32.xlu2 %v7010_v16  ;;  %v6921_v60 = vmul.f32 %v14912_v19, %v13906_v11  ;;  %v9441_v16 = vld [vmem:[#allocation17 + $0x90] sm:$0xf]  ;;  %v9434_v5 = vor.u32 %v9744_v17, %v9433_v22 }
 0xee8   : > { %7458 = vmatpush.bf16.msra.mxu2 %v9486_v56  ;;  %v9435_v56 = vld [vmem:[#allocation17 + $0x88] sm:$0xf0] }
 0xee9   : > { %6952 = vadd.xlane.f32.xlu1 %v6921_v60  ;;  %v9746_v60 = vld [vmem:[#allocation17 + $0x94] sm:$0xf0]  ;;  %v9438_v34 = vor.u32 %v9743_v7, %v9435_v56 }
 0xeea   : > { %v9442_v6 = vor.u32 %v9746_v60, %v9441_v16 }
 0xeec   : > { %7459 = vmatpush.bf16.msra.mxu2 %v9478_v13  ;;  %7414 = vmatpush.bf16.msra.mxu1 %v9442_v6 }
 0xef0   : > { %7460 = vmatpush.bf16.msra.mxu2 %v9470_v52  ;;  %7415 = vmatpush.bf16.msra.mxu1 %v9434_v5  ;;  %v13924_v5 = vld [vmem:[#allocation16 + $0x1] ss:$0 sm:$0xff] }
 0xef4   : > { %7461 = vmatpush.bf16.msra.mxu2 %v9462_v44 }
 0xef8   : > { %7462 = vmatpush.bf16.msra.mxu2 %v9454_v55 }
 0xefc   : > { %7463 = vmatpush.bf16.msra.mxu2 %v9446_v21 }
 0xf00   : > { %7464 = vmatpush.bf16.msra.mxu2 %v9438_v34 }
 0xf17   : > { %v7019_v31 = vpop.xlane.xlu1 %7018 }
 0xf18   : > { %v7050_v42 = vmul.f32 0.015625, %v7019_v31 }
 0xf1a   : > { %v7066_v45 = vadd.f32 1e-05, %v7050_v42 }
 0xf1c   : > { %10386 = vrsqrt.f32 %v7066_v45  ;;  %vm7088_vm0 = vweird.f32 %v7066_v45 }
 0xf1f   : > { %v7021_v18 = vpop.xlane.xlu2 %7020  ;;  %v6941_v20 = vpop.xlane.xlu1 %6940 }
 0xf20   : > { %v7051_v32 = vmul.f32 0.015625, %v7021_v18  ;;  %v6963_v3 = vmul.f32 0.015625, %v6941_v20 }
 0xf22   : > { %v10387_v13 = vpop.eup %10386  ;;  %v7067_v28 = vadd.f32 1e-05, %v7051_v32  ;;  %v6979_v23 = vsub.f32 %v13824_v59, %v6963_v3 }
 0xf23   : > { %v7083_v2 = vmul.f32 %v10387_v13, %v7066_v45  ;;  %vm7089_vm14 = vweird.f32 %v10387_v13 }
 0xf24   : > { %10388 = vrsqrt.f32 %v7067_v28  ;;  %v13914_v35 = vmul.f32 %v14912_v19, %v6979_v23  ;;  %vm7090_vm1 = vmor %vm7088_vm0, %vm7089_vm14  ;;  %vm7098_vm3 = vweird.f32 %v7067_v28 }
 0xf25   : > { %v7084_v61 = vmul.f32 %v10387_v13, %v7083_v2 }
 0xf26   : > { %v7011_v52 = vmul.f32 %v13914_v35, %v13914_v35 }
 0xf27   : > { %v7085_v9 = vmul.f32 0.5, %v7084_v61  ;;  %v6943_v12 = vpop.xlane.xlu1 %6942 }
 0xf28   : > { %v7023_v33 = vpop.xlane.xlu2 %7022  ;;  %v6964_v46 = vmul.f32 0.015625, %v6943_v12  ;;  %7036 = vadd.xlane.f32.xlu0 %v7011_v52 }
 0xf29   : > { %v7086_v51 = vsub.f32 1.5, %v7085_v9  ;;  %v7052_v44 = vmul.f32 0.015625, %v7023_v33 }
 0xf2a   : > { %v10389_v53 = vpop.eup %10388  ;;  %v6980_v24 = vsub.f32 %v13836_v47, %v6964_v46 }
 0xf2b   : > { %v7093_v37 = vmul.f32 %v10389_v53, %v7067_v28  ;;  %v7068_v15 = vadd.f32 1e-05, %v7052_v44  ;;  %v7087_v0 = vmul.f32 %v10387_v13, %v7086_v51  ;;  %vm7099_vm2 = vweird.f32 %v10389_v53  ;;  %v13935_v28 = vld [vmem:[%s14620_s11 + $0x1] ss:$0 sm:$0xff] }
 0xf2c   : > { %v13920_v55 = vmul.f32 %v14912_v19, %v6980_v24  ;;  %vm7100_vm4 = vmor %vm7098_vm3, %vm7099_vm2 }
 0xf2d   : > { %v7094_v16 = vmul.f32 %v10389_v53, %v7093_v37  ;;  %10390 = vrsqrt.f32 %v7068_v15  ;;  %v7091_v31 = vsel %vm7090_vm1, %v10387_v13, %v7087_v0  ;;  %vm7108_vm6 = vweird.f32 %v7068_v15 }
 0xf2e   : > { %v7012_v60 = vmul.f32 %v13920_v55, %v13920_v55  ;;  %v7242_v7 = vmul.f32 %v7091_v31, %v13818_v63 }
 0xf2f   : > { %v7095_v30 = vmul.f32 0.5, %v7094_v16 }
 0xf30   : > { %v7025_v6 = vpop.xlane.xlu0 %7024  ;;  %v6945_v62 = vpop.xlane.xlu2 %6944  ;;  %7038 = vadd.xlane.f32.xlu1 %v7012_v60  ;;  %v7261_v63 = vmul.f32 %v13924_v5, %v7242_v7 }
 0xf31   : > { %v7096_v42 = vsub.f32 1.5, %v7095_v30  ;;  %v7053_v21 = vmul.f32 0.015625, %v7025_v6  ;;  %v6965_v22 = vmul.f32 0.015625, %v6945_v62 }
 0xf32   : > { %v7280_v44 = vadd.f32 %v13935_v28, %v7261_v63 }
 0xf33   : > { %v10391_v17 = vpop.eup %10390  ;;  %v7097_v45 = vmul.f32 %v10389_v53, %v7096_v42  ;;  %v7069_v56 = vadd.f32 1e-05, %v7053_v21  ;;  %v6981_v34 = vsub.f32 %v13848_v10, %v6965_v22 }
 0xf34   : > { %v7103_v18 = vmul.f32 %v10391_v17, %v7068_v15  ;;  %vm7109_vm5 = vweird.f32 %v10391_v17 }
 0xf35   : > { %v7101_v20 = vsel %vm7100_vm4, %v10389_v53, %v7097_v45  ;;  %10392 = vrsqrt.f32 %v7069_v56  ;;  %v13929_v32 = vmul.f32 %v14912_v19, %v6981_v34  ;;  %vm7110_vm7 = vmor %vm7108_vm6, %vm7109_vm5  ;;  %vm7118_vm9 = vweird.f32 %v7069_v56 }
 0xf36   : > { %v7243_v3 = vmul.f32 %v7101_v20, %v13828_v4  ;;  %v7104_v13 = vmul.f32 %v10391_v17, %v7103_v18 }
 0xf37   : > { %v7013_v23 = vmul.f32 %v13929_v32, %v13929_v32 }
 0xf38   : > { %v7262_v2 = vmul.f32 %v13924_v5, %v7243_v3  ;;  %v7105_v61 = vmul.f32 0.5, %v7104_v13  ;;  %v6947_v52 = vpop.xlane.xlu2 %6946 }
 0xf39   : > { %v7027_v9 = vpop.xlane.xlu0 %7026  ;;  %v6966_v12 = vmul.f32 0.015625, %v6947_v52  ;;  %7040 = vadd.xlane.f32.xlu2 %v7013_v23 }
 0xf3a   : > { %v7281_v4 = vadd.f32 %v13935_v28, %v7262_v2  ;;  %v7106_v33 = vsub.f32 1.5, %v7105_v61  ;;  %v7054_v46 = vmul.f32 0.015625, %v7027_v9 }
 0xf3b   : > { %v10393_v51 = vpop.eup %10392  ;;  %v6982_v53 = vsub.f32 %v13860_v40, %v6966_v12 }
 0xf3c   : > { %v7107_v24 = vmul.f32 %v10391_v17, %v7106_v33  ;;  %v7113_v37 = vmul.f32 %v10393_v51, %v7069_v56  ;;  %v7070_v0 = vadd.f32 1e-05, %v7054_v46  ;;  %v7296_v60 = vpack.c.bf16 %v7281_v4, %v7280_v44 }
 0xf3d   : > { %v13945_v16 = vmul.f32 %v14912_v19, %v6982_v53  ;;  %vm7119_vm8 = vweird.f32 %v10393_v51 }
 0xf3e   : > { %v7114_v30 = vmul.f32 %v10393_v51, %v7113_v37  ;;  %10394 = vrsqrt.f32 %v7070_v0  ;;  %7416 = vmatmul.bf16.vlgmr.msra.gmra.mxu1 %v7296_v60  ;;  %7465 = vmatmul.bf16.vlgmr.msra.gmra.mxu2 %v7296_v60  ;;  %v7111_v6 = vsel %vm7110_vm7, %v10391_v17, %v7107_v24  ;;  %vm7120_vm10 = vmor %vm7118_vm9, %vm7119_vm8  ;;  %vm7128_vm12 = vweird.f32 %v7070_v0 }
 0xf3f   : > { %v7014_v31 = vmul.f32 %v13945_v16, %v13945_v16  ;;  %v7244_v34 = vmul.f32 %v7111_v6, %v13840_v1 }
 0xf40   : > { %v7115_v62 = vmul.f32 0.5, %v7114_v30 }
 0xf41   : > { %v7029_v42 = vpop.xlane.xlu1 %7028  ;;  %v6949_v21 = vpop.xlane.xlu0 %6948  ;;  %7042 = vadd.xlane.f32.xlu0 %v7014_v31  ;;  %v7263_v61 = vmul.f32 %v13924_v5, %v7244_v34 }
 0xf42   : > { %v7116_v22 = vsub.f32 1.5, %v7115_v62  ;;  %v7055_v7 = vmul.f32 0.015625, %v7029_v42  ;;  %v6967_v45 = vmul.f32 0.015625, %v6949_v21 }
 0xf43   : > { %v7282_v33 = vadd.f32 %v13935_v28, %v7263_v61 }
 0xf44   : > { %v10395_v15 = vpop.eup %10394  ;;  %v7117_v18 = vmul.f32 %v10393_v51, %v7116_v22  ;;  %v7071_v20 = vadd.f32 1e-05, %v7055_v7  ;;  %v6983_v3 = vsub.f32 %v13872_v26, %v6967_v45 }
 0xf45   : > { %v7123_v13 = vmul.f32 %v10395_v15, %v7070_v0  ;;  %vm7129_vm11 = vweird.f32 %v10395_v15 }
 0xf46   : > { %v7121_v63 = vsel %vm7120_vm10, %v10393_v51, %v7117_v18  ;;  %10396 = vrsqrt.f32 %v7071_v20  ;;  %v13952_v17 = vmul.f32 %v14912_v19, %v6983_v3  ;;  %vm7130_vm13 = vmor %vm7128_vm12, %vm7129_vm11  ;;  %vm7138_vm14 = vweird.f32 %v7071_v20 }
 0xf47   : > { %v7245_v23 = vmul.f32 %v7121_v63, %v13852_v49  ;;  %v7124_v2 = vmul.f32 %v10395_v15, %v7123_v13 }
 0xf48   : > { %v7015_v1 = vmul.f32 %v13952_v17, %v13952_v17 }
 0xf49   : > { %v7125_v52 = vmul.f32 0.5, %v7124_v2  ;;  %v7264_v9 = vmul.f32 %v13924_v5, %v7245_v23 }
 0xf4a   : > { %v7031_v56 = vpop.xlane.xlu1 %7030  ;;  %7044 = vadd.xlane.f32.xlu1 %v7015_v1 }
 0xf4b   : > { %v7056_v12 = vmul.f32 0.015625, %v7031_v56  ;;  %v7126_v4 = vsub.f32 1.5, %v7125_v52  ;;  %v7283_v46 = vadd.f32 %v13935_v28, %v7264_v9 }
 0xf4c   : > { %v10397_v51 = vpop.eup %10396 }
 0xf4d   : > { %v7072_v44 = vadd.f32 1e-05, %v7056_v12  ;;  %v7127_v49 = vmul.f32 %v10395_v15, %v7126_v4  ;;  %v7133_v53 = vmul.f32 %v10397_v51, %v7071_v20  ;;  %v7297_v24 = vpack.c.bf16 %v7283_v46, %v7282_v33 }
 0xf4e   : > { %vm7139_vm15 = vweird.f32 %v10397_v51 }
 0xf4f   : > { %10398 = vrsqrt.f32 %v7072_v44  ;;  %v7134_v37 = vmul.f32 %v10397_v51, %v7133_v53  ;;  %7421 = vmatmul.bf16.gmra.mxu1 %v7297_v24  ;;  %7470 = vmatmul.bf16.gmra.mxu2 %v7297_v24  ;;  %v7131_v60 = vsel %vm7130_vm13, %v10395_v15, %v7127_v49  ;;  %vm7140_vm0 = vmor %vm7138_vm14, %vm7139_vm15  ;;  %vm7148_vm2 = vweird.f32 %v7072_v44 }
 0xf50   : > { %v7246_v22 = vmul.f32 %v7131_v60, %v13864_v57 }
 0xf51   : > { %v7135_v30 = vmul.f32 0.5, %v7134_v37 }
 0xf52   : > { %v7033_v31 = vpop.xlane.xlu2 %7032  ;;  %v7265_v23 = vmul.f32 %v13924_v5, %v7246_v22 }
 0xf53   : > { %v7057_v6 = vmul.f32 0.015625, %v7033_v31  ;;  %v7136_v62 = vsub.f32 1.5, %v7135_v30 }
 0xf54   : > { %v6951_v42 = vpop.xlane.xlu0 %6950  ;;  %v7284_v9 = vadd.f32 %v13935_v28, %v7265_v23 }
 0xf55   : > { %v10399_v21 = vpop.eup %10398  ;;  %v7073_v7 = vadd.f32 1e-05, %v7057_v6  ;;  %v6968_v45 = vmul.f32 0.015625, %v6951_v42  ;;  %v7137_v34 = vmul.f32 %v10397_v51, %v7136_v62 }
 0xf56   : > { %v7143_v18 = vmul.f32 %v10399_v21, %v7072_v44  ;;  %vm7149_vm1 = vweird.f32 %v10399_v21 }
 0xf57   : > { %10400 = vrsqrt.f32 %v7073_v7  ;;  %v6984_v0 = vsub.f32 %v13894_v29, %v6968_v45  ;;  %v7141_v3 = vsel %vm7140_vm0, %v10397_v51, %v7137_v34  ;;  %vm7150_vm3 = vmor %vm7148_vm2, %vm7149_vm1  ;;  %vm7158_vm5 = vweird.f32 %v7073_v7 }
 0xf58   : > { %v7144_v15 = vmul.f32 %v10399_v21, %v7143_v18  ;;  %v7247_v13 = vmul.f32 %v7141_v3, %v13876_v58 }
 0xf59   : > { %v13965_v63 = vmul.f32 %v14912_v19, %v6984_v0 }
 0xf5a   : > { %v7145_v2 = vmul.f32 0.5, %v7144_v15  ;;  %v7266_v20 = vmul.f32 %v13924_v5, %v7247_v13  ;;  %v7035_v34 = vpop.xlane.xlu2 %7034 }
 0xf5b   : > { %v7016_v57 = vmul.f32 %v13965_v63, %v13965_v63 }
 0xf5c   : > { %v7146_v61 = vsub.f32 1.5, %v7145_v2  ;;  %v6953_v1 = vpop.xlane.xlu1 %6952  ;;  %v7285_v58 = vadd.f32 %v13935_v28, %v7266_v20  ;;  %v9766_v2 = vld [vmem:[#allocation19 + $0xb8] sm:$0xff] }
 0xf5d   : > { %v10401_v52 = vpop.eup %10400  ;;  %v6969_v56 = vmul.f32 0.015625, %v6953_v1  ;;  %7046 = vadd.xlane.f32.xlu2 %v7016_v57  ;;  %7939 = vmatpush.bf16.msra.mxu3 %v9766_v2  ;;  %v9765_v1 = vld [vmem:[#allocation19 + $0xb0] sm:$0xff] }
 0xf5e   : > { %v7147_v12 = vmul.f32 %v10399_v21, %v7146_v61  ;;  %v7153_v4 = vmul.f32 %v10401_v52, %v7073_v7  ;;  %v7298_v46 = vpack.c.bf16 %v7285_v58, %v7284_v9  ;;  %vm7159_vm4 = vweird.f32 %v10401_v52  ;;  %v9774_v9 = vld [vmem:[#allocation19 + $0xf8] sm:$0xff] }
 0xf5f   : > { %v6985_v33 = vsub.f32 %v13906_v11, %v6969_v56  ;;  %vm7160_vm6 = vmor %vm7158_vm5, %vm7159_vm4  ;;  %7988 = vmatpush.bf16.msra.mxu0 %v9774_v9  ;;  %v9760_v9 = vld [vmem:[#allocation19 + $0x88] sm:$0xff] }
 0xf60   : > { %v7154_v51 = vmul.f32 %v10401_v52, %v7153_v4  ;;  %7426 = vmatmul.bf16.gmra.mxu1 %v7298_v46  ;;  %7475 = vmatmul.bf16.gmra.mxu2 %v7298_v46  ;;  %v7151_v53 = vsel %vm7150_vm3, %v10399_v21, %v7147_v12  ;;  %v9764_v4 = vld [vmem:[#allocation19 + $0xa8] sm:$0xff]  ;;  %v9773_v46 = vld [vmem:[#allocation19 + $0xf0] sm:$0xff] }
 0xf61   : > { %v13975_v49 = vmul.f32 %v14912_v19, %v6985_v33  ;;  %v7248_v30 = vmul.f32 %v7151_v53, %v13884_v41  ;;  %v7058_v41 = vmul.f32 0.015625, %v7035_v34  ;;  %7940 = vmatpush.bf16.msra.mxu3 %v9765_v1 }
 0xf62   : > { %v7155_v24 = vmul.f32 0.5, %v7154_v51 }
 0xf63   : > { %v7017_v37 = vmul.f32 %v13975_v49, %v13975_v49  ;;  %v7267_v62 = vmul.f32 %v13924_v5, %v7248_v30  ;;  %v7074_v18 = vadd.f32 1e-05, %v7058_v41  ;;  %7989 = vmatpush.bf16.msra.mxu0 %v9773_v46 }
 0xf64   : > { %v7156_v60 = vsub.f32 1.5, %v7155_v24 }
 0xf65   : > { %7048 = vadd.xlane.f32.xlu0 %v7017_v37  ;;  %v7286_v21 = vadd.f32 %v13935_v28, %v7267_v62  ;;  %10402 = vrsqrt.f32 %v7074_v18  ;;  %vm7168_vm8 = vweird.f32 %v7074_v18  ;;  %7941 = vmatpush.bf16.msra.mxu3 %v9764_v4  ;;  %v9763_v37 = vld [vmem:[#allocation19 + $0xa0] sm:$0xff] }
 0xf66   : > { %v7157_v31 = vmul.f32 %v10401_v52, %v7156_v60 }
 0xf68   : > { %v7161_v44 = vsel %vm7160_vm6, %v10401_v52, %v7157_v31 }
 0xf69   : > { %v7249_v6 = vmul.f32 %v7161_v44, %v13890_v14  ;;  %7942 = vmatpush.bf16.msra.mxu3 %v9763_v37 }
 0xf6b   : > { %v7268_v42 = vmul.f32 %v13924_v5, %v7249_v6  ;;  %v10403_v7 = vpop.eup %10402  ;;  %v9772_v6 = vld [vmem:[#allocation19 + $0xe8] sm:$0xff] }
 0xf6c   : > { %v7163_v0 = vmul.f32 %v10403_v7, %v7074_v18  ;;  %vm7169_vm7 = vweird.f32 %v10403_v7  ;;  %7990 = vmatpush.bf16.msra.mxu0 %v9772_v6  ;;  %v9768_v6 = vld [vmem:[#allocation19 + $0xc8] sm:$0xff] }
 0xf6d   : > { %v7287_v22 = vadd.f32 %v13935_v28, %v7268_v42  ;;  %vm7170_vm9 = vmor %vm7168_vm8, %vm7169_vm7 }
 0xf6e   : > { %v7164_v3 = vmul.f32 %v10403_v7, %v7163_v0 }
 0xf6f   : > { %v7299_v45 = vpack.c.bf16 %v7287_v22, %v7286_v21  ;;  %v9762_v22 = vld [vmem:[#allocation19 + $0x98] sm:$0xff] }
 0xf70   : > { %v7165_v23 = vmul.f32 0.5, %v7164_v3  ;;  %7943 = vmatpush.bf16.msra.mxu3 %v9762_v22 }
 0xf71   : > { %7431 = vmatmul.bf16.gmra.mxu1 %v7299_v45  ;;  %7480 = vmatmul.bf16.gmra.mxu2 %v7299_v45 }
 0xf72   : > { %v7166_v57 = vsub.f32 1.5, %v7165_v23 }
 0xf74   : > { %v7167_v58 = vmul.f32 %v10403_v7, %v7166_v57  ;;  %v9770_v57 = vld [vmem:[#allocation19 + $0xd8] sm:$0xff] }
 0xf76   : > { %v7171_v51 = vsel %vm7170_vm9, %v10403_v7, %v7167_v58 }
 0xf77   : > { %v7250_v44 = vmul.f32 %v7171_v51, %v13902_v48  ;;  %v9771_v48 = vld [vmem:[#allocation19 + $0xe0] sm:$0xff] }
 0xf78   : > { %7991 = vmatpush.bf16.msra.mxu0 %v9771_v48 }
 0xf79   : > { %v7269_v18 = vmul.f32 %v13924_v5, %v7250_v44 }
 0xf7b   : > { %v7288_v23 = vadd.f32 %v13935_v28, %v7269_v18 }
 0xf7c   : > { %7992 = vmatpush.bf16.msra.mxu0 %v9770_v57 }
 0xf9b   : > { %v7037_v15 = vpop.xlane.xlu0 %7036 }
 0xf9c   : > { %v7059_v14 = vmul.f32 0.015625, %v7037_v15  ;;  %v9761_v15 = vld [vmem:[#allocation19 + $0x90] sm:$0xff] }
 0xf9d   : > { %7944 = vmatpush.bf16.msra.mxu3 %v9761_v15 }
 0xf9e   : > { %v7075_v13 = vadd.f32 1e-05, %v7059_v14 }
 0xfa0   : > { %10404 = vrsqrt.f32 %v7075_v13  ;;  %vm7178_vm11 = vweird.f32 %v7075_v13 }
 0xfa1   : > { %7945 = vmatpush.bf16.msra.mxu3 %v9760_v9 }
 0xfa3   : > { %v7039_v20 = vpop.xlane.xlu1 %7038 }
 0xfa4   : > { %v7060_v61 = vmul.f32 0.015625, %v7039_v20 }
 0xfa6   : > { %v10405_v52 = vpop.eup %10404  ;;  %v13985_v56 = vadd.f32 1e-05, %v7060_v61 }
 0xfa7   : > { %v7173_v12 = vmul.f32 %v10405_v52, %v7075_v13  ;;  %vm7179_vm10 = vweird.f32 %v10405_v52 }
 0xfa8   : > { %10406 = vrsqrt.f32 %v13985_v56  ;;  %vm7180_vm12 = vmor %vm7178_vm11, %vm7179_vm10  ;;  %vm7188_vm15 = vweird.f32 %v13985_v56 }
 0xfa9   : > { %v7174_v33 = vmul.f32 %v10405_v52, %v7173_v12 }
 0xfab   : > { %v7175_v53 = vmul.f32 0.5, %v7174_v33  ;;  %v9769_v33 = vld [vmem:[#allocation19 + $0xd0] sm:$0xff] }
 0xfac   : > { %v7041_v24 = vpop.xlane.xlu2 %7040  ;;  %7993 = vmatpush.bf16.msra.mxu0 %v9769_v33 }
 0xfad   : > { %v7176_v60 = vsub.f32 1.5, %v7175_v53  ;;  %v7061_v30 = vmul.f32 0.015625, %v7041_v24  ;;  %v9759_v24 = vld [vmem:[#allocation19 + $0x80] sm:$0xff] }
 0xfae   : > { %v13988_v31 = vpop.eup %10406  ;;  %7946 = vmatpush.bf16.msra.mxu3 %v9759_v24 }
 0xfaf   : > { %v7177_v62 = vmul.f32 %v10405_v52, %v7176_v60  ;;  %v7183_v42 = vmul.f32 %v13988_v31, %v13985_v56  ;;  %v7077_v21 = vadd.f32 1e-05, %v7061_v30  ;;  %vm7189_vm13 = vweird.f32 %v13988_v31 }
 0xfb0   : > { %vm14010_vm14 = vmor %vm7188_vm15, %vm7189_vm13  ;;  %7994 = vmatpush.bf16.msra.mxu0 %v9768_v6 }
 0xfb1   : > { %v7181_v45 = vsel %vm7180_vm12, %v10405_v52, %v7177_v62  ;;  %v7184_v34 = vmul.f32 %v13988_v31, %v7183_v42  ;;  %10408 = vrsqrt.f32 %v7077_v21  ;;  %vm7198_vm1 = vweird.f32 %v7077_v21 }
 0xfb2   : > { %v7251_v41 = vmul.f32 %v7181_v45, %v13914_v35  ;;  %v9430_v35 = vld [vmem:[%s14858_s18 + $0x2] sm:$0x3] }
 0xfb3   : > { %v7185_v7 = vmul.f32 0.5, %v7184_v34  ;;  %v14007_v12 = vperm.slane %v9430_v35, 0  ;;  %v14024_v22 = vperm.slane %v9430_v35, 1 }
 0xfb4   : > { %v7043_v0 = vpop.xlane.xlu0 %7042  ;;  %v7270_v3 = vmul.f32 %v13924_v5, %v7251_v41 }
 0xfb5   : > { %v7186_v14 = vsub.f32 1.5, %v7185_v7  ;;  %v7062_v13 = vmul.f32 0.015625, %v7043_v0  ;;  %v9767_v0 = vld [vmem:[#allocation19 + $0xc0] sm:$0xff] }
 0xfb6   : > { %v7289_v2 = vadd.f32 %v13935_v28, %v7270_v3  ;;  %7995 = vmatpush.bf16.msra.mxu0 %v9767_v0 }
 0xfb7   : > { %v10409_v20 = vpop.eup %10408  ;;  %v14002_v61 = vadd.f32 1e-05, %v7062_v13  ;;  %v7187_v58 = vmul.f32 %v13988_v31, %v7186_v14 }
 0xfb8   : > { %v7193_v1 = vmul.f32 %v10409_v20, %v7077_v21  ;;  %v7300_v52 = vpack.c.bf16 %v7289_v2, %v7288_v23  ;;  %vm7199_vm0 = vweird.f32 %v10409_v20 }
 0xfb9   : > { %10410 = vrsqrt.f32 %v14002_v61  ;;  %v7191_v37 = vsel %vm14010_vm14, %v13988_v31, %v7187_v58  ;;  %vm7200_vm2 = vmor %vm7198_vm1, %vm7199_vm0  ;;  %vm7208_vm4 = vweird.f32 %v14002_v61 }
 0xfba   : > { %v7194_v4 = vmul.f32 %v10409_v20, %v7193_v1  ;;  %7436 = vmatmul.bf16.gmra.mxu1 %v7300_v52  ;;  %7485 = vmatmul.bf16.gmra.mxu2 %v7300_v52  ;;  %v7252_v45 = vmul.f32 %v7191_v37, %v13920_v55 }
 0xfbb   : > { %v7417_v53 = vpop.f32.mrf.mxu1 }
 0xfbc   : > { %v7195_v51 = vmul.f32 0.5, %v7194_v4  ;;  %v14018_v60 = vadd.f32 %v7417_v53, %v14007_v12  ;;  %v7271_v23 = vmul.f32 %v13924_v5, %v7252_v45 }
 0xfbd   : > { %v7045_v30 = vpop.xlane.xlu1 %7044 }
 0xfbe   : > { %v7196_v44 = vsub.f32 1.5, %v7195_v51  ;;  %v7063_v56 = vmul.f32 0.015625, %v7045_v30  ;;  %v7506_v42 = vmul.f32 %v14018_v60, %v14018_v60  ;;  %v7290_v46 = vadd.f32 %v13935_v28, %v7271_v23 }
 0xfbf   : > { %v14020_v62 = vpop.eup %10410 }
 0xfc0   : > { %v7197_v31 = vmul.f32 %v10409_v20, %v7196_v44  ;;  %v7203_v34 = vmul.f32 %v14020_v62, %v14002_v61  ;;  %v14029_v41 = vadd.f32 1e-05, %v7063_v56  ;;  %v7538_v18 = vmul.f32 %v7506_v42, %v14018_v60 }
 0xfc1   : > { %v7466_v7 = vpop.f32.mrf.mxu2  ;;  %vm7209_vm3 = vweird.f32 %v14020_v62 }
 0xfc2   : > { %v7201_v48 = vsel %vm7200_vm2, %v10409_v20, %v7197_v31  ;;  %v7204_v21 = vmul.f32 %v14020_v62, %v7203_v34  ;;  %10412 = vrsqrt.f32 %v14029_v41  ;;  %v7570_v55 = vmul.f32 0.044715, %v7538_v18  ;;  %vm14056_vm5 = vmor %vm7208_vm4, %vm7209_vm3 }
 0xfc3   : > { %v7253_v3 = vmul.f32 %v7201_v48, %v13929_v32  ;;  %v14036_v15 = vadd.f32 %v7466_v7, %v14024_v22  ;;  %v7419_v13 = vpop.f32.mrf.mxu1  ;;  %vm7218_vm7 = vweird.f32 %v14029_v41 }
 0xfc4   : > { %v7205_v14 = vmul.f32 0.5, %v7204_v21  ;;  %v7602_v2 = vadd.f32 %v7570_v55, %v14018_v60  ;;  %v14043_v57 = vadd.f32 %v7419_v13, %v14007_v12 }
 0xfc5   : > { %v7507_v35 = vmul.f32 %v14036_v15, %v14036_v15  ;;  %v7272_v20 = vmul.f32 %v13924_v5, %v7253_v3 }
 0xfc6   : > { %v7206_v32 = vsub.f32 1.5, %v7205_v14  ;;  %v7634_v1 = vmul.f32 0.7978846, %v7602_v2  ;;  %v7508_v9 = vmul.f32 %v14043_v57, %v14043_v57 }
 0xfc7   : > { %v7539_v52 = vmul.f32 %v7507_v35, %v14036_v15  ;;  %v7291_v58 = vadd.f32 %v13935_v28, %v7272_v20 }
 0xfc8   : > { %v10413_v4 = vpop.eup %10412  ;;  %v7207_v33 = vmul.f32 %v14020_v62, %v7206_v32  ;;  %v7540_v24 = vmul.f32 %v7508_v9, %v14043_v57  ;;  %10414 = vtanh.f32 %v7634_v1 }
 0xfc9   : > { %v7213_v51 = vmul.f32 %v10413_v4, %v14029_v41  ;;  %v7571_v53 = vmul.f32 0.044715, %v7539_v52  ;;  %v7468_v37 = vpop.f32.mrf.mxu2  ;;  %v7301_v30 = vpack.c.bf16 %v7291_v58, %v7290_v46  ;;  %vm7219_vm6 = vweird.f32 %v10413_v4 }
 0xfca   : > { %v14062_v42 = vadd.f32 %v7468_v37, %v14024_v22  ;;  %v7211_v45 = vsel %vm14056_vm5, %v14020_v62, %v7207_v33  ;;  %v7572_v61 = vmul.f32 0.044715, %v7540_v24  ;;  %vm7220_vm8 = vmor %vm7218_vm7, %vm7219_vm6 }
 0xfcb   : > { %v7214_v56 = vmul.f32 %v10413_v4, %v7213_v51  ;;  %v7603_v6 = vadd.f32 %v7571_v53, %v14036_v15  ;;  %7441 = vmatmul.bf16.gmra.mxu1 %v7301_v30  ;;  %7490 = vmatmul.bf16.gmra.mxu2 %v7301_v30  ;;  %v7254_v14 = vmul.f32 %v7211_v45, %v13945_v16 }
 0xfcc   : > { %v7422_v31 = vpop.f32.mrf.mxu1  ;;  %v7509_v48 = vmul.f32 %v14062_v42, %v14062_v42  ;;  %v7604_v7 = vadd.f32 %v7572_v61, %v14043_v57 }
 0xfcd   : > { %v7215_v34 = vmul.f32 0.5, %v7214_v56  ;;  %v7635_v18 = vmul.f32 0.7978846, %v7603_v6  ;;  %v14070_v21 = vadd.f32 %v7422_v31, %v14007_v12  ;;  %v7273_v53 = vmul.f32 %v13924_v5, %v7254_v14 }
 0xfce   : > { %v7541_v3 = vmul.f32 %v7509_v48, %v14062_v42  ;;  %v7636_v13 = vmul.f32 0.7978846, %v7604_v7  ;;  %v10415_v2 = vpop.eup %10414 }
 0xfcf   : > { %v7216_v0 = vsub.f32 1.5, %v7215_v34  ;;  %v7510_v62 = vmul.f32 %v14070_v21, %v14070_v21  ;;  %10416 = vtanh.f32 %v7635_v18  ;;  %v7698_v46 = vadd.f32 1.0, %v10415_v2 }
 0xfd0   : > { %v7047_v55 = vpop.xlane.xlu2 %7046  ;;  %v7573_v20 = vmul.f32 0.044715, %v7541_v3  ;;  %10418 = vtanh.f32 %v7636_v13  ;;  %v7292_v48 = vadd.f32 %v13935_v28, %v7273_v53 }
 0xfd1   : > { %v7064_v23 = vmul.f32 0.015625, %v7047_v55  ;;  %v7217_v35 = vmul.f32 %v10413_v4, %v7216_v0  ;;  %v7542_v32 = vmul.f32 %v7510_v62, %v14070_v21  ;;  %v7730_v34 = vmul.f32 0.5, %v7698_v46 }
 0xfd2   : > { %v7471_v52 = vpop.f32.mrf.mxu2  ;;  %v7605_v58 = vadd.f32 %v7573_v20, %v14062_v42 }
 0xfd3   : > { %v14079_v1 = vadd.f32 1e-05, %v7064_v23  ;;  %v7221_v9 = vsel %vm7220_vm8, %v10413_v4, %v7217_v35  ;;  %v7574_v33 = vmul.f32 0.044715, %v7542_v32  ;;  %v14083_v16 = vadd.f32 %v7471_v52, %v14024_v22 }
 0xfd4   : > { %v7255_v51 = vmul.f32 %v7221_v9, %v13952_v17  ;;  %v7424_v41 = vpop.f32.mrf.mxu1  ;;  %v7637_v24 = vmul.f32 0.7978846, %v7605_v58  ;;  %v7762_v52 = vmul.f32 %v7730_v34, %v14018_v60 }
 0xfd5   : > { %10420 = vrsqrt.f32 %v14079_v1  ;;  %v7606_v37 = vadd.f32 %v7574_v33, %v14070_v21  ;;  %v7511_v4 = vmul.f32 %v14083_v16, %v14083_v16  ;;  %v14092_v30 = vadd.f32 %v7424_v41, %v14007_v12  ;;  %v10417_v44 = vpop.eup %10416 }
 0xfd6   : > { %v7274_v56 = vmul.f32 %v13924_v5, %v7255_v51  ;;  %10422 = vtanh.f32 %v7637_v24  ;;  %v10419_v31 = vpop.eup %10418  ;;  %v7699_v0 = vadd.f32 1.0, %v10417_v44  ;;  %vm7228_vm10 = vweird.f32 %v14079_v1 }
 0xfd7   : > { %v7638_v6 = vmul.f32 0.7978846, %v7606_v37  ;;  %v7543_v17 = vmul.f32 %v7511_v4, %v14083_v16  ;;  %v7512_v45 = vmul.f32 %v14092_v30, %v14092_v30  ;;  %v7700_v3 = vadd.f32 1.0, %v10419_v31 }
 0xfd8   : > { %v7049_v61 = vpop.xlane.xlu0 %7048  ;;  %v7293_v7 = vadd.f32 %v13935_v28, %v7274_v56  ;;  %v7731_v46 = vmul.f32 0.5, %v7699_v0 }
 0xfd9   : > { %v7065_v18 = vmul.f32 0.015625, %v7049_v61  ;;  %v7575_v62 = vmul.f32 0.044715, %v7543_v17  ;;  %v7544_v55 = vmul.f32 %v7512_v45, %v14092_v30  ;;  %10424 = vtanh.f32 %v7638_v6 }
 0xfda   : > { %v7473_v23 = vpop.f32.mrf.mxu2  ;;  %v7302_v2 = vpack.c.bf16 %v7293_v7, %v7292_v48  ;;  %v7732_v35 = vmul.f32 0.5, %v7700_v3  ;;  %v7763_v34 = vmul.f32 %v7731_v46, %v14036_v15 }
 0xfdb   : > { %v14101_v14 = vpop.eup %10420  ;;  %v14103_v13 = vadd.f32 1e-05, %v7065_v18  ;;  %v7607_v32 = vadd.f32 %v7575_v62, %v14083_v16  ;;  %v7576_v9 = vmul.f32 0.044715, %v7544_v55  ;;  %v14111_v58 = vadd.f32 %v7473_v23, %v14024_v22 }
 0xfdc   : > { %v7223_v20 = vmul.f32 %v14101_v14, %v14079_v1  ;;  %7446 = vmatmul.bf16.gmra.mxu1 %v7302_v2  ;;  %7495 = vmatmul.bf16.gmra.mxu2 %v7302_v2  ;;  %v10423_v33 = vpop.eup %10422  ;;  %v7764_v51 = vmul.f32 %v7732_v35, %v14043_v57  ;;  %vm7229_vm9 = vweird.f32 %v14101_v14 }
 0xfdd   : > { %10426 = vrsqrt.f32 %v14103_v13  ;;  %v7639_v53 = vmul.f32 0.7978846, %v7607_v32  ;;  %v7427_v24 = vpop.f32.mrf.mxu1  ;;  %v7701_v37 = vadd.f32 1.0, %v10423_v33  ;;  %v7608_v4 = vadd.f32 %v7576_v9, %v14092_v30  ;;  %vm14137_vm11 = vmor %vm7228_vm10, %vm7229_vm9 }
 0xfde   : > { %v7224_v41 = vmul.f32 %v14101_v14, %v7223_v20  ;;  %v7513_v60 = vmul.f32 %v14111_v58, %v14111_v58  ;;  %v14119_v44 = vadd.f32 %v7427_v24, %v14007_v12  ;;  %v7794_v56 = vpack.c.bf16 %v7764_v51, %v7762_v52 }
 0xfdf   : > { %v10425_v17 = vpop.eup %10424  ;;  %v7733_v45 = vmul.f32 0.5, %v7701_v37  ;;  %v7640_v61 = vmul.f32 0.7978846, %v7608_v4  ;;  %10428 = vtanh.f32 %v7639_v53  ;;  %vm7238_vm13 = vweird.f32 %v14103_v13 }
 0xfe0   : > { %v7225_v6 = vmul.f32 0.5, %v7224_v41  ;;  %v7545_v57 = vmul.f32 %v7513_v60, %v14111_v58  ;;  %v7514_v31 = vmul.f32 %v14119_v44, %v14119_v44  ;;  %7947 = vmatmul.bf16.vlgmr.msra.gmra.mxu3 %v7794_v56  ;;  %v7702_v15 = vadd.f32 1.0, %v10425_v17 }
 0xfe1   : > { %v7765_v7 = vmul.f32 %v7733_v45, %v14062_v42  ;;  %10430 = vtanh.f32 %v7640_v61 }
 0xfe2   : > { %v7226_v18 = vsub.f32 1.5, %v7225_v6  ;;  %v7577_v0 = vmul.f32 0.044715, %v7545_v57  ;;  %v7546_v3 = vmul.f32 %v7514_v31, %v14119_v44  ;;  %v7734_v56 = vmul.f32 0.5, %v7702_v15 }
 0xfe3   : > { %v10427_v48 = vpop.eup %10426  ;;  %v7476_v23 = vpop.f32.mrf.mxu2  ;;  %v7795_v2 = vpack.c.bf16 %v7765_v7, %v7763_v34 }
 0xfe4   : > { %v7227_v62 = vmul.f32 %v14101_v14, %v7226_v18  ;;  %v7233_v55 = vmul.f32 %v10427_v48, %v14103_v13  ;;  %v7609_v35 = vadd.f32 %v7577_v0, %v14111_v58  ;;  %v7578_v20 = vmul.f32 0.044715, %v7546_v3 }
 0xfe5   : > { %v14133_v32 = vadd.f32 %v7476_v23, %v14024_v22  ;;  %v7429_v9 = vpop.f32.mrf.mxu1  ;;  %7996 = vmatmul.bf16.vlgmr.msra.gmra.mxu0 %v7795_v2  ;;  %v10429_v41 = vpop.eup %10428  ;;  %vm7239_vm12 = vweird.f32 %v10427_v48  ;;  %v7766_v3 = vmul.f32 %v7734_v56, %v14070_v21 }
 0xfe6   : > { %v7234_v52 = vmul.f32 %v10427_v48, %v7233_v55  ;;  %v7231_v1 = vsel %vm14137_vm11, %v14101_v14, %v7227_v62  ;;  %v7641_v33 = vmul.f32 0.7978846, %v7609_v35  ;;  %v7610_v46 = vadd.f32 %v7578_v20, %v14119_v44  ;;  %vm7240_vm15 = vmor %vm7238_vm13, %vm7239_vm12 }
 0xfe7   : > { %v7515_v51 = vmul.f32 %v14133_v32, %v14133_v32  ;;  %v14148_v24 = vadd.f32 %v7429_v9, %v14007_v12  ;;  %v10431_v37 = vpop.eup %10430  ;;  %v7256_v14 = vmul.f32 %v7231_v1, %v13965_v63  ;;  %v7703_v7 = vadd.f32 1.0, %v10429_v41 }
 0xfe8   : > { %v7235_v53 = vmul.f32 0.5, %v7234_v52  ;;  %10432 = vtanh.f32 %v7641_v33  ;;  %v7642_v4 = vmul.f32 0.7978846, %v7610_v46  ;;  %v7704_v45 = vadd.f32 1.0, %v10431_v37 }
 0xfe9   : > { %v7547_v60 = vmul.f32 %v7515_v51, %v14133_v32  ;;  %v7516_v17 = vmul.f32 %v14148_v24, %v14148_v24  ;;  %v7275_v15 = vmul.f32 %v13924_v5, %v7256_v14  ;;  %v7735_v1 = vmul.f32 0.5, %v7703_v7 }
 0xfea   : > { %v7236_v6 = vsub.f32 1.5, %v7235_v53  ;;  %v7736_v18 = vmul.f32 0.5, %v7704_v45  ;;  %10434 = vtanh.f32 %v7642_v4 }
 0xfeb   : > { %v7579_v61 = vmul.f32 0.044715, %v7547_v60  ;;  %v7548_v31 = vmul.f32 %v7516_v17, %v14148_v24  ;;  %v7478_v34 = vpop.f32.mrf.mxu2  ;;  %v7294_v51 = vadd.f32 %v13935_v28, %v7275_v15  ;;  %v7767_v14 = vmul.f32 %v7735_v1, %v14083_v16 }
 0xfec   : > { %v7237_v57 = vmul.f32 %v10427_v48, %v7236_v6  ;;  %v14159_v63 = vadd.f32 %v7478_v34, %v14024_v22  ;;  %v7768_v23 = vmul.f32 %v7736_v18, %v14092_v30 }
 0xfed   : > { %v7611_v0 = vadd.f32 %v7579_v61, %v14133_v32  ;;  %v7580_v55 = vmul.f32 0.044715, %v7548_v31 }
 0xfee   : > { %v7241_v62 = vsel %vm7240_vm15, %v10427_v48, %v7237_v57  ;;  %v7432_v13 = vpop.f32.mrf.mxu1  ;;  %v10433_v2 = vpop.eup %10432  ;;  %v7517_v42 = vmul.f32 %v14159_v63, %v14159_v63  ;;  %v7796_v21 = vpack.c.bf16 %v7768_v23, %v7766_v3 }
 0xfef   : > { %v7257_v35 = vmul.f32 %v7241_v62, %v13975_v49  ;;  %v7643_v20 = vmul.f32 0.7978846, %v7611_v0  ;;  %v14168_v52 = vadd.f32 %v7432_v13, %v14007_v12  ;;  %v7612_v9 = vadd.f32 %v7580_v55, %v14148_v24 }
 0xff0   : > { %v7705_v48 = vadd.f32 1.0, %v10433_v2  ;;  %v7549_v33 = vmul.f32 %v7517_v42, %v14159_v63  ;;  %7952 = vmatmul.bf16.gmra.mxu3 %v7796_v21  ;;  %v10435_v53 = vpop.eup %10434 }
 0xff1   : > { %v7518_v30 = vmul.f32 %v14168_v52, %v14168_v52  ;;  %v7276_v46 = vmul.f32 %v13924_v5, %v7257_v35  ;;  %v7644_v49 = vmul.f32 0.7978846, %v7612_v9  ;;  %10436 = vtanh.f32 %v7643_v20 }
 0xff2   : > { %v7737_v41 = vmul.f32 0.5, %v7705_v48  ;;  %v7581_v37 = vmul.f32 0.044715, %v7549_v33  ;;  %v7706_v34 = vadd.f32 1.0, %v10435_v53 }
 0xff3   : > { %v7550_v4 = vmul.f32 %v7518_v30, %v14168_v52  ;;  %v7295_v60 = vadd.f32 %v13935_v28, %v7276_v46  ;;  %10438 = vtanh.f32 %v7644_v49 }
 0xff4   : > { %v7481_v56 = vpop.f32.mrf.mxu2  ;;  %v7769_v6 = vmul.f32 %v7737_v41, %v14111_v58  ;;  %v7613_v5 = vadd.f32 %v7581_v37, %v14159_v63  ;;  %v7738_v13 = vmul.f32 0.5, %v7706_v34 }
 0xff5   : > { %v7582_v17 = vmul.f32 0.044715, %v7550_v4  ;;  %v14182_v45 = vadd.f32 %v7481_v56, %v14024_v22  ;;  %v7303_v61 = vpack.c.bf16 %v7295_v60, %v7294_v51 }
 0xff6   : > { %v7434_v57 = vpop.f32.mrf.mxu1  ;;  %v7797_v31 = vpack.c.bf16 %v7769_v6, %v7767_v14  ;;  %v7645_v18 = vmul.f32 0.7978846, %v7613_v5  ;;  %v7770_v1 = vmul.f32 %v7738_v13, %v14119_v44 }
 0xff7   : > { %v7614_v7 = vadd.f32 %v7582_v17, %v14168_v52  ;;  %v7519_v28 = vmul.f32 %v14182_v45, %v14182_v45  ;;  %v7435_v16 = vadd.f32 %v7434_v57, %v14007_v12  ;;  %7451 = vmatmul.bf16.gmra.mxu1 %v7303_v61  ;;  %7500 = vmatmul.bf16.gmra.mxu2 %v7303_v61  ;;  %v10437_v58 = vpop.eup %10436 }
 0xff8   : > { %8001 = vmatmul.bf16.gmra.mxu0 %v7797_v31  ;;  %10440 = vtanh.f32 %v7645_v18  ;;  %v7707_v20 = vadd.f32 1.0, %v10437_v58 }
 0xff9   : > { %v7646_v0 = vmul.f32 0.7978846, %v7614_v7  ;;  %v7551_v3 = vmul.f32 %v7519_v28, %v14182_v45  ;;  %v7520_v62 = vmul.f32 %v7435_v16, %v7435_v16  ;;  %v10439_v55 = vpop.eup %10438 }
 0xffa   : > { %v7708_v2 = vadd.f32 1.0, %v10439_v55  ;;  %v7739_v53 = vmul.f32 0.5, %v7707_v20 }
 0xffb   : > { %v7583_v23 = vmul.f32 0.044715, %v7551_v3  ;;  %v7552_v15 = vmul.f32 %v7520_v62, %v7435_v16  ;;  %10442 = vtanh.f32 %v7646_v0 }
 0xffc   : > { %v7483_v35 = vpop.f32.mrf.mxu2  ;;  %v7740_v48 = vmul.f32 0.5, %v7708_v2  ;;  %v7771_v5 = vmul.f32 %v7739_v53, %v14133_v32 }
 0xffd   : > { %v7615_v42 = vadd.f32 %v7583_v23, %v14182_v45  ;;  %v7584_v9 = vmul.f32 0.044715, %v7552_v15  ;;  %v7484_v21 = vadd.f32 %v7483_v35, %v14024_v22 }
 0xffe   : > { %v10441_v33 = vpop.eup %10440  ;;  %v7772_v51 = vmul.f32 %v7740_v48, %v14148_v24 }
 0xfff   : > { %v7647_v30 = vmul.f32 0.7978846, %v7615_v42  ;;  %v7616_v46 = vadd.f32 %v7584_v9, %v7435_v16  ;;  %v7521_v49 = vmul.f32 %v7484_v21, %v7484_v21  ;;  %v7709_v41 = vadd.f32 1.0, %v10441_v33 }
0x1000   : > { %v7798_v60 = vpack.c.bf16 %v7772_v51, %v7770_v1 }
0x1001   : > { %v7648_v37 = vmul.f32 0.7978846, %v7616_v46  ;;  %v7553_v4 = vmul.f32 %v7521_v49, %v7484_v21  ;;  %v10443_v56 = vpop.eup %10442  ;;  %10444 = vtanh.f32 %v7647_v30  ;;  %v7741_v14 = vmul.f32 0.5, %v7709_v41 }
0x1002   : > { %7957 = vmatmul.bf16.gmra.mxu3 %v7798_v60  ;;  %v7710_v57 = vadd.f32 1.0, %v10443_v56 }
0x1003   : > { %10446 = vtanh.f32 %v7648_v37  ;;  %v7585_v6 = vmul.f32 0.044715, %v7553_v4  ;;  %v7773_v44 = vmul.f32 %v7741_v14, %v14159_v63 }
0x1004   : > { %v7742_v7 = vmul.f32 0.5, %v7710_v57 }
0x1005   : > { %v7617_v17 = vadd.f32 %v7585_v6, %v7484_v21  ;;  %v7799_v61 = vpack.c.bf16 %v7773_v44, %v7771_v5 }
0x1006   : > { %v7774_v0 = vmul.f32 %v7742_v7, %v14168_v52 }
0x1007   : > { %v7649_v31 = vmul.f32 0.7978846, %v7617_v17  ;;  %v10445_v24 = vpop.eup %10444 }
0x1008   : > { %8006 = vmatmul.bf16.gmra.mxu0 %v7799_v61  ;;  %v7711_v58 = vadd.f32 1.0, %v10445_v24 }
0x1009   : > { %v10447_v34 = vpop.eup %10446  ;;  %10448 = vtanh.f32 %v7649_v31 }
0x100a   : > { %v7712_v18 = vadd.f32 1.0, %v10447_v34  ;;  %v7743_v13 = vmul.f32 0.5, %v7711_v58 }
0x100c   : > { %v7744_v28 = vmul.f32 0.5, %v7712_v18  ;;  %v7775_v23 = vmul.f32 %v7743_v13, %v14182_v45 }
0x100e   : > { %v7776_v3 = vmul.f32 %v7744_v28, %v7435_v16 }
0x100f   : > { %v10449_v62 = vpop.eup %10448 }
0x1010   : > { %v7800_v55 = vpack.c.bf16 %v7776_v3, %v7774_v0  ;;  %v7713_v32 = vadd.f32 1.0, %v10449_v62 }
0x1012   : > { %v7745_v63 = vmul.f32 0.5, %v7713_v32  ;;  %7962 = vmatmul.bf16.gmra.mxu3 %v7800_v55 }
0x1014   : > { %v7777_v15 = vmul.f32 %v7745_v63, %v7484_v21 }
0x1016   : > { %v7801_v2 = vpack.c.bf16 %v7777_v15, %v7775_v23 }
0x1018   : > { %8011 = vmatmul.bf16.gmra.mxu0 %v7801_v2 }
0x1037   : > { %v7437_v35 = vpop.f32.mrf.mxu1 }
0x1038   : > { %v7438_v20 = vadd.f32 %v7437_v35, %v14007_v12 }
0x103a   : > { %v7522_v42 = vmul.f32 %v7438_v20, %v7438_v20 }
0x103c   : > { %v7554_v9 = vmul.f32 %v7522_v42, %v7438_v20 }
0x103d   : > { %v7486_v48 = vpop.f32.mrf.mxu2 }
0x103e   : > { %v7586_v1 = vmul.f32 0.044715, %v7554_v9  ;;  %v14199_v52 = vadd.f32 %v7486_v48, %v14024_v22 }
0x103f   : > { %v7439_v16 = vpop.f32.mrf.mxu1 }
0x1040   : > { %v7618_v33 = vadd.f32 %v7586_v1, %v7438_v20  ;;  %v7523_v30 = vmul.f32 %v14199_v52, %v14199_v52  ;;  %v7440_v45 = vadd.f32 %v7439_v16, %v14007_v12 }
0x1042   : > { %v7650_v21 = vmul.f32 0.7978846, %v7618_v33  ;;  %v7555_v46 = vmul.f32 %v7523_v30, %v14199_v52  ;;  %v7524_v49 = vmul.f32 %v7440_v45, %v7440_v45 }
0x1044   : > { %v7587_v51 = vmul.f32 0.044715, %v7555_v46  ;;  %v7556_v41 = vmul.f32 %v7524_v49, %v7440_v45  ;;  %10450 = vtanh.f32 %v7650_v21 }
0x1045   : > { %v7488_v53 = vpop.f32.mrf.mxu2 }
0x1046   : > { %v7619_v37 = vadd.f32 %v7587_v51, %v14199_v52  ;;  %v7588_v4 = vmul.f32 0.044715, %v7556_v41  ;;  %v7489_v60 = vadd.f32 %v7488_v53, %v14024_v22 }
0x1048   : > { %v7651_v56 = vmul.f32 0.7978846, %v7619_v37  ;;  %v7620_v14 = vadd.f32 %v7588_v4, %v7440_v45  ;;  %v7525_v6 = vmul.f32 %v7489_v60, %v7489_v60  ;;  %v7442_v5 = vpop.f32.mrf.mxu1 }
0x1049   : > { %v14208_v61 = vadd.f32 %v7442_v5, %v14007_v12 }
0x104a   : > { %v7652_v44 = vmul.f32 0.7978846, %v7620_v14  ;;  %v7557_v17 = vmul.f32 %v7525_v6, %v7489_v60  ;;  %10452 = vtanh.f32 %v7651_v56  ;;  %v10451_v57 = vpop.eup %10450 }
0x104b   : > { %v7526_v24 = vmul.f32 %v14208_v61, %v14208_v61  ;;  %v7714_v28 = vadd.f32 1.0, %v10451_v57 }
0x104c   : > { %10454 = vtanh.f32 %v7652_v44  ;;  %v7589_v31 = vmul.f32 0.044715, %v7557_v17 }
0x104d   : > { %v7558_v18 = vmul.f32 %v7526_v24, %v14208_v61  ;;  %v7746_v2 = vmul.f32 0.5, %v7714_v28 }
0x104e   : > { %v7621_v34 = vadd.f32 %v7589_v31, %v7489_v60  ;;  %v7491_v7 = vpop.f32.mrf.mxu2 }
0x104f   : > { %v7590_v0 = vmul.f32 0.044715, %v7558_v18  ;;  %v14214_v3 = vadd.f32 %v7491_v7, %v14024_v22  ;;  %v7778_v21 = vmul.f32 %v7746_v2, %v7438_v20 }
0x1050   : > { %v7653_v58 = vmul.f32 0.7978846, %v7621_v34  ;;  %v10453_v62 = vpop.eup %10452  ;;  %v7444_v55 = vpop.f32.mrf.mxu1 }
0x1051   : > { %v7622_v13 = vadd.f32 %v7590_v0, %v14208_v61  ;;  %v7527_v63 = vmul.f32 %v14214_v3, %v14214_v3  ;;  %v14220_v23 = vadd.f32 %v7444_v55, %v14007_v12  ;;  %v7715_v1 = vadd.f32 1.0, %v10453_v62 }
0x1052   : > { %v10455_v32 = vpop.eup %10454  ;;  %10456 = vtanh.f32 %v7653_v58 }
0x1053   : > { %v7716_v15 = vadd.f32 1.0, %v10455_v32  ;;  %v7654_v35 = vmul.f32 0.7978846, %v7622_v13  ;;  %v7559_v42 = vmul.f32 %v7527_v63, %v14214_v3  ;;  %v7528_v9 = vmul.f32 %v14220_v23, %v14220_v23 }
0x1054   : > { %v7747_v14 = vmul.f32 0.5, %v7715_v1 }
0x1055   : > { %v7748_v48 = vmul.f32 0.5, %v7716_v15  ;;  %v7591_v16 = vmul.f32 0.044715, %v7559_v42  ;;  %v7560_v33 = vmul.f32 %v7528_v9, %v14220_v23  ;;  %10458 = vtanh.f32 %v7654_v35 }
0x1056   : > { %v7493_v30 = vpop.f32.mrf.mxu2  ;;  %v7779_v24 = vmul.f32 %v7747_v14, %v14199_v52 }
0x1057   : > { %v7780_v46 = vmul.f32 %v7748_v48, %v7440_v45  ;;  %v7623_v51 = vadd.f32 %v7591_v16, %v14214_v3  ;;  %v7592_v41 = vmul.f32 0.044715, %v7560_v33  ;;  %v14228_v53 = vadd.f32 %v7493_v30, %v14024_v22 }
0x1058   : > { %v10457_v49 = vpop.eup %10456 }
0x1059   : > { %v7447_v37 = vpop.f32.mrf.mxu1  ;;  %v7802_v4 = vpack.c.bf16 %v7780_v46, %v7778_v21  ;;  %v7717_v56 = vadd.f32 1.0, %v10457_v49  ;;  %v7655_v6 = vmul.f32 0.7978846, %v7623_v51  ;;  %v7624_v5 = vadd.f32 %v7592_v41, %v14220_v23  ;;  %v14257_v21 = vld [vmem:[%s14868_s25 + $0x1] ss:$0 sm:$0xff] }
0x105a   : > { %v7529_v44 = vmul.f32 %v14228_v53, %v14228_v53  ;;  %v14234_v20 = vadd.f32 %v7447_v37, %v14007_v12 }
0x105b   : > { %7967 = vmatmul.bf16.gmra.mxu3 %v7802_v4  ;;  %v7749_v45 = vmul.f32 0.5, %v7717_v56  ;;  %v7656_v17 = vmul.f32 0.7978846, %v7624_v5  ;;  %10460 = vtanh.f32 %v7655_v6  ;;  %v10459_v18 = vpop.eup %10458 }
0x105c   : > { %v7561_v57 = vmul.f32 %v7529_v44, %v14228_v53  ;;  %v7530_v31 = vmul.f32 %v14234_v20, %v14234_v20  ;;  %v7718_v63 = vadd.f32 1.0, %v10459_v18 }
0x105d   : > { %v7781_v34 = vmul.f32 %v7749_v45, %v7489_v60  ;;  %10462 = vtanh.f32 %v7656_v17 }
0x105e   : > { %v7593_v7 = vmul.f32 0.044715, %v7561_v57  ;;  %v7562_v28 = vmul.f32 %v7530_v31, %v14234_v20  ;;  %v7750_v49 = vmul.f32 0.5, %v7718_v63 }
0x105f   : > { %v7496_v58 = vpop.f32.mrf.mxu2  ;;  %v7803_v0 = vpack.c.bf16 %v7781_v34, %v7779_v24 }
0x1060   : > { %v7625_v62 = vadd.f32 %v7593_v7, %v14228_v53  ;;  %v7594_v55 = vmul.f32 0.044715, %v7562_v28  ;;  %v14243_v32 = vadd.f32 %v7496_v58, %v14024_v22  ;;  %v7782_v17 = vmul.f32 %v7750_v49, %v14208_v61 }
0x1061   : > { %v7449_v13 = vpop.f32.mrf.mxu1  ;;  %8016 = vmatmul.bf16.gmra.mxu0 %v7803_v0  ;;  %v10461_v35 = vpop.eup %10460 }
0x1062   : > { %v7657_v15 = vmul.f32 0.7978846, %v7625_v62  ;;  %v7626_v52 = vadd.f32 %v7594_v55, %v14234_v20  ;;  %v7531_v60 = vmul.f32 %v14243_v32, %v14243_v32  ;;  %v14249_v2 = vadd.f32 %v7449_v13, %v14007_v12  ;;  %v7997_v42 = vpop.f32.mrf.mxu0 }
0x1063   : > { %v10463_v9 = vpop.eup %10462  ;;  %v7948_v33 = vpop.f32.mrf.mxu3  ;;  %v7719_v14 = vadd.f32 1.0, %v10461_v35 }
0x1064   : > { %10464 = vtanh.f32 %v7657_v15  ;;  %v7658_v48 = vmul.f32 0.7978846, %v7626_v52  ;;  %v7563_v1 = vmul.f32 %v7531_v60, %v14243_v32  ;;  %v7532_v16 = vmul.f32 %v14249_v2, %v14249_v2 }
0x1065   : > { %v7998_v30 = vadd.f32 %v7997_v42, %v7948_v33  ;;  %v7720_v46 = vadd.f32 1.0, %v10463_v9  ;;  %v7751_v0 = vmul.f32 0.5, %v7719_v14 }
0x1066   : > { %v7595_v51 = vmul.f32 0.044715, %v7563_v1  ;;  %v7564_v41 = vmul.f32 %v7532_v16, %v14249_v2  ;;  %10466 = vtanh.f32 %v7658_v48 }
0x1067   : > { %v8037_v37 = vadd.f32 %v7998_v30, %v13764_v38  ;;  %v7498_v4 = vpop.f32.mrf.mxu2  ;;  %v7752_v56 = vmul.f32 0.5, %v7720_v46  ;;  %v7783_v60 = vmul.f32 %v7751_v0, %v14214_v3 }
0x1068   : > { %v7627_v6 = vadd.f32 %v7595_v51, %v14243_v32  ;;  %v7596_v5 = vmul.f32 0.044715, %v7564_v41  ;;  %v14263_v44 = vadd.f32 %v7498_v4, %v14024_v22 }
0x1069   : > { %v14266_v45 = vadd.f32 %v14257_v21, %v8037_v37  ;;  %v7784_v57 = vmul.f32 %v7752_v56, %v14220_v23 }
0x106a   : > { %v10465_v31 = vpop.eup %10464  ;;  %v7659_v24 = vmul.f32 0.7978846, %v7627_v6  ;;  %v7628_v38 = vadd.f32 %v7596_v5, %v14249_v2  ;;  %v7533_v34 = vmul.f32 %v14263_v44, %v14263_v44  ;;  %v7999_v18 = vpop.f32.mrf.mxu0 }
0x106b   : > { %v8076_v7 = vmul.f32 %v14912_v19, %v14266_v45  ;;  %v7804_v28 = vpack.c.bf16 %v7784_v57, %v7782_v17  ;;  %v7721_v58 = vadd.f32 1.0, %v10465_v31  ;;  %v7950_v61 = vpop.f32.mrf.mxu3 }
0x106c   : > { %v7660_v62 = vmul.f32 0.7978846, %v7628_v38  ;;  %v7565_v55 = vmul.f32 %v7533_v34, %v14263_v44  ;;  %10468 = vtanh.f32 %v7659_v24  ;;  %v8000_v23 = vadd.f32 %v7999_v18, %v7950_v61  ;;  %v10467_v63 = vpop.eup %10466 }
0x106d   : > { %8092 = vadd.xlane.f32.xlu1 %v8076_v7  ;;  %7972 = vmatmul.bf16.gmra.mxu3 %v7804_v28  ;;  %v7753_v13 = vmul.f32 0.5, %v7721_v58  ;;  %v7722_v1 = vadd.f32 1.0, %v10467_v63 }
0x106e   : > { %10470 = vtanh.f32 %v7660_v62  ;;  %v7597_v15 = vmul.f32 0.044715, %v7565_v55  ;;  %v8038_v52 = vadd.f32 %v8000_v23, %v13770_v39 }
0x106f   : > { %v7785_v35 = vmul.f32 %v7753_v13, %v14228_v53  ;;  %v7754_v37 = vmul.f32 0.5, %v7722_v1 }
0x1070   : > { %v7629_v42 = vadd.f32 %v7597_v15, %v14263_v44  ;;  %v14281_v9 = vadd.f32 %v14257_v21, %v8038_v52 }
0x1071   : > { %v7805_v48 = vpack.c.bf16 %v7785_v35, %v7783_v60  ;;  %v7786_v31 = vmul.f32 %v7754_v37, %v14234_v20 }
0x1072   : > { %v7661_v16 = vmul.f32 0.7978846, %v7629_v42  ;;  %v10469_v33 = vpop.eup %10468  ;;  %v8077_v46 = vmul.f32 %v14912_v19, %v14281_v9 }
0x1073   : > { %8021 = vmatmul.bf16.gmra.mxu0 %v7805_v48  ;;  %v7953_v3 = vpop.f32.mrf.mxu3  ;;  %v7723_v6 = vadd.f32 1.0, %v10469_v33 }
0x1074   : > { %v7452_v30 = vpop.f32.mrf.mxu1  ;;  %v10471_v49 = vpop.eup %10470  ;;  %10472 = vtanh.f32 %v7661_v16  ;;  %8094 = vadd.xlane.f32.xlu2 %v8077_v46 }
0x1075   : > { %v14286_v39 = vadd.f32 %v7452_v30, %v14007_v12  ;;  %v8002_v53 = vpop.f32.mrf.mxu0  ;;  %v7724_v41 = vadd.f32 1.0, %v10471_v49  ;;  %v7755_v0 = vmul.f32 0.5, %v7723_v6 }
0x1076   : > { %v8003_v51 = vadd.f32 %v8002_v53, %v7953_v3 }
0x1077   : > { %v7534_v4 = vmul.f32 %v14286_v39, %v14286_v39  ;;  %v7756_v14 = vmul.f32 0.5, %v7724_v41  ;;  %v7787_v35 = vmul.f32 %v7755_v0, %v14243_v32 }
0x1078   : > { %v8039_v56 = vadd.f32 %v8003_v51, %v13776_v54 }
0x1079   : > { %v7566_v5 = vmul.f32 %v7534_v4, %v14286_v39  ;;  %v7788_v24 = vmul.f32 %v7756_v14, %v14249_v2 }
0x107a   : > { %v14293_v17 = vadd.f32 %v14257_v21, %v8039_v56  ;;  %v7501_v57 = vpop.f32.mrf.mxu2  ;;  %v10473_v38 = vpop.eup %10472 }
0x107b   : > { %v7598_v34 = vmul.f32 0.044715, %v7566_v5  ;;  %v14298_v18 = vadd.f32 %v7501_v57, %v14024_v22  ;;  %v7806_v28 = vpack.c.bf16 %v7788_v24, %v7786_v31  ;;  %v7725_v58 = vadd.f32 1.0, %v10473_v38  ;;  %v7955_v2 = vpop.f32.mrf.mxu3 }
0x107c   : > { %v7454_v7 = vpop.f32.mrf.mxu1  ;;  %v8078_v54 = vmul.f32 %v14912_v19, %v14293_v17 }
0x107d   : > { %v7630_v62 = vadd.f32 %v7598_v34, %v14286_v39  ;;  %v7535_v55 = vmul.f32 %v14298_v18, %v14298_v18  ;;  %v7455_v20 = vadd.f32 %v7454_v7, %v14007_v12  ;;  %v8004_v61 = vpop.f32.mrf.mxu0  ;;  %7977 = vmatmul.bf16.gmra.mxu3 %v7806_v28  ;;  %v7757_v13 = vmul.f32 0.5, %v7725_v58 }
0x107e   : > { %v8005_v23 = vadd.f32 %v8004_v61, %v7955_v2  ;;  %8096 = vadd.xlane.f32.xlu0 %v8078_v54 }
0x107f   : > { %v7662_v63 = vmul.f32 0.7978846, %v7630_v62  ;;  %v7567_v15 = vmul.f32 %v7535_v55, %v14298_v18  ;;  %v7536_v52 = vmul.f32 %v7455_v20, %v7455_v20  ;;  %v7789_v42 = vmul.f32 %v7757_v13, %v14263_v44 }
0x1080   : > { %v8040_v60 = vadd.f32 %v8005_v23, %v13782_v8 }
0x1081   : > { %v7599_v48 = vmul.f32 0.044715, %v7567_v15  ;;  %v7568_v1 = vmul.f32 %v7536_v52, %v7455_v20  ;;  %v7807_v33 = vpack.c.bf16 %v7789_v42, %v7787_v35  ;;  %10474 = vtanh.f32 %v7662_v63 }
0x1082   : > { %v14311_v12 = vadd.f32 %v14257_v21, %v8040_v60  ;;  %v7503_v16 = vpop.f32.mrf.mxu2 }
0x1083   : > { %v7631_v30 = vadd.f32 %v7599_v48, %v14298_v18  ;;  %v7600_v46 = vmul.f32 0.044715, %v7568_v1  ;;  %v7504_v49 = vadd.f32 %v7503_v16, %v14024_v22  ;;  %8026 = vmatmul.bf16.gmra.mxu0 %v7807_v33 }
0x1084   : > { %v8079_v8 = vmul.f32 %v14912_v19, %v14311_v12 }
0x1085   : > { %v7663_v32 = vmul.f32 0.7978846, %v7631_v30  ;;  %v7632_v3 = vadd.f32 %v7600_v46, %v7455_v20  ;;  %v7537_v44 = vmul.f32 %v7504_v49, %v7504_v49  ;;  %v8007_v53 = vpop.f32.mrf.mxu0  ;;  %v7958_v51 = vpop.f32.mrf.mxu3 }
0x1086   : > { %8098 = vadd.xlane.f32.xlu1 %v8079_v8  ;;  %v8008_v4 = vadd.f32 %v8007_v53, %v7958_v51 }
0x1087   : > { %v7664_v41 = vmul.f32 0.7978846, %v7632_v3  ;;  %v7569_v37 = vmul.f32 %v7537_v44, %v7504_v49  ;;  %10476 = vtanh.f32 %v7663_v32  ;;  %v10475_v56 = vpop.eup %10474 }
0x1088   : > { %v8041_v6 = vadd.f32 %v8008_v4, %v13788_v50  ;;  %v7726_v57 = vadd.f32 1.0, %v10475_v56 }
0x1089   : > { %10478 = vtanh.f32 %v7664_v41  ;;  %v7601_v14 = vmul.f32 0.044715, %v7569_v37 }
0x108a   : > { %v14319_v5 = vadd.f32 %v14257_v21, %v8041_v6  ;;  %v7758_v0 = vmul.f32 0.5, %v7726_v57 }
0x108b   : > { %v7633_v22 = vadd.f32 %v7601_v14, %v7504_v49 }
0x108c   : > { %v8080_v38 = vmul.f32 %v14912_v19, %v14319_v5  ;;  %v7790_v61 = vmul.f32 %v7758_v0, %v14286_v39 }
0x108d   : > { %v7665_v31 = vmul.f32 0.7978846, %v7633_v22  ;;  %v8009_v24 = vpop.f32.mrf.mxu0  ;;  %v10477_v34 = vpop.eup %10476 }
0x108e   : > { %v7960_v7 = vpop.f32.mrf.mxu3  ;;  %8100 = vadd.xlane.f32.xlu2 %v8080_v38  ;;  %v7727_v55 = vadd.f32 1.0, %v10477_v34 }
0x108f   : > { %v10479_v54 = vpop.eup %10478  ;;  %10480 = vtanh.f32 %v7665_v31  ;;  %v8010_v28 = vadd.f32 %v8009_v24, %v7960_v7 }
0x1090   : > { %v7728_v58 = vadd.f32 1.0, %v10479_v54  ;;  %v7759_v42 = vmul.f32 0.5, %v7727_v55 }
0x1091   : > { %v8042_v50 = vadd.f32 %v8010_v28, %v13794_v25 }
0x1092   : > { %v7760_v62 = vmul.f32 0.5, %v7728_v58  ;;  %v7791_v16 = vmul.f32 %v7759_v42, %v14298_v18 }
0x1093   : > { %v14325_v2 = vadd.f32 %v14257_v21, %v8042_v50 }
0x1094   : > { %v7792_v23 = vmul.f32 %v7760_v62, %v7455_v20 }
0x1095   : > { %v10481_v13 = vpop.eup %10480  ;;  %v8012_v63 = vpop.f32.mrf.mxu0  ;;  %v8081_v15 = vmul.f32 %v14912_v19, %v14325_v2 }
0x1096   : > { %v7963_v52 = vpop.f32.mrf.mxu3  ;;  %v7808_v60 = vpack.c.bf16 %v7792_v23, %v7790_v61  ;;  %v7729_v35 = vadd.f32 1.0, %v10481_v13 }
0x1097   : > { %v8013_v48 = vadd.f32 %v8012_v63, %v7963_v52  ;;  %8102 = vadd.xlane.f32.xlu0 %v8081_v15 }
0x1098   : > { %7982 = vmatmul.bf16.gmra.mxu3 %v7808_v60  ;;  %v7761_v25 = vmul.f32 0.5, %v7729_v35 }
0x1099   : > { %v8043_v1 = vadd.f32 %v8013_v48, %v13800_v36 }
0x109a   : > { %v7793_v33 = vmul.f32 %v7761_v25, %v7504_v49 }
0x109b   : > { %v14333_v39 = vadd.f32 %v14257_v21, %v8043_v1 }
0x109c   : > { %v7809_v20 = vpack.c.bf16 %v7793_v33, %v7791_v16 }
0x109d   : > { %v8014_v30 = vpop.f32.mrf.mxu0  ;;  %v8082_v46 = vmul.f32 %v14912_v19, %v14333_v39 }
0x109e   : > { %v7965_v8 = vpop.f32.mrf.mxu3  ;;  %8031 = vmatmul.bf16.gmra.mxu0 %v7809_v20 }
0x109f   : > { %v8015_v32 = vadd.f32 %v8014_v30, %v7965_v8  ;;  %8104 = vadd.xlane.f32.xlu1 %v8082_v46 }
0x10a1   : > { %v8044_v3 = vadd.f32 %v8015_v32, %v13806_v43 }
0x10a3   : > { %v14339_v44 = vadd.f32 %v14257_v21, %v8044_v3 }
0x10a5   : > { %v8083_v36 = vmul.f32 %v14912_v19, %v14339_v44 }
0x10a7   : > { %8106 = vadd.xlane.f32.xlu2 %v8083_v36 }
0x10de   : > { %v7968_v18 = vpop.f32.mrf.mxu3  ;;  %v8017_v49 = vpop.f32.mrf.mxu0 }
0x10df   : > { %v8018_v53 = vadd.f32 %v8017_v49, %v7968_v18 }
0x10e1   : > { %v8045_v51 = vadd.f32 %v8018_v53, %v13812_v27 }
0x10e3   : > { %v14345_v41 = vadd.f32 %v14257_v21, %v8045_v51 }
0x10e5   : > { %v8084_v37 = vmul.f32 %v14912_v19, %v14345_v41 }
0x10e6   : > { %v8019_v4 = vpop.f32.mrf.mxu0  ;;  %v7970_v43 = vpop.f32.mrf.mxu3 }
0x10e7   : > { %v8020_v56 = vadd.f32 %v8019_v4, %v7970_v43  ;;  %8108 = vadd.xlane.f32.xlu0 %v8084_v37 }
0x10e9   : > { %v8046_v14 = vadd.f32 %v8020_v56, %v13824_v59 }
0x10eb   : > { %v14351_v6 = vadd.f32 %v14257_v21, %v8046_v14 }
0x10ed   : > { %v8085_v22 = vmul.f32 %v14912_v19, %v14351_v6 }
0x10ef   : > { %8110 = vadd.xlane.f32.xlu1 %v8085_v22 }
0x10f0   : > { %v7973_v27 = vpop.f32.mrf.mxu3  ;;  %v8022_v57 = vpop.f32.mrf.mxu0 }
0x10f1   : > { %v8023_v31 = vadd.f32 %v8022_v57, %v7973_v27  ;;  %v8097_v51 = vpop.xlane.xlu0 %8096 }
0x10f2   : > { %v8126_v22 = vmul.f32 0.015625, %v8097_v51 }
0x10f3   : > { %v8047_v24 = vadd.f32 %v8023_v31, %v13836_v47 }
0x10f5   : > { %v14357_v38 = vadd.f32 %v14257_v21, %v8047_v24  ;;  %v8142_v24 = vsub.f32 %v14293_v17, %v8126_v22 }
0x10f7   : > { %v8086_v7 = vmul.f32 %v14912_v19, %v14357_v38 }
0x10f8   : > { %v7975_v34 = vpop.f32.mrf.mxu3  ;;  %v8024_v59 = vpop.f32.mrf.mxu0 }
0x10f9   : > { %v8025_v54 = vadd.f32 %v8024_v59, %v7975_v34  ;;  %8112 = vadd.xlane.f32.xlu2 %v8086_v7 }
0x10fb   : > { %v8048_v28 = vadd.f32 %v8025_v54, %v13848_v10  ;;  %v8093_v10 = vpop.xlane.xlu1 %8092 }
0x10fc   : > { %v8124_v52 = vmul.f32 0.015625, %v8093_v10 }
0x10fd   : > { %v14363_v58 = vadd.f32 %v14257_v21, %v8048_v28 }
0x10fe   : > { %v8140_v42 = vsub.f32 %v14266_v45, %v8124_v52 }
0x10ff   : > { %v8087_v50 = vmul.f32 %v14912_v19, %v14363_v58 }
0x1100   : > { %v7978_v0 = vpop.f32.mrf.mxu3  ;;  %v8027_v47 = vpop.f32.mrf.mxu0  ;;  %v14381_v25 = vmul.f32 %v14912_v19, %v8140_v42 }
0x1101   : > { %v8028_v62 = vadd.f32 %v8027_v47, %v7978_v0  ;;  %8114 = vadd.xlane.f32.xlu0 %v8087_v50 }
0x1102   : > { %v8172_v33 = vmul.f32 %v14381_v25, %v14381_v25 }
0x1103   : > { %v8049_v55 = vadd.f32 %v8028_v62, %v13860_v40  ;;  %v8099_v48 = vpop.xlane.xlu1 %8098 }
0x1104   : > { %v8127_v1 = vmul.f32 0.015625, %v8099_v48 }
0x1105   : > { %v14369_v61 = vadd.f32 %v14257_v21, %v8049_v55 }
0x1106   : > { %v8143_v16 = vsub.f32 %v14311_v12, %v8127_v1 }
0x1107   : > { %v8088_v13 = vmul.f32 %v14912_v19, %v14369_v61 }
0x1108   : > { %v7980_v23 = vpop.f32.mrf.mxu3  ;;  %v8029_v63 = vpop.f32.mrf.mxu0  ;;  %v14387_v8 = vmul.f32 %v14912_v19, %v8143_v16 }
0x1109   : > { %v8030_v15 = vadd.f32 %v8029_v63, %v7980_v23  ;;  %8116 = vadd.xlane.f32.xlu1 %v8088_v13 }
0x110a   : > { %v8175_v49 = vmul.f32 %v14387_v8, %v14387_v8  ;;  %v8103_v54 = vpop.xlane.xlu0 %8102 }
0x110b   : > { %v8050_v60 = vadd.f32 %v8030_v15, %v13872_v26  ;;  %v8095_v26 = vpop.xlane.xlu2 %8094  ;;  %v8129_v17 = vmul.f32 0.015625, %v8103_v54 }
0x110c   : > { %v8125_v3 = vmul.f32 0.015625, %v8095_v26 }
0x110d   : > { %v14375_v35 = vadd.f32 %v14257_v21, %v8050_v60 }
0x110e   : > { %v8141_v53 = vsub.f32 %v14281_v9, %v8125_v3 }
0x110f   : > { %v8089_v40 = vmul.f32 %v14912_v19, %v14375_v35 }
0x1111   : > { %8118 = vadd.xlane.f32.xlu2 %v8089_v40 }
0x1112   : > { %v8105_v20 = vpop.xlane.xlu1 %8104 }
0x1113   : > { %v8130_v32 = vmul.f32 0.015625, %v8105_v20  ;;  %v8101_v37 = vpop.xlane.xlu2 %8100 }
0x1114   : > { %v8128_v27 = vmul.f32 0.015625, %v8101_v37 }
0x1115   : > { %v8146_v12 = vsub.f32 %v14333_v39, %v8130_v32  ;;  %v14403_v39 = vmul.f32 %v14912_v19, %v8141_v53 }
0x1116   : > { %v8144_v34 = vsub.f32 %v14319_v5, %v8128_v27  ;;  %v8145_v5 = vsub.f32 %v14325_v2, %v8129_v17 }
0x1117   : > { %v8173_v7 = vmul.f32 %v14403_v39, %v14403_v39 }
0x1118   : > { %v14430_v55 = vmul.f32 %v14912_v19, %v8145_v5 }
0x1119   : > { %8188 = vadd.xlane.f32.xlu2 %v8172_v33 }
0x111a   : > { %v8177_v2 = vmul.f32 %v14430_v55, %v14430_v55 }
0x111b   : > { %v7983_v30 = vpop.f32.mrf.mxu3  ;;  %v8032_v46 = vpop.f32.mrf.mxu0 }
0x111c   : > { %v8033_v45 = vadd.f32 %v8032_v46, %v7983_v30  ;;  %v8107_v28 = vpop.xlane.xlu2 %8106 }
0x111d   : > { %v8131_v0 = vmul.f32 0.015625, %v8107_v28 }
0x111e   : > { %v8051_v36 = vadd.f32 %v8033_v45, %v13894_v29  ;;  %v14400_v29 = vmul.f32 %v14912_v19, %v8146_v12 }
0x111f   : > { %v8147_v50 = vsub.f32 %v14339_v44, %v8131_v0 }
0x1120   : > { %v14391_v18 = vadd.f32 %v14257_v21, %v8051_v36  ;;  %v8178_v31 = vmul.f32 %v14400_v29, %v14400_v29 }
0x1121   : > { %8194 = vadd.xlane.f32.xlu2 %v8175_v49  ;;  %v14433_v23 = vmul.f32 %v14912_v19, %v8147_v50 }
0x1122   : > { %v8090_v4 = vmul.f32 %v14912_v19, %v14391_v18 }
0x1123   : > { %v7985_v43 = vpop.f32.mrf.mxu3  ;;  %v8034_v56 = vpop.f32.mrf.mxu0  ;;  %v8179_v13 = vmul.f32 %v14433_v23, %v14433_v23 }
0x1124   : > { %v8035_v14 = vadd.f32 %v8034_v56, %v7985_v43  ;;  %8120 = vadd.xlane.f32.xlu0 %v8090_v4 }
0x1126   : > { %v8052_v9 = vadd.f32 %v8035_v14, %v13906_v11  ;;  %v14418_v11 = vmul.f32 %v14912_v19, %v8142_v24 }
0x1128   : > { %v14407_v57 = vadd.f32 %v14257_v21, %v8052_v9  ;;  %v14421_v21 = vmul.f32 %v14912_v19, %v8144_v34  ;;  %v8174_v62 = vmul.f32 %v14418_v11, %v14418_v11 }
0x1129   : > { %8200 = vadd.xlane.f32.xlu2 %v8178_v31 }
0x112a   : > { %v8091_v59 = vmul.f32 %v14912_v19, %v14407_v57  ;;  %v8176_v47 = vmul.f32 %v14421_v21, %v14421_v21 }
0x112c   : > { %8190 = vadd.xlane.f32.xlu0 %v8173_v7  ;;  %8122 = vadd.xlane.f32.xlu1 %v8091_v59 }
0x1134   : > { %8196 = vadd.xlane.f32.xlu0 %v8176_v47  ;;  %8192 = vadd.xlane.f32.xlu1 %v8174_v62 }
0x113c   : > { %8202 = vadd.xlane.f32.xlu0 %v8179_v13  ;;  %8198 = vadd.xlane.f32.xlu1 %v8177_v2 }
0x115a   : > { %v8109_v44 = vpop.xlane.xlu0 %8108 }
0x115b   : > { %v8132_v10 = vmul.f32 0.015625, %v8109_v44 }
0x115d   : > { %v8148_v63 = vsub.f32 %v14345_v41, %v8132_v10 }
0x115f   : > { %v14441_v15 = vmul.f32 %v14912_v19, %v8148_v63 }
0x1161   : > { %v8180_v52 = vmul.f32 %v14441_v15, %v14441_v15 }
0x1162   : > { %v8111_v60 = vpop.xlane.xlu1 %8110 }
0x1163   : > { %v8133_v42 = vmul.f32 0.015625, %v8111_v60  ;;  %8204 = vadd.xlane.f32.xlu1 %v8180_v52  ;;  %v14486_v52 = vld [vmem:[%s14934_s10] ss:$0 sm:$0xff] }
0x1165   : > { %v8149_v40 = vsub.f32 %v14351_v6, %v8133_v42 }
0x1167   : > { %v14447_v48 = vmul.f32 %v14912_v19, %v8149_v40 }
0x1169   : > { %v8181_v1 = vmul.f32 %v14447_v48, %v14447_v48 }
0x116b   : > { %8206 = vadd.xlane.f32.xlu2 %v8181_v1  ;;  %v14493_v1 = vld [vmem:[%s14935_s29] ss:$0 sm:$0xff] }
0x116c   : > { %v8113_v16 = vpop.xlane.xlu2 %8112 }
0x116d   : > { %v8134_v41 = vmul.f32 0.015625, %v8113_v16 }
0x116f   : > { %v8150_v33 = vsub.f32 %v14357_v38, %v8134_v41 }
0x1171   : > { %v14453_v26 = vmul.f32 %v14912_v19, %v8150_v33 }
0x1173   : > { %v8182_v20 = vmul.f32 %v14453_v26, %v14453_v26 }
0x1174   : > { %v8115_v30 = vpop.xlane.xlu0 %8114 }
0x1175   : > { %v8135_v46 = vmul.f32 0.015625, %v8115_v30  ;;  %8208 = vadd.xlane.f32.xlu0 %v8182_v20 }
0x1177   : > { %v8151_v6 = vsub.f32 %v14363_v58, %v8135_v46 }
0x1179   : > { %v14459_v45 = vmul.f32 %v14912_v19, %v8151_v6 }
0x117b   : > { %v8183_v32 = vmul.f32 %v14459_v45, %v14459_v45 }
0x117c   : > { %v8117_v3 = vpop.xlane.xlu1 %8116 }
0x117d   : > { %v8136_v36 = vmul.f32 0.015625, %v8117_v3  ;;  %8210 = vadd.xlane.f32.xlu1 %v8183_v32 }
0x117f   : > { %v8152_v38 = vsub.f32 %v14369_v61, %v8136_v36 }
0x1181   : > { %v14465_v12 = vmul.f32 %v14912_v19, %v8152_v38 }
0x1183   : > { %v8184_v49 = vmul.f32 %v14465_v12, %v14465_v12 }
0x1184   : > { %v8119_v53 = vpop.xlane.xlu2 %8118 }
0x1185   : > { %v8137_v51 = vmul.f32 0.015625, %v8119_v53  ;;  %8212 = vadd.xlane.f32.xlu2 %v8184_v49 }
0x1187   : > { %v8153_v58 = vsub.f32 %v14375_v35, %v8137_v51 }
0x1189   : > { %v14471_v37 = vmul.f32 %v14912_v19, %v8153_v58 }
0x118b   : > { %v8185_v4 = vmul.f32 %v14471_v37, %v14471_v37 }
0x118c   : > { %v8189_v43 = vpop.xlane.xlu2 %8188 }
0x118d   : > { %v8220_v56 = vmul.f32 0.015625, %v8189_v43  ;;  %8214 = vadd.xlane.f32.xlu0 %v8185_v4 }
0x118f   : > { %v8236_v61 = vadd.f32 1e-05, %v8220_v56 }
0x1191   : > { %10482 = vrsqrt.f32 %v8236_v61  ;;  %vm8258_vm0 = vweird.f32 %v8236_v61 }
0x1194   : > { %v8195_v14 = vpop.xlane.xlu2 %8194 }
0x1195   : > { %v8223_v22 = vmul.f32 0.015625, %v8195_v14 }
0x1197   : > { %v8121_v27 = vpop.xlane.xlu0 %8120  ;;  %v10483_v31 = vpop.eup %10482  ;;  %v8239_v24 = vadd.f32 1e-05, %v8223_v22 }
0x1198   : > { %v8138_v9 = vmul.f32 0.015625, %v8121_v27  ;;  %v8253_v34 = vmul.f32 %v10483_v31, %v8236_v61  ;;  %vm8259_vm14 = vweird.f32 %v10483_v31 }
0x1199   : > { %10484 = vrsqrt.f32 %v8239_v24  ;;  %vm8260_vm1 = vmor %vm8258_vm0, %vm8259_vm14  ;;  %vm8288_vm3 = vweird.f32 %v8239_v24 }
0x119a   : > { %v8154_v35 = vsub.f32 %v14391_v18, %v8138_v9  ;;  %v8254_v7 = vmul.f32 %v10483_v31, %v8253_v34 }
0x119c   : > { %v14477_v59 = vmul.f32 %v14912_v19, %v8154_v35  ;;  %v8255_v54 = vmul.f32 0.5, %v8254_v7  ;;  %v8201_v28 = vpop.xlane.xlu2 %8200 }
0x119d   : > { %v8226_v0 = vmul.f32 0.015625, %v8201_v28 }
0x119e   : > { %v8186_v17 = vmul.f32 %v14477_v59, %v14477_v59  ;;  %v8256_v47 = vsub.f32 1.5, %v8255_v54 }
0x119f   : > { %v8191_v5 = vpop.xlane.xlu0 %8190  ;;  %v8123_v50 = vpop.xlane.xlu1 %8122  ;;  %v8242_v18 = vadd.f32 1e-05, %v8226_v0 }
0x11a0   : > { %v8221_v62 = vmul.f32 0.015625, %v8191_v5  ;;  %v8139_v13 = vmul.f32 0.015625, %v8123_v50  ;;  %8216 = vadd.xlane.f32.xlu1 %v8186_v17  ;;  %v10485_v2 = vpop.eup %10484  ;;  %v8257_v44 = vmul.f32 %v10483_v31, %v8256_v47 }
0x11a1   : > { %v8283_v10 = vmul.f32 %v10485_v2, %v8239_v24  ;;  %10486 = vrsqrt.f32 %v8242_v18  ;;  %vm8289_vm2 = vweird.f32 %v10485_v2  ;;  %vm8318_vm7 = vweird.f32 %v8242_v18 }
0x11a2   : > { %v14481_v63 = vadd.f32 1e-05, %v8221_v62  ;;  %v8155_v60 = vsub.f32 %v14407_v57, %v8139_v13  ;;  %v8261_v42 = vsel %vm8260_vm1, %v10483_v31, %v8257_v44  ;;  %vm8290_vm4 = vmor %vm8288_vm3, %vm8289_vm2 }
0x11a3   : > { %v8284_v40 = vmul.f32 %v10485_v2, %v8283_v10  ;;  %v8412_v16 = vmul.f32 %v8261_v42, %v14381_v25 }
0x11a4   : > { %10488 = vrsqrt.f32 %v14481_v63  ;;  %v14497_v41 = vmul.f32 %v14912_v19, %v8155_v60  ;;  %vm8268_vm9 = vweird.f32 %v14481_v63 }
0x11a5   : > { %v8285_v33 = vmul.f32 0.5, %v8284_v40  ;;  %v8431_v20 = vmul.f32 %v14486_v52, %v8412_v16 }
0x11a6   : > { %v8187_v46 = vmul.f32 %v14497_v41, %v14497_v41 }
0x11a7   : > { %v8197_v30 = vpop.xlane.xlu0 %8196  ;;  %v8193_v57 = vpop.xlane.xlu1 %8192  ;;  %v8286_v6 = vsub.f32 1.5, %v8285_v33  ;;  %v8450_v38 = vadd.f32 %v14493_v1, %v8431_v20 }
0x11a8   : > { %v8224_v32 = vmul.f32 0.015625, %v8197_v30  ;;  %v8222_v3 = vmul.f32 0.015625, %v8193_v57  ;;  %v10487_v36 = vpop.eup %10486  ;;  %8218 = vadd.xlane.f32.xlu2 %v8187_v46 }
0x11a9   : > { %v8287_v19 = vmul.f32 %v10485_v2, %v8286_v6  ;;  %v8313_v49 = vmul.f32 %v10487_v36, %v8242_v18  ;;  %8466 = vst [vmem:[%s14505_s20] sm:$0xff] %v8450_v38  ;;  %vm8319_vm5 = vweird.f32 %v10487_v36 }
0x11aa   : > { %v10489_v25 = vpop.eup %10488  ;;  %v8240_v53 = vadd.f32 1e-05, %v8224_v32  ;;  %v8238_v58 = vadd.f32 1e-05, %v8222_v3  ;;  %vm8320_vm8 = vmor %vm8318_vm7, %vm8319_vm5 }
0x11ab   : > { %v8263_v51 = vmul.f32 %v10489_v25, %v14481_v63  ;;  %v8291_v4 = vsel %vm8290_vm4, %v10485_v2, %v8287_v19  ;;  %v8314_v43 = vmul.f32 %v10487_v36, %v8313_v49  ;;  %vm8269_vm6 = vweird.f32 %v10489_v25 }
0x11ac   : > { %10490 = vrsqrt.f32 %v8240_v53  ;;  %v8415_v56 = vmul.f32 %v8291_v4, %v14387_v8  ;;  %vm8270_vm10 = vmor %vm8268_vm9, %vm8269_vm6  ;;  %vm8298_vm13 = vweird.f32 %v8240_v53  ;;  %vm8278_vm14 = vweird.f32 %v8238_v58 }
0x11ad   : > { %v8264_v61 = vmul.f32 %v10489_v25, %v8263_v51  ;;  %10492 = vrsqrt.f32 %v8238_v58  ;;  %v8315_v14 = vmul.f32 0.5, %v8314_v43 }
0x11ae   : > { %v8434_v22 = vmul.f32 %v14486_v52, %v8415_v56 }
0x11af   : > { %v8265_v27 = vmul.f32 0.5, %v8264_v61  ;;  %v8203_v9 = vpop.xlane.xlu0 %8202  ;;  %v8199_v31 = vpop.xlane.xlu1 %8198  ;;  %v8316_v24 = vsub.f32 1.5, %v8315_v14 }
0x11b0   : > { %v8227_v34 = vmul.f32 0.015625, %v8203_v9  ;;  %v8225_v35 = vmul.f32 0.015625, %v8199_v31  ;;  %v8453_v7 = vadd.f32 %v14493_v1, %v8434_v22 }
0x11b1   : > { %v8266_v54 = vsub.f32 1.5, %v8265_v27  ;;  %v8317_v17 = vmul.f32 %v10487_v36, %v8316_v24 }
0x11b2   : > { %v10491_v28 = vpop.eup %10490  ;;  %v8243_v8 = vadd.f32 1e-05, %v8227_v34  ;;  %v14512_v0 = vadd.f32 1e-05, %v8225_v35  ;;  %8469 = vst [vmem:[%s14505_s20 + $0x18] sm:$0xff] %v8453_v7 }
0x11b3   : > { %v10493_v5 = vpop.eup %10492  ;;  %v8267_v50 = vmul.f32 %v10489_v25, %v8266_v54  ;;  %v8293_v47 = vmul.f32 %v10491_v28, %v8240_v53  ;;  %v8321_v62 = vsel %vm8320_vm8, %v10487_v36, %v8317_v17  ;;  %vm8299_vm11 = vweird.f32 %v10491_v28 }
0x11b4   : > { %v8273_v13 = vmul.f32 %v10493_v5, %v8238_v58  ;;  %10494 = vrsqrt.f32 %v8243_v8  ;;  %v8418_v2 = vmul.f32 %v8321_v62, %v14400_v29  ;;  %vm8279_vm12 = vweird.f32 %v10493_v5  ;;  %vm8300_vm15 = vmor %vm8298_vm13, %vm8299_vm11 }
0x11b5   : > { %v8271_v44 = vsel %vm8270_vm10, %v10489_v25, %v8267_v50  ;;  %v8294_v10 = vmul.f32 %v10491_v28, %v8293_v47  ;;  %10496 = vrsqrt.f32 %v14512_v0  ;;  %vm8280_vm0 = vmor %vm8278_vm14, %vm8279_vm12  ;;  %vm8328_vm2 = vweird.f32 %v8243_v8 }
0x11b6   : > { %v8413_v18 = vmul.f32 %v8271_v44, %v14403_v39  ;;  %v8274_v60 = vmul.f32 %v10493_v5, %v8273_v13  ;;  %v8437_v42 = vmul.f32 %v14486_v52, %v8418_v2  ;;  %vm8308_vm5 = vweird.f32 %v14512_v0 }
0x11b7   : > { %v8295_v40 = vmul.f32 0.5, %v8294_v10 }
0x11b8   : > { %v8432_v63 = vmul.f32 %v14486_v52, %v8413_v18  ;;  %v8275_v16 = vmul.f32 0.5, %v8274_v60  ;;  %v8456_v33 = vadd.f32 %v14493_v1, %v8437_v42 }
0x11b9   : > { %v8296_v20 = vsub.f32 1.5, %v8295_v40 }
0x11ba   : > { %v10495_v29 = vpop.eup %10494  ;;  %v8451_v30 = vadd.f32 %v14493_v1, %v8432_v63  ;;  %v8276_v57 = vsub.f32 1.5, %v8275_v16  ;;  %8472 = vst [vmem:[%s14505_s20 + $0x30] sm:$0xff] %v8456_v33 }
0x11bb   : > { %v8297_v39 = vmul.f32 %v10491_v28, %v8296_v20  ;;  %v8323_v46 = vmul.f32 %v10495_v29, %v8243_v8  ;;  %v10497_v6 = vpop.eup %10496  ;;  %vm8329_vm1 = vweird.f32 %v10495_v29 }
0x11bc   : > { %8467 = vst [vmem:[%s14505_s20 + $0x8] sm:$0xff] %v8451_v30  ;;  %v8277_v32 = vmul.f32 %v10493_v5, %v8276_v57  ;;  %v8303_v38 = vmul.f32 %v10497_v6, %v14512_v0  ;;  %vm8309_vm3 = vweird.f32 %v10497_v6  ;;  %vm8330_vm4 = vmor %vm8328_vm2, %vm8329_vm1 }
0x11bd   : > { %v8301_v3 = vsel %vm8300_vm15, %v10491_v28, %v8297_v39  ;;  %v8324_v36 = vmul.f32 %v10495_v29, %v8323_v46  ;;  %vm8310_vm6 = vmor %vm8308_vm5, %vm8309_vm3 }
0x11be   : > { %v8416_v25 = vmul.f32 %v8301_v3, %v14421_v21  ;;  %v8281_v19 = vsel %vm8280_vm0, %v10493_v5, %v8277_v32  ;;  %v8304_v53 = vmul.f32 %v10497_v6, %v8303_v38 }
0x11bf   : > { %v8414_v49 = vmul.f32 %v8281_v19, %v14418_v11  ;;  %v8325_v51 = vmul.f32 0.5, %v8324_v36 }
0x11c0   : > { %v8435_v4 = vmul.f32 %v14486_v52, %v8416_v25  ;;  %v8305_v58 = vmul.f32 0.5, %v8304_v53 }
0x11c1   : > { %v8433_v43 = vmul.f32 %v14486_v52, %v8414_v49  ;;  %v8326_v56 = vsub.f32 1.5, %v8325_v51 }
0x11c2   : > { %v8454_v61 = vadd.f32 %v14493_v1, %v8435_v4  ;;  %v8306_v22 = vsub.f32 1.5, %v8305_v58 }
0x11c3   : > { %v8452_v14 = vadd.f32 %v14493_v1, %v8433_v43  ;;  %v8327_v21 = vmul.f32 %v10495_v29, %v8326_v56 }
0x11c4   : > { %8470 = vst [vmem:[%s14505_s20 + $0x20] sm:$0xff] %v8454_v61  ;;  %v8307_v27 = vmul.f32 %v10497_v6, %v8306_v22 }
0x11c5   : > { %8468 = vst [vmem:[%s14505_s20 + $0x10] sm:$0xff] %v8452_v14  ;;  %v8331_v11 = vsel %vm8330_vm4, %v10495_v29, %v8327_v21 }
0x11c6   : > { %v8419_v9 = vmul.f32 %v8331_v11, %v14433_v23  ;;  %v8311_v31 = vsel %vm8310_vm6, %v10497_v6, %v8307_v27 }
0x11c7   : > { %v8417_v34 = vmul.f32 %v8311_v31, %v14430_v55 }
0x11c8   : > { %v8438_v24 = vmul.f32 %v14486_v52, %v8419_v9 }
0x11c9   : > { %v8436_v7 = vmul.f32 %v14486_v52, %v8417_v34 }
0x11ca   : > { %v8457_v35 = vadd.f32 %v14493_v1, %v8438_v24 }
0x11cb   : > { %v8455_v54 = vadd.f32 %v14493_v1, %v8436_v7 }
0x11cc   : > { %8473 = vst [vmem:[%s14505_s20 + $0x38] sm:$0xff] %v8457_v35 }
0x11cd   : > { %8471 = vst [vmem:[%s14505_s20 + $0x28] sm:$0xff] %v8455_v54 }
0x11d6   : > { %v8205_v28 = vpop.xlane.xlu1 %8204 }
0x11d7   : > { %v8228_v17 = vmul.f32 0.015625, %v8205_v28 }
0x11d9   : > { %v8244_v8 = vadd.f32 1e-05, %v8228_v17 }
0x11db   : > { %10498 = vrsqrt.f32 %v8244_v8  ;;  %vm8338_vm8 = vweird.f32 %v8244_v8 }
0x11de   : > { %v8207_v0 = vpop.xlane.xlu2 %8206 }
0x11df   : > { %v8229_v23 = vmul.f32 0.015625, %v8207_v0 }
0x11e1   : > { %v10499_v5 = vpop.eup %10498  ;;  %v8245_v50 = vadd.f32 1e-05, %v8229_v23 }
0x11e2   : > { %v8333_v47 = vmul.f32 %v10499_v5, %v8244_v8  ;;  %vm8339_vm7 = vweird.f32 %v10499_v5 }
0x11e3   : > { %10500 = vrsqrt.f32 %v8245_v50  ;;  %vm8340_vm9 = vmor %vm8338_vm8, %vm8339_vm7  ;;  %vm8348_vm11 = vweird.f32 %v8245_v50 }
0x11e4   : > { %v8334_v62 = vmul.f32 %v10499_v5, %v8333_v47 }
0x11e6   : > { %v8335_v55 = vmul.f32 0.5, %v8334_v62 }
0x11e8   : > { %v8336_v13 = vsub.f32 1.5, %v8335_v55  ;;  %v8209_v44 = vpop.xlane.xlu0 %8208 }
0x11e9   : > { %v10501_v2 = vpop.eup %10500  ;;  %v8230_v60 = vmul.f32 0.015625, %v8209_v44 }
0x11ea   : > { %v8337_v10 = vmul.f32 %v10499_v5, %v8336_v13  ;;  %v8343_v18 = vmul.f32 %v10501_v2, %v8245_v50  ;;  %vm8349_vm10 = vweird.f32 %v10501_v2 }
0x11eb   : > { %v8246_v63 = vadd.f32 1e-05, %v8230_v60  ;;  %vm8350_vm12 = vmor %vm8348_vm11, %vm8349_vm10 }
0x11ec   : > { %v8341_v42 = vsel %vm8340_vm9, %v10499_v5, %v8337_v10  ;;  %v8344_v40 = vmul.f32 %v10501_v2, %v8343_v18 }
0x11ed   : > { %v8420_v16 = vmul.f32 %v8341_v42, %v14441_v15  ;;  %10502 = vrsqrt.f32 %v8246_v63  ;;  %vm8358_vm15 = vweird.f32 %v8246_v63 }
0x11ee   : > { %v8345_v33 = vmul.f32 0.5, %v8344_v40 }
0x11ef   : > { %v8439_v20 = vmul.f32 %v14486_v52, %v8420_v16 }
0x11f0   : > { %v8346_v29 = vsub.f32 1.5, %v8345_v33  ;;  %v8211_v57 = vpop.xlane.xlu1 %8210 }
0x11f1   : > { %v8458_v30 = vadd.f32 %v14493_v1, %v8439_v20  ;;  %v8231_v46 = vmul.f32 0.015625, %v8211_v57 }
0x11f2   : > { %v8347_v39 = vmul.f32 %v10501_v2, %v8346_v29 }
0x11f3   : > { %8474 = vst [vmem:[%s14505_s20 + $0x40] sm:$0xff] %v8458_v30  ;;  %v10503_v6 = vpop.eup %10502  ;;  %v8247_v3 = vadd.f32 1e-05, %v8231_v46 }
0x11f4   : > { %v8351_v32 = vsel %vm8350_vm12, %v10501_v2, %v8347_v39  ;;  %v8353_v36 = vmul.f32 %v10503_v6, %v8246_v63  ;;  %vm8359_vm13 = vweird.f32 %v10503_v6 }
0x11f5   : > { %v8421_v15 = vmul.f32 %v8351_v32, %v14447_v48  ;;  %10504 = vrsqrt.f32 %v8247_v3  ;;  %vm8360_vm14 = vmor %vm8358_vm15, %vm8359_vm13  ;;  %vm8368_vm1 = vweird.f32 %v8247_v3 }
0x11f6   : > { %v8354_v25 = vmul.f32 %v10503_v6, %v8353_v36 }
0x11f7   : > { %v8440_v38 = vmul.f32 %v14486_v52, %v8421_v15 }
0x11f8   : > { %v8355_v49 = vmul.f32 0.5, %v8354_v25  ;;  %v8213_v51 = vpop.xlane.xlu2 %8212 }
0x11f9   : > { %v8459_v19 = vadd.f32 %v14493_v1, %v8440_v38  ;;  %v8232_v53 = vmul.f32 0.015625, %v8213_v51 }
0x11fa   : > { %v8356_v4 = vsub.f32 1.5, %v8355_v49 }
0x11fb   : > { %8475 = vst [vmem:[%s14505_s20 + $0x48] sm:$0xff] %v8459_v19  ;;  %v10505_v43 = vpop.eup %10504  ;;  %v8248_v56 = vadd.f32 1e-05, %v8232_v53 }
0x11fc   : > { %v8357_v58 = vmul.f32 %v10503_v6, %v8356_v4  ;;  %v8363_v61 = vmul.f32 %v10505_v43, %v8247_v3  ;;  %vm8369_vm0 = vweird.f32 %v10505_v43 }
0x11fd   : > { %10506 = vrsqrt.f32 %v8248_v56  ;;  %vm8370_vm2 = vmor %vm8368_vm1, %vm8369_vm0  ;;  %vm8378_vm4 = vweird.f32 %v8248_v56 }
0x11fe   : > { %v8361_v48 = vsel %vm8360_vm14, %v10503_v6, %v8357_v58  ;;  %v8364_v14 = vmul.f32 %v10505_v43, %v8363_v61 }
0x11ff   : > { %v8422_v21 = vmul.f32 %v8361_v48, %v14453_v26 }
0x1200   : > { %v8365_v22 = vmul.f32 0.5, %v8364_v14  ;;  %v8215_v11 = vpop.xlane.xlu0 %8214 }
0x1201   : > { %v8441_v27 = vmul.f32 %v14486_v52, %v8422_v21  ;;  %v8233_v9 = vmul.f32 0.015625, %v8215_v11 }
0x1202   : > { %v8366_v31 = vsub.f32 1.5, %v8365_v22 }
0x1203   : > { %v10507_v24 = vpop.eup %10506  ;;  %v8460_v34 = vadd.f32 %v14493_v1, %v8441_v27  ;;  %v8249_v35 = vadd.f32 1e-05, %v8233_v9 }
0x1204   : > { %v8367_v7 = vmul.f32 %v10505_v43, %v8366_v31  ;;  %v8373_v54 = vmul.f32 %v10507_v24, %v8248_v56  ;;  %vm8379_vm3 = vweird.f32 %v10507_v24 }
0x1205   : > { %8476 = vst [vmem:[%s14505_s20 + $0x50] sm:$0xff] %v8460_v34  ;;  %10508 = vrsqrt.f32 %v8249_v35  ;;  %vm8380_vm5 = vmor %vm8378_vm4, %vm8379_vm3  ;;  %vm8388_vm7 = vweird.f32 %v8249_v35 }
0x1206   : > { %v8371_v28 = vsel %vm8370_vm2, %v10505_v43, %v8367_v7  ;;  %v8374_v26 = vmul.f32 %v10507_v24, %v8373_v54 }
0x1207   : > { %v8423_v17 = vmul.f32 %v8371_v28, %v14459_v45 }
0x1208   : > { %v8375_v8 = vmul.f32 0.5, %v8374_v26 }
0x1209   : > { %v8442_v0 = vmul.f32 %v14486_v52, %v8423_v17 }
0x120a   : > { %v8376_v23 = vsub.f32 1.5, %v8375_v8 }
0x120b   : > { %v10509_v5 = vpop.eup %10508  ;;  %v8461_v50 = vadd.f32 %v14493_v1, %v8442_v0 }
0x120c   : > { %v8377_v47 = vmul.f32 %v10507_v24, %v8376_v23  ;;  %v8383_v62 = vmul.f32 %v10509_v5, %v8249_v35  ;;  %vm8389_vm6 = vweird.f32 %v10509_v5 }
0x120d   : > { %8477 = vst [vmem:[%s14505_s20 + $0x58] sm:$0xff] %v8461_v50  ;;  %vm8390_vm8 = vmor %vm8388_vm7, %vm8389_vm6 }
0x120e   : > { %v8381_v55 = vsel %vm8380_vm5, %v10507_v24, %v8377_v47  ;;  %v8384_v13 = vmul.f32 %v10509_v5, %v8383_v62 }
0x120f   : > { %v8424_v2 = vmul.f32 %v8381_v55, %v14465_v12 }
0x1210   : > { %v8385_v44 = vmul.f32 0.5, %v8384_v13 }
0x1211   : > { %v8443_v45 = vmul.f32 %v14486_v52, %v8424_v2 }
0x1212   : > { %v8386_v18 = vsub.f32 1.5, %v8385_v44 }
0x1213   : > { %v8217_v10 = vpop.xlane.xlu1 %8216  ;;  %v8462_v42 = vadd.f32 %v14493_v1, %v8443_v45 }
0x1214   : > { %v8234_v60 = vmul.f32 0.015625, %v8217_v10  ;;  %v8387_v40 = vmul.f32 %v10509_v5, %v8386_v18 }
0x1215   : > { %8478 = vst [vmem:[%s14505_s20 + $0x60] sm:$0xff] %v8462_v42 }
0x1216   : > { %v8250_v63 = vadd.f32 1e-05, %v8234_v60  ;;  %v8391_v16 = vsel %vm8390_vm8, %v10509_v5, %v8387_v40 }
0x1217   : > { %v8425_v33 = vmul.f32 %v8391_v16, %v14471_v37 }
0x1218   : > { %10510 = vrsqrt.f32 %v8250_v63  ;;  %vm8398_vm10 = vweird.f32 %v8250_v63 }
0x1219   : > { %v8444_v12 = vmul.f32 %v14486_v52, %v8425_v33 }
0x121b   : > { %v8219_v20 = vpop.xlane.xlu2 %8218  ;;  %v8463_v29 = vadd.f32 %v14493_v1, %v8444_v12 }
0x121c   : > { %v8235_v30 = vmul.f32 0.015625, %v8219_v20 }
0x121d   : > { %8479 = vst [vmem:[%s14505_s20 + $0x68] sm:$0xff] %v8463_v29 }
0x121e   : > { %v10511_v57 = vpop.eup %10510  ;;  %v8251_v46 = vadd.f32 1e-05, %v8235_v30 }
0x121f   : > { %v8393_v39 = vmul.f32 %v10511_v57, %v8250_v63  ;;  %vm8399_vm9 = vweird.f32 %v10511_v57 }
0x1220   : > { %10512 = vrsqrt.f32 %v8251_v46  ;;  %vm8400_vm11 = vmor %vm8398_vm10, %vm8399_vm9  ;;  %vm8408_vm13 = vweird.f32 %v8251_v46 }
0x1221   : > { %v8394_v6 = vmul.f32 %v10511_v57, %v8393_v39 }
0x1223   : > { %v8395_v32 = vmul.f32 0.5, %v8394_v6 }
0x1225   : > { %v8396_v3 = vsub.f32 1.5, %v8395_v32 }
0x1226   : > { %v10513_v15 = vpop.eup %10512 }
0x1227   : > { %v8397_v36 = vmul.f32 %v10511_v57, %v8396_v3  ;;  %v8403_v37 = vmul.f32 %v10513_v15, %v8251_v46  ;;  %vm8409_vm12 = vweird.f32 %v10513_v15 }
0x1228   : > { %vm8410_vm15 = vmor %vm8408_vm13, %vm8409_vm12 }
0x1229   : > { %v8401_v38 = vsel %vm8400_vm11, %v10511_v57, %v8397_v36  ;;  %v8404_v19 = vmul.f32 %v10513_v15, %v8403_v37 }
0x122a   : > { %v8426_v25 = vmul.f32 %v8401_v38, %v14477_v59 }
0x122b   : > { %v8405_v51 = vmul.f32 0.5, %v8404_v19 }
0x122c   : > { %v8445_v49 = vmul.f32 %v14486_v52, %v8426_v25 }
0x122d   : > { %v8406_v4 = vsub.f32 1.5, %v8405_v51 }
0x122e   : > { %v8464_v53 = vadd.f32 %v14493_v1, %v8445_v49 }
0x122f   : > { %v8407_v43 = vmul.f32 %v10513_v15, %v8406_v4 }
0x1230   : > { %8480 = vst [vmem:[%s14505_s20 + $0x70] sm:$0xff] %v8464_v53 }
0x1231   : > { %v8411_v59 = vsel %vm8410_vm15, %v10513_v15, %v8407_v43 }
0x1232   : > { %v8427_v56 = vmul.f32 %v8411_v59, %v14497_v41 }
0x1234   : > { %v8446_v58 = vmul.f32 %v14486_v52, %v8427_v56 }
0x1236   : > { %v8465_v61 = vadd.f32 %v14493_v1, %v8446_v58 }
0x1238   : > { %8481 = vst [vmem:[%s14505_s20 + $0x78] sm:$0xff] %v8465_v61 }
0x1239   : > { %10871 = shalt.err (!%p10868_p8)
}
0x123a   : > { %s10955_s6 = smov 128   ;;  %s10956_s8 = smov 8  }
0x123b   : > { %9840 = dma.vmem_to_hbm [thread:$0]  (%p11180_p0), %s8496_s16, 2048, %s8498_s21, %s8483_s14, %s10955_s6, %s10955_s6, %s10956_s8  }
0x123c PF: > { %s8512_s29 = sand.u32 1, %s10922_s27   ;;  %p14937_p10 = scmp.ge.s32.totalorder %s10934_s30, 2 }
0x123d   : > { %s8513_s20 = scalar_lea.sflag [#allocation4], %s8512_s29 }
0x123e   : > { %p9878_p11 = pnand %p14937_p10, %p11188_p6 }
0x1240   : > { %p9879_p12 = pneg %p9878_p11 }
0x1242   : > { %10917 = dma.done.wait (%p9879_p12), %s8513_s20, 2048  }
0x1243   : > { %10919 = vsyncadd (%p9879_p12), %s8513_s20, 4294965248  ;;  %s14938_s30 = sld [smem:[#allocation30_spill]]  ;;  %s14941_s27 = smov %s10926_s28 }
0x1244   : > { %s14939_s24 = sld [smem:[#allocation29_spill]] }
0x1245   : > { %s14940_s29 = sld [smem:[#allocation31_spill]] }
0x1249   : > { %p38_p2 = scmp.ge.s32.totalorder %s14938_s30, 4  }
0x124a   : > { %s14942_s28 = smov %s14939_s24 }
0x124b   :  { %40 = sbr.rel (!%p38_p2) target bundleno = 28 (0x1c), region = 197 }
0x1250   :  { %8519 = vsyncpa [#allocation3], 1 }
0x1251   :  { %8521 = vsyncpa [#allocation3 + $0x1], 1 }
0x1252   :  { %8522 = vsyncpa [#allocation6], 1 }
0x1253   :  { %8524 = vsyncpa [#allocation6 + $0x1], 1 }
0x1254   :  { %8525 = vsyncpa [#allocation9], 1 }
0x1255   :  { %8526 = vsyncpa [#allocation12], 1 }
0x1256   :  { %8527 = vsyncpa [#allocation15], 1 }
0x1257   :  { %8528 = vsyncpa [#allocation18], 1 }
0x1258   :  { %8529 = vsyncpa [#allocation4], 1 }
0x1259   :  { %8531 = vsyncpa [#allocation4 + $0x1], 1 }

</bundles_post_ra>
